<compile_context>
chip_gen: v7x
topology: tpu7x:2x2x1
jax: 0.10.0
libtpu: 0.0.40
codegen_flags: <defaults>
</compile_context>

<pallas_src>
import math
import numpy as np

import jax
import jax.numpy as jnp
from jax.experimental import pallas as pl
from jax.experimental.pallas import tpu as pltpu

# ----------------------------- configuration ------------------------------
B = 2                 # batch
C_IN = 3              # image channels
H = W = 16            # image spatial size
BASE = 8              # base_size (tile size fed to base_model.unet)
STRIDE = 4            # tile stride
MULT = (3, 3)         # mult_shape  -> (MULT[0]-1)*STRIDE + BASE == H
NTILES = MULT[0] * MULT[1]
W_CH = NTILES * 3     # dit_w in/out channels

PATCH = 2             # DiT patch size
HIDDEN = 64           # DiT hidden size
NUM_HEADS = 4
DH = HIDDEN // NUM_HEADS
T_TOKENS = (H // PATCH) * (W // PATCH)
FREQ_DIM = 64         # sinusoidal sigma-embedding width

K_PAD = 128           # padded patch-embedding K dim (pd 12 / 108 -> 128)
OUT_PAD = 128         # padded final-layer N dim   (od 12 / 108 -> 128)
HW = H * W            # lane-dense flattened spatial size (256)


# ------------------------- static tile masks (numpy) ------------------------
def _build_tile_masks():
    m = np.zeros((NTILES, H, W), np.float32)
    t = 0
    for i in range(MULT[0]):
        for j in range(MULT[1]):
            l1, l2 = i * STRIDE, j * STRIDE
            m[t, l1:l1 + BASE, l2:l2 + BASE] = 1.0
            t += 1
    return m


TILE_MASKS = _build_tile_masks()          # (NTILES, H, W), compile-time const


# ------------------------------ small helpers ------------------------------
def _layernorm(x, eps=1e-6):
    mu = jnp.mean(x, axis=-1, keepdims=True)
    var = jnp.mean((x - mu) ** 2, axis=-1, keepdims=True)
    return (x - mu) * jax.lax.rsqrt(var + eps)


def _timestep_embedding(t, dim, max_period=10000.0):
    half = dim // 2
    freqs = jnp.exp(-math.log(max_period)
                    * jnp.arange(half, dtype=jnp.float32) / half)
    args = t.astype(jnp.float32)[:, None] * freqs[None, :]
    return jnp.concatenate([jnp.cos(args), jnp.sin(args)], axis=-1)


def _patchify(x, p):
    b, c, h, w = x.shape
    x = x.reshape(b, c, h // p, p, w // p, p)
    x = x.transpose(0, 2, 4, 3, 5, 1)                 # (B, h/p, w/p, p, p, C)
    return x.reshape(b, (h // p) * (w // p), p * p * c)


def _unpatchify(tok, p, c_out, h, w):
    b = tok.shape[0]
    x = tok.reshape(b, h // p, w // p, p, p, c_out)
    x = x.transpose(0, 5, 1, 3, 2, 4)                 # (B, C, h/p, p, w/p, p)
    return x.reshape(b, c_out, h, w)


# ------------------------- fused DiT Pallas kernel --------------------------
def _fused_dit_kernel(xt_ref, temb_ref, pos_ref,
                      We_ref, be_ref, Wt1_ref, bt1_ref, Wt2_ref, bt2_ref,
                      Wmod_ref, bmod_ref, Wqkv_ref, bqkv_ref,
                      Wproj_ref, bproj_ref, Wfc1_ref, bfc1_ref,
                      Wfc2_ref, bfc2_ref, Wfmod_ref, bfmod_ref,
                      Wfin_ref, bfin_ref, o_ref):
    """One grid step = one batch element.  Everything VMEM resident."""
    f32 = jnp.float32
    bf16 = jnp.bfloat16
    D = HIDDEN

    def mm(a, w_ref, b_ref):
        # bf16 operands on the MXU, f32 accumulation + bias.
        return jnp.dot(a.astype(bf16), w_ref[...],
                       preferred_element_type=f32) + b_ref[...]

    # --- token embedding (xt already bf16, K zero-padded to 128) -----------
    xt = xt_ref[0]                                          # (T, K_PAD) bf16
    tok = jnp.dot(xt, We_ref[...], preferred_element_type=f32)
    tok = tok + be_ref[...] + pos_ref[...]                  # (T, D) f32

    # --- sigma conditioning (adaLN) ----------------------------------------
    temb = temb_ref[0]                                      # (1, FREQ_DIM)
    c = jax.nn.silu(mm(temb, Wt1_ref, bt1_ref))
    c = mm(c, Wt2_ref, bt2_ref)                             # (1, D)
    c_act = jax.nn.silu(c)
    mod = mm(c_act, Wmod_ref, bmod_ref)                     # (1, 6D)
    sh_a, sc_a, g_a = mod[:, 0:D], mod[:, D:2 * D], mod[:, 2 * D:3 * D]
    sh_m, sc_m, g_m = mod[:, 3 * D:4 * D], mod[:, 4 * D:5 * D], mod[:, 5 * D:6 * D]
    fmod = mm(c_act, Wfmod_ref, bfmod_ref)                  # (1, 2D)
    sh_f, sc_f = fmod[:, 0:D], fmod[:, D:2 * D]

    # --- attention block (all heads, no transpose / no lane concat) --------
    hmod = _layernorm(tok) * (1.0 + sc_a) + sh_a
    qkv = mm(hmod, Wqkv_ref, bqkv_ref)                      # (T, 3D) fused
    scale = 1.0 / math.sqrt(DH)
    att_p = jnp.zeros((T_TOKENS, D), f32)
    for hd in range(NUM_HEADS):
        q = qkv[:, hd * DH:(hd + 1) * DH]
        k = qkv[:, D + hd * DH:D + (hd + 1) * DH]
        v = qkv[:, 2 * D + hd * DH:2 * D + (hd + 1) * DH]
        s = jax.lax.dot_general(q.astype(bf16), k.astype(bf16),
                                (((1,), (1,)), ((), ())),
                                preferred_element_type=f32) * scale
        s = s - jnp.max(s, axis=-1, keepdims=True)
        e = jnp.exp(s)
        p = e * pl.reciprocal(jnp.sum(e, axis=-1, keepdims=True), approx=True)
        a_h = jnp.dot(p.astype(bf16), v.astype(bf16),
                      preferred_element_type=f32)           # (T, DH)
        # fold output projection per head: att @ Wproj == sum_h a_h @ Wproj[h]
        att_p = att_p + jnp.dot(a_h.astype(bf16),
                                Wproj_ref[hd * DH:(hd + 1) * DH, :],
                                preferred_element_type=f32)
    tok = tok + g_a * (att_p + bproj_ref[...])

    # --- MLP block ----------------------------------------------------------
    hmod = _layernorm(tok) * (1.0 + sc_m) + sh_m
    m1 = jax.nn.gelu(mm(hmod, Wfc1_ref, bfc1_ref), approximate=True)
    m2 = mm(m1, Wfc2_ref, bfc2_ref)
    tok = tok + g_m * m2

    # --- final adaLN layer (lane-dense OUT_PAD=128 output) ------------------
    hmod = _layernorm(tok) * (1.0 + sc_f) + sh_f
    o_ref[0] = mm(hmod, Wfin_ref, bfin_ref)                 # (T, OUT_PAD)


def dit_forward(p, x, temb, out_ch):
    """Minimal single-block DiT (adaLN conditioning) — one fused pallas_call."""
    b, c, h, w = x.shape
    xt = _patchify(x, PATCH)                                # (B, T, p*p*c)
    pd = xt.shape[-1]
    xt = jnp.pad(xt, ((0, 0), (0, 0), (0, K_PAD - pd))).astype(jnp.bfloat16)
    temb3 = temb.reshape(b, 1, FREQ_DIM).astype(jnp.float32)

    per_b = lambda shape: pl.BlockSpec(shape, lambda i: (i, 0, 0))
    bcast = lambda shape: pl.BlockSpec(shape, lambda i: (0, 0))

    w_order = (p['We'], p['be'], p['Wt1'], p['bt1'], p['Wt2'], p['bt2'],
               p['Wmod'], p['bmod'], p['Wqkv'], p['bqkv'],
               p['Wproj'], p['bproj'], p['Wfc1'], p['bfc1'],
               p['Wfc2'], p['bfc2'], p['Wfmod'], p['bfmod'],
               p['Wfin'], p['bfin'])
    w_specs = [bcast(a.shape) for a in w_order]

    out = pl.pallas_call(
        _fused_dit_kernel,
        grid=(b,),
        out_shape=jax.ShapeDtypeStruct((b, T_TOKENS, OUT_PAD), jnp.float32),
        in_specs=[per_b((1, T_TOKENS, K_PAD)),
                  per_b((1, 1, FREQ_DIM)),
                  bcast(p['pos'].shape)] + w_specs,
        out_specs=per_b((1, T_TOKENS, OUT_PAD)),
        compiler_params=pltpu.CompilerParams(
            dimension_semantics=("parallel",)),    # megacore split on v7x
    )(xt, temb3, p['pos'], *w_order)

    od = PATCH * PATCH * out_ch
    return _unpatchify(out[:, :, :od], PATCH, out_ch, h, w)


# ----------------------- fused tile-merge Pallas kernel ----------------------
def _merge_kernel(ditw_ref, x_ref, mask_ref, uWt_ref, ub_ref, scale_ref, o_ref):
    """Per batch element: 1x1-conv unet stand-in + sigma scale, then for each
    tile t (PyTorch order): kernel = exp(dit_w crop), scores overwrite,
    w accumulate; finally scores * 1/w.  Lane-dense (C, H*W) layout."""
    f32 = jnp.float32
    xb = x_ref[0]                                           # (C_IN, HW)
    yb = jnp.dot(uWt_ref[...], xb, preferred_element_type=f32) + ub_ref[...]
    yb = yb * scale_ref[0]                                  # sigma scale

    scores = jnp.zeros((C_IN, HW), f32)
    wacc = jnp.zeros((C_IN, HW), f32)
    for t in range(NTILES):
        m = mask_ref[t:t + 1, :] > 0.0                      # (1, HW) bool
        ker = jnp.exp(ditw_ref[0, 3 * t:3 * t + 3, :])      # (C_IN, HW)
        scores = jnp.where(m, yb * ker, scores)             # overwrite order
        wacc = wacc + jnp.where(m, ker, jnp.zeros_like(ker))
    o_ref[0] = scores * pl.reciprocal(wacc, approx=True)


def merge_tiles(unet_p, x_noisy, ditw_out, sigmas):
    b = x_noisy.shape[0]
    x_flat = x_noisy.reshape(b, C_IN, HW)
    ditw_flat = ditw_out.reshape(b, W_CH, HW)
    scale = (1.0 / (sigmas ** 2 + 1.0)).reshape(b, 1, 1).astype(jnp.float32)
    masks = jnp.asarray(TILE_MASKS.reshape(NTILES, HW))

    out = pl.pallas_call(
        _merge_kernel,
        grid=(b,),
        out_shape=jax.ShapeDtypeStruct((b, C_IN, HW), jnp.float32),
        in_specs=[
            pl.BlockSpec((1, W_CH, HW), lambda i: (i, 0, 0)),
            pl.BlockSpec((1, C_IN, HW), lambda i: (i, 0, 0)),
            pl.BlockSpec((NTILES, HW), lambda i: (0, 0)),
            pl.BlockSpec((C_IN, C_IN), lambda i: (0, 0)),
            pl.BlockSpec((C_IN, 1), lambda i: (0, 0)),
            pl.BlockSpec((1, 1, 1), lambda i: (i, 0, 0)),
        ],
        out_specs=pl.BlockSpec((1, C_IN, HW), lambda i: (i, 0, 0)),
        compiler_params=pltpu.CompilerParams(
            dimension_semantics=("parallel",)),
    )(ditw_flat, x_flat, masks, unet_p['Wt'], unet_p['b'], scale)
    return out.reshape(b, C_IN, H, W)


# ------------------------------ parameter init ------------------------------
def init_dit_params(key, in_ch, out_ch, hidden, patch, n_tokens, freq_dim):
    pd = patch * patch * in_ch
    od = patch * patch * out_ch
    assert pd <= K_PAD and od <= OUT_PAD
    ks = jax.random.split(key, 11)
    wn = lambda k, s: 0.02 * jax.random.normal(k, s, jnp.float32)
    zrow = lambda n: jnp.zeros((1, n), jnp.float32)
    bf = lambda a: a.astype(jnp.bfloat16)

    W_embed = jnp.zeros((K_PAD, hidden), jnp.float32).at[:pd].set(
        wn(ks[0], (pd, hidden)))
    W_final = jnp.zeros((hidden, OUT_PAD), jnp.float32).at[:, :od].set(
        wn(ks[10], (hidden, od)))

    return dict(
        We=bf(W_embed), be=zrow(hidden),
        pos=wn(ks[1], (n_tokens, hidden)),
        Wt1=bf(wn(ks[2], (freq_dim, hidden))), bt1=zrow(hidden),
        Wt2=bf(wn(ks[3], (hidden, hidden))), bt2=zrow(hidden),
        Wmod=bf(wn(ks[4], (hidden, 6 * hidden))), bmod=zrow(6 * hidden),
        Wqkv=bf(wn(ks[5], (hidden, 3 * hidden))), bqkv=zrow(3 * hidden),
        Wproj=bf(wn(ks[6], (hidden, hidden))), bproj=zrow(hidden),
        Wfc1=bf(wn(ks[7], (hidden, 4 * hidden))), bfc1=zrow(4 * hidden),
        Wfc2=bf(wn(ks[8], (4 * hidden, hidden))), bfc2=zrow(hidden),
        Wfmod=bf(wn(ks[9], (hidden, 2 * hidden))), bfmod=zrow(2 * hidden),
        Wfin=bf(W_final), bfin=jnp.zeros((1, OUT_PAD), jnp.float32),
    )


# --------------------- TransformerDevilWithW forward -----------------------
def transformer_devil_forward(params, x_noisy, sigmas):
    b = x_noisy.shape[0]
    temb = _timestep_embedding(sigmas, FREQ_DIM)            # (B, FREQ_DIM)

    # 1) dit_w input: channel block 3t holds x_noisy masked to tile t region
    #    — single broadcast multiply (no dynamic-update-slice chain).
    masks = jnp.asarray(TILE_MASKS)                          # (NT, H, W)
    ditw_in = (x_noisy[:, None, :, :, :]
               * masks[None, :, None, :, :]).reshape(b, W_CH, H, W)

    # 2) fused dit_w
    ditw_out = dit_forward(params['dit_w'], ditw_in, temb, W_CH)

    # 3+4) fused merge kernel: unet stand-in + sigma scale + exp weighting
    #      + overwrite + w accumulation + scores/w normalization.
    scores = merge_tiles(params['unet'], x_noisy, ditw_out, sigmas)

    # 5) final fused DiT on normalized scores
    return dit_forward(params['dit'], scores, temb, C_IN)


# ----------------------------------- main -----------------------------------
if __name__ == "__main__":
    key = jax.random.PRNGKey(0)
    k_dit, k_ditw, k_unet, k_x = jax.random.split(key, 4)

    unet_W = 0.1 * jax.random.normal(k_unet, (C_IN, C_IN), jnp.float32)
    params = {
        'dit': init_dit_params(k_dit, C_IN, C_IN, HIDDEN, PATCH,
                               T_TOKENS, FREQ_DIM),
        'dit_w': init_dit_params(k_ditw, W_CH, W_CH, HIDDEN, PATCH,
                                 T_TOKENS, FREQ_DIM),
        'unet': {
            'Wt': unet_W.T,                                  # (C_in->C_out).T
            'b': jnp.zeros((C_IN, 1), jnp.float32),
        },
    }

    x_noisy = jax.random.normal(k_x, (B, C_IN, H, W), jnp.float32)
    sigmas = jnp.array([0.5, 1.3], jnp.float32)

    fwd = jax.jit(transformer_devil_forward)
    out = jax.block_until_ready(fwd(params, x_noisy, sigmas))

    assert out.shape == (B, C_IN, H, W), out.shape
    assert bool(jnp.all(jnp.isfinite(out)))
    print("KERNEL_OK")
</pallas_src>

<mosaic_0001>
module attributes {stable_mosaic.version = 11 : i64} {
  func.func @_fused_dit_kernel(%arg0: i32, %arg1: memref<1x64x128xbf16, #tpu.memory_space<vmem>>, %arg2: memref<1x1x64xf32, #tpu.memory_space<vmem>>, %arg3: memref<64x64xf32, #tpu.memory_space<vmem>>, %arg4: memref<128x64xbf16, #tpu.memory_space<vmem>>, %arg5: memref<1x64xf32, #tpu.memory_space<vmem>>, %arg6: memref<64x64xbf16, #tpu.memory_space<vmem>>, %arg7: memref<1x64xf32, #tpu.memory_space<vmem>>, %arg8: memref<64x64xbf16, #tpu.memory_space<vmem>>, %arg9: memref<1x64xf32, #tpu.memory_space<vmem>>, %arg10: memref<64x384xbf16, #tpu.memory_space<vmem>>, %arg11: memref<1x384xf32, #tpu.memory_space<vmem>>, %arg12: memref<64x192xbf16, #tpu.memory_space<vmem>>, %arg13: memref<1x192xf32, #tpu.memory_space<vmem>>, %arg14: memref<64x64xbf16, #tpu.memory_space<vmem>>, %arg15: memref<1x64xf32, #tpu.memory_space<vmem>>, %arg16: memref<64x256xbf16, #tpu.memory_space<vmem>>, %arg17: memref<1x256xf32, #tpu.memory_space<vmem>>, %arg18: memref<256x64xbf16, #tpu.memory_space<vmem>>, %arg19: memref<1x64xf32, #tpu.memory_space<vmem>>, %arg20: memref<64x128xbf16, #tpu.memory_space<vmem>>, %arg21: memref<1x128xf32, #tpu.memory_space<vmem>>, %arg22: memref<64x128xbf16, #tpu.memory_space<vmem>>, %arg23: memref<1x128xf32, #tpu.memory_space<vmem>>, %arg24: memref<1x64x128xf32, #tpu.memory_space<vmem>>) attributes {dimension_semantics = [#tpu.dimension_semantics<parallel>], iteration_bounds = array<i64: 2>, scalar_prefetch = 0 : i64, scratch_operands = 0 : i64, tpu.core_type = #tpu.core_type<tc>, window_params = [{transform_indices = @transform_0, window_bounds = array<i64: 1, 64, 128>}, {transform_indices = @transform_1, window_bounds = array<i64: 1, 1, 64>}, {pipeline_mode = #tpu.pipeline_mode<synchronous>, transform_indices = @transform_2, window_bounds = array<i64: 64, 64>}, {pipeline_mode = #tpu.pipeline_mode<synchronous>, transform_indices = @transform_3, window_bounds = array<i64: 128, 64>}, {pipeline_mode = #tpu.pipeline_mode<synchronous>, transform_indices = @transform_4, window_bounds = array<i64: 1, 64>}, {pipeline_mode = #tpu.pipeline_mode<synchronous>, transform_indices = @transform_5, window_bounds = array<i64: 64, 64>}, {pipeline_mode = #tpu.pipeline_mode<synchronous>, transform_indices = @transform_6, window_bounds = array<i64: 1, 64>}, {pipeline_mode = #tpu.pipeline_mode<synchronous>, transform_indices = @transform_7, window_bounds = array<i64: 64, 64>}, {pipeline_mode = #tpu.pipeline_mode<synchronous>, transform_indices = @transform_8, window_bounds = array<i64: 1, 64>}, {pipeline_mode = #tpu.pipeline_mode<synchronous>, transform_indices = @transform_9, window_bounds = array<i64: 64, 384>}, {pipeline_mode = #tpu.pipeline_mode<synchronous>, transform_indices = @transform_10, window_bounds = array<i64: 1, 384>}, {pipeline_mode = #tpu.pipeline_mode<synchronous>, transform_indices = @transform_11, window_bounds = array<i64: 64, 192>}, {pipeline_mode = #tpu.pipeline_mode<synchronous>, transform_indices = @transform_12, window_bounds = array<i64: 1, 192>}, {pipeline_mode = #tpu.pipeline_mode<synchronous>, transform_indices = @transform_13, window_bounds = array<i64: 64, 64>}, {pipeline_mode = #tpu.pipeline_mode<synchronous>, transform_indices = @transform_14, window_bounds = array<i64: 1, 64>}, {pipeline_mode = #tpu.pipeline_mode<synchronous>, transform_indices = @transform_15, window_bounds = array<i64: 64, 256>}, {pipeline_mode = #tpu.pipeline_mode<synchronous>, transform_indices = @transform_16, window_bounds = array<i64: 1, 256>}, {pipeline_mode = #tpu.pipeline_mode<synchronous>, transform_indices = @transform_17, window_bounds = array<i64: 256, 64>}, {pipeline_mode = #tpu.pipeline_mode<synchronous>, transform_indices = @transform_18, window_bounds = array<i64: 1, 64>}, {pipeline_mode = #tpu.pipeline_mode<synchronous>, transform_indices = @transform_19, window_bounds = array<i64: 64, 128>}, {pipeline_mode = #tpu.pipeline_mode<synchronous>, transform_indices = @transform_20, window_bounds = array<i64: 1, 128>}, {pipeline_mode = #tpu.pipeline_mode<synchronous>, transform_indices = @transform_21, window_bounds = array<i64: 64, 128>}, {pipeline_mode = #tpu.pipeline_mode<synchronous>, transform_indices = @transform_22, window_bounds = array<i64: 1, 128>}, {transform_indices = @transform_23, window_bounds = array<i64: 1, 64, 128>}]} {
    %c0 = arith.constant 0 : index
    %c0_0 = arith.constant 0 : index
    %c0_1 = arith.constant 0 : index
    %0 = vector.load %arg1[%c0, %c0_0, %c0_1] : memref<1x64x128xbf16, #tpu.memory_space<vmem>>, vector<1x64x128xbf16>
    %1 = vector.shape_cast %0 : vector<1x64x128xbf16> to vector<64x128xbf16>
    %c0_2 = arith.constant 0 : index
    %c0_3 = arith.constant 0 : index
    %2 = vector.load %arg4[%c0_2, %c0_3] : memref<128x64xbf16, #tpu.memory_space<vmem>>, vector<128x64xbf16>
    %cst = arith.constant dense<0.000000e+00> : vector<64x64xf32>
    %3 = tpu.matmul %1, %2, %cst {dimension_numbers = #tpu.dot_dimension_numbers<[1], [0], [0], [1], [0, 0, 1, 1], [], []>} : vector<64x128xbf16>, vector<128x64xbf16>, vector<64x64xf32> -> vector<64x64xf32>
    %c0_4 = arith.constant 0 : index
    %c0_5 = arith.constant 0 : index
    %4 = vector.load %arg5[%c0_4, %c0_5] : memref<1x64xf32, #tpu.memory_space<vmem>>, vector<1x64xf32>
    %5 = vector.broadcast %4 : vector<1x64xf32> to vector<64x64xf32>
    %6 = arith.addf %3, %5 : vector<64x64xf32>
    %c0_6 = arith.constant 0 : index
    %c0_7 = arith.constant 0 : index
    %7 = vector.load %arg3[%c0_6, %c0_7] : memref<64x64xf32, #tpu.memory_space<vmem>>, vector<64x64xf32>
    %8 = arith.addf %6, %7 : vector<64x64xf32>
    %c0_8 = arith.constant 0 : index
    %c0_9 = arith.constant 0 : index
    %c0_10 = arith.constant 0 : index
    %9 = vector.load %arg2[%c0_8, %c0_9, %c0_10] : memref<1x1x64xf32, #tpu.memory_space<vmem>>, vector<1x1x64xf32>
    %10 = vector.shape_cast %9 : vector<1x1x64xf32> to vector<1x64xf32>
    %11 = arith.truncf %10 : vector<1x64xf32> to vector<1x64xbf16>
    %c0_11 = arith.constant 0 : index
    %c0_12 = arith.constant 0 : index
    %12 = vector.load %arg6[%c0_11, %c0_12] : memref<64x64xbf16, #tpu.memory_space<vmem>>, vector<64x64xbf16>
    %cst_13 = arith.constant dense<0.000000e+00> : vector<1x64xf32>
    %13 = tpu.matmul %11, %12, %cst_13 {dimension_numbers = #tpu.dot_dimension_numbers<[1], [0], [0], [1], [0, 0, 1, 1], [], []>} : vector<1x64xbf16>, vector<64x64xbf16>, vector<1x64xf32> -> vector<1x64xf32>
    %c0_14 = arith.constant 0 : index
    %c0_15 = arith.constant 0 : index
    %14 = vector.load %arg7[%c0_14, %c0_15] : memref<1x64xf32, #tpu.memory_space<vmem>>, vector<1x64xf32>
    %15 = arith.addf %13, %14 : vector<1x64xf32>
    %16 = arith.negf %15 : vector<1x64xf32>
    %17 = math.exp %16 : vector<1x64xf32>
    %cst_16 = arith.constant 1.000000e+00 : f32
    %18 = vector.broadcast %cst_16 : f32 to vector<1x64xf32>
    %19 = arith.addf %18, %17 : vector<1x64xf32>
    %20 = arith.divf %18, %19 : vector<1x64xf32>
    %21 = arith.mulf %15, %20 : vector<1x64xf32>
    %22 = arith.truncf %21 : vector<1x64xf32> to vector<1x64xbf16>
    %c0_17 = arith.constant 0 : index
    %c0_18 = arith.constant 0 : index
    %23 = vector.load %arg8[%c0_17, %c0_18] : memref<64x64xbf16, #tpu.memory_space<vmem>>, vector<64x64xbf16>
    %cst_19 = arith.constant dense<0.000000e+00> : vector<1x64xf32>
    %24 = tpu.matmul %22, %23, %cst_19 {dimension_numbers = #tpu.dot_dimension_numbers<[1], [0], [0], [1], [0, 0, 1, 1], [], []>} : vector<1x64xbf16>, vector<64x64xbf16>, vector<1x64xf32> -> vector<1x64xf32>
    %c0_20 = arith.constant 0 : index
    %c0_21 = arith.constant 0 : index
    %25 = vector.load %arg9[%c0_20, %c0_21] : memref<1x64xf32, #tpu.memory_space<vmem>>, vector<1x64xf32>
    %26 = arith.addf %24, %25 : vector<1x64xf32>
    %27 = arith.negf %26 : vector<1x64xf32>
    %28 = math.exp %27 : vector<1x64xf32>
    %cst_22 = arith.constant 1.000000e+00 : f32
    %29 = vector.broadcast %cst_22 : f32 to vector<1x64xf32>
    %30 = arith.addf %29, %28 : vector<1x64xf32>
    %31 = arith.divf %29, %30 : vector<1x64xf32>
    %32 = arith.mulf %26, %31 : vector<1x64xf32>
    %33 = arith.truncf %32 : vector<1x64xf32> to vector<1x64xbf16>
    %c0_23 = arith.constant 0 : index
    %c0_24 = arith.constant 0 : index
    %34 = vector.load %arg10[%c0_23, %c0_24] : memref<64x384xbf16, #tpu.memory_space<vmem>>, vector<64x384xbf16>
    %cst_25 = arith.constant dense<0.000000e+00> : vector<1x384xf32>
    %35 = tpu.matmul %33, %34, %cst_25 {dimension_numbers = #tpu.dot_dimension_numbers<[1], [0], [0], [1], [0, 0, 1, 1], [], []>} : vector<1x64xbf16>, vector<64x384xbf16>, vector<1x384xf32> -> vector<1x384xf32>
    %c0_26 = arith.constant 0 : index
    %c0_27 = arith.constant 0 : index
    %36 = vector.load %arg11[%c0_26, %c0_27] : memref<1x384xf32, #tpu.memory_space<vmem>>, vector<1x384xf32>
    %37 = arith.addf %35, %36 : vector<1x384xf32>
    %38 = vector.extract_strided_slice %37 {offsets = [0, 0], sizes = [1, 64], strides = [1, 1]} : vector<1x384xf32> to vector<1x64xf32>
    %39 = vector.extract_strided_slice %37 {offsets = [0, 64], sizes = [1, 64], strides = [1, 1]} : vector<1x384xf32> to vector<1x64xf32>
    %40 = vector.extract_strided_slice %37 {offsets = [0, 128], sizes = [1, 64], strides = [1, 1]} : vector<1x384xf32> to vector<1x64xf32>
    %41 = vector.extract_strided_slice %37 {offsets = [0, 192], sizes = [1, 64], strides = [1, 1]} : vector<1x384xf32> to vector<1x64xf32>
    %42 = vector.extract_strided_slice %37 {offsets = [0, 256], sizes = [1, 64], strides = [1, 1]} : vector<1x384xf32> to vector<1x64xf32>
    %43 = vector.extract_strided_slice %37 {offsets = [0, 320], sizes = [1, 64], strides = [1, 1]} : vector<1x384xf32> to vector<1x64xf32>
    %44 = arith.truncf %32 : vector<1x64xf32> to vector<1x64xbf16>
    %c0_28 = arith.constant 0 : index
    %c0_29 = arith.constant 0 : index
    %45 = vector.load %arg20[%c0_28, %c0_29] : memref<64x128xbf16, #tpu.memory_space<vmem>>, vector<64x128xbf16>
    %cst_30 = arith.constant dense<0.000000e+00> : vector<1x128xf32>
    %46 = tpu.matmul %44, %45, %cst_30 {dimension_numbers = #tpu.dot_dimension_numbers<[1], [0], [0], [1], [0, 0, 1, 1], [], []>} : vector<1x64xbf16>, vector<64x128xbf16>, vector<1x128xf32> -> vector<1x128xf32>
    %c0_31 = arith.constant 0 : index
    %c0_32 = arith.constant 0 : index
    %47 = vector.load %arg21[%c0_31, %c0_32] : memref<1x128xf32, #tpu.memory_space<vmem>>, vector<1x128xf32>
    %48 = arith.addf %46, %47 : vector<1x128xf32>
    %49 = vector.extract_strided_slice %48 {offsets = [0, 0], sizes = [1, 64], strides = [1, 1]} : vector<1x128xf32> to vector<1x64xf32>
    %50 = vector.extract_strided_slice %48 {offsets = [0, 64], sizes = [1, 64], strides = [1, 1]} : vector<1x128xf32> to vector<1x64xf32>
    %cst_33 = arith.constant dense<0.000000e+00> : vector<64xf32>
    %51 = vector.multi_reduction <add>, %8, %cst_33 [1] : vector<64x64xf32> to vector<64xf32>
    %52 = vector.shape_cast %51 : vector<64xf32> to vector<64x1xf32>
    %cst_34 = arith.constant 6.400000e+01 : f32
    %53 = vector.broadcast %cst_34 : f32 to vector<64x1xf32>
    %54 = arith.divf %52, %53 : vector<64x1xf32>
    %55 = vector.broadcast %54 : vector<64x1xf32> to vector<64x64xf32>
    %56 = arith.subf %8, %55 : vector<64x64xf32>
    %57 = arith.mulf %56, %56 : vector<64x64xf32>
    %cst_35 = arith.constant dense<0.000000e+00> : vector<64xf32>
    %58 = vector.multi_reduction <add>, %57, %cst_35 [1] : vector<64x64xf32> to vector<64xf32>
    %59 = vector.shape_cast %58 : vector<64xf32> to vector<64x1xf32>
    %cst_36 = arith.constant 6.400000e+01 : f32
    %60 = vector.broadcast %cst_36 : f32 to vector<64x1xf32>
    %61 = arith.divf %59, %60 : vector<64x1xf32>
    %62 = vector.broadcast %54 : vector<64x1xf32> to vector<64x64xf32>
    %63 = arith.subf %8, %62 : vector<64x64xf32>
    %cst_37 = arith.constant 9.99999997E-7 : f32
    %64 = vector.broadcast %cst_37 : f32 to vector<64x1xf32>
    %65 = arith.addf %61, %64 : vector<64x1xf32>
    %66 = math.rsqrt %65 : vector<64x1xf32>
    %67 = vector.broadcast %66 : vector<64x1xf32> to vector<64x64xf32>
    %68 = arith.mulf %63, %67 : vector<64x64xf32>
    %cst_38 = arith.constant 1.000000e+00 : f32
    %69 = vector.broadcast %cst_38 : f32 to vector<1x64xf32>
    %70 = arith.addf %69, %39 : vector<1x64xf32>
    %71 = vector.broadcast %70 : vector<1x64xf32> to vector<64x64xf32>
    %72 = arith.mulf %68, %71 : vector<64x64xf32>
    %73 = vector.broadcast %38 : vector<1x64xf32> to vector<64x64xf32>
    %74 = arith.addf %72, %73 : vector<64x64xf32>
    %75 = arith.truncf %74 : vector<64x64xf32> to vector<64x64xbf16>
    %c0_39 = arith.constant 0 : index
    %c0_40 = arith.constant 0 : index
    %76 = vector.load %arg12[%c0_39, %c0_40] : memref<64x192xbf16, #tpu.memory_space<vmem>>, vector<64x192xbf16>
    %cst_41 = arith.constant dense<0.000000e+00> : vector<64x192xf32>
    %77 = tpu.matmul %75, %76, %cst_41 {dimension_numbers = #tpu.dot_dimension_numbers<[1], [0], [0], [1], [0, 0, 1, 1], [], []>} : vector<64x64xbf16>, vector<64x192xbf16>, vector<64x192xf32> -> vector<64x192xf32>
    %c0_42 = arith.constant 0 : index
    %c0_43 = arith.constant 0 : index
    %78 = vector.load %arg13[%c0_42, %c0_43] : memref<1x192xf32, #tpu.memory_space<vmem>>, vector<1x192xf32>
    %79 = vector.broadcast %78 : vector<1x192xf32> to vector<64x192xf32>
    %80 = arith.addf %77, %79 : vector<64x192xf32>
    %cst_44 = arith.constant 0.000000e+00 : f32
    %81 = vector.broadcast %cst_44 : f32 to vector<64x64xf32>
    %82 = vector.extract_strided_slice %80 {offsets = [0, 0], sizes = [64, 16], strides = [1, 1]} : vector<64x192xf32> to vector<64x16xf32>
    %83 = vector.extract_strided_slice %80 {offsets = [0, 64], sizes = [64, 16], strides = [1, 1]} : vector<64x192xf32> to vector<64x16xf32>
    %84 = vector.extract_strided_slice %80 {offsets = [0, 128], sizes = [64, 16], strides = [1, 1]} : vector<64x192xf32> to vector<64x16xf32>
    %85 = arith.truncf %82 : vector<64x16xf32> to vector<64x16xbf16>
    %86 = arith.truncf %83 : vector<64x16xf32> to vector<64x16xbf16>
    %cst_45 = arith.constant dense<0.000000e+00> : vector<64x64xf32>
    %87 = tpu.matmul %85, %86, %cst_45 {dimension_numbers = #tpu.dot_dimension_numbers<[1], [1], [0], [0], [0, 0, 1, 0], [], []>} : vector<64x16xbf16>, vector<64x16xbf16>, vector<64x64xf32> -> vector<64x64xf32>
    %cst_46 = arith.constant 2.500000e-01 : f32
    %88 = vector.broadcast %cst_46 : f32 to vector<64x64xf32>
    %89 = arith.mulf %87, %88 : vector<64x64xf32>
    %cst_47 = arith.constant dense<0xFF800000> : vector<64xf32>
    %90 = vector.multi_reduction <maximumf>, %89, %cst_47 [1] : vector<64x64xf32> to vector<64xf32>
    %91 = vector.shape_cast %90 : vector<64xf32> to vector<64x1xf32>
    %92 = vector.broadcast %91 : vector<64x1xf32> to vector<64x64xf32>
    %93 = arith.subf %89, %92 : vector<64x64xf32>
    %94 = math.exp %93 : vector<64x64xf32>
    %cst_48 = arith.constant dense<0.000000e+00> : vector<64xf32>
    %95 = vector.multi_reduction <add>, %94, %cst_48 [1] : vector<64x64xf32> to vector<64xf32>
    %96 = vector.shape_cast %95 : vector<64xf32> to vector<64x1xf32>
    %97 = tpu.reciprocal %96 {approx = true} : vector<64x1xf32> -> vector<64x1xf32>
    %98 = vector.broadcast %97 : vector<64x1xf32> to vector<64x64xf32>
    %99 = arith.mulf %94, %98 : vector<64x64xf32>
    %100 = arith.truncf %99 : vector<64x64xf32> to vector<64x64xbf16>
    %101 = arith.truncf %84 : vector<64x16xf32> to vector<64x16xbf16>
    %cst_49 = arith.constant dense<0.000000e+00> : vector<64x16xf32>
    %102 = tpu.matmul %100, %101, %cst_49 {dimension_numbers = #tpu.dot_dimension_numbers<[1], [0], [0], [1], [0, 0, 1, 1], [], []>} : vector<64x64xbf16>, vector<64x16xbf16>, vector<64x16xf32> -> vector<64x16xf32>
    %103 = arith.truncf %102 : vector<64x16xf32> to vector<64x16xbf16>
    %c0_50 = arith.constant 0 : index
    %c0_51 = arith.constant 0 : index
    %104 = vector.load %arg14[%c0_50, %c0_51] : memref<64x64xbf16, #tpu.memory_space<vmem>>, vector<16x64xbf16>
    %cst_52 = arith.constant dense<0.000000e+00> : vector<64x64xf32>
    %105 = tpu.matmul %103, %104, %cst_52 {dimension_numbers = #tpu.dot_dimension_numbers<[1], [0], [0], [1], [0, 0, 1, 1], [], []>} : vector<64x16xbf16>, vector<16x64xbf16>, vector<64x64xf32> -> vector<64x64xf32>
    %106 = arith.addf %81, %105 : vector<64x64xf32>
    %107 = vector.extract_strided_slice %80 {offsets = [0, 16], sizes = [64, 16], strides = [1, 1]} : vector<64x192xf32> to vector<64x16xf32>
    %108 = vector.extract_strided_slice %80 {offsets = [0, 80], sizes = [64, 16], strides = [1, 1]} : vector<64x192xf32> to vector<64x16xf32>
    %109 = vector.extract_strided_slice %80 {offsets = [0, 144], sizes = [64, 16], strides = [1, 1]} : vector<64x192xf32> to vector<64x16xf32>
    %110 = arith.truncf %107 : vector<64x16xf32> to vector<64x16xbf16>
    %111 = arith.truncf %108 : vector<64x16xf32> to vector<64x16xbf16>
    %cst_53 = arith.constant dense<0.000000e+00> : vector<64x64xf32>
    %112 = tpu.matmul %110, %111, %cst_53 {dimension_numbers = #tpu.dot_dimension_numbers<[1], [1], [0], [0], [0, 0, 1, 0], [], []>} : vector<64x16xbf16>, vector<64x16xbf16>, vector<64x64xf32> -> vector<64x64xf32>
    %cst_54 = arith.constant 2.500000e-01 : f32
    %113 = vector.broadcast %cst_54 : f32 to vector<64x64xf32>
    %114 = arith.mulf %112, %113 : vector<64x64xf32>
    %cst_55 = arith.constant dense<0xFF800000> : vector<64xf32>
    %115 = vector.multi_reduction <maximumf>, %114, %cst_55 [1] : vector<64x64xf32> to vector<64xf32>
    %116 = vector.shape_cast %115 : vector<64xf32> to vector<64x1xf32>
    %117 = vector.broadcast %116 : vector<64x1xf32> to vector<64x64xf32>
    %118 = arith.subf %114, %117 : vector<64x64xf32>
    %119 = math.exp %118 : vector<64x64xf32>
    %cst_56 = arith.constant dense<0.000000e+00> : vector<64xf32>
    %120 = vector.multi_reduction <add>, %119, %cst_56 [1] : vector<64x64xf32> to vector<64xf32>
    %121 = vector.shape_cast %120 : vector<64xf32> to vector<64x1xf32>
    %122 = tpu.reciprocal %121 {approx = true} : vector<64x1xf32> -> vector<64x1xf32>
    %123 = vector.broadcast %122 : vector<64x1xf32> to vector<64x64xf32>
    %124 = arith.mulf %119, %123 : vector<64x64xf32>
    %125 = arith.truncf %124 : vector<64x64xf32> to vector<64x64xbf16>
    %126 = arith.truncf %109 : vector<64x16xf32> to vector<64x16xbf16>
    %cst_57 = arith.constant dense<0.000000e+00> : vector<64x16xf32>
    %127 = tpu.matmul %125, %126, %cst_57 {dimension_numbers = #tpu.dot_dimension_numbers<[1], [0], [0], [1], [0, 0, 1, 1], [], []>} : vector<64x64xbf16>, vector<64x16xbf16>, vector<64x16xf32> -> vector<64x16xf32>
    %128 = arith.truncf %127 : vector<64x16xf32> to vector<64x16xbf16>
    %c16 = arith.constant 16 : index
    %c0_58 = arith.constant 0 : index
    %129 = vector.load %arg14[%c16, %c0_58] : memref<64x64xbf16, #tpu.memory_space<vmem>>, vector<16x64xbf16>
    %cst_59 = arith.constant dense<0.000000e+00> : vector<64x64xf32>
    %130 = tpu.matmul %128, %129, %cst_59 {dimension_numbers = #tpu.dot_dimension_numbers<[1], [0], [0], [1], [0, 0, 1, 1], [], []>} : vector<64x16xbf16>, vector<16x64xbf16>, vector<64x64xf32> -> vector<64x64xf32>
    %131 = arith.addf %106, %130 : vector<64x64xf32>
    %132 = vector.extract_strided_slice %80 {offsets = [0, 32], sizes = [64, 16], strides = [1, 1]} : vector<64x192xf32> to vector<64x16xf32>
    %133 = vector.extract_strided_slice %80 {offsets = [0, 96], sizes = [64, 16], strides = [1, 1]} : vector<64x192xf32> to vector<64x16xf32>
    %134 = vector.extract_strided_slice %80 {offsets = [0, 160], sizes = [64, 16], strides = [1, 1]} : vector<64x192xf32> to vector<64x16xf32>
    %135 = arith.truncf %132 : vector<64x16xf32> to vector<64x16xbf16>
    %136 = arith.truncf %133 : vector<64x16xf32> to vector<64x16xbf16>
    %cst_60 = arith.constant dense<0.000000e+00> : vector<64x64xf32>
    %137 = tpu.matmul %135, %136, %cst_60 {dimension_numbers = #tpu.dot_dimension_numbers<[1], [1], [0], [0], [0, 0, 1, 0], [], []>} : vector<64x16xbf16>, vector<64x16xbf16>, vector<64x64xf32> -> vector<64x64xf32>
    %cst_61 = arith.constant 2.500000e-01 : f32
    %138 = vector.broadcast %cst_61 : f32 to vector<64x64xf32>
    %139 = arith.mulf %137, %138 : vector<64x64xf32>
    %cst_62 = arith.constant dense<0xFF800000> : vector<64xf32>
    %140 = vector.multi_reduction <maximumf>, %139, %cst_62 [1] : vector<64x64xf32> to vector<64xf32>
    %141 = vector.shape_cast %140 : vector<64xf32> to vector<64x1xf32>
    %142 = vector.broadcast %141 : vector<64x1xf32> to vector<64x64xf32>
    %143 = arith.subf %139, %142 : vector<64x64xf32>
    %144 = math.exp %143 : vector<64x64xf32>
    %cst_63 = arith.constant dense<0.000000e+00> : vector<64xf32>
    %145 = vector.multi_reduction <add>, %144, %cst_63 [1] : vector<64x64xf32> to vector<64xf32>
    %146 = vector.shape_cast %145 : vector<64xf32> to vector<64x1xf32>
    %147 = tpu.reciprocal %146 {approx = true} : vector<64x1xf32> -> vector<64x1xf32>
    %148 = vector.broadcast %147 : vector<64x1xf32> to vector<64x64xf32>
    %149 = arith.mulf %144, %148 : vector<64x64xf32>
    %150 = arith.truncf %149 : vector<64x64xf32> to vector<64x64xbf16>
    %151 = arith.truncf %134 : vector<64x16xf32> to vector<64x16xbf16>
    %cst_64 = arith.constant dense<0.000000e+00> : vector<64x16xf32>
    %152 = tpu.matmul %150, %151, %cst_64 {dimension_numbers = #tpu.dot_dimension_numbers<[1], [0], [0], [1], [0, 0, 1, 1], [], []>} : vector<64x64xbf16>, vector<64x16xbf16>, vector<64x16xf32> -> vector<64x16xf32>
    %153 = arith.truncf %152 : vector<64x16xf32> to vector<64x16xbf16>
    %c32 = arith.constant 32 : index
    %c0_65 = arith.constant 0 : index
    %154 = vector.load %arg14[%c32, %c0_65] : memref<64x64xbf16, #tpu.memory_space<vmem>>, vector<16x64xbf16>
    %cst_66 = arith.constant dense<0.000000e+00> : vector<64x64xf32>
    %155 = tpu.matmul %153, %154, %cst_66 {dimension_numbers = #tpu.dot_dimension_numbers<[1], [0], [0], [1], [0, 0, 1, 1], [], []>} : vector<64x16xbf16>, vector<16x64xbf16>, vector<64x64xf32> -> vector<64x64xf32>
    %156 = arith.addf %131, %155 : vector<64x64xf32>
    %157 = vector.extract_strided_slice %80 {offsets = [0, 48], sizes = [64, 16], strides = [1, 1]} : vector<64x192xf32> to vector<64x16xf32>
    %158 = vector.extract_strided_slice %80 {offsets = [0, 112], sizes = [64, 16], strides = [1, 1]} : vector<64x192xf32> to vector<64x16xf32>
    %159 = vector.extract_strided_slice %80 {offsets = [0, 176], sizes = [64, 16], strides = [1, 1]} : vector<64x192xf32> to vector<64x16xf32>
    %160 = arith.truncf %157 : vector<64x16xf32> to vector<64x16xbf16>
    %161 = arith.truncf %158 : vector<64x16xf32> to vector<64x16xbf16>
    %cst_67 = arith.constant dense<0.000000e+00> : vector<64x64xf32>
    %162 = tpu.matmul %160, %161, %cst_67 {dimension_numbers = #tpu.dot_dimension_numbers<[1], [1], [0], [0], [0, 0, 1, 0], [], []>} : vector<64x16xbf16>, vector<64x16xbf16>, vector<64x64xf32> -> vector<64x64xf32>
    %cst_68 = arith.constant 2.500000e-01 : f32
    %163 = vector.broadcast %cst_68 : f32 to vector<64x64xf32>
    %164 = arith.mulf %162, %163 : vector<64x64xf32>
    %cst_69 = arith.constant dense<0xFF800000> : vector<64xf32>
    %165 = vector.multi_reduction <maximumf>, %164, %cst_69 [1] : vector<64x64xf32> to vector<64xf32>
    %166 = vector.shape_cast %165 : vector<64xf32> to vector<64x1xf32>
    %167 = vector.broadcast %166 : vector<64x1xf32> to vector<64x64xf32>
    %168 = arith.subf %164, %167 : vector<64x64xf32>
    %169 = math.exp %168 : vector<64x64xf32>
    %cst_70 = arith.constant dense<0.000000e+00> : vector<64xf32>
    %170 = vector.multi_reduction <add>, %169, %cst_70 [1] : vector<64x64xf32> to vector<64xf32>
    %171 = vector.shape_cast %170 : vector<64xf32> to vector<64x1xf32>
    %172 = tpu.reciprocal %171 {approx = true} : vector<64x1xf32> -> vector<64x1xf32>
    %173 = vector.broadcast %172 : vector<64x1xf32> to vector<64x64xf32>
    %174 = arith.mulf %169, %173 : vector<64x64xf32>
    %175 = arith.truncf %174 : vector<64x64xf32> to vector<64x64xbf16>
    %176 = arith.truncf %159 : vector<64x16xf32> to vector<64x16xbf16>
    %cst_71 = arith.constant dense<0.000000e+00> : vector<64x16xf32>
    %177 = tpu.matmul %175, %176, %cst_71 {dimension_numbers = #tpu.dot_dimension_numbers<[1], [0], [0], [1], [0, 0, 1, 1], [], []>} : vector<64x64xbf16>, vector<64x16xbf16>, vector<64x16xf32> -> vector<64x16xf32>
    %178 = arith.truncf %177 : vector<64x16xf32> to vector<64x16xbf16>
    %c48 = arith.constant 48 : index
    %c0_72 = arith.constant 0 : index
    %179 = vector.load %arg14[%c48, %c0_72] : memref<64x64xbf16, #tpu.memory_space<vmem>>, vector<16x64xbf16>
    %cst_73 = arith.constant dense<0.000000e+00> : vector<64x64xf32>
    %180 = tpu.matmul %178, %179, %cst_73 {dimension_numbers = #tpu.dot_dimension_numbers<[1], [0], [0], [1], [0, 0, 1, 1], [], []>} : vector<64x16xbf16>, vector<16x64xbf16>, vector<64x64xf32> -> vector<64x64xf32>
    %181 = arith.addf %156, %180 : vector<64x64xf32>
    %c0_74 = arith.constant 0 : index
    %c0_75 = arith.constant 0 : index
    %182 = vector.load %arg15[%c0_74, %c0_75] : memref<1x64xf32, #tpu.memory_space<vmem>>, vector<1x64xf32>
    %183 = vector.broadcast %182 : vector<1x64xf32> to vector<64x64xf32>
    %184 = arith.addf %181, %183 : vector<64x64xf32>
    %185 = vector.broadcast %40 : vector<1x64xf32> to vector<64x64xf32>
    %186 = arith.mulf %185, %184 : vector<64x64xf32>
    %187 = arith.addf %8, %186 : vector<64x64xf32>
    %cst_76 = arith.constant dense<0.000000e+00> : vector<64xf32>
    %188 = vector.multi_reduction <add>, %187, %cst_76 [1] : vector<64x64xf32> to vector<64xf32>
    %189 = vector.shape_cast %188 : vector<64xf32> to vector<64x1xf32>
    %cst_77 = arith.constant 6.400000e+01 : f32
    %190 = vector.broadcast %cst_77 : f32 to vector<64x1xf32>
    %191 = arith.divf %189, %190 : vector<64x1xf32>
    %192 = vector.broadcast %191 : vector<64x1xf32> to vector<64x64xf32>
    %193 = arith.subf %187, %192 : vector<64x64xf32>
    %194 = arith.mulf %193, %193 : vector<64x64xf32>
    %cst_78 = arith.constant dense<0.000000e+00> : vector<64xf32>
    %195 = vector.multi_reduction <add>, %194, %cst_78 [1] : vector<64x64xf32> to vector<64xf32>
    %196 = vector.shape_cast %195 : vector<64xf32> to vector<64x1xf32>
    %cst_79 = arith.constant 6.400000e+01 : f32
    %197 = vector.broadcast %cst_79 : f32 to vector<64x1xf32>
    %198 = arith.divf %196, %197 : vector<64x1xf32>
    %199 = vector.broadcast %191 : vector<64x1xf32> to vector<64x64xf32>
    %200 = arith.subf %187, %199 : vector<64x64xf32>
    %cst_80 = arith.constant 9.99999997E-7 : f32
    %201 = vector.broadcast %cst_80 : f32 to vector<64x1xf32>
    %202 = arith.addf %198, %201 : vector<64x1xf32>
    %203 = math.rsqrt %202 : vector<64x1xf32>
    %204 = vector.broadcast %203 : vector<64x1xf32> to vector<64x64xf32>
    %205 = arith.mulf %200, %204 : vector<64x64xf32>
    %cst_81 = arith.constant 1.000000e+00 : f32
    %206 = vector.broadcast %cst_81 : f32 to vector<1x64xf32>
    %207 = arith.addf %206, %42 : vector<1x64xf32>
    %208 = vector.broadcast %207 : vector<1x64xf32> to vector<64x64xf32>
    %209 = arith.mulf %205, %208 : vector<64x64xf32>
    %210 = vector.broadcast %41 : vector<1x64xf32> to vector<64x64xf32>
    %211 = arith.addf %209, %210 : vector<64x64xf32>
    %212 = arith.truncf %211 : vector<64x64xf32> to vector<64x64xbf16>
    %c0_82 = arith.constant 0 : index
    %c0_83 = arith.constant 0 : index
    %213 = vector.load %arg16[%c0_82, %c0_83] : memref<64x256xbf16, #tpu.memory_space<vmem>>, vector<64x256xbf16>
    %cst_84 = arith.constant dense<0.000000e+00> : vector<64x256xf32>
    %214 = tpu.matmul %212, %213, %cst_84 {dimension_numbers = #tpu.dot_dimension_numbers<[1], [0], [0], [1], [0, 0, 1, 1], [], []>} : vector<64x64xbf16>, vector<64x256xbf16>, vector<64x256xf32> -> vector<64x256xf32>
    %c0_85 = arith.constant 0 : index
    %c0_86 = arith.constant 0 : index
    %215 = vector.load %arg17[%c0_85, %c0_86] : memref<1x256xf32, #tpu.memory_space<vmem>>, vector<1x256xf32>
    %216 = vector.broadcast %215 : vector<1x256xf32> to vector<64x256xf32>
    %217 = arith.addf %214, %216 : vector<64x256xf32>
    %218 = arith.mulf %217, %217 : vector<64x256xf32>
    %219 = arith.mulf %217, %218 : vector<64x256xf32>
    %cst_87 = arith.constant 4.471500e-02 : f32
    %220 = vector.broadcast %cst_87 : f32 to vector<64x256xf32>
    %221 = arith.mulf %220, %219 : vector<64x256xf32>
    %222 = arith.addf %217, %221 : vector<64x256xf32>
    %cst_88 = arith.constant 0.797884583 : f32
    %223 = vector.broadcast %cst_88 : f32 to vector<64x256xf32>
    %224 = arith.mulf %223, %222 : vector<64x256xf32>
    %225 = math.tanh %224 : vector<64x256xf32>
    %cst_89 = arith.constant 1.000000e+00 : f32
    %226 = vector.broadcast %cst_89 : f32 to vector<64x256xf32>
    %227 = arith.addf %226, %225 : vector<64x256xf32>
    %cst_90 = arith.constant 5.000000e-01 : f32
    %228 = vector.broadcast %cst_90 : f32 to vector<64x256xf32>
    %229 = arith.mulf %228, %227 : vector<64x256xf32>
    %230 = arith.mulf %217, %229 : vector<64x256xf32>
    %231 = arith.truncf %230 : vector<64x256xf32> to vector<64x256xbf16>
    %c0_91 = arith.constant 0 : index
    %c0_92 = arith.constant 0 : index
    %232 = vector.load %arg18[%c0_91, %c0_92] : memref<256x64xbf16, #tpu.memory_space<vmem>>, vector<256x64xbf16>
    %cst_93 = arith.constant dense<0.000000e+00> : vector<64x64xf32>
    %233 = tpu.matmul %231, %232, %cst_93 {dimension_numbers = #tpu.dot_dimension_numbers<[1], [0], [0], [1], [0, 0, 1, 1], [], []>} : vector<64x256xbf16>, vector<256x64xbf16>, vector<64x64xf32> -> vector<64x64xf32>
    %c0_94 = arith.constant 0 : index
    %c0_95 = arith.constant 0 : index
    %234 = vector.load %arg19[%c0_94, %c0_95] : memref<1x64xf32, #tpu.memory_space<vmem>>, vector<1x64xf32>
    %235 = vector.broadcast %234 : vector<1x64xf32> to vector<64x64xf32>
    %236 = arith.addf %233, %235 : vector<64x64xf32>
    %237 = vector.broadcast %43 : vector<1x64xf32> to vector<64x64xf32>
    %238 = arith.mulf %237, %236 : vector<64x64xf32>
    %239 = arith.addf %187, %238 : vector<64x64xf32>
    %cst_96 = arith.constant dense<0.000000e+00> : vector<64xf32>
    %240 = vector.multi_reduction <add>, %239, %cst_96 [1] : vector<64x64xf32> to vector<64xf32>
    %241 = vector.shape_cast %240 : vector<64xf32> to vector<64x1xf32>
    %cst_97 = arith.constant 6.400000e+01 : f32
    %242 = vector.broadcast %cst_97 : f32 to vector<64x1xf32>
    %243 = arith.divf %241, %242 : vector<64x1xf32>
    %244 = vector.broadcast %243 : vector<64x1xf32> to vector<64x64xf32>
    %245 = arith.subf %239, %244 : vector<64x64xf32>
    %246 = arith.mulf %245, %245 : vector<64x64xf32>
    %cst_98 = arith.constant dense<0.000000e+00> : vector<64xf32>
    %247 = vector.multi_reduction <add>, %246, %cst_98 [1] : vector<64x64xf32> to vector<64xf32>
    %248 = vector.shape_cast %247 : vector<64xf32> to vector<64x1xf32>
    %cst_99 = arith.constant 6.400000e+01 : f32
    %249 = vector.broadcast %cst_99 : f32 to vector<64x1xf32>
    %250 = arith.divf %248, %249 : vector<64x1xf32>
    %251 = vector.broadcast %243 : vector<64x1xf32> to vector<64x64xf32>
    %252 = arith.subf %239, %251 : vector<64x64xf32>
    %cst_100 = arith.constant 9.99999997E-7 : f32
    %253 = vector.broadcast %cst_100 : f32 to vector<64x1xf32>
    %254 = arith.addf %250, %253 : vector<64x1xf32>
    %255 = math.rsqrt %254 : vector<64x1xf32>
    %256 = vector.broadcast %255 : vector<64x1xf32> to vector<64x64xf32>
    %257 = arith.mulf %252, %256 : vector<64x64xf32>
    %cst_101 = arith.constant 1.000000e+00 : f32
    %258 = vector.broadcast %cst_101 : f32 to vector<1x64xf32>
    %259 = arith.addf %258, %50 : vector<1x64xf32>
    %260 = vector.broadcast %259 : vector<1x64xf32> to vector<64x64xf32>
    %261 = arith.mulf %257, %260 : vector<64x64xf32>
    %262 = vector.broadcast %49 : vector<1x64xf32> to vector<64x64xf32>
    %263 = arith.addf %261, %262 : vector<64x64xf32>
    %264 = arith.truncf %263 : vector<64x64xf32> to vector<64x64xbf16>
    %c0_102 = arith.constant 0 : index
    %c0_103 = arith.constant 0 : index
    %265 = vector.load %arg22[%c0_102, %c0_103] : memref<64x128xbf16, #tpu.memory_space<vmem>>, vector<64x128xbf16>
    %cst_104 = arith.constant dense<0.000000e+00> : vector<64x128xf32>
    %266 = tpu.matmul %264, %265, %cst_104 {dimension_numbers = #tpu.dot_dimension_numbers<[1], [0], [0], [1], [0, 0, 1, 1], [], []>} : vector<64x64xbf16>, vector<64x128xbf16>, vector<64x128xf32> -> vector<64x128xf32>
    %c0_105 = arith.constant 0 : index
    %c0_106 = arith.constant 0 : index
    %267 = vector.load %arg23[%c0_105, %c0_106] : memref<1x128xf32, #tpu.memory_space<vmem>>, vector<1x128xf32>
    %268 = vector.broadcast %267 : vector<1x128xf32> to vector<64x128xf32>
    %269 = arith.addf %266, %268 : vector<64x128xf32>
    %c0_107 = arith.constant 0 : index
    %c0_108 = arith.constant 0 : index
    %c0_109 = arith.constant 0 : index
    %270 = vector.load %arg24[%c0_107, %c0_108, %c0_109] : memref<1x64x128xf32, #tpu.memory_space<vmem>>, vector<1x64x128xf32>
    %271 = vector.shape_cast %270 : vector<1x64x128xf32> to vector<64x128xf32>
    %272 = vector.shape_cast %269 : vector<64x128xf32> to vector<1x64x128xf32>
    tpu.vector_store %arg24[%c0_107, %c0_108, %c0_109], %272 {strides = array<i32>} : memref<1x64x128xf32, #tpu.memory_space<vmem>>, vector<1x64x128xf32>,
    return
  }
  func.func @transform_0(%arg0: i32) -> (i32, i32, i32) {
    %c0_i32 = arith.constant 0 : i32
    %c0_i32_0 = arith.constant 0 : i32
    %c0_i32_1 = arith.constant 0 : i32
    return %arg0, %c0_i32, %c0_i32_0 : i32, i32, i32
  }
  func.func @transform_1(%arg0: i32) -> (i32, i32, i32) {
    %c0_i32 = arith.constant 0 : i32
    %c0_i32_0 = arith.constant 0 : i32
    %c0_i32_1 = arith.constant 0 : i32
    return %arg0, %c0_i32, %c0_i32_0 : i32, i32, i32
  }
  func.func @transform_2(%arg0: i32) -> (i32, i32) {
    %c0_i32 = arith.constant 0 : i32
    %c0_i32_0 = arith.constant 0 : i32
    %c0_i32_1 = arith.constant 0 : i32
    return %c0_i32, %c0_i32_0 : i32, i32
  }
  func.func @transform_3(%arg0: i32) -> (i32, i32) {
    %c0_i32 = arith.constant 0 : i32
    %c0_i32_0 = arith.constant 0 : i32
    %c0_i32_1 = arith.constant 0 : i32
    return %c0_i32, %c0_i32_0 : i32, i32
  }
  func.func @transform_4(%arg0: i32) -> (i32, i32) {
    %c0_i32 = arith.constant 0 : i32
    %c0_i32_0 = arith.constant 0 : i32
    %c0_i32_1 = arith.constant 0 : i32
    return %c0_i32, %c0_i32_0 : i32, i32
  }
  func.func @transform_5(%arg0: i32) -> (i32, i32) {
    %c0_i32 = arith.constant 0 : i32
    %c0_i32_0 = arith.constant 0 : i32
    %c0_i32_1 = arith.constant 0 : i32
    return %c0_i32, %c0_i32_0 : i32, i32
  }
  func.func @transform_6(%arg0: i32) -> (i32, i32) {
    %c0_i32 = arith.constant 0 : i32
    %c0_i32_0 = arith.constant 0 : i32
    %c0_i32_1 = arith.constant 0 : i32
    return %c0_i32, %c0_i32_0 : i32, i32
  }
  func.func @transform_7(%arg0: i32) -> (i32, i32) {
    %c0_i32 = arith.constant 0 : i32
    %c0_i32_0 = arith.constant 0 : i32
    %c0_i32_1 = arith.constant 0 : i32
    return %c0_i32, %c0_i32_0 : i32, i32
  }
  func.func @transform_8(%arg0: i32) -> (i32, i32) {
    %c0_i32 = arith.constant 0 : i32
    %c0_i32_0 = arith.constant 0 : i32
    %c0_i32_1 = arith.constant 0 : i32
    return %c0_i32, %c0_i32_0 : i32, i32
  }
  func.func @transform_9(%arg0: i32) -> (i32, i32) {
    %c0_i32 = arith.constant 0 : i32
    %c0_i32_0 = arith.constant 0 : i32
    %c0_i32_1 = arith.constant 0 : i32
    return %c0_i32, %c0_i32_0 : i32, i32
  }
  func.func @transform_10(%arg0: i32) -> (i32, i32) {
    %c0_i32 = arith.constant 0 : i32
    %c0_i32_0 = arith.constant 0 : i32
    %c0_i32_1 = arith.constant 0 : i32
    return %c0_i32, %c0_i32_0 : i32, i32
  }
  func.func @transform_11(%arg0: i32) -> (i32, i32) {
    %c0_i32 = arith.constant 0 : i32
    %c0_i32_0 = arith.constant 0 : i32
    %c0_i32_1 = arith.constant 0 : i32
    return %c0_i32, %c0_i32_0 : i32, i32
  }
  func.func @transform_12(%arg0: i32) -> (i32, i32) {
    %c0_i32 = arith.constant 0 : i32
    %c0_i32_0 = arith.constant 0 : i32
    %c0_i32_1 = arith.constant 0 : i32
    return %c0_i32, %c0_i32_0 : i32, i32
  }
  func.func @transform_13(%arg0: i32) -> (i32, i32) {
    %c0_i32 = arith.constant 0 : i32
    %c0_i32_0 = arith.constant 0 : i32
    %c0_i32_1 = arith.constant 0 : i32
    return %c0_i32, %c0_i32_0 : i32, i32
  }
  func.func @transform_14(%arg0: i32) -> (i32, i32) {
    %c0_i32 = arith.constant 0 : i32
    %c0_i32_0 = arith.constant 0 : i32
    %c0_i32_1 = arith.constant 0 : i32
    return %c0_i32, %c0_i32_0 : i32, i32
  }
  func.func @transform_15(%arg0: i32) -> (i32, i32) {
    %c0_i32 = arith.constant 0 : i32
    %c0_i32_0 = arith.constant 0 : i32
    %c0_i32_1 = arith.constant 0 : i32
    return %c0_i32, %c0_i32_0 : i32, i32
  }
  func.func @transform_16(%arg0: i32) -> (i32, i32) {
    %c0_i32 = arith.constant 0 : i32
    %c0_i32_0 = arith.constant 0 : i32
    %c0_i32_1 = arith.constant 0 : i32
    return %c0_i32, %c0_i32_0 : i32, i32
  }
  func.func @transform_17(%arg0: i32) -> (i32, i32) {
    %c0_i32 = arith.constant 0 : i32
    %c0_i32_0 = arith.constant 0 : i32
    %c0_i32_1 = arith.constant 0 : i32
    return %c0_i32, %c0_i32_0 : i32, i32
  }
  func.func @transform_18(%arg0: i32) -> (i32, i32) {
    %c0_i32 = arith.constant 0 : i32
    %c0_i32_0 = arith.constant 0 : i32
    %c0_i32_1 = arith.constant 0 : i32
    return %c0_i32, %c0_i32_0 : i32, i32
  }
  func.func @transform_19(%arg0: i32) -> (i32, i32) {
    %c0_i32 = arith.constant 0 : i32
    %c0_i32_0 = arith.constant 0 : i32
    %c0_i32_1 = arith.constant 0 : i32
    return %c0_i32, %c0_i32_0 : i32, i32
  }
  func.func @transform_20(%arg0: i32) -> (i32, i32) {
    %c0_i32 = arith.constant 0 : i32
    %c0_i32_0 = arith.constant 0 : i32
    %c0_i32_1 = arith.constant 0 : i32
    return %c0_i32, %c0_i32_0 : i32, i32
  }
  func.func @transform_21(%arg0: i32) -> (i32, i32) {
    %c0_i32 = arith.constant 0 : i32
    %c0_i32_0 = arith.constant 0 : i32
    %c0_i32_1 = arith.constant 0 : i32
    return %c0_i32, %c0_i32_0 : i32, i32
  }
  func.func @transform_22(%arg0: i32) -> (i32, i32) {
    %c0_i32 = arith.constant 0 : i32
    %c0_i32_0 = arith.constant 0 : i32
    %c0_i32_1 = arith.constant 0 : i32
    return %c0_i32, %c0_i32_0 : i32, i32
  }
  func.func @transform_23(%arg0: i32) -> (i32, i32, i32) {
    %c0_i32 = arith.constant 0 : i32
    %c0_i32_0 = arith.constant 0 : i32
    %c0_i32_1 = arith.constant 0 : i32
    return %arg0, %c0_i32, %c0_i32_0 : i32, i32, i32
  }
}

module attributes {stable_mosaic.version = 11 : i64} {
  func.func @_merge_kernel(%arg0: i32, %arg1: memref<1x27x256xf32, #tpu.memory_space<vmem>>, %arg2: memref<1x3x256xf32, #tpu.memory_space<vmem>>, %arg3: memref<9x256xf32, #tpu.memory_space<vmem>>, %arg4: memref<3x3xf32, #tpu.memory_space<vmem>>, %arg5: memref<3x1xf32, #tpu.memory_space<vmem>>, %arg6: memref<1x1x1xf32, #tpu.memory_space<vmem>>, %arg7: memref<1x3x256xf32, #tpu.memory_space<vmem>>) attributes {dimension_semantics = [#tpu.dimension_semantics<parallel>], iteration_bounds = array<i64: 2>, scalar_prefetch = 0 : i64, scratch_operands = 0 : i64, tpu.core_type = #tpu.core_type<tc>, window_params = [{transform_indices = @transform_0, window_bounds = array<i64: 1, 27, 256>}, {transform_indices = @transform_1, window_bounds = array<i64: 1, 3, 256>}, {pipeline_mode = #tpu.pipeline_mode<synchronous>, transform_indices = @transform_2, window_bounds = array<i64: 9, 256>}, {pipeline_mode = #tpu.pipeline_mode<synchronous>, transform_indices = @transform_3, window_bounds = array<i64: 3, 3>}, {pipeline_mode = #tpu.pipeline_mode<synchronous>, transform_indices = @transform_4, window_bounds = array<i64: 3, 1>}, {transform_indices = @transform_5, window_bounds = array<i64: 1, 1, 1>}, {transform_indices = @transform_6, window_bounds = array<i64: 1, 3, 256>}]} {
    %c0 = arith.constant 0 : index
    %c0_0 = arith.constant 0 : index
    %c0_1 = arith.constant 0 : index
    %0 = vector.load %arg2[%c0, %c0_0, %c0_1] : memref<1x3x256xf32, #tpu.memory_space<vmem>>, vector<1x3x256xf32>
    %1 = vector.shape_cast %0 : vector<1x3x256xf32> to vector<3x256xf32>
    %c0_2 = arith.constant 0 : index
    %c0_3 = arith.constant 0 : index
    %2 = vector.load %arg4[%c0_2, %c0_3] : memref<3x3xf32, #tpu.memory_space<vmem>>, vector<3x3xf32>
    %cst = arith.constant dense<0.000000e+00> : vector<3x256xf32>
    %3 = tpu.matmul %2, %1, %cst {dimension_numbers = #tpu.dot_dimension_numbers<[1], [0], [0], [1], [0, 0, 1, 1], [], []>} : vector<3x3xf32>, vector<3x256xf32>, vector<3x256xf32> -> vector<3x256xf32>
    %c0_4 = arith.constant 0 : index
    %c0_5 = arith.constant 0 : index
    %4 = vector.load %arg5[%c0_4, %c0_5] : memref<3x1xf32, #tpu.memory_space<vmem>>, vector<3x1xf32>
    %5 = vector.broadcast %4 : vector<3x1xf32> to vector<3x256xf32>
    %6 = arith.addf %3, %5 : vector<3x256xf32>
    %c0_6 = arith.constant 0 : index
    %c0_7 = arith.constant 0 : index
    %c0_8 = arith.constant 0 : index
    %7 = vector.load %arg6[%c0_6, %c0_7, %c0_8] : memref<1x1x1xf32, #tpu.memory_space<vmem>>, vector<1x1x1xf32>
    %8 = vector.shape_cast %7 : vector<1x1x1xf32> to vector<1x1xf32>
    %9 = vector.broadcast %8 : vector<1x1xf32> to vector<3x256xf32>
    %10 = arith.mulf %6, %9 : vector<3x256xf32>
    %cst_9 = arith.constant 0.000000e+00 : f32
    %11 = vector.broadcast %cst_9 : f32 to vector<3x256xf32>
    %cst_10 = arith.constant 0.000000e+00 : f32
    %12 = vector.broadcast %cst_10 : f32 to vector<3x256xf32>
    %c0_11 = arith.constant 0 : index
    %c0_12 = arith.constant 0 : index
    %13 = vector.load %arg3[%c0_11, %c0_12] : memref<9x256xf32, #tpu.memory_space<vmem>>, vector<1x256xf32>
    %cst_13 = arith.constant 0.000000e+00 : f32
    %14 = vector.broadcast %cst_13 : f32 to vector<1x256xf32>
    %15 = arith.cmpf ogt, %13, %14 : vector<1x256xf32>
    %c0_14 = arith.constant 0 : index
    %c0_15 = arith.constant 0 : index
    %c0_16 = arith.constant 0 : index
    %16 = vector.load %arg1[%c0_14, %c0_15, %c0_16] : memref<1x27x256xf32, #tpu.memory_space<vmem>>, vector<1x3x256xf32>
    %17 = vector.shape_cast %16 : vector<1x3x256xf32> to vector<3x256xf32>
    %18 = math.exp %17 : vector<3x256xf32>
    %19 = arith.mulf %10, %18 : vector<3x256xf32>
    %20 = vector.shape_cast %15 : vector<1x256xi1> to vector<1x256xi1>
    %21 = vector.broadcast %20 : vector<1x256xi1> to vector<3x256xi1>
    %22 = arith.select %21, %19, %11 : vector<3x256xi1>, vector<3x256xf32>
    %cst_17 = arith.constant 0.000000e+00 : f32
    %23 = vector.broadcast %cst_17 : f32 to vector<3x256xf32>
    %24 = vector.shape_cast %15 : vector<1x256xi1> to vector<1x256xi1>
    %25 = vector.broadcast %24 : vector<1x256xi1> to vector<3x256xi1>
    %26 = arith.select %25, %18, %23 : vector<3x256xi1>, vector<3x256xf32>
    %27 = arith.addf %12, %26 : vector<3x256xf32>
    %c1 = arith.constant 1 : index
    %c0_18 = arith.constant 0 : index
    %28 = vector.load %arg3[%c1, %c0_18] : memref<9x256xf32, #tpu.memory_space<vmem>>, vector<1x256xf32>
    %cst_19 = arith.constant 0.000000e+00 : f32
    %29 = vector.broadcast %cst_19 : f32 to vector<1x256xf32>
    %30 = arith.cmpf ogt, %28, %29 : vector<1x256xf32>
    %c0_20 = arith.constant 0 : index
    %c3 = arith.constant 3 : index
    %c0_21 = arith.constant 0 : index
    %31 = vector.load %arg1[%c0_20, %c3, %c0_21] : memref<1x27x256xf32, #tpu.memory_space<vmem>>, vector<1x3x256xf32>
    %32 = vector.shape_cast %31 : vector<1x3x256xf32> to vector<3x256xf32>
    %33 = math.exp %32 : vector<3x256xf32>
    %34 = arith.mulf %10, %33 : vector<3x256xf32>
    %35 = vector.shape_cast %30 : vector<1x256xi1> to vector<1x256xi1>
    %36 = vector.broadcast %35 : vector<1x256xi1> to vector<3x256xi1>
    %37 = arith.select %36, %34, %22 : vector<3x256xi1>, vector<3x256xf32>
    %cst_22 = arith.constant 0.000000e+00 : f32
    %38 = vector.broadcast %cst_22 : f32 to vector<3x256xf32>
    %39 = vector.shape_cast %30 : vector<1x256xi1> to vector<1x256xi1>
    %40 = vector.broadcast %39 : vector<1x256xi1> to vector<3x256xi1>
    %41 = arith.select %40, %33, %38 : vector<3x256xi1>, vector<3x256xf32>
    %42 = arith.addf %27, %41 : vector<3x256xf32>
    %c2 = arith.constant 2 : index
    %c0_23 = arith.constant 0 : index
    %43 = vector.load %arg3[%c2, %c0_23] : memref<9x256xf32, #tpu.memory_space<vmem>>, vector<1x256xf32>
    %cst_24 = arith.constant 0.000000e+00 : f32
    %44 = vector.broadcast %cst_24 : f32 to vector<1x256xf32>
    %45 = arith.cmpf ogt, %43, %44 : vector<1x256xf32>
    %c0_25 = arith.constant 0 : index
    %c6 = arith.constant 6 : index
    %c0_26 = arith.constant 0 : index
    %46 = vector.load %arg1[%c0_25, %c6, %c0_26] : memref<1x27x256xf32, #tpu.memory_space<vmem>>, vector<1x3x256xf32>
    %47 = vector.shape_cast %46 : vector<1x3x256xf32> to vector<3x256xf32>
    %48 = math.exp %47 : vector<3x256xf32>
    %49 = arith.mulf %10, %48 : vector<3x256xf32>
    %50 = vector.shape_cast %45 : vector<1x256xi1> to vector<1x256xi1>
    %51 = vector.broadcast %50 : vector<1x256xi1> to vector<3x256xi1>
    %52 = arith.select %51, %49, %37 : vector<3x256xi1>, vector<3x256xf32>
    %cst_27 = arith.constant 0.000000e+00 : f32
    %53 = vector.broadcast %cst_27 : f32 to vector<3x256xf32>
    %54 = vector.shape_cast %45 : vector<1x256xi1> to vector<1x256xi1>
    %55 = vector.broadcast %54 : vector<1x256xi1> to vector<3x256xi1>
    %56 = arith.select %55, %48, %53 : vector<3x256xi1>, vector<3x256xf32>
    %57 = arith.addf %42, %56 : vector<3x256xf32>
    %c3_28 = arith.constant 3 : index
    %c0_29 = arith.constant 0 : index
    %58 = vector.load %arg3[%c3_28, %c0_29] : memref<9x256xf32, #tpu.memory_space<vmem>>, vector<1x256xf32>
    %cst_30 = arith.constant 0.000000e+00 : f32
    %59 = vector.broadcast %cst_30 : f32 to vector<1x256xf32>
    %60 = arith.cmpf ogt, %58, %59 : vector<1x256xf32>
    %c0_31 = arith.constant 0 : index
    %c9 = arith.constant 9 : index
    %c0_32 = arith.constant 0 : index
    %61 = vector.load %arg1[%c0_31, %c9, %c0_32] : memref<1x27x256xf32, #tpu.memory_space<vmem>>, vector<1x3x256xf32>
    %62 = vector.shape_cast %61 : vector<1x3x256xf32> to vector<3x256xf32>
    %63 = math.exp %62 : vector<3x256xf32>
    %64 = arith.mulf %10, %63 : vector<3x256xf32>
    %65 = vector.shape_cast %60 : vector<1x256xi1> to vector<1x256xi1>
    %66 = vector.broadcast %65 : vector<1x256xi1> to vector<3x256xi1>
    %67 = arith.select %66, %64, %52 : vector<3x256xi1>, vector<3x256xf32>
    %cst_33 = arith.constant 0.000000e+00 : f32
    %68 = vector.broadcast %cst_33 : f32 to vector<3x256xf32>
    %69 = vector.shape_cast %60 : vector<1x256xi1> to vector<1x256xi1>
    %70 = vector.broadcast %69 : vector<1x256xi1> to vector<3x256xi1>
    %71 = arith.select %70, %63, %68 : vector<3x256xi1>, vector<3x256xf32>
    %72 = arith.addf %57, %71 : vector<3x256xf32>
    %c4 = arith.constant 4 : index
    %c0_34 = arith.constant 0 : index
    %73 = vector.load %arg3[%c4, %c0_34] : memref<9x256xf32, #tpu.memory_space<vmem>>, vector<1x256xf32>
    %cst_35 = arith.constant 0.000000e+00 : f32
    %74 = vector.broadcast %cst_35 : f32 to vector<1x256xf32>
    %75 = arith.cmpf ogt, %73, %74 : vector<1x256xf32>
    %c0_36 = arith.constant 0 : index
    %c12 = arith.constant 12 : index
    %c0_37 = arith.constant 0 : index
    %76 = vector.load %arg1[%c0_36, %c12, %c0_37] : memref<1x27x256xf32, #tpu.memory_space<vmem>>, vector<1x3x256xf32>
    %77 = vector.shape_cast %76 : vector<1x3x256xf32> to vector<3x256xf32>
    %78 = math.exp %77 : vector<3x256xf32>
    %79 = arith.mulf %10, %78 : vector<3x256xf32>
    %80 = vector.shape_cast %75 : vector<1x256xi1> to vector<1x256xi1>
    %81 = vector.broadcast %80 : vector<1x256xi1> to vector<3x256xi1>
    %82 = arith.select %81, %79, %67 : vector<3x256xi1>, vector<3x256xf32>
    %cst_38 = arith.constant 0.000000e+00 : f32
    %83 = vector.broadcast %cst_38 : f32 to vector<3x256xf32>
    %84 = vector.shape_cast %75 : vector<1x256xi1> to vector<1x256xi1>
    %85 = vector.broadcast %84 : vector<1x256xi1> to vector<3x256xi1>
    %86 = arith.select %85, %78, %83 : vector<3x256xi1>, vector<3x256xf32>
    %87 = arith.addf %72, %86 : vector<3x256xf32>
    %c5 = arith.constant 5 : index
    %c0_39 = arith.constant 0 : index
    %88 = vector.load %arg3[%c5, %c0_39] : memref<9x256xf32, #tpu.memory_space<vmem>>, vector<1x256xf32>
    %cst_40 = arith.constant 0.000000e+00 : f32
    %89 = vector.broadcast %cst_40 : f32 to vector<1x256xf32>
    %90 = arith.cmpf ogt, %88, %89 : vector<1x256xf32>
    %c0_41 = arith.constant 0 : index
    %c15 = arith.constant 15 : index
    %c0_42 = arith.constant 0 : index
    %91 = vector.load %arg1[%c0_41, %c15, %c0_42] : memref<1x27x256xf32, #tpu.memory_space<vmem>>, vector<1x3x256xf32>
    %92 = vector.shape_cast %91 : vector<1x3x256xf32> to vector<3x256xf32>
    %93 = math.exp %92 : vector<3x256xf32>
    %94 = arith.mulf %10, %93 : vector<3x256xf32>
    %95 = vector.shape_cast %90 : vector<1x256xi1> to vector<1x256xi1>
    %96 = vector.broadcast %95 : vector<1x256xi1> to vector<3x256xi1>
    %97 = arith.select %96, %94, %82 : vector<3x256xi1>, vector<3x256xf32>
    %cst_43 = arith.constant 0.000000e+00 : f32
    %98 = vector.broadcast %cst_43 : f32 to vector<3x256xf32>
    %99 = vector.shape_cast %90 : vector<1x256xi1> to vector<1x256xi1>
    %100 = vector.broadcast %99 : vector<1x256xi1> to vector<3x256xi1>
    %101 = arith.select %100, %93, %98 : vector<3x256xi1>, vector<3x256xf32>
    %102 = arith.addf %87, %101 : vector<3x256xf32>
    %c6_44 = arith.constant 6 : index
    %c0_45 = arith.constant 0 : index
    %103 = vector.load %arg3[%c6_44, %c0_45] : memref<9x256xf32, #tpu.memory_space<vmem>>, vector<1x256xf32>
    %cst_46 = arith.constant 0.000000e+00 : f32
    %104 = vector.broadcast %cst_46 : f32 to vector<1x256xf32>
    %105 = arith.cmpf ogt, %103, %104 : vector<1x256xf32>
    %c0_47 = arith.constant 0 : index
    %c18 = arith.constant 18 : index
    %c0_48 = arith.constant 0 : index
    %106 = vector.load %arg1[%c0_47, %c18, %c0_48] : memref<1x27x256xf32, #tpu.memory_space<vmem>>, vector<1x3x256xf32>
    %107 = vector.shape_cast %106 : vector<1x3x256xf32> to vector<3x256xf32>
    %108 = math.exp %107 : vector<3x256xf32>
    %109 = arith.mulf %10, %108 : vector<3x256xf32>
    %110 = vector.shape_cast %105 : vector<1x256xi1> to vector<1x256xi1>
    %111 = vector.broadcast %110 : vector<1x256xi1> to vector<3x256xi1>
    %112 = arith.select %111, %109, %97 : vector<3x256xi1>, vector<3x256xf32>
    %cst_49 = arith.constant 0.000000e+00 : f32
    %113 = vector.broadcast %cst_49 : f32 to vector<3x256xf32>
    %114 = vector.shape_cast %105 : vector<1x256xi1> to vector<1x256xi1>
    %115 = vector.broadcast %114 : vector<1x256xi1> to vector<3x256xi1>
    %116 = arith.select %115, %108, %113 : vector<3x256xi1>, vector<3x256xf32>
    %117 = arith.addf %102, %116 : vector<3x256xf32>
    %c7 = arith.constant 7 : index
    %c0_50 = arith.constant 0 : index
    %118 = vector.load %arg3[%c7, %c0_50] : memref<9x256xf32, #tpu.memory_space<vmem>>, vector<1x256xf32>
    %cst_51 = arith.constant 0.000000e+00 : f32
    %119 = vector.broadcast %cst_51 : f32 to vector<1x256xf32>
    %120 = arith.cmpf ogt, %118, %119 : vector<1x256xf32>
    %c0_52 = arith.constant 0 : index
    %c21 = arith.constant 21 : index
    %c0_53 = arith.constant 0 : index
    %121 = vector.load %arg1[%c0_52, %c21, %c0_53] : memref<1x27x256xf32, #tpu.memory_space<vmem>>, vector<1x3x256xf32>
    %122 = vector.shape_cast %121 : vector<1x3x256xf32> to vector<3x256xf32>
    %123 = math.exp %122 : vector<3x256xf32>
    %124 = arith.mulf %10, %123 : vector<3x256xf32>
    %125 = vector.shape_cast %120 : vector<1x256xi1> to vector<1x256xi1>
    %126 = vector.broadcast %125 : vector<1x256xi1> to vector<3x256xi1>
    %127 = arith.select %126, %124, %112 : vector<3x256xi1>, vector<3x256xf32>
    %cst_54 = arith.constant 0.000000e+00 : f32
    %128 = vector.broadcast %cst_54 : f32 to vector<3x256xf32>
    %129 = vector.shape_cast %120 : vector<1x256xi1> to vector<1x256xi1>
    %130 = vector.broadcast %129 : vector<1x256xi1> to vector<3x256xi1>
    %131 = arith.select %130, %123, %128 : vector<3x256xi1>, vector<3x256xf32>
    %132 = arith.addf %117, %131 : vector<3x256xf32>
    %c8 = arith.constant 8 : index
    %c0_55 = arith.constant 0 : index
    %133 = vector.load %arg3[%c8, %c0_55] : memref<9x256xf32, #tpu.memory_space<vmem>>, vector<1x256xf32>
    %cst_56 = arith.constant 0.000000e+00 : f32
    %134 = vector.broadcast %cst_56 : f32 to vector<1x256xf32>
    %135 = arith.cmpf ogt, %133, %134 : vector<1x256xf32>
    %c0_57 = arith.constant 0 : index
    %c24 = arith.constant 24 : index
    %c0_58 = arith.constant 0 : index
    %136 = vector.load %arg1[%c0_57, %c24, %c0_58] : memref<1x27x256xf32, #tpu.memory_space<vmem>>, vector<1x3x256xf32>
    %137 = vector.shape_cast %136 : vector<1x3x256xf32> to vector<3x256xf32>
    %138 = math.exp %137 : vector<3x256xf32>
    %139 = arith.mulf %10, %138 : vector<3x256xf32>
    %140 = vector.shape_cast %135 : vector<1x256xi1> to vector<1x256xi1>
    %141 = vector.broadcast %140 : vector<1x256xi1> to vector<3x256xi1>
    %142 = arith.select %141, %139, %127 : vector<3x256xi1>, vector<3x256xf32>
    %cst_59 = arith.constant 0.000000e+00 : f32
    %143 = vector.broadcast %cst_59 : f32 to vector<3x256xf32>
    %144 = vector.shape_cast %135 : vector<1x256xi1> to vector<1x256xi1>
    %145 = vector.broadcast %144 : vector<1x256xi1> to vector<3x256xi1>
    %146 = arith.select %145, %138, %143 : vector<3x256xi1>, vector<3x256xf32>
    %147 = arith.addf %132, %146 : vector<3x256xf32>
    %148 = tpu.reciprocal %147 {approx = true} : vector<3x256xf32> -> vector<3x256xf32>
    %149 = arith.mulf %142, %148 : vector<3x256xf32>
    %c0_60 = arith.constant 0 : index
    %c0_61 = arith.constant 0 : index
    %c0_62 = arith.constant 0 : index
    %150 = vector.load %arg7[%c0_60, %c0_61, %c0_62] : memref<1x3x256xf32, #tpu.memory_space<vmem>>, vector<1x3x256xf32>
    %151 = vector.shape_cast %150 : vector<1x3x256xf32> to vector<3x256xf32>
    %152 = vector.shape_cast %149 : vector<3x256xf32> to vector<1x3x256xf32>
    tpu.vector_store %arg7[%c0_60, %c0_61, %c0_62], %152 {strides = array<i32>} : memref<1x3x256xf32, #tpu.memory_space<vmem>>, vector<1x3x256xf32>,
    return
  }
  func.func @transform_0(%arg0: i32) -> (i32, i32, i32) {
    %c0_i32 = arith.constant 0 : i32
    %c0_i32_0 = arith.constant 0 : i32
    %c0_i32_1 = arith.constant 0 : i32
    return %arg0, %c0_i32, %c0_i32_0 : i32, i32, i32
  }
  func.func @transform_1(%arg0: i32) -> (i32, i32, i32) {
    %c0_i32 = arith.constant 0 : i32
    %c0_i32_0 = arith.constant 0 : i32
    %c0_i32_1 = arith.constant 0 : i32
    return %arg0, %c0_i32, %c0_i32_0 : i32, i32, i32
  }
  func.func @transform_2(%arg0: i32) -> (i32, i32) {
    %c0_i32 = arith.constant 0 : i32
    %c0_i32_0 = arith.constant 0 : i32
    %c0_i32_1 = arith.constant 0 : i32
    return %c0_i32, %c0_i32_0 : i32, i32
  }
  func.func @transform_3(%arg0: i32) -> (i32, i32) {
    %c0_i32 = arith.constant 0 : i32
    %c0_i32_0 = arith.constant 0 : i32
    %c0_i32_1 = arith.constant 0 : i32
    return %c0_i32, %c0_i32_0 : i32, i32
  }
  func.func @transform_4(%arg0: i32) -> (i32, i32) {
    %c0_i32 = arith.constant 0 : i32
    %c0_i32_0 = arith.constant 0 : i32
    %c0_i32_1 = arith.constant 0 : i32
    return %c0_i32, %c0_i32_0 : i32, i32
  }
  func.func @transform_5(%arg0: i32) -> (i32, i32, i32) {
    %c0_i32 = arith.constant 0 : i32
    %c0_i32_0 = arith.constant 0 : i32
    %c0_i32_1 = arith.constant 0 : i32
    return %arg0, %c0_i32, %c0_i32_0 : i32, i32, i32
  }
  func.func @transform_6(%arg0: i32) -> (i32, i32, i32) {
    %c0_i32 = arith.constant 0 : i32
    %c0_i32_0 = arith.constant 0 : i32
    %c0_i32_1 = arith.constant 0 : i32
    return %arg0, %c0_i32, %c0_i32_0 : i32, i32, i32
  }
}

module attributes {stable_mosaic.version = 11 : i64} {
  func.func @_fused_dit_kernel(%arg0: i32, %arg1: memref<1x64x128xbf16, #tpu.memory_space<vmem>>, %arg2: memref<1x1x64xf32, #tpu.memory_space<vmem>>, %arg3: memref<64x64xf32, #tpu.memory_space<vmem>>, %arg4: memref<128x64xbf16, #tpu.memory_space<vmem>>, %arg5: memref<1x64xf32, #tpu.memory_space<vmem>>, %arg6: memref<64x64xbf16, #tpu.memory_space<vmem>>, %arg7: memref<1x64xf32, #tpu.memory_space<vmem>>, %arg8: memref<64x64xbf16, #tpu.memory_space<vmem>>, %arg9: memref<1x64xf32, #tpu.memory_space<vmem>>, %arg10: memref<64x384xbf16, #tpu.memory_space<vmem>>, %arg11: memref<1x384xf32, #tpu.memory_space<vmem>>, %arg12: memref<64x192xbf16, #tpu.memory_space<vmem>>, %arg13: memref<1x192xf32, #tpu.memory_space<vmem>>, %arg14: memref<64x64xbf16, #tpu.memory_space<vmem>>, %arg15: memref<1x64xf32, #tpu.memory_space<vmem>>, %arg16: memref<64x256xbf16, #tpu.memory_space<vmem>>, %arg17: memref<1x256xf32, #tpu.memory_space<vmem>>, %arg18: memref<256x64xbf16, #tpu.memory_space<vmem>>, %arg19: memref<1x64xf32, #tpu.memory_space<vmem>>, %arg20: memref<64x128xbf16, #tpu.memory_space<vmem>>, %arg21: memref<1x128xf32, #tpu.memory_space<vmem>>, %arg22: memref<64x128xbf16, #tpu.memory_space<vmem>>, %arg23: memref<1x128xf32, #tpu.memory_space<vmem>>, %arg24: memref<1x64x128xf32, #tpu.memory_space<vmem>>) attributes {dimension_semantics = [#tpu.dimension_semantics<parallel>], iteration_bounds = array<i64: 2>, scalar_prefetch = 0 : i64, scratch_operands = 0 : i64, tpu.core_type = #tpu.core_type<tc>, window_params = [{transform_indices = @transform_0, window_bounds = array<i64: 1, 64, 128>}, {transform_indices = @transform_1, window_bounds = array<i64: 1, 1, 64>}, {pipeline_mode = #tpu.pipeline_mode<synchronous>, transform_indices = @transform_2, window_bounds = array<i64: 64, 64>}, {pipeline_mode = #tpu.pipeline_mode<synchronous>, transform_indices = @transform_3, window_bounds = array<i64: 128, 64>}, {pipeline_mode = #tpu.pipeline_mode<synchronous>, transform_indices = @transform_4, window_bounds = array<i64: 1, 64>}, {pipeline_mode = #tpu.pipeline_mode<synchronous>, transform_indices = @transform_5, window_bounds = array<i64: 64, 64>}, {pipeline_mode = #tpu.pipeline_mode<synchronous>, transform_indices = @transform_6, window_bounds = array<i64: 1, 64>}, {pipeline_mode = #tpu.pipeline_mode<synchronous>, transform_indices = @transform_7, window_bounds = array<i64: 64, 64>}, {pipeline_mode = #tpu.pipeline_mode<synchronous>, transform_indices = @transform_8, window_bounds = array<i64: 1, 64>}, {pipeline_mode = #tpu.pipeline_mode<synchronous>, transform_indices = @transform_9, window_bounds = array<i64: 64, 384>}, {pipeline_mode = #tpu.pipeline_mode<synchronous>, transform_indices = @transform_10, window_bounds = array<i64: 1, 384>}, {pipeline_mode = #tpu.pipeline_mode<synchronous>, transform_indices = @transform_11, window_bounds = array<i64: 64, 192>}, {pipeline_mode = #tpu.pipeline_mode<synchronous>, transform_indices = @transform_12, window_bounds = array<i64: 1, 192>}, {pipeline_mode = #tpu.pipeline_mode<synchronous>, transform_indices = @transform_13, window_bounds = array<i64: 64, 64>}, {pipeline_mode = #tpu.pipeline_mode<synchronous>, transform_indices = @transform_14, window_bounds = array<i64: 1, 64>}, {pipeline_mode = #tpu.pipeline_mode<synchronous>, transform_indices = @transform_15, window_bounds = array<i64: 64, 256>}, {pipeline_mode = #tpu.pipeline_mode<synchronous>, transform_indices = @transform_16, window_bounds = array<i64: 1, 256>}, {pipeline_mode = #tpu.pipeline_mode<synchronous>, transform_indices = @transform_17, window_bounds = array<i64: 256, 64>}, {pipeline_mode = #tpu.pipeline_mode<synchronous>, transform_indices = @transform_18, window_bounds = array<i64: 1, 64>}, {pipeline_mode = #tpu.pipeline_mode<synchronous>, transform_indices = @transform_19, window_bounds = array<i64: 64, 128>}, {pipeline_mode = #tpu.pipeline_mode<synchronous>, transform_indices = @transform_20, window_bounds = array<i64: 1, 128>}, {pipeline_mode = #tpu.pipeline_mode<synchronous>, transform_indices = @transform_21, window_bounds = array<i64: 64, 128>}, {pipeline_mode = #tpu.pipeline_mode<synchronous>, transform_indices = @transform_22, window_bounds = array<i64: 1, 128>}, {transform_indices = @transform_23, window_bounds = array<i64: 1, 64, 128>}]} {
    %c0 = arith.constant 0 : index
    %c0_0 = arith.constant 0 : index
    %c0_1 = arith.constant 0 : index
    %0 = vector.load %arg1[%c0, %c0_0, %c0_1] : memref<1x64x128xbf16, #tpu.memory_space<vmem>>, vector<1x64x128xbf16>
    %1 = vector.shape_cast %0 : vector<1x64x128xbf16> to vector<64x128xbf16>
    %c0_2 = arith.constant 0 : index
    %c0_3 = arith.constant 0 : index
    %2 = vector.load %arg4[%c0_2, %c0_3] : memref<128x64xbf16, #tpu.memory_space<vmem>>, vector<128x64xbf16>
    %cst = arith.constant dense<0.000000e+00> : vector<64x64xf32>
    %3 = tpu.matmul %1, %2, %cst {dimension_numbers = #tpu.dot_dimension_numbers<[1], [0], [0], [1], [0, 0, 1, 1], [], []>} : vector<64x128xbf16>, vector<128x64xbf16>, vector<64x64xf32> -> vector<64x64xf32>
    %c0_4 = arith.constant 0 : index
    %c0_5 = arith.constant 0 : index
    %4 = vector.load %arg5[%c0_4, %c0_5] : memref<1x64xf32, #tpu.memory_space<vmem>>, vector<1x64xf32>
    %5 = vector.broadcast %4 : vector<1x64xf32> to vector<64x64xf32>
    %6 = arith.addf %3, %5 : vector<64x64xf32>
    %c0_6 = arith.constant 0 : index
    %c0_7 = arith.constant 0 : index
    %7 = vector.load %arg3[%c0_6, %c0_7] : memref<64x64xf32, #tpu.memory_space<vmem>>, vector<64x64xf32>
    %8 = arith.addf %6, %7 : vector<64x64xf32>
    %c0_8 = arith.constant 0 : index
    %c0_9 = arith.constant 0 : index
    %c0_10 = arith.constant 0 : index
    %9 = vector.load %arg2[%c0_8, %c0_9, %c0_10] : memref<1x1x64xf32, #tpu.memory_space<vmem>>, vector<1x1x64xf32>
    %10 = vector.shape_cast %9 : vector<1x1x64xf32> to vector<1x64xf32>
    %11 = arith.truncf %10 : vector<1x64xf32> to vector<1x64xbf16>
    %c0_11 = arith.constant 0 : index
    %c0_12 = arith.constant 0 : index
    %12 = vector.load %arg6[%c0_11, %c0_12] : memref<64x64xbf16, #tpu.memory_space<vmem>>, vector<64x64xbf16>
    %cst_13 = arith.constant dense<0.000000e+00> : vector<1x64xf32>
    %13 = tpu.matmul %11, %12, %cst_13 {dimension_numbers = #tpu.dot_dimension_numbers<[1], [0], [0], [1], [0, 0, 1, 1], [], []>} : vector<1x64xbf16>, vector<64x64xbf16>, vector<1x64xf32> -> vector<1x64xf32>
    %c0_14 = arith.constant 0 : index
    %c0_15 = arith.constant 0 : index
    %14 = vector.load %arg7[%c0_14, %c0_15] : memref<1x64xf32, #tpu.memory_space<vmem>>, vector<1x64xf32>
    %15 = arith.addf %13, %14 : vector<1x64xf32>
    %16 = arith.negf %15 : vector<1x64xf32>
    %17 = math.exp %16 : vector<1x64xf32>
    %cst_16 = arith.constant 1.000000e+00 : f32
    %18 = vector.broadcast %cst_16 : f32 to vector<1x64xf32>
    %19 = arith.addf %18, %17 : vector<1x64xf32>
    %20 = arith.divf %18, %19 : vector<1x64xf32>
    %21 = arith.mulf %15, %20 : vector<1x64xf32>
    %22 = arith.truncf %21 : vector<1x64xf32> to vector<1x64xbf16>
    %c0_17 = arith.constant 0 : index
    %c0_18 = arith.constant 0 : index
    %23 = vector.load %arg8[%c0_17, %c0_18] : memref<64x64xbf16, #tpu.memory_space<vmem>>, vector<64x64xbf16>
    %cst_19 = arith.constant dense<0.000000e+00> : vector<1x64xf32>
    %24 = tpu.matmul %22, %23, %cst_19 {dimension_numbers = #tpu.dot_dimension_numbers<[1], [0], [0], [1], [0, 0, 1, 1], [], []>} : vector<1x64xbf16>, vector<64x64xbf16>, vector<1x64xf32> -> vector<1x64xf32>
    %c0_20 = arith.constant 0 : index
    %c0_21 = arith.constant 0 : index
    %25 = vector.load %arg9[%c0_20, %c0_21] : memref<1x64xf32, #tpu.memory_space<vmem>>, vector<1x64xf32>
    %26 = arith.addf %24, %25 : vector<1x64xf32>
    %27 = arith.negf %26 : vector<1x64xf32>
    %28 = math.exp %27 : vector<1x64xf32>
    %cst_22 = arith.constant 1.000000e+00 : f32
    %29 = vector.broadcast %cst_22 : f32 to vector<1x64xf32>
    %30 = arith.addf %29, %28 : vector<1x64xf32>
    %31 = arith.divf %29, %30 : vector<1x64xf32>
    %32 = arith.mulf %26, %31 : vector<1x64xf32>
    %33 = arith.truncf %32 : vector<1x64xf32> to vector<1x64xbf16>
    %c0_23 = arith.constant 0 : index
    %c0_24 = arith.constant 0 : index
    %34 = vector.load %arg10[%c0_23, %c0_24] : memref<64x384xbf16, #tpu.memory_space<vmem>>, vector<64x384xbf16>
    %cst_25 = arith.constant dense<0.000000e+00> : vector<1x384xf32>
    %35 = tpu.matmul %33, %34, %cst_25 {dimension_numbers = #tpu.dot_dimension_numbers<[1], [0], [0], [1], [0, 0, 1, 1], [], []>} : vector<1x64xbf16>, vector<64x384xbf16>, vector<1x384xf32> -> vector<1x384xf32>
    %c0_26 = arith.constant 0 : index
    %c0_27 = arith.constant 0 : index
    %36 = vector.load %arg11[%c0_26, %c0_27] : memref<1x384xf32, #tpu.memory_space<vmem>>, vector<1x384xf32>
    %37 = arith.addf %35, %36 : vector<1x384xf32>
    %38 = vector.extract_strided_slice %37 {offsets = [0, 0], sizes = [1, 64], strides = [1, 1]} : vector<1x384xf32> to vector<1x64xf32>
    %39 = vector.extract_strided_slice %37 {offsets = [0, 64], sizes = [1, 64], strides = [1, 1]} : vector<1x384xf32> to vector<1x64xf32>
    %40 = vector.extract_strided_slice %37 {offsets = [0, 128], sizes = [1, 64], strides = [1, 1]} : vector<1x384xf32> to vector<1x64xf32>
    %41 = vector.extract_strided_slice %37 {offsets = [0, 192], sizes = [1, 64], strides = [1, 1]} : vector<1x384xf32> to vector<1x64xf32>
    %42 = vector.extract_strided_slice %37 {offsets = [0, 256], sizes = [1, 64], strides = [1, 1]} : vector<1x384xf32> to vector<1x64xf32>
    %43 = vector.extract_strided_slice %37 {offsets = [0, 320], sizes = [1, 64], strides = [1, 1]} : vector<1x384xf32> to vector<1x64xf32>
    %44 = arith.truncf %32 : vector<1x64xf32> to vector<1x64xbf16>
    %c0_28 = arith.constant 0 : index
    %c0_29 = arith.constant 0 : index
    %45 = vector.load %arg20[%c0_28, %c0_29] : memref<64x128xbf16, #tpu.memory_space<vmem>>, vector<64x128xbf16>
    %cst_30 = arith.constant dense<0.000000e+00> : vector<1x128xf32>
    %46 = tpu.matmul %44, %45, %cst_30 {dimension_numbers = #tpu.dot_dimension_numbers<[1], [0], [0], [1], [0, 0, 1, 1], [], []>} : vector<1x64xbf16>, vector<64x128xbf16>, vector<1x128xf32> -> vector<1x128xf32>
    %c0_31 = arith.constant 0 : index
    %c0_32 = arith.constant 0 : index
    %47 = vector.load %arg21[%c0_31, %c0_32] : memref<1x128xf32, #tpu.memory_space<vmem>>, vector<1x128xf32>
    %48 = arith.addf %46, %47 : vector<1x128xf32>
    %49 = vector.extract_strided_slice %48 {offsets = [0, 0], sizes = [1, 64], strides = [1, 1]} : vector<1x128xf32> to vector<1x64xf32>
    %50 = vector.extract_strided_slice %48 {offsets = [0, 64], sizes = [1, 64], strides = [1, 1]} : vector<1x128xf32> to vector<1x64xf32>
    %cst_33 = arith.constant dense<0.000000e+00> : vector<64xf32>
    %51 = vector.multi_reduction <add>, %8, %cst_33 [1] : vector<64x64xf32> to vector<64xf32>
    %52 = vector.shape_cast %51 : vector<64xf32> to vector<64x1xf32>
    %cst_34 = arith.constant 6.400000e+01 : f32
    %53 = vector.broadcast %cst_34 : f32 to vector<64x1xf32>
    %54 = arith.divf %52, %53 : vector<64x1xf32>
    %55 = vector.broadcast %54 : vector<64x1xf32> to vector<64x64xf32>
    %56 = arith.subf %8, %55 : vector<64x64xf32>
    %57 = arith.mulf %56, %56 : vector<64x64xf32>
    %cst_35 = arith.constant dense<0.000000e+00> : vector<64xf32>
    %58 = vector.multi_reduction <add>, %57, %cst_35 [1] : vector<64x64xf32> to vector<64xf32>
    %59 = vector.shape_cast %58 : vector<64xf32> to vector<64x1xf32>
    %cst_36 = arith.constant 6.400000e+01 : f32
    %60 = vector.broadcast %cst_36 : f32 to vector<64x1xf32>
    %61 = arith.divf %59, %60 : vector<64x1xf32>
    %62 = vector.broadcast %54 : vector<64x1xf32> to vector<64x64xf32>
    %63 = arith.subf %8, %62 : vector<64x64xf32>
    %cst_37 = arith.constant 9.99999997E-7 : f32
    %64 = vector.broadcast %cst_37 : f32 to vector<64x1xf32>
    %65 = arith.addf %61, %64 : vector<64x1xf32>
    %66 = math.rsqrt %65 : vector<64x1xf32>
    %67 = vector.broadcast %66 : vector<64x1xf32> to vector<64x64xf32>
    %68 = arith.mulf %63, %67 : vector<64x64xf32>
    %cst_38 = arith.constant 1.000000e+00 : f32
    %69 = vector.broadcast %cst_38 : f32 to vector<1x64xf32>
    %70 = arith.addf %69, %39 : vector<1x64xf32>
    %71 = vector.broadcast %70 : vector<1x64xf32> to vector<64x64xf32>
    %72 = arith.mulf %68, %71 : vector<64x64xf32>
    %73 = vector.broadcast %38 : vector<1x64xf32> to vector<64x64xf32>
    %74 = arith.addf %72, %73 : vector<64x64xf32>
    %75 = arith.truncf %74 : vector<64x64xf32> to vector<64x64xbf16>
    %c0_39 = arith.constant 0 : index
    %c0_40 = arith.constant 0 : index
    %76 = vector.load %arg12[%c0_39, %c0_40] : memref<64x192xbf16, #tpu.memory_space<vmem>>, vector<64x192xbf16>
    %cst_41 = arith.constant dense<0.000000e+00> : vector<64x192xf32>
    %77 = tpu.matmul %75, %76, %cst_41 {dimension_numbers = #tpu.dot_dimension_numbers<[1], [0], [0], [1], [0, 0, 1, 1], [], []>} : vector<64x64xbf16>, vector<64x192xbf16>, vector<64x192xf32> -> vector<64x192xf32>
    %c0_42 = arith.constant 0 : index
    %c0_43 = arith.constant 0 : index
    %78 = vector.load %arg13[%c0_42, %c0_43] : memref<1x192xf32, #tpu.memory_space<vmem>>, vector<1x192xf32>
    %79 = vector.broadcast %78 : vector<1x192xf32> to vector<64x192xf32>
    %80 = arith.addf %77, %79 : vector<64x192xf32>
    %cst_44 = arith.constant 0.000000e+00 : f32
    %81 = vector.broadcast %cst_44 : f32 to vector<64x64xf32>
    %82 = vector.extract_strided_slice %80 {offsets = [0, 0], sizes = [64, 16], strides = [1, 1]} : vector<64x192xf32> to vector<64x16xf32>
    %83 = vector.extract_strided_slice %80 {offsets = [0, 64], sizes = [64, 16], strides = [1, 1]} : vector<64x192xf32> to vector<64x16xf32>
    %84 = vector.extract_strided_slice %80 {offsets = [0, 128], sizes = [64, 16], strides = [1, 1]} : vector<64x192xf32> to vector<64x16xf32>
    %85 = arith.truncf %82 : vector<64x16xf32> to vector<64x16xbf16>
    %86 = arith.truncf %83 : vector<64x16xf32> to vector<64x16xbf16>
    %cst_45 = arith.constant dense<0.000000e+00> : vector<64x64xf32>
    %87 = tpu.matmul %85, %86, %cst_45 {dimension_numbers = #tpu.dot_dimension_numbers<[1], [1], [0], [0], [0, 0, 1, 0], [], []>} : vector<64x16xbf16>, vector<64x16xbf16>, vector<64x64xf32> -> vector<64x64xf32>
    %cst_46 = arith.constant 2.500000e-01 : f32
    %88 = vector.broadcast %cst_46 : f32 to vector<64x64xf32>
    %89 = arith.mulf %87, %88 : vector<64x64xf32>
    %cst_47 = arith.constant dense<0xFF800000> : vector<64xf32>
    %90 = vector.multi_reduction <maximumf>, %89, %cst_47 [1] : vector<64x64xf32> to vector<64xf32>
    %91 = vector.shape_cast %90 : vector<64xf32> to vector<64x1xf32>
    %92 = vector.broadcast %91 : vector<64x1xf32> to vector<64x64xf32>
    %93 = arith.subf %89, %92 : vector<64x64xf32>
    %94 = math.exp %93 : vector<64x64xf32>
    %cst_48 = arith.constant dense<0.000000e+00> : vector<64xf32>
    %95 = vector.multi_reduction <add>, %94, %cst_48 [1] : vector<64x64xf32> to vector<64xf32>
    %96 = vector.shape_cast %95 : vector<64xf32> to vector<64x1xf32>
    %97 = tpu.reciprocal %96 {approx = true} : vector<64x1xf32> -> vector<64x1xf32>
    %98 = vector.broadcast %97 : vector<64x1xf32> to vector<64x64xf32>
    %99 = arith.mulf %94, %98 : vector<64x64xf32>
    %100 = arith.truncf %99 : vector<64x64xf32> to vector<64x64xbf16>
    %101 = arith.truncf %84 : vector<64x16xf32> to vector<64x16xbf16>
    %cst_49 = arith.constant dense<0.000000e+00> : vector<64x16xf32>
    %102 = tpu.matmul %100, %101, %cst_49 {dimension_numbers = #tpu.dot_dimension_numbers<[1], [0], [0], [1], [0, 0, 1, 1], [], []>} : vector<64x64xbf16>, vector<64x16xbf16>, vector<64x16xf32> -> vector<64x16xf32>
    %103 = arith.truncf %102 : vector<64x16xf32> to vector<64x16xbf16>
    %c0_50 = arith.constant 0 : index
    %c0_51 = arith.constant 0 : index
    %104 = vector.load %arg14[%c0_50, %c0_51] : memref<64x64xbf16, #tpu.memory_space<vmem>>, vector<16x64xbf16>
    %cst_52 = arith.constant dense<0.000000e+00> : vector<64x64xf32>
    %105 = tpu.matmul %103, %104, %cst_52 {dimension_numbers = #tpu.dot_dimension_numbers<[1], [0], [0], [1], [0, 0, 1, 1], [], []>} : vector<64x16xbf16>, vector<16x64xbf16>, vector<64x64xf32> -> vector<64x64xf32>
    %106 = arith.addf %81, %105 : vector<64x64xf32>
    %107 = vector.extract_strided_slice %80 {offsets = [0, 16], sizes = [64, 16], strides = [1, 1]} : vector<64x192xf32> to vector<64x16xf32>
    %108 = vector.extract_strided_slice %80 {offsets = [0, 80], sizes = [64, 16], strides = [1, 1]} : vector<64x192xf32> to vector<64x16xf32>
    %109 = vector.extract_strided_slice %80 {offsets = [0, 144], sizes = [64, 16], strides = [1, 1]} : vector<64x192xf32> to vector<64x16xf32>
    %110 = arith.truncf %107 : vector<64x16xf32> to vector<64x16xbf16>
    %111 = arith.truncf %108 : vector<64x16xf32> to vector<64x16xbf16>
    %cst_53 = arith.constant dense<0.000000e+00> : vector<64x64xf32>
    %112 = tpu.matmul %110, %111, %cst_53 {dimension_numbers = #tpu.dot_dimension_numbers<[1], [1], [0], [0], [0, 0, 1, 0], [], []>} : vector<64x16xbf16>, vector<64x16xbf16>, vector<64x64xf32> -> vector<64x64xf32>
    %cst_54 = arith.constant 2.500000e-01 : f32
    %113 = vector.broadcast %cst_54 : f32 to vector<64x64xf32>
    %114 = arith.mulf %112, %113 : vector<64x64xf32>
    %cst_55 = arith.constant dense<0xFF800000> : vector<64xf32>
    %115 = vector.multi_reduction <maximumf>, %114, %cst_55 [1] : vector<64x64xf32> to vector<64xf32>
    %116 = vector.shape_cast %115 : vector<64xf32> to vector<64x1xf32>
    %117 = vector.broadcast %116 : vector<64x1xf32> to vector<64x64xf32>
    %118 = arith.subf %114, %117 : vector<64x64xf32>
    %119 = math.exp %118 : vector<64x64xf32>
    %cst_56 = arith.constant dense<0.000000e+00> : vector<64xf32>
    %120 = vector.multi_reduction <add>, %119, %cst_56 [1] : vector<64x64xf32> to vector<64xf32>
    %121 = vector.shape_cast %120 : vector<64xf32> to vector<64x1xf32>
    %122 = tpu.reciprocal %121 {approx = true} : vector<64x1xf32> -> vector<64x1xf32>
    %123 = vector.broadcast %122 : vector<64x1xf32> to vector<64x64xf32>
    %124 = arith.mulf %119, %123 : vector<64x64xf32>
    %125 = arith.truncf %124 : vector<64x64xf32> to vector<64x64xbf16>
    %126 = arith.truncf %109 : vector<64x16xf32> to vector<64x16xbf16>
    %cst_57 = arith.constant dense<0.000000e+00> : vector<64x16xf32>
    %127 = tpu.matmul %125, %126, %cst_57 {dimension_numbers = #tpu.dot_dimension_numbers<[1], [0], [0], [1], [0, 0, 1, 1], [], []>} : vector<64x64xbf16>, vector<64x16xbf16>, vector<64x16xf32> -> vector<64x16xf32>
    %128 = arith.truncf %127 : vector<64x16xf32> to vector<64x16xbf16>
    %c16 = arith.constant 16 : index
    %c0_58 = arith.constant 0 : index
    %129 = vector.load %arg14[%c16, %c0_58] : memref<64x64xbf16, #tpu.memory_space<vmem>>, vector<16x64xbf16>
    %cst_59 = arith.constant dense<0.000000e+00> : vector<64x64xf32>
    %130 = tpu.matmul %128, %129, %cst_59 {dimension_numbers = #tpu.dot_dimension_numbers<[1], [0], [0], [1], [0, 0, 1, 1], [], []>} : vector<64x16xbf16>, vector<16x64xbf16>, vector<64x64xf32> -> vector<64x64xf32>
    %131 = arith.addf %106, %130 : vector<64x64xf32>
    %132 = vector.extract_strided_slice %80 {offsets = [0, 32], sizes = [64, 16], strides = [1, 1]} : vector<64x192xf32> to vector<64x16xf32>
    %133 = vector.extract_strided_slice %80 {offsets = [0, 96], sizes = [64, 16], strides = [1, 1]} : vector<64x192xf32> to vector<64x16xf32>
    %134 = vector.extract_strided_slice %80 {offsets = [0, 160], sizes = [64, 16], strides = [1, 1]} : vector<64x192xf32> to vector<64x16xf32>
    %135 = arith.truncf %132 : vector<64x16xf32> to vector<64x16xbf16>
    %136 = arith.truncf %133 : vector<64x16xf32> to vector<64x16xbf16>
    %cst_60 = arith.constant dense<0.000000e+00> : vector<64x64xf32>
    %137 = tpu.matmul %135, %136, %cst_60 {dimension_numbers = #tpu.dot_dimension_numbers<[1], [1], [0], [0], [0, 0, 1, 0], [], []>} : vector<64x16xbf16>, vector<64x16xbf16>, vector<64x64xf32> -> vector<64x64xf32>
    %cst_61 = arith.constant 2.500000e-01 : f32
    %138 = vector.broadcast %cst_61 : f32 to vector<64x64xf32>
    %139 = arith.mulf %137, %138 : vector<64x64xf32>
    %cst_62 = arith.constant dense<0xFF800000> : vector<64xf32>
    %140 = vector.multi_reduction <maximumf>, %139, %cst_62 [1] : vector<64x64xf32> to vector<64xf32>
    %141 = vector.shape_cast %140 : vector<64xf32> to vector<64x1xf32>
    %142 = vector.broadcast %141 : vector<64x1xf32> to vector<64x64xf32>
    %143 = arith.subf %139, %142 : vector<64x64xf32>
    %144 = math.exp %143 : vector<64x64xf32>
    %cst_63 = arith.constant dense<0.000000e+00> : vector<64xf32>
    %145 = vector.multi_reduction <add>, %144, %cst_63 [1] : vector<64x64xf32> to vector<64xf32>
    %146 = vector.shape_cast %145 : vector<64xf32> to vector<64x1xf32>
    %147 = tpu.reciprocal %146 {approx = true} : vector<64x1xf32> -> vector<64x1xf32>
    %148 = vector.broadcast %147 : vector<64x1xf32> to vector<64x64xf32>
    %149 = arith.mulf %144, %148 : vector<64x64xf32>
    %150 = arith.truncf %149 : vector<64x64xf32> to vector<64x64xbf16>
    %151 = arith.truncf %134 : vector<64x16xf32> to vector<64x16xbf16>
    %cst_64 = arith.constant dense<0.000000e+00> : vector<64x16xf32>
    %152 = tpu.matmul %150, %151, %cst_64 {dimension_numbers = #tpu.dot_dimension_numbers<[1], [0], [0], [1], [0, 0, 1, 1], [], []>} : vector<64x64xbf16>, vector<64x16xbf16>, vector<64x16xf32> -> vector<64x16xf32>
    %153 = arith.truncf %152 : vector<64x16xf32> to vector<64x16xbf16>
    %c32 = arith.constant 32 : index
    %c0_65 = arith.constant 0 : index
    %154 = vector.load %arg14[%c32, %c0_65] : memref<64x64xbf16, #tpu.memory_space<vmem>>, vector<16x64xbf16>
    %cst_66 = arith.constant dense<0.000000e+00> : vector<64x64xf32>
    %155 = tpu.matmul %153, %154, %cst_66 {dimension_numbers = #tpu.dot_dimension_numbers<[1], [0], [0], [1], [0, 0, 1, 1], [], []>} : vector<64x16xbf16>, vector<16x64xbf16>, vector<64x64xf32> -> vector<64x64xf32>
    %156 = arith.addf %131, %155 : vector<64x64xf32>
    %157 = vector.extract_strided_slice %80 {offsets = [0, 48], sizes = [64, 16], strides = [1, 1]} : vector<64x192xf32> to vector<64x16xf32>
    %158 = vector.extract_strided_slice %80 {offsets = [0, 112], sizes = [64, 16], strides = [1, 1]} : vector<64x192xf32> to vector<64x16xf32>
    %159 = vector.extract_strided_slice %80 {offsets = [0, 176], sizes = [64, 16], strides = [1, 1]} : vector<64x192xf32> to vector<64x16xf32>
    %160 = arith.truncf %157 : vector<64x16xf32> to vector<64x16xbf16>
    %161 = arith.truncf %158 : vector<64x16xf32> to vector<64x16xbf16>
    %cst_67 = arith.constant dense<0.000000e+00> : vector<64x64xf32>
    %162 = tpu.matmul %160, %161, %cst_67 {dimension_numbers = #tpu.dot_dimension_numbers<[1], [1], [0], [0], [0, 0, 1, 0], [], []>} : vector<64x16xbf16>, vector<64x16xbf16>, vector<64x64xf32> -> vector<64x64xf32>
    %cst_68 = arith.constant 2.500000e-01 : f32
    %163 = vector.broadcast %cst_68 : f32 to vector<64x64xf32>
    %164 = arith.mulf %162, %163 : vector<64x64xf32>
    %cst_69 = arith.constant dense<0xFF800000> : vector<64xf32>
    %165 = vector.multi_reduction <maximumf>, %164, %cst_69 [1] : vector<64x64xf32> to vector<64xf32>
    %166 = vector.shape_cast %165 : vector<64xf32> to vector<64x1xf32>
    %167 = vector.broadcast %166 : vector<64x1xf32> to vector<64x64xf32>
    %168 = arith.subf %164, %167 : vector<64x64xf32>
    %169 = math.exp %168 : vector<64x64xf32>
    %cst_70 = arith.constant dense<0.000000e+00> : vector<64xf32>
    %170 = vector.multi_reduction <add>, %169, %cst_70 [1] : vector<64x64xf32> to vector<64xf32>
    %171 = vector.shape_cast %170 : vector<64xf32> to vector<64x1xf32>
    %172 = tpu.reciprocal %171 {approx = true} : vector<64x1xf32> -> vector<64x1xf32>
    %173 = vector.broadcast %172 : vector<64x1xf32> to vector<64x64xf32>
    %174 = arith.mulf %169, %173 : vector<64x64xf32>
    %175 = arith.truncf %174 : vector<64x64xf32> to vector<64x64xbf16>
    %176 = arith.truncf %159 : vector<64x16xf32> to vector<64x16xbf16>
    %cst_71 = arith.constant dense<0.000000e+00> : vector<64x16xf32>
    %177 = tpu.matmul %175, %176, %cst_71 {dimension_numbers = #tpu.dot_dimension_numbers<[1], [0], [0], [1], [0, 0, 1, 1], [], []>} : vector<64x64xbf16>, vector<64x16xbf16>, vector<64x16xf32> -> vector<64x16xf32>
    %178 = arith.truncf %177 : vector<64x16xf32> to vector<64x16xbf16>
    %c48 = arith.constant 48 : index
    %c0_72 = arith.constant 0 : index
    %179 = vector.load %arg14[%c48, %c0_72] : memref<64x64xbf16, #tpu.memory_space<vmem>>, vector<16x64xbf16>
    %cst_73 = arith.constant dense<0.000000e+00> : vector<64x64xf32>
    %180 = tpu.matmul %178, %179, %cst_73 {dimension_numbers = #tpu.dot_dimension_numbers<[1], [0], [0], [1], [0, 0, 1, 1], [], []>} : vector<64x16xbf16>, vector<16x64xbf16>, vector<64x64xf32> -> vector<64x64xf32>
    %181 = arith.addf %156, %180 : vector<64x64xf32>
    %c0_74 = arith.constant 0 : index
    %c0_75 = arith.constant 0 : index
    %182 = vector.load %arg15[%c0_74, %c0_75] : memref<1x64xf32, #tpu.memory_space<vmem>>, vector<1x64xf32>
    %183 = vector.broadcast %182 : vector<1x64xf32> to vector<64x64xf32>
    %184 = arith.addf %181, %183 : vector<64x64xf32>
    %185 = vector.broadcast %40 : vector<1x64xf32> to vector<64x64xf32>
    %186 = arith.mulf %185, %184 : vector<64x64xf32>
    %187 = arith.addf %8, %186 : vector<64x64xf32>
    %cst_76 = arith.constant dense<0.000000e+00> : vector<64xf32>
    %188 = vector.multi_reduction <add>, %187, %cst_76 [1] : vector<64x64xf32> to vector<64xf32>
    %189 = vector.shape_cast %188 : vector<64xf32> to vector<64x1xf32>
    %cst_77 = arith.constant 6.400000e+01 : f32
    %190 = vector.broadcast %cst_77 : f32 to vector<64x1xf32>
    %191 = arith.divf %189, %190 : vector<64x1xf32>
    %192 = vector.broadcast %191 : vector<64x1xf32> to vector<64x64xf32>
    %193 = arith.subf %187, %192 : vector<64x64xf32>
    %194 = arith.mulf %193, %193 : vector<64x64xf32>
    %cst_78 = arith.constant dense<0.000000e+00> : vector<64xf32>
    %195 = vector.multi_reduction <add>, %194, %cst_78 [1] : vector<64x64xf32> to vector<64xf32>
    %196 = vector.shape_cast %195 : vector<64xf32> to vector<64x1xf32>
    %cst_79 = arith.constant 6.400000e+01 : f32
    %197 = vector.broadcast %cst_79 : f32 to vector<64x1xf32>
    %198 = arith.divf %196, %197 : vector<64x1xf32>
    %199 = vector.broadcast %191 : vector<64x1xf32> to vector<64x64xf32>
    %200 = arith.subf %187, %199 : vector<64x64xf32>
    %cst_80 = arith.constant 9.99999997E-7 : f32
    %201 = vector.broadcast %cst_80 : f32 to vector<64x1xf32>
    %202 = arith.addf %198, %201 : vector<64x1xf32>
    %203 = math.rsqrt %202 : vector<64x1xf32>
    %204 = vector.broadcast %203 : vector<64x1xf32> to vector<64x64xf32>
    %205 = arith.mulf %200, %204 : vector<64x64xf32>
    %cst_81 = arith.constant 1.000000e+00 : f32
    %206 = vector.broadcast %cst_81 : f32 to vector<1x64xf32>
    %207 = arith.addf %206, %42 : vector<1x64xf32>
    %208 = vector.broadcast %207 : vector<1x64xf32> to vector<64x64xf32>
    %209 = arith.mulf %205, %208 : vector<64x64xf32>
    %210 = vector.broadcast %41 : vector<1x64xf32> to vector<64x64xf32>
    %211 = arith.addf %209, %210 : vector<64x64xf32>
    %212 = arith.truncf %211 : vector<64x64xf32> to vector<64x64xbf16>
    %c0_82 = arith.constant 0 : index
    %c0_83 = arith.constant 0 : index
    %213 = vector.load %arg16[%c0_82, %c0_83] : memref<64x256xbf16, #tpu.memory_space<vmem>>, vector<64x256xbf16>
    %cst_84 = arith.constant dense<0.000000e+00> : vector<64x256xf32>
    %214 = tpu.matmul %212, %213, %cst_84 {dimension_numbers = #tpu.dot_dimension_numbers<[1], [0], [0], [1], [0, 0, 1, 1], [], []>} : vector<64x64xbf16>, vector<64x256xbf16>, vector<64x256xf32> -> vector<64x256xf32>
    %c0_85 = arith.constant 0 : index
    %c0_86 = arith.constant 0 : index
    %215 = vector.load %arg17[%c0_85, %c0_86] : memref<1x256xf32, #tpu.memory_space<vmem>>, vector<1x256xf32>
    %216 = vector.broadcast %215 : vector<1x256xf32> to vector<64x256xf32>
    %217 = arith.addf %214, %216 : vector<64x256xf32>
    %218 = arith.mulf %217, %217 : vector<64x256xf32>
    %219 = arith.mulf %217, %218 : vector<64x256xf32>
    %cst_87 = arith.constant 4.471500e-02 : f32
    %220 = vector.broadcast %cst_87 : f32 to vector<64x256xf32>
    %221 = arith.mulf %220, %219 : vector<64x256xf32>
    %222 = arith.addf %217, %221 : vector<64x256xf32>
    %cst_88 = arith.constant 0.797884583 : f32
    %223 = vector.broadcast %cst_88 : f32 to vector<64x256xf32>
    %224 = arith.mulf %223, %222 : vector<64x256xf32>
    %225 = math.tanh %224 : vector<64x256xf32>
    %cst_89 = arith.constant 1.000000e+00 : f32
    %226 = vector.broadcast %cst_89 : f32 to vector<64x256xf32>
    %227 = arith.addf %226, %225 : vector<64x256xf32>
    %cst_90 = arith.constant 5.000000e-01 : f32
    %228 = vector.broadcast %cst_90 : f32 to vector<64x256xf32>
    %229 = arith.mulf %228, %227 : vector<64x256xf32>
    %230 = arith.mulf %217, %229 : vector<64x256xf32>
    %231 = arith.truncf %230 : vector<64x256xf32> to vector<64x256xbf16>
    %c0_91 = arith.constant 0 : index
    %c0_92 = arith.constant 0 : index
    %232 = vector.load %arg18[%c0_91, %c0_92] : memref<256x64xbf16, #tpu.memory_space<vmem>>, vector<256x64xbf16>
    %cst_93 = arith.constant dense<0.000000e+00> : vector<64x64xf32>
    %233 = tpu.matmul %231, %232, %cst_93 {dimension_numbers = #tpu.dot_dimension_numbers<[1], [0], [0], [1], [0, 0, 1, 1], [], []>} : vector<64x256xbf16>, vector<256x64xbf16>, vector<64x64xf32> -> vector<64x64xf32>
    %c0_94 = arith.constant 0 : index
    %c0_95 = arith.constant 0 : index
    %234 = vector.load %arg19[%c0_94, %c0_95] : memref<1x64xf32, #tpu.memory_space<vmem>>, vector<1x64xf32>
    %235 = vector.broadcast %234 : vector<1x64xf32> to vector<64x64xf32>
    %236 = arith.addf %233, %235 : vector<64x64xf32>
    %237 = vector.broadcast %43 : vector<1x64xf32> to vector<64x64xf32>
    %238 = arith.mulf %237, %236 : vector<64x64xf32>
    %239 = arith.addf %187, %238 : vector<64x64xf32>
    %cst_96 = arith.constant dense<0.000000e+00> : vector<64xf32>
    %240 = vector.multi_reduction <add>, %239, %cst_96 [1] : vector<64x64xf32> to vector<64xf32>
    %241 = vector.shape_cast %240 : vector<64xf32> to vector<64x1xf32>
    %cst_97 = arith.constant 6.400000e+01 : f32
    %242 = vector.broadcast %cst_97 : f32 to vector<64x1xf32>
    %243 = arith.divf %241, %242 : vector<64x1xf32>
    %244 = vector.broadcast %243 : vector<64x1xf32> to vector<64x64xf32>
    %245 = arith.subf %239, %244 : vector<64x64xf32>
    %246 = arith.mulf %245, %245 : vector<64x64xf32>
    %cst_98 = arith.constant dense<0.000000e+00> : vector<64xf32>
    %247 = vector.multi_reduction <add>, %246, %cst_98 [1] : vector<64x64xf32> to vector<64xf32>
    %248 = vector.shape_cast %247 : vector<64xf32> to vector<64x1xf32>
    %cst_99 = arith.constant 6.400000e+01 : f32
    %249 = vector.broadcast %cst_99 : f32 to vector<64x1xf32>
    %250 = arith.divf %248, %249 : vector<64x1xf32>
    %251 = vector.broadcast %243 : vector<64x1xf32> to vector<64x64xf32>
    %252 = arith.subf %239, %251 : vector<64x64xf32>
    %cst_100 = arith.constant 9.99999997E-7 : f32
    %253 = vector.broadcast %cst_100 : f32 to vector<64x1xf32>
    %254 = arith.addf %250, %253 : vector<64x1xf32>
    %255 = math.rsqrt %254 : vector<64x1xf32>
    %256 = vector.broadcast %255 : vector<64x1xf32> to vector<64x64xf32>
    %257 = arith.mulf %252, %256 : vector<64x64xf32>
    %cst_101 = arith.constant 1.000000e+00 : f32
    %258 = vector.broadcast %cst_101 : f32 to vector<1x64xf32>
    %259 = arith.addf %258, %50 : vector<1x64xf32>
    %260 = vector.broadcast %259 : vector<1x64xf32> to vector<64x64xf32>
    %261 = arith.mulf %257, %260 : vector<64x64xf32>
    %262 = vector.broadcast %49 : vector<1x64xf32> to vector<64x64xf32>
    %263 = arith.addf %261, %262 : vector<64x64xf32>
    %264 = arith.truncf %263 : vector<64x64xf32> to vector<64x64xbf16>
    %c0_102 = arith.constant 0 : index
    %c0_103 = arith.constant 0 : index
    %265 = vector.load %arg22[%c0_102, %c0_103] : memref<64x128xbf16, #tpu.memory_space<vmem>>, vector<64x128xbf16>
    %cst_104 = arith.constant dense<0.000000e+00> : vector<64x128xf32>
    %266 = tpu.matmul %264, %265, %cst_104 {dimension_numbers = #tpu.dot_dimension_numbers<[1], [0], [0], [1], [0, 0, 1, 1], [], []>} : vector<64x64xbf16>, vector<64x128xbf16>, vector<64x128xf32> -> vector<64x128xf32>
    %c0_105 = arith.constant 0 : index
    %c0_106 = arith.constant 0 : index
    %267 = vector.load %arg23[%c0_105, %c0_106] : memref<1x128xf32, #tpu.memory_space<vmem>>, vector<1x128xf32>
    %268 = vector.broadcast %267 : vector<1x128xf32> to vector<64x128xf32>
    %269 = arith.addf %266, %268 : vector<64x128xf32>
    %c0_107 = arith.constant 0 : index
    %c0_108 = arith.constant 0 : index
    %c0_109 = arith.constant 0 : index
    %270 = vector.load %arg24[%c0_107, %c0_108, %c0_109] : memref<1x64x128xf32, #tpu.memory_space<vmem>>, vector<1x64x128xf32>
    %271 = vector.shape_cast %270 : vector<1x64x128xf32> to vector<64x128xf32>
    %272 = vector.shape_cast %269 : vector<64x128xf32> to vector<1x64x128xf32>
    tpu.vector_store %arg24[%c0_107, %c0_108, %c0_109], %272 {strides = array<i32>} : memref<1x64x128xf32, #tpu.memory_space<vmem>>, vector<1x64x128xf32>,
    return
  }
  func.func @transform_0(%arg0: i32) -> (i32, i32, i32) {
    %c0_i32 = arith.constant 0 : i32
    %c0_i32_0 = arith.constant 0 : i32
    %c0_i32_1 = arith.constant 0 : i32
    return %arg0, %c0_i32, %c0_i32_0 : i32, i32, i32
  }
  func.func @transform_1(%arg0: i32) -> (i32, i32, i32) {
    %c0_i32 = arith.constant 0 : i32
    %c0_i32_0 = arith.constant 0 : i32
    %c0_i32_1 = arith.constant 0 : i32
    return %arg0, %c0_i32, %c0_i32_0 : i32, i32, i32
  }
  func.func @transform_2(%arg0: i32) -> (i32, i32) {
    %c0_i32 = arith.constant 0 : i32
    %c0_i32_0 = arith.constant 0 : i32
    %c0_i32_1 = arith.constant 0 : i32
    return %c0_i32, %c0_i32_0 : i32, i32
  }
  func.func @transform_3(%arg0: i32) -> (i32, i32) {
    %c0_i32 = arith.constant 0 : i32
    %c0_i32_0 = arith.constant 0 : i32
    %c0_i32_1 = arith.constant 0 : i32
    return %c0_i32, %c0_i32_0 : i32, i32
  }
  func.func @transform_4(%arg0: i32) -> (i32, i32) {
    %c0_i32 = arith.constant 0 : i32
    %c0_i32_0 = arith.constant 0 : i32
    %c0_i32_1 = arith.constant 0 : i32
    return %c0_i32, %c0_i32_0 : i32, i32
  }
  func.func @transform_5(%arg0: i32) -> (i32, i32) {
    %c0_i32 = arith.constant 0 : i32
    %c0_i32_0 = arith.constant 0 : i32
    %c0_i32_1 = arith.constant 0 : i32
    return %c0_i32, %c0_i32_0 : i32, i32
  }
  func.func @transform_6(%arg0: i32) -> (i32, i32) {
    %c0_i32 = arith.constant 0 : i32
    %c0_i32_0 = arith.constant 0 : i32
    %c0_i32_1 = arith.constant 0 : i32
    return %c0_i32, %c0_i32_0 : i32, i32
  }
  func.func @transform_7(%arg0: i32) -> (i32, i32) {
    %c0_i32 = arith.constant 0 : i32
    %c0_i32_0 = arith.constant 0 : i32
    %c0_i32_1 = arith.constant 0 : i32
    return %c0_i32, %c0_i32_0 : i32, i32
  }
  func.func @transform_8(%arg0: i32) -> (i32, i32) {
    %c0_i32 = arith.constant 0 : i32
    %c0_i32_0 = arith.constant 0 : i32
    %c0_i32_1 = arith.constant 0 : i32
    return %c0_i32, %c0_i32_0 : i32, i32
  }
  func.func @transform_9(%arg0: i32) -> (i32, i32) {
    %c0_i32 = arith.constant 0 : i32
    %c0_i32_0 = arith.constant 0 : i32
    %c0_i32_1 = arith.constant 0 : i32
    return %c0_i32, %c0_i32_0 : i32, i32
  }
  func.func @transform_10(%arg0: i32) -> (i32, i32) {
    %c0_i32 = arith.constant 0 : i32
    %c0_i32_0 = arith.constant 0 : i32
    %c0_i32_1 = arith.constant 0 : i32
    return %c0_i32, %c0_i32_0 : i32, i32
  }
  func.func @transform_11(%arg0: i32) -> (i32, i32) {
    %c0_i32 = arith.constant 0 : i32
    %c0_i32_0 = arith.constant 0 : i32
    %c0_i32_1 = arith.constant 0 : i32
    return %c0_i32, %c0_i32_0 : i32, i32
  }
  func.func @transform_12(%arg0: i32) -> (i32, i32) {
    %c0_i32 = arith.constant 0 : i32
    %c0_i32_0 = arith.constant 0 : i32
    %c0_i32_1 = arith.constant 0 : i32
    return %c0_i32, %c0_i32_0 : i32, i32
  }
  func.func @transform_13(%arg0: i32) -> (i32, i32) {
    %c0_i32 = arith.constant 0 : i32
    %c0_i32_0 = arith.constant 0 : i32
    %c0_i32_1 = arith.constant 0 : i32
    return %c0_i32, %c0_i32_0 : i32, i32
  }
  func.func @transform_14(%arg0: i32) -> (i32, i32) {
    %c0_i32 = arith.constant 0 : i32
    %c0_i32_0 = arith.constant 0 : i32
    %c0_i32_1 = arith.constant 0 : i32
    return %c0_i32, %c0_i32_0 : i32, i32
  }
  func.func @transform_15(%arg0: i32) -> (i32, i32) {
    %c0_i32 = arith.constant 0 : i32
    %c0_i32_0 = arith.constant 0 : i32
    %c0_i32_1 = arith.constant 0 : i32
    return %c0_i32, %c0_i32_0 : i32, i32
  }
  func.func @transform_16(%arg0: i32) -> (i32, i32) {
    %c0_i32 = arith.constant 0 : i32
    %c0_i32_0 = arith.constant 0 : i32
    %c0_i32_1 = arith.constant 0 : i32
    return %c0_i32, %c0_i32_0 : i32, i32
  }
  func.func @transform_17(%arg0: i32) -> (i32, i32) {
    %c0_i32 = arith.constant 0 : i32
    %c0_i32_0 = arith.constant 0 : i32
    %c0_i32_1 = arith.constant 0 : i32
    return %c0_i32, %c0_i32_0 : i32, i32
  }
  func.func @transform_18(%arg0: i32) -> (i32, i32) {
    %c0_i32 = arith.constant 0 : i32
    %c0_i32_0 = arith.constant 0 : i32
    %c0_i32_1 = arith.constant 0 : i32
    return %c0_i32, %c0_i32_0 : i32, i32
  }
  func.func @transform_19(%arg0: i32) -> (i32, i32) {
    %c0_i32 = arith.constant 0 : i32
    %c0_i32_0 = arith.constant 0 : i32
    %c0_i32_1 = arith.constant 0 : i32
    return %c0_i32, %c0_i32_0 : i32, i32
  }
  func.func @transform_20(%arg0: i32) -> (i32, i32) {
    %c0_i32 = arith.constant 0 : i32
    %c0_i32_0 = arith.constant 0 : i32
    %c0_i32_1 = arith.constant 0 : i32
    return %c0_i32, %c0_i32_0 : i32, i32
  }
  func.func @transform_21(%arg0: i32) -> (i32, i32) {
    %c0_i32 = arith.constant 0 : i32
    %c0_i32_0 = arith.constant 0 : i32
    %c0_i32_1 = arith.constant 0 : i32
    return %c0_i32, %c0_i32_0 : i32, i32
  }
  func.func @transform_22(%arg0: i32) -> (i32, i32) {
    %c0_i32 = arith.constant 0 : i32
    %c0_i32_0 = arith.constant 0 : i32
    %c0_i32_1 = arith.constant 0 : i32
    return %c0_i32, %c0_i32_0 : i32, i32
  }
  func.func @transform_23(%arg0: i32) -> (i32, i32, i32) {
    %c0_i32 = arith.constant 0 : i32
    %c0_i32_0 = arith.constant 0 : i32
    %c0_i32_1 = arith.constant 0 : i32
    return %arg0, %c0_i32, %c0_i32_0 : i32, i32, i32
  }
}

</mosaic_0001>

<bundles_post_ra>
// kernel: transformer_devil_forward.3
= control target key start
LH: loop header
LB: loop body
LE: loop exit
PB: predicated region body
PF: predicated region fallthrough
CT: control target
= control target key end

     0   :  { %s6634_s0 = inlined_call_operand.vmem [shape: bf16[2,64,128], index: 0, kind: input, shape index: {}]   ;;  %s6635_s1 = inlined_call_operand.vmem [shape: f32[2,1,64], index: 1, kind: input, shape index: {}]   ;;  %s6636_s2 = inlined_call_operand.vmem [shape: f32[64,64], index: 2, kind: input, shape index: {}]   ;;  %s6637_s3 = inlined_call_operand.vmem [shape: bf16[128,64], index: 3, kind: input, shape index: {}]   ;;  %s6638_s4 = inlined_call_operand.vmem [shape: f32[1,64], index: 4, kind: input, shape index: {}]   ;;  %s6639_s5 = inlined_call_operand.vmem [shape: bf16[64,64], index: 5, kind: input, shape index: {}]   ;;  %s6640_s6 = inlined_call_operand.vmem [shape: f32[1,64], index: 6, kind: input, shape index: {}]   ;;  %s6641_s7 = inlined_call_operand.vmem [shape: bf16[64,64], index: 7, kind: input, shape index: {}]   ;;  %s6642_s8 = inlined_call_operand.vmem [shape: f32[1,64], index: 8, kind: input, shape index: {}]   ;;  %s6643_s9 = inlined_call_operand.vmem [shape: bf16[64,384], index: 9, kind: input, shape index: {}]   ;;  %s6644_s10 = inlined_call_operand.vmem [shape: f32[1,384], index: 10, kind: input, shape index: {}]   ;;  %s6645_s11 = inlined_call_operand.vmem [shape: bf16[64,192], index: 11, kind: input, shape index: {}]   ;;  %s6646_s12 = inlined_call_operand.vmem [shape: f32[1,192], index: 12, kind: input, shape index: {}]   ;;  %s6647_s13 = inlined_call_operand.vmem [shape: bf16[64,64], index: 13, kind: input, shape index: {}]   ;;  %s6648_s14 = inlined_call_operand.vmem [shape: f32[1,64], index: 14, kind: input, shape index: {}]   ;;  %s6649_s15 = inlined_call_operand.vmem [shape: bf16[64,256], index: 15, kind: input, shape index: {}]   ;;  %s6650_s16 = inlined_call_operand.vmem [shape: f32[1,256], index: 16, kind: input, shape index: {}]   ;;  %s6651_s17 = inlined_call_operand.vmem [shape: bf16[256,64], index: 17, kind: input, shape index: {}]   ;;  %s6652_s18 = inlined_call_operand.vmem [shape: f32[1,64], index: 18, kind: input, shape index: {}]   ;;  %s6653_s19 = inlined_call_operand.vmem [shape: bf16[64,128], index: 19, kind: input, shape index: {}]   ;;  %s6654_s20 = inlined_call_operand.vmem [shape: f32[1,128], index: 20, kind: input, shape index: {}]   ;;  %s6655_s21 = inlined_call_operand.vmem [shape: bf16[64,128], index: 21, kind: input, shape index: {}]   ;;  %s6656_s22 = inlined_call_operand.vmem [shape: f32[1,128], index: 22, kind: input, shape index: {}]   ;;  %s6657_s23 = inlined_call_operand.vmem [shape: f32[2,64,128], index: 23, kind: output, shape index: {}]  }
   0x1   :  { %6663 = sst [smem:[#allocation3_spill]] %s6634_s0 }
   0x2   :  { %6664 = sst [smem:[#allocation4_spill]] %s6635_s1 }
   0x3   :  { %6665 = sst [smem:[#allocation5_spill]] %s6636_s2 }
   0x4   :  { %6666 = sst [smem:[#allocation6_spill]] %s6637_s3 }
   0x5   :  { %6667 = sst [smem:[#allocation7_spill]] %s6638_s4  ;;  %s5318_s4 = smov 0  }
   0x6   :  { %6668 = sst [smem:[#allocation8_spill]] %s6639_s5 }
   0x7   :  { %6669 = sst [smem:[#allocation9_spill]] %s6640_s6 }
   0x8   :  { %6670 = sst [smem:[#allocation10_spill]] %s6641_s7 }
   0x9   :  { %6671 = sst [smem:[#allocation11_spill]] %s6657_s23 }
   0xa LB: > { %6672 = sst [smem:[#allocation2_spill]] %s5186_s4  ;;  %s4237_s30 = sadd.s32 4294967295, %s5186_s4   ;;  %s5186_s4 = sphi %s5318_s4, %s33_s4  }
   0xb   : > { %p4241_p0 = scmp.ge.s32.totalorder %s5186_s4, 1  ;;  %p645_p1 = scmp.lt.s32.totalorder %s5186_s4, 3 }
   0xd   : > { %p646_p2 = pnand %p4241_p0, %p645_p1 }
   0xe   : > { %s6673_s5 = sld [smem:[#allocation6_spill]] (!%p646_p2)  ;;  %v5188_v1 = vmov (!%p646_p2), 0.0   ;;  %s6674_s2 = sld [smem:[#allocation8_spill]] (!%p646_p2)  ;;  %vm5189_vm0 = vmmov (!%p646_p2), 0   ;;  %vm945_vm1 = vcmask (!%p646_p2), 523264   ;;  %vm1634_vm2 = vcmask (!%p646_p2), 130048  }
   0xf   : > { %649 = sbr.rel (%p646_p2) target bundleno = 4406 (0x1136), region = 112  ;;  %4585 = vmatprep.subr.bf16.mxu1 (!%p646_p2), %v5188_v1  ;;  %4593 = vmatprep.mubr.msk.bf16.mxu1 (!%p646_p2), %vm5189_vm0, %v5188_v1  ;;  %p712_p3 = scmp.lt.s32.totalorder (!%p646_p2), %s4237_s30, 1 }
  0x10   : > { %s6675_s7 = sld [smem:[#allocation4_spill]] (!%p646_p2)  ;;  %s6676_s0 = sld [smem:[#allocation3_spill]] (!%p646_p2) }
  0x11   : > { %s6677_s3 = sld [smem:[#allocation10_spill]] (!%p646_p2)  ;;  %s6678_s27 = sld [smem:[#allocation9_spill]] (!%p646_p2) }
  0x12   : > { %s6679_s29 = sld [smem:[#allocation7_spill]] (!%p646_p2)  ;;  %s6680_s26 = sld [smem:[#allocation5_spill]] (!%p646_p2) }
  0x13   : > { %s5193_s6 = smov (!%p646_p2), 112  }
  0x14   : > { %v4875_v0 = vld [vmem:[%s6673_s5] sm:$0xff] (!%p646_p2)   ;;  %v4877_v3 = vld [vmem:[%s6673_s5 + $0x8] sm:$0xff] (!%p646_p2)   ;;  %v4879_v5 = vld [vmem:[%s6673_s5 + $0x10] sm:$0xff] (!%p646_p2)  }
  0x15   : > { %v4876_v2 = vld [vmem:[%s6674_s2] sm:$0xff] (!%p646_p2)   ;;  %4561 = vmatprep.subr.bf16.mxu0 (!%p646_p2), %v4875_v0  ;;  %v4878_v4 = vld [vmem:[%s6674_s2 + $0x8] sm:$0xff] (!%p646_p2)   ;;  %v4880_v6 = vld [vmem:[%s6674_s2 + $0x10] sm:$0xff] (!%p646_p2)  }
  0x16   : > { %4586 = vmatpush3.bf16.msra.mxu1 %v4876_v2  ;;  %4562 = vmatpush3.bf16.msra.mxu0 %v4875_v0  ;;  %s6684_s30 = smov (!%p712_p3, %s4237_s30), 1  ;;  %v4881_v7 = vld [vmem:[%s6673_s5 + $0x18] sm:$0xff]   ;;  %v4883_v10 = vld [vmem:[%s6673_s5 + $0x20] sm:$0xff]   ;;  %v4884_v13 = vld [vmem:[%s6673_s5 + $0x28] sm:$0xff]  }
  0x17   : > { %4587 = vmatprep.subr.bf16.mxu1 %v5188_v1  ;;  %4563 = vmatprep.subr.bf16.mxu0 %v4877_v3  ;;  %s4395_s25 = sshll.u32 %s6684_s30, 5  ;;  %s719_s28 = scalar_lea.vmem %s6675_s7, %s6684_s30  ;;  %v4882_v8 = vld [vmem:[%s6674_s2 + $0x18] sm:$0xff]   ;;  %v4885_v14 = vld [vmem:[%s6673_s5 + $0x30] sm:$0xff]   ;;  %v4891_v19 = vld [vmem:[%s6677_s3] sm:$0xff]  }
  0x18   : > { %s5365_s24 = scalar_lea.vmem %s6676_s0, %s4395_s25  ;;  %v910_v9 = vld [vmem:[%s719_s28] sm:$0x1]  ;;  %v4886_v15 = vld [vmem:[%s6673_s5 + $0x38] sm:$0xff]   ;;  %v4892_v20 = vld [vmem:[%s6677_s3 + $0x8] sm:$0xff]   ;;  %s5192_s25 = smov 48  }
  0x19   : > { %v4887_v11 = vld [vmem:[%s5365_s24] sm:$0xff]   ;;  %v911_v12 = vpack.c.bf16 %v910_v9, %v910_v9  ;;  %v4888_v16 = vld [vmem:[%s5365_s24 + $0x8] sm:$0xff]   ;;  %v4889_v17 = vld [vmem:[%s5365_s24 + $0x10] sm:$0xff]   ;;  %s5195_s7 = smov 96   ;;  %s5196_s28 = smov 16  }
  0x1a   : > { %4588 = vmatpush3.bf16.msra.mxu1 %v4878_v4  ;;  %4564 = vmatpush3.bf16.msra.mxu0 %v4877_v3  ;;  %v4890_v18 = vld [vmem:[%s5365_s24 + $0x18] sm:$0xff]   ;;  %v4893_v21 = vld [vmem:[%s6677_s3 + $0x10] sm:$0xff]   ;;  %v920_v23 = vld [vmem:[%s6678_s27] sm:$0x1]  ;;  %s5191_s24 = smov 64   ;;  %s5194_s27 = smov 32  }
  0x1b   : > { %4589 = vmatprep.subr.bf16.mxu1 %v5188_v1  ;;  %4565 = vmatprep.subr.bf16.mxu0 %v4879_v5  ;;  %v4894_v22 = vld [vmem:[%s6677_s3 + $0x18] sm:$0xff]   ;;  %v4246_v31 = vld [vmem:[%s6679_s29] ss:$0 sm:$0xff]  ;;  %v896_v34 = vld [vmem:[%s6680_s26 + $0x10] sm:$0xff]  ;;  %s5197_s29 = smov 80  }
  0x1c   : > { %4577 = vmatprep.mubr.bf16.mxu0 %v4887_v11  ;;  %v894_v37 = vld [vmem:[%s6680_s26] sm:$0xff]  ;;  %v897_v40 = vld [vmem:[%s6680_s26 + $0x18] sm:$0xff]  ;;  %v895_v44 = vld [vmem:[%s6680_s26 + $0x8] sm:$0xff] }
  0x1d   : > { %v900_v55 = vld [vmem:[%s6680_s26 + $0x30] sm:$0xff]  ;;  %v898_v57 = vld [vmem:[%s6680_s26 + $0x20] sm:$0xff]  ;;  %v901_v61 = vld [vmem:[%s6680_s26 + $0x38] sm:$0xff] }
  0x1e   : > { %4590 = vmatpush3.bf16.msra.mxu1 %v4880_v6  ;;  %4566 = vmatpush3.bf16.msra.mxu0 %v4879_v5  ;;  %v899_v63 = vld [vmem:[%s6680_s26 + $0x28] sm:$0xff] }
  0x1f   : > { %4591 = vmatprep.subr.bf16.mxu1 %v5188_v1  ;;  %4567 = vmatprep.subr.bf16.mxu0 %v4881_v7 }
  0x22   : > { %4592 = vmatpush3.bf16.msra.mxu1 %v4882_v8  ;;  %4568 = vmatpush3.bf16.msra.mxu0 %v4881_v7 }
  0x23   : > { %4569 = vmatprep.subr.bf16.mxu0 %v4883_v10  ;;  %4597 = vmatprep.subr.bf16.mxu1 %v5188_v1 }
  0x25   : > { %4594 = vmatmul.mubr.msk.bf16.vlgmr.msra.gmra.mrb[0].mxu1 %vm945_vm1, %v911_v12 }
  0x26   : > { %4570 = vmatpush3.bf16.msra.mxu0 %v4883_v10  ;;  %4605 = vmatprep.mubr.msk.bf16.mxu1 %vm5189_vm0, %v5188_v1 }
  0x27   : > { %4571 = vmatprep.subr.bf16.mxu0 %v4884_v13  ;;  %4598 = vmatpush3.bf16.msra.mxu1 %v4891_v19  ;;  %v4905_v19 = vld [vmem:[%s6643_s9 + $0x34] ss:$12 sps:$4 sm:$0xff]  }
  0x28   : > { %4599 = vmatprep.subr.bf16.mxu1 %v5188_v1 }
  0x2a   : > { %4572 = vmatpush3.bf16.msra.mxu0 %v4884_v13  ;;  %v4897_v13 = vld [vmem:[%s6643_s9 + $0x4] ss:$12 sps:$4 sm:$0xff]  }
  0x2b   : > { %4573 = vmatprep.subr.bf16.mxu0 %v4885_v14  ;;  %4600 = vmatpush3.bf16.msra.mxu1 %v4892_v20  ;;  %v4903_v20 = vld [vmem:[%s6643_s9 + $0x30] ss:$12 sps:$4 sm:$0xff]  }
  0x2c   : > { %4601 = vmatprep.subr.bf16.mxu1 %v5188_v1 }
  0x2e   : > { %4574 = vmatpush3.bf16.msra.mxu0 %v4885_v14  ;;  %v4895_v14 = vld [vmem:[%s6643_s9] ss:$12 sps:$4 sm:$0xff]  }
  0x2f   : > { %4575 = vmatprep.subr.bf16.mxu0 %v4886_v15  ;;  %4602 = vmatpush3.bf16.msra.mxu1 %v4893_v21  ;;  %v4906_v21 = vld [vmem:[%s6653_s19 + $0x10] sm:$0xff]  }
  0x30   : > { %4603 = vmatprep.subr.bf16.mxu1 %v5188_v1 }
  0x32   : > { %4576 = vmatpush3.bf16.msra.mxu0 %v4886_v15  ;;  %v4898_v15 = vld [vmem:[%s6653_s19] sm:$0xff]  }
  0x33   : > { %4621 = vmatprep.subr.bf16.mxu0 %v5188_v1  ;;  %4604 = vmatpush3.bf16.msra.mxu1 %v4894_v22  ;;  %v4909_v22 = vld [vmem:[%s6643_s9 + $0x4c] ss:$12 sps:$4 sm:$0xff]  }
  0x34   : > { %1181 = vmatprep.subr.bf16.mxu1 %v4897_v13 }
  0x35   : > { %4578 = vmatmul.mubr.bf16.vlgmr.msra.gmra.mrb[0].mxu0 %v4888_v16  ;;  %v4901_v16 = vld [vmem:[%s6643_s9 + $0x1c] ss:$12 sps:$4 sm:$0xff]  }
  0x36   : > { %4581 = vmatprep.mubr.bf16.mxu0 %v4889_v17  ;;  %4622 = vmatpush3.bf16.msra.mxu0 %v4898_v15  ;;  %v4899_v17 = vld [vmem:[%s6643_s9 + $0x18] ss:$12 sps:$4 sm:$0xff]  }
  0x37   : > { %4623 = vmatprep.subr.bf16.mxu0 %v5188_v1 }
  0x3d   : > { %4582 = vmatmul.mubr.bf16.gmra.mrb[4].mxu0 %v4890_v18  ;;  %v4902_v18 = vld [vmem:[%s6653_s19 + $0x8] sm:$0xff]  }
  0x3e   : > { %4629 = vmatprep.mubr.msk.bf16.mxu0 %vm5189_vm0, %v5188_v1  ;;  %4624 = vmatpush3.bf16.msra.mxu0 %v4902_v18 }
  0x3f   : > { %4625 = vmatprep.subr.bf16.mxu0 %v5188_v1 }
  0x42   : > { %4626 = vmatpush3.bf16.msra.mxu0 %v4906_v21 }
  0x43   : > { %4627 = vmatprep.subr.bf16.mxu0 %v5188_v1 }
  0xf8   : > { %v983_v24 = vpop.f32.mrb[0].mxu1 }
  0xf9   : > { %v984_v25 = vadd.f32 %v983_v24, %v920_v23  ;;  %v4595_v26 = vpop.f32.mrb[1].mxu1  ;;  %v4907_v23 = vld [vmem:[%s6643_s9 + $0x48] ss:$12 sps:$4 sm:$0xff]   ;;  %v4910_v24 = vld [vmem:[%s6653_s19 + $0x18] sm:$0xff]  }
  0xfa   : > { %v986_v27 = vpop.f32.mrb[2].mxu1  ;;  %4628 = vmatpush3.bf16.msra.mxu0 %v4910_v24  ;;  %v4912_v24 = vld [vmem:[%s6643_s9 + $0x20] ss:$12 sps:$4 sm:$0xff]  }
  0xfb   : > { %v4264_v28 = vmul.f32 -1.442695, %v984_v25  ;;  %v4596_v29 = vpop.f32.mrb[3].mxu1 }
  0xfd   : > { %4963 = vpow2.f32 %v4264_v28 }
 0x107   : > { %v4964_v30 = vpop.eup %4963 }
 0x108   : > { %v992_v32 = vadd.f32 1.0, %v4964_v30  ;;  %v4579_v33 = vpop.f32.mrb[0].mxu0 }
 0x109   : > { %v872_v35 = vadd.f32 %v4579_v33, %v4246_v31  ;;  %v863_v36 = vpop.f32.mrb[1].mxu0 }
 0x10a   : > { %4965 = vrcp.f32 %v992_v32  ;;  %v864_v38 = vadd.f32 %v4246_v31, %v863_v36  ;;  %v4580_v39 = vpop.f32.mrb[2].mxu0 }
 0x10b   : > { %v5421_v41 = vadd.f32 %v896_v34, %v872_v35  ;;  %v875_v42 = vadd.f32 %v4580_v39, %v4246_v31  ;;  %v866_v43 = vpop.f32.mrb[3].mxu0 }
 0x10c   : > { %v5426_v45 = vadd.f32 %v894_v37, %v864_v38  ;;  %v867_v46 = vadd.f32 %v4246_v31, %v866_v43 }
 0x10d   : > { %v5428_v47 = vadd.f32 %v897_v40, %v875_v42  ;;  %v1341_v48 = vsel %vm945_vm1, %v5421_v41, 0.0 }
 0x10e   : > { %v5432_v49 = vadd.f32 %v895_v44, %v867_v46  ;;  %v1335_v50 = vsel %vm945_vm1, %v5426_v45, 0.0  ;;  %1342 = vadd.xlane.f32.xlu1 %v1341_v48 }
 0x10f   : > { %1336 = vadd.xlane.f32.xlu0 %v1335_v50  ;;  %v1344_v51 = vsel %vm945_vm1, %v5428_v47, 0.0 }
 0x110   : > { %v4583_v52 = vpop.f32.mrb[4].mxu0  ;;  %v1338_v53 = vsel %vm945_vm1, %v5432_v49, 0.0 }
 0x111   : > { %v888_v54 = vadd.f32 %v4583_v52, %v4246_v31  ;;  %v879_v56 = vpop.f32.mrb[5].mxu0 }
 0x112   : > { %v880_v58 = vadd.f32 %v4246_v31, %v879_v56  ;;  %v4584_v59 = vpop.f32.mrb[6].mxu0  ;;  %1345 = vadd.xlane.f32.xlu1 %v1344_v51 }
 0x113   : > { %1339 = vadd.xlane.f32.xlu0 %v1338_v53  ;;  %v891_v60 = vadd.f32 %v4584_v59, %v4246_v31  ;;  %v882_v62 = vpop.f32.mrb[7].mxu0  ;;  %v5452_v2 = vadd.f32 %v900_v55, %v888_v54 }
 0x114   : > { %v4966_v0 = vpop.eup %4965  ;;  %v5454_v3 = vadd.f32 %v898_v57, %v880_v58  ;;  %v883_v4 = vadd.f32 %v4246_v31, %v882_v62 }
 0x115   : > { %v995_v5 = vmul.f32 %v4966_v0, %v984_v25  ;;  %v5456_v6 = vadd.f32 %v901_v61, %v891_v60  ;;  %v1353_v11 = vsel %vm945_vm1, %v5452_v2, 0.0  ;;  %v5190_v25 = vmov 0  }
 0x116   : > { %v5458_v7 = vadd.f32 %v899_v63, %v883_v4  ;;  %v1347_v8 = vsel %vm945_vm1, %v5454_v3, 0.0 }
 0x117   : > { %v996_v9 = vpack.c.bf16 %v995_v5, %v995_v5  ;;  %1348 = vadd.xlane.f32.xlu0 %v1347_v8  ;;  %v1356_v12 = vsel %vm945_vm1, %v5456_v6, 0.0 }
 0x118   : > { %v1350_v10 = vsel %vm945_vm1, %v5458_v7, 0.0 }
 0x119   : > { %4606 = vmatmul.mubr.msk.bf16.vlgmr.msra.gmra.mrb[4].mxu1 %vm945_vm1, %v996_v9  ;;  %1351 = vadd.xlane.f32.xlu1 %v1350_v10 }
 0x11a   : > { %1182 = vmatpush1.bf16.msra.mxu1 %v4895_v14  ;;  %1213 = vmatprep.mubr.bf16.mxu1 %v5190_v25 }
 0x11b   : > { %1354 = vadd.xlane.f32.xlu0 %v1353_v11  ;;  %1183 = vmatprep.subr.bf16.mxu1 %v4901_v16  ;;  %v1005_v11 = vld [vmem:[%s6642_s8] sm:$0x1] }
 0x11d   : > { %1357 = vadd.xlane.f32.xlu1 %v1356_v12 }
 0x11e   : > { %1184 = vmatpush1.bf16.msra.mxu1 %v4899_v17 }
 0x11f   : > { %1185 = vmatprep.subr.bf16.mxu1 %v4905_v19 }
 0x122   : > { %1186 = vmatpush1.bf16.msra.mxu1 %v4903_v20 }
 0x123   : > { %1187 = vmatprep.subr.bf16.mxu1 %v4909_v22  ;;  %v4911_v22 = vld [vmem:[%s6643_s9 + $0x8] ss:$12 sps:$4 sm:$0xff]  }
 0x126   : > { %1188 = vmatpush1.bf16.msra.mxu1 %v4907_v23 }
 0x127   : > { %4609 = vmatprep.subr.bf16.mxu1 %v5188_v1 }
 0x19b   : > { %v1343_v26 = vpop.xlane.xlu1 %1342 }
 0x19c   : > { %v1337_v27 = vpop.xlane.xlu0 %1336  ;;  %v1362_v28 = vmul.f32 0.015625, %v1343_v26  ;;  %v4913_v26 = vld [vmem:[%s6643_s9 + $0x38] ss:$12 sps:$4 sm:$0xff]  }
 0x19d   : > { %v1360_v29 = vmul.f32 0.015625, %v1337_v27  ;;  %v4914_v27 = vld [vmem:[%s6643_s9 + $0x50] ss:$12 sps:$4 sm:$0xff]  }
 0x19e   : > { %v5511_v30 = vsub.f32 %v5421_v41, %v1362_v28  ;;  %v4915_v28 = vld [vmem:[%s6645_s11] ss:$8 sps:$4 sm:$0xff]  }
 0x19f   : > { %v5514_v31 = vsub.f32 %v5426_v45, %v1360_v29  ;;  %v1346_v32 = vpop.xlane.xlu1 %1345  ;;  %v4917_v29 = vld [vmem:[%s6645_s11 + $0x4] ss:$8 sps:$4 sm:$0xff]  }
 0x1a0   : > { %v1340_v33 = vpop.xlane.xlu0 %1339  ;;  %v1363_v34 = vmul.f32 0.015625, %v1346_v32  ;;  %v1378_v37 = vmul.f32 %v5511_v30, %v5511_v30  ;;  %v4920_v32 = vld [vmem:[%s6645_s11 + $0x14] ss:$8 sps:$4 sm:$0xff]  }
 0x1a1   : > { %v1361_v35 = vmul.f32 0.015625, %v1340_v33  ;;  %v1376_v36 = vmul.f32 %v5514_v31, %v5514_v31  ;;  %v4923_v33 = vld [vmem:[%s6645_s11 + $0x24] ss:$8 sps:$4 sm:$0xff]  }
 0x1a2   : > { %v5521_v38 = vsub.f32 %v5428_v47, %v1363_v34  ;;  %v1390_v44 = vsel %vm945_vm1, %v1378_v37, 0.0  ;;  %v4921_v34 = vld [vmem:[%s6645_s11 + $0x20] ss:$8 sps:$4 sm:$0xff]  }
 0x1a3   : > { %v5524_v39 = vsub.f32 %v5432_v49, %v1361_v35  ;;  %v1384_v40 = vsel %vm945_vm1, %v1376_v36, 0.0  ;;  %v1163_v35 = vlaneseq }
 0x1a4   : > { %1385 = vadd.xlane.f32.xlu0 %v1384_v40  ;;  %v1349_v42 = vpop.xlane.xlu0 %1348  ;;  %v1379_v48 = vmul.f32 %v5521_v38, %v5521_v38  ;;  %v4924_v40 = vld [vmem:[%s6645_s11 + $0x30] ss:$8 sps:$4 sm:$0xff]  }
 0x1a5   : > { %v1364_v43 = vmul.f32 0.015625, %v1349_v42  ;;  %v1377_v46 = vmul.f32 %v5524_v39, %v5524_v39  ;;  %v5600_v36 = vshrl.u32 %v1163_v35, 7  ;;  %v4926_v42 = vld [vmem:[%s6645_s11 + $0x34] ss:$8 sps:$4 sm:$0xff]  }
 0x1a6   : > { %v1352_v50 = vpop.xlane.xlu1 %1351  ;;  %v1393_v57 = vsel %vm945_vm1, %v1379_v48, 0.0 }
 0x1a7   : > { %v5533_v51 = vsub.f32 %v5454_v3, %v1364_v43  ;;  %v1365_v52 = vmul.f32 0.015625, %v1352_v50  ;;  %v1387_v53 = vsel %vm945_vm1, %v1377_v46, 0.0  ;;  %v5603_v37 = vsub.s32 0, %v5600_v36  ;;  %v1097_v43 = vld [vmem:[%s6644_s10] sm:$0x7] }
 0x1a8   : > { %1391 = vadd.xlane.f32.xlu0 %v1390_v44  ;;  %1388 = vadd.xlane.f32.xlu1 %v1387_v53  ;;  %v1355_v54 = vpop.xlane.xlu0 %1354  ;;  %v5615_v44 = vsub.s32 1, %v5600_v36 }
 0x1a9   : > { %v5537_v55 = vsub.f32 %v5458_v7, %v1365_v52  ;;  %v1366_v56 = vmul.f32 0.015625, %v1355_v54  ;;  %v1380_v58 = vmul.f32 %v5533_v51, %v5533_v51  ;;  %v1166_v46 = vrot.slane %v1097_v43, %v5603_v37 }
 0x1aa   : > { %v1358_v59 = vpop.xlane.xlu1 %1357  ;;  %v1170_v48 = vrot.slane %v1097_v43, %v5615_v44 }
 0x1ab   : > { %v5543_v60 = vsub.f32 %v5452_v2, %v1366_v56  ;;  %v1367_v61 = vmul.f32 0.015625, %v1358_v59  ;;  %v1396_v62 = vsel %vm945_vm1, %v1380_v58, 0.0  ;;  %v1381_v63 = vmul.f32 %v5537_v55, %v5537_v55 }
 0x1ac   : > { %1394 = vadd.xlane.f32.xlu1 %v1393_v57  ;;  %1397 = vadd.xlane.f32.xlu0 %v1396_v62 }
 0x1ad   : > { %v5549_v0 = vsub.f32 %v5456_v6, %v1367_v61  ;;  %v1399_v4 = vsel %vm945_vm1, %v1381_v63, 0.0  ;;  %v1382_v5 = vmul.f32 %v5543_v60, %v5543_v60 }
 0x1af   : > { %v1402_v8 = vsel %vm945_vm1, %v1382_v5, 0.0  ;;  %v1383_v9 = vmul.f32 %v5549_v0, %v5549_v0 }
 0x1b0   : > { %1400 = vadd.xlane.f32.xlu1 %v1399_v4  ;;  %1403 = vadd.xlane.f32.xlu0 %v1402_v8 }
 0x1b1   : > { %v1405_v10 = vsel %vm945_vm1, %v1383_v9, 0.0 }
 0x1b4   : > { %1406 = vadd.xlane.f32.xlu1 %v1405_v10 }
 0x1ec   : > { %v1067_v12 = vpop.f32.mrb[4].mxu1 }
 0x1ed   : > { %v1068_v13 = vadd.f32 %v1067_v12, %v1005_v11  ;;  %v4607_v14 = vpop.f32.mrb[5].mxu1 }
 0x1ee   : > { %v1070_v15 = vpop.f32.mrb[6].mxu1 }
 0x1ef   : > { %v4270_v16 = vmul.f32 -1.442695, %v1068_v13  ;;  %v4608_v17 = vpop.f32.mrb[7].mxu1 }
 0x1f1   : > { %4967 = vpow2.f32 %v4270_v16 }
 0x1fb   : > { %v4968_v18 = vpop.eup %4967 }
 0x1fc   : > { %v1076_v19 = vadd.f32 1.0, %v4968_v18 }
 0x1fe   : > { %4969 = vrcp.f32 %v1076_v19 }
 0x208   : > { %v4970_v20 = vpop.eup %4969 }
 0x209   : > { %v1079_v21 = vmul.f32 %v4970_v20, %v1068_v13 }
 0x20b   : > { %v1080_v23 = vpack.c.bf16 %v1079_v21, %v1079_v21 }
 0x20d   : > { %4283 = vmatmul.mubr.msk.bf16.vlgmr.msra.gmra.mrb[8].mxu1 %vm945_vm1, %v1080_v23  ;;  %4630 = vmatmul.mubr.msk.bf16.vlgmr.msra.gmra.mrb[8].mxu0 %vm945_vm1, %v1080_v23 }
 0x20e   : > { %4610 = vmatpush3.bf16.msra.mxu1 %v4911_v22  ;;  %4617 = vmatprep.mubr.msk.bf16.mxu1 %vm5189_vm0, %v5188_v1 }
 0x20f   : > { %4611 = vmatprep.subr.bf16.mxu1 %v5188_v1 }
 0x212   : > { %4612 = vmatpush3.bf16.msra.mxu1 %v4912_v24 }
 0x213   : > { %4613 = vmatprep.subr.bf16.mxu1 %v5188_v1 }
 0x216   : > { %4614 = vmatpush3.bf16.msra.mxu1 %v4913_v26 }
 0x217   : > { %4615 = vmatprep.subr.bf16.mxu1 %v5188_v1  ;;  %v4918_v1 = vld [vmem:[%s6645_s11 + $0x10] ss:$8 sps:$4 sm:$0xff]  }
 0x21a   : > { %4616 = vmatpush3.bf16.msra.mxu1 %v4914_v27 }
 0x21b   : > { %1545 = vmatprep.subr.bf16.mxu1 %v4917_v29 }
 0x21d   : > { %4618 = vmatmul.mubr.msk.bf16.vlgmr.msra.gmra.mrb[12].mxu1 %vm945_vm1, %v1080_v23 }
 0x21e   : > { %1577 = vmatprep.mubr.bf16.mxu1 %v5190_v25  ;;  %1546 = vmatpush1.bf16.msra.mxu1 %v4915_v28 }
 0x21f   : > { %1547 = vmatprep.subr.bf16.mxu1 %v4920_v32 }
 0x222   : > { %1548 = vmatpush1.bf16.msra.mxu1 %v4918_v1 }
 0x223   : > { %1549 = vmatprep.subr.bf16.mxu1 %v4923_v33 }
 0x226   : > { %1550 = vmatpush1.bf16.msra.mxu1 %v4921_v34 }
 0x227   : > { %1551 = vmatprep.subr.bf16.mxu1 %v4926_v42 }
 0x22a   : > { %1552 = vmatpush1.bf16.msra.mxu1 %v4924_v40 }
 0x231   : > { %v1386_v11 = vpop.xlane.xlu0 %1385 }
 0x232   : > { %v1408_v13 = vmul.f32 0.015625, %v1386_v11 }
 0x234   : > { %v1416_v17 = vadd.f32 1e-06, %v1408_v13 }
 0x235   : > { %v1389_v12 = vpop.xlane.xlu1 %1388  ;;  %v1392_v15 = vpop.xlane.xlu0 %1391 }
 0x236   : > { %v1409_v14 = vmul.f32 0.015625, %v1389_v12  ;;  %v1410_v18 = vmul.f32 0.015625, %v1392_v15  ;;  %4971 = vrsqrt.f32 %v1416_v17 }
 0x238   : > { %v1417_v19 = vadd.f32 1e-06, %v1409_v14  ;;  %v1418_v21 = vadd.f32 1e-06, %v1410_v18 }
 0x239   : > { %v1395_v16 = vpop.xlane.xlu1 %1394  ;;  %v1398_v23 = vpop.xlane.xlu0 %1397 }
 0x23a   : > { %v1411_v20 = vmul.f32 0.015625, %v1395_v16  ;;  %4973 = vrsqrt.f32 %v1417_v19  ;;  %v1412_v26 = vmul.f32 0.015625, %v1398_v23 }
 0x23b   : > { %4975 = vrsqrt.f32 %v1418_v21 }
 0x23c   : > { %v1419_v22 = vadd.f32 1e-06, %v1411_v20  ;;  %v1420_v28 = vadd.f32 1e-06, %v1412_v26 }
 0x23d   : > { %v1401_v24 = vpop.xlane.xlu1 %1400  ;;  %v1404_v32 = vpop.xlane.xlu0 %1403 }
 0x23e   : > { %4977 = vrsqrt.f32 %v1419_v22  ;;  %v1413_v27 = vmul.f32 0.015625, %v1401_v24  ;;  %v1414_v35 = vmul.f32 0.015625, %v1404_v32 }
 0x23f   : > { %4979 = vrsqrt.f32 %v1420_v28 }
 0x240   : > { %v1421_v29 = vadd.f32 1e-06, %v1413_v27  ;;  %v4972_v1 = vpop.eup %4971  ;;  %v1481_v27 = vld [vmem:[%s6646_s12] sm:$0x3] }
 0x241   : > { %v1407_v33 = vpop.xlane.xlu1 %1406  ;;  %v1432_v43 = vmul.f32 %v4972_v1, %v5514_v31 }
 0x242   : > { %4981 = vrsqrt.f32 %v1421_v29  ;;  %v1415_v40 = vmul.f32 0.015625, %v1407_v33 }
 0x244   : > { %v4974_v34 = vpop.eup %4973 }
 0x245   : > { %v4976_v42 = vpop.eup %4975 }
 0x2e0   : > { %v1215_v50 = vpop.f32.mrb[8].mxu1  ;;  %v5619_v52 = vpop.f32.mrb[8].mxu0 }
 0x2e1   : > { %v1216_v53 = vadd.f32 %v1215_v50, %v1166_v46  ;;  %v1217_v54 = vpop.f32.mrb[9].mxu1  ;;  %v4631_v56 = vpop.f32.mrb[9].mxu0  ;;  %v1433_v46 = vmul.f32 %v4974_v34, %v5524_v39 }
 0x2e2   : > { %v5621_v57 = vadd.f32 %v1217_v54, %v1170_v48  ;;  %v1219_v58 = vpop.f32.mrb[10].mxu1  ;;  %v1332_v59 = vpop.f32.mrb[10].mxu0  ;;  %v1422_v54 = vadd.f32 1e-06, %v1414_v35 }
 0x2e3   : > { %v1440_v61 = vadd.f32 1.0, %v1216_v53  ;;  %v1220_v62 = vpop.f32.mrb[11].mxu1  ;;  %v4632_v63 = vpop.f32.mrb[11].mxu0  ;;  %v1460_v56 = vrot.slane %v1216_v53, %v5603_v37 }
 0x2e4   : > { %v4978_v48 = vpop.eup %4977  ;;  %4983 = vrsqrt.f32 %v1422_v54 }
 0x2e5   : > { %v1444_v4 = vrot.slane %v1440_v61, %v5603_v37  ;;  %v1423_v61 = vadd.f32 1e-06, %v1415_v40  ;;  %v4980_v39 = vpop.eup %4979 }
 0x2e6   : > { %v4982_v11 = vpop.eup %4981  ;;  %v1436_v13 = vmul.f32 %v4980_v39, %v5533_v51 }
 0x2e7   : > { %1446 = vrot.lane.b32.xlu0 %v1444_v4, %s5191_s24  ;;  %v1434_v4 = vmul.f32 %v4976_v42, %v5511_v30  ;;  %4985 = vrsqrt.f32 %v1423_v61  ;;  %v1437_v14 = vmul.f32 %v4982_v11, %v5537_v55 }
 0x2ee   : > { %v4984_v16 = vpop.eup %4983 }
 0x2ef   : > { %v1438_v20 = vmul.f32 %v4984_v16, %v5543_v60  ;;  %v1486_v60 = vrot.slane %v1481_v27, %v5603_v37 }
 0x2f0   : > { %v5625_v5 = vpop.f32.mrb[12].mxu1 }
 0x2f1   : > { %v4619_v8 = vpop.f32.mrb[13].mxu1  ;;  %v4986_v17 = vpop.eup %4985 }
 0x2f2   : > { %v1259_v9 = vpop.f32.mrb[14].mxu1  ;;  %v1435_v8 = vmul.f32 %v4978_v48, %v5521_v38  ;;  %v1439_v21 = vmul.f32 %v4986_v17, %v5549_v0  ;;  %v1490_v0 = vrot.slane %v1481_v27, %v5615_v44 }
 0x2f3   : > { %v4620_v10 = vpop.f32.mrb[15].mxu1 }
 0x359   : > { %v1447_v50 = vpop.permute.xlu0 %1446 }
 0x35a   : > { %v1449_v58 = vmul.f32 %v1447_v50, %v1432_v43  ;;  %v1450_v59 = vmul.f32 %v1447_v50, %v1433_v46  ;;  %v1451_v10 = vmul.f32 %v1447_v50, %v1434_v4  ;;  %v1452_v31 = vmul.f32 %v1447_v50, %v1435_v8 }
 0x35b   : > { %v1453_v15 = vmul.f32 %v1447_v50, %v1436_v13  ;;  %v1454_v38 = vmul.f32 %v1447_v50, %v1437_v14  ;;  %v1455_v23 = vmul.f32 %v1447_v50, %v1438_v20  ;;  %v1456_v51 = vmul.f32 %v1447_v50, %v1439_v21 }
 0x35c   : > { %v1461_v62 = vadd.f32 %v1460_v56, %v1449_v58  ;;  %v1462_v63 = vadd.f32 %v1460_v56, %v1450_v59  ;;  %v1463_v53 = vadd.f32 %v1460_v56, %v1451_v10  ;;  %v1464_v12 = vadd.f32 %v1460_v56, %v1452_v31 }
 0x35d   : > { %v1465_v18 = vadd.f32 %v1460_v56, %v1453_v15  ;;  %v1466_v19 = vadd.f32 %v1460_v56, %v1454_v38  ;;  %v1467_v55 = vadd.f32 %v1460_v56, %v1455_v23  ;;  %v1468_v24 = vadd.f32 %v1460_v56, %v1456_v51 }
 0x35e   : > { %v1469_v9 = vpack.c.bf16 %v1462_v63, %v1461_v62  ;;  %v1470_v30 = vpack.c.bf16 %v1464_v12, %v1463_v53 }
 0x35f   : > { %v1471_v22 = vpack.c.bf16 %v1466_v19, %v1465_v18  ;;  %v1472_v26 = vpack.c.bf16 %v1468_v24, %v1467_v55 }
 0x360   : > { %4298 = vmatmul.mubr.msk.bf16.vlgmr.msra.gmra.mrb[16].mxu1 %vm945_vm1, %v1469_v9 }
 0x361   : > { %1587 = vmatprep.mubr.bf16.mxu1 %v5190_v25 }
 0x368   : > { %4299 = vmatmul.mubr.msk.bf16.gmra.mrb[20].mxu1 %vm945_vm1, %v1470_v30 }
 0x369   : > { %1597 = vmatprep.mubr.bf16.mxu1 %v5190_v25 }
 0x370   : > { %4300 = vmatmul.mubr.msk.bf16.gmra.mrb[24].mxu1 %vm945_vm1, %v1471_v22 }
 0x371   : > { %1607 = vmatprep.mubr.bf16.mxu1 %v5190_v25 }
 0x378   : > { %4301 = vmatmul.mubr.msk.bf16.gmra.mrb[28].mxu1 %vm945_vm1, %v1472_v26 }
 0x433   : > { %v1579_v28 = vpop.f32.mrb[16].mxu1 }
 0x434   : > { %v1581_v29 = vpop.f32.mrb[17].mxu1  ;;  %v1580_v1 = vadd.f32 %v1579_v28, %v1486_v60 }
 0x435   : > { %v1583_v32 = vpop.f32.mrb[18].mxu1  ;;  %v1582_v35 = vadd.f32 %v1581_v29, %v1490_v0 }
 0x436   : > { %v1584_v33 = vadd.f32 %v1583_v32, %v1486_v60  ;;  %v1585_v34 = vpop.f32.mrb[19].mxu1 }
 0x437   : > { %v1586_v40 = vadd.f32 %v1585_v34, %v1490_v0 }
 0x438   : > { %v5648_v42 = vpack.c.bf16 %v1584_v33, %v1580_v1 }
 0x439   : > { %v5650_v43 = vpack.c.bf16 %v1586_v40, %v1582_v35 }
 0x43a   : > { %1626 = vrot.lane.b32.xlu1 %v5648_v42, %s5191_s24  ;;  %4641 = vmatprep.mubr.msk.bf16.mxu0 %vm1634_vm2, %v5648_v42 }
 0x43b   : > { %v1589_v46 = vpop.f32.mrb[20].mxu1  ;;  %4649 = vmatprep.subr.bf16.mxu1 %v5650_v43 }
 0x43c   : > { %v1591_v48 = vpop.f32.mrb[21].mxu1  ;;  %4650 = vmatpush3.bf16.msra.mxu1 %v5650_v43  ;;  %v1590_v54 = vadd.f32 %v1589_v46, %v1486_v60 }
 0x43d   : > { %v1593_v50 = vpop.f32.mrb[22].mxu1  ;;  %v1592_v59 = vadd.f32 %v1591_v48, %v1490_v0 }
 0x43e   : > { %v1594_v56 = vadd.f32 %v1593_v50, %v1486_v60  ;;  %v1595_v58 = vpop.f32.mrb[23].mxu1 }
 0x43f   : > { %v1596_v61 = vadd.f32 %v1595_v58, %v1490_v0 }
 0x440   : > { %v5658_v62 = vpack.c.bf16 %v1594_v56, %v1590_v54 }
 0x441   : > { %v5660_v63 = vpack.c.bf16 %v1596_v61, %v1592_v59 }
 0x442   : > { %1628 = vrot.lane.b32.xlu1 %v5658_v62, %s5191_s24 }
 0x443   : > { %v1599_v4 = vpop.f32.mrb[24].mxu1  ;;  %4651 = vmatprep.subr.bf16.mxu1 %v5660_v63 }
 0x444   : > { %v1601_v8 = vpop.f32.mrb[25].mxu1  ;;  %4652 = vmatpush3.bf16.msra.mxu1 %v5660_v63  ;;  %v1600_v10 = vadd.f32 %v1599_v4, %v1486_v60 }
 0x445   : > { %v1603_v9 = vpop.f32.mrb[26].mxu1  ;;  %v1602_v11 = vadd.f32 %v1601_v8, %v1490_v0 }
 0x446   : > { %v1604_v31 = vadd.f32 %v1603_v9, %v1486_v60  ;;  %v1605_v39 = vpop.f32.mrb[27].mxu1 }
 0x447   : > { %v1606_v53 = vadd.f32 %v1605_v39, %v1490_v0 }
 0x448   : > { %v5666_v12 = vpack.c.bf16 %v1604_v31, %v1600_v10 }
 0x449   : > { %v5668_v13 = vpack.c.bf16 %v1606_v53, %v1602_v11 }
 0x44a   : > { %1630 = vrot.lane.b32.xlu1 %v5666_v12, %s5191_s24 }
 0x44b   : > { %v1609_v14 = vpop.f32.mrb[28].mxu1  ;;  %4653 = vmatprep.subr.bf16.mxu1 %v5668_v13 }
 0x44c   : > { %v1611_v30 = vpop.f32.mrb[29].mxu1  ;;  %4654 = vmatpush3.bf16.msra.mxu1 %v5668_v13  ;;  %v1610_v38 = vadd.f32 %v1609_v14, %v1486_v60 }
 0x44d   : > { %v1613_v15 = vpop.f32.mrb[30].mxu1  ;;  %v1612_v18 = vadd.f32 %v1611_v30, %v1490_v0 }
 0x44e   : > { %v1614_v16 = vadd.f32 %v1613_v15, %v1486_v60  ;;  %v1615_v17 = vpop.f32.mrb[31].mxu1  ;;  %1919 = vrot.lane.b32.xlu1 %v5648_v42, %s5192_s25 }
 0x44f   : > { %v1616_v19 = vadd.f32 %v1615_v17, %v1490_v0 }
 0x450   : > { %v5675_v20 = vpack.c.bf16 %v1614_v16, %v1610_v38 }
 0x451   : > { %v5677_v21 = vpack.c.bf16 %v1616_v19, %v1612_v18 }
 0x452   : > { %1632 = vrot.lane.b32.xlu0 %v5675_v20, %s5191_s24  ;;  %1923 = vrot.lane.b32.xlu1 %v5666_v12, %s5192_s25 }
 0x453   : > { %4655 = vmatprep.subr.bf16.mxu1 %v5677_v21 }
 0x454   : > { %4656 = vmatpush3.bf16.msra.mxu1 %v5677_v21 }
 0x456   : > { %1921 = vrot.lane.b32.xlu0 %v5658_v62, %s5192_s25  ;;  %1911 = vrot.lane.b32.xlu1 %v5648_v42, %s5193_s6 }
 0x45a   : > { %1925 = vrot.lane.b32.xlu0 %v5675_v20, %s5192_s25  ;;  %1915 = vrot.lane.b32.xlu1 %v5666_v12, %s5193_s6 }
 0x45e   : > { %1913 = vrot.lane.b32.xlu0 %v5658_v62, %s5193_s6  ;;  %2389 = vrot.lane.b32.xlu1 %v5648_v42, %s5194_s27 }
 0x462   : > { %1917 = vrot.lane.b32.xlu0 %v5675_v20, %s5193_s6  ;;  %2393 = vrot.lane.b32.xlu1 %v5666_v12, %s5194_s27 }
 0x466   : > { %2391 = vrot.lane.b32.xlu0 %v5658_v62, %s5194_s27  ;;  %2381 = vrot.lane.b32.xlu1 %v5648_v42, %s5195_s7 }
 0x46a   : > { %2383 = vrot.lane.b32.xlu0 %v5658_v62, %s5195_s7  ;;  %2385 = vrot.lane.b32.xlu1 %v5666_v12, %s5195_s7 }
 0x46e   : > { %2395 = vrot.lane.b32.xlu0 %v5675_v20, %s5194_s27 }
 0x472   : > { %2387 = vrot.lane.b32.xlu0 %v5675_v20, %s5195_s7 }
 0x4ac   : > { %v1627_v22 = vpop.permute.xlu1 %1626 }
 0x4ad   : > { %4841 = vmatprep.subr.msk.bf16.mxu0 %vm1634_vm2, %v1627_v22  ;;  %v1648_v23 = vsel %vm1634_vm2, %v1627_v22, 0 }
 0x4ae   : > { %4634 = vmatpush3.bf16.xpose.msra.mxu0 %v1648_v23 }
 0x4b4   : > { %v1629_v51 = vpop.permute.xlu1 %1628 }
 0x4b5   : > { %4842 = vmatprep.subr.msk.bf16.mxu0 %vm1634_vm2, %v1629_v51  ;;  %v1651_v55 = vsel %vm1634_vm2, %v1629_v51, 0 }
 0x4b6   : > { %4636 = vmatpush3.bf16.xpose.msra.mxu0 %v1651_v55 }
 0x4bc   : > { %v1631_v24 = vpop.permute.xlu1 %1630 }
 0x4bd   : > { %4843 = vmatprep.subr.msk.bf16.mxu0 %vm1634_vm2, %v1631_v24  ;;  %v1654_v26 = vsel %vm1634_vm2, %v1631_v24, 0 }
 0x4be   : > { %4638 = vmatpush3.bf16.xpose.msra.mxu0 %v1654_v26 }
 0x4c0   : > { %v1920_v0 = vpop.permute.xlu1 %1919 }
 0x4c1   : > { %v1940_v28 = vsel %vm1634_vm2, %v1920_v0, 0 }
 0x4c4   : > { %v1633_v27 = vpop.permute.xlu0 %1632  ;;  %v1924_v32 = vpop.permute.xlu1 %1923 }
 0x4c5   : > { %4844 = vmatprep.subr.msk.bf16.mxu0 %vm1634_vm2, %v1633_v27  ;;  %v1657_v60 = vsel %vm1634_vm2, %v1633_v27, 0  ;;  %v1946_v35 = vsel %vm1634_vm2, %v1924_v32, 0 }
 0x4c6   : > { %4640 = vmatpush3.bf16.xpose.msra.mxu0 %v1657_v60 }
 0x4c7   : > { %4845 = vmatprep.subr.msk.bf16.mxu0 %vm1634_vm2, %v1920_v0 }
 0x4c8   : > { %v1922_v29 = vpop.permute.xlu0 %1921  ;;  %v1912_v1 = vpop.permute.xlu1 %1911 }
 0x4c9   : > { %v1943_v33 = vsel %vm1634_vm2, %v1922_v29, 0 }
 0x4cc   : > { %v1926_v34 = vpop.permute.xlu0 %1925  ;;  %v1916_v40 = vpop.permute.xlu1 %1915 }
 0x4cd   : > { %4642 = vmatmul.mubr.msk.bf16.vlgmr.msra.gmra.mrb[12].mxu0 %vm1634_vm2, %v5658_v62  ;;  %v1949_v48 = vsel %vm1634_vm2, %v1926_v34, 0 }
 0x4ce   : > { %4645 = vmatprep.mubr.msk.bf16.mxu0 %vm1634_vm2, %v5666_v12  ;;  %4666 = vmatpush3.bf16.xpose.msra.mxu0 %v1940_v28 }
 0x4cf   : > { %4846 = vmatprep.subr.msk.bf16.mxu0 %vm1634_vm2, %v1922_v29 }
 0x4d0   : > { %v1914_v46 = vpop.permute.xlu0 %1913  ;;  %v2390_v50 = vpop.permute.xlu1 %2389 }
 0x4d1   : > { %v2410_v56 = vsel %vm1634_vm2, %v2390_v50, 0 }
 0x4d4   : > { %v1918_v54 = vpop.permute.xlu0 %1917  ;;  %v2394_v59 = vpop.permute.xlu1 %2393 }
 0x4d5   : > { %4646 = vmatmul.mubr.msk.bf16.gmra.mrb[16].mxu0 %vm1634_vm2, %v5675_v20  ;;  %v2416_v9 = vsel %vm1634_vm2, %v2394_v59, 0 }
 0x4d6   : > { %4668 = vmatpush3.bf16.xpose.msra.mxu0 %v1943_v33  ;;  %4673 = vmatprep.mubr.msk.bf16.mxu0 %vm1634_vm2, %v1912_v1 }
 0x4d7   : > { %4847 = vmatprep.subr.msk.bf16.mxu0 %vm1634_vm2, %v1924_v32 }
 0x4d8   : > { %v2392_v58 = vpop.permute.xlu0 %2391  ;;  %v2382_v61 = vpop.permute.xlu1 %2381 }
 0x4d9   : > { %v2413_v4 = vsel %vm1634_vm2, %v2392_v58, 0 }
 0x4dc   : > { %v2384_v8 = vpop.permute.xlu0 %2383  ;;  %v2386_v39 = vpop.permute.xlu1 %2385 }
 0x4de   : > { %4670 = vmatpush3.bf16.xpose.msra.mxu0 %v1946_v35 }
 0x4df   : > { %4848 = vmatprep.subr.msk.bf16.mxu0 %vm1634_vm2, %v1926_v34 }
 0x4e0   : > { %v2396_v10 = vpop.permute.xlu0 %2395 }
 0x4e1   : > { %v2419_v31 = vsel %vm1634_vm2, %v2396_v10, 0 }
 0x4e4   : > { %v2388_v11 = vpop.permute.xlu0 %2387 }
 0x4e6   : > { %4672 = vmatpush3.bf16.xpose.msra.mxu0 %v1949_v48 }
 0x4e7   : > { %4849 = vmatprep.subr.msk.bf16.mxu0 %vm1634_vm2, %v2390_v50 }
 0x4ed   : > { %4674 = vmatmul.mubr.msk.bf16.vlgmr.msra.gmra.mrb[20].mxu0 %vm1634_vm2, %v1914_v46 }
 0x4ee   : > { %4677 = vmatprep.mubr.msk.bf16.mxu0 %vm1634_vm2, %v1916_v40  ;;  %4718 = vmatpush3.bf16.xpose.msra.mxu0 %v2410_v56 }
 0x4ef   : > { %4850 = vmatprep.subr.msk.bf16.mxu0 %vm1634_vm2, %v2392_v58 }
 0x4f5   : > { %4678 = vmatmul.mubr.msk.bf16.gmra.mrb[24].mxu0 %vm1634_vm2, %v1918_v54 }
 0x4f6   : > { %4720 = vmatpush3.bf16.xpose.msra.mxu0 %v2413_v4  ;;  %4725 = vmatprep.mubr.msk.bf16.mxu0 %vm1634_vm2, %v2382_v61 }
 0x4f7   : > { %4851 = vmatprep.subr.msk.bf16.mxu0 %vm1634_vm2, %v2394_v59 }
 0x4fe   : > { %4722 = vmatpush3.bf16.xpose.msra.mxu0 %v2416_v9 }
 0x4ff   : > { %4852 = vmatprep.subr.msk.bf16.mxu0 %vm1634_vm2, %v2396_v10 }
 0x506   : > { %4724 = vmatpush3.bf16.xpose.msra.mxu0 %v2419_v31 }
 0x50d   : > { %4726 = vmatmul.mubr.msk.bf16.vlgmr.msra.gmra.mrb[28].mxu0 %vm1634_vm2, %v2384_v8 }
 0x50e   : > { %4729 = vmatprep.mubr.msk.bf16.mxu0 %vm1634_vm2, %v2386_v39 }
 0x515   : > { %4730 = vmatmul.mubr.msk.bf16.gmra.mrb[32].mxu0 %vm1634_vm2, %v2388_v11 }
 0x5a0   : > { %v4643_v53 = vpop.f32.mrb[12].mxu0 }
 0x5a1   : > { %v5744_v14 = vmul.f32 0.25, %v4643_v53  ;;  %v1693_v30 = vpop.f32.mrb[13].mxu0 }
 0x5a2   : > { %v5746_v15 = vmul.f32 0.25, %v1693_v30  ;;  %v4644_v38 = vpop.f32.mrb[14].mxu0 }
 0x5a3   : > { %v1696_v16 = vpop.f32.mrb[15].mxu0  ;;  %v1738_v17 = vsel %vm945_vm1, %v5744_v14, -inf  ;;  %v5756_v23 = vmul.f32 0.25, %v4644_v38 }
 0x5a4   : > { %v5750_v18 = vmul.f32 0.25, %v1696_v16  ;;  %1739 = vmax.xlane.f32.xlu0 %v1738_v17  ;;  %v1732_v19 = vsel %vm945_vm1, %v5746_v15, -inf }
 0x5a5   : > { %1733 = vmax.xlane.f32.xlu1 %v1732_v19  ;;  %v1741_v0 = vsel %vm945_vm1, %v5756_v23, -inf }
 0x5a6   : > { %v1735_v22 = vsel %vm945_vm1, %v5750_v18, -inf }
 0x5a8   : > { %1736 = vmax.xlane.f32.xlu0 %v1735_v22  ;;  %v4647_v51 = vpop.f32.mrb[16].mxu0 }
 0x5a9   : > { %v5758_v55 = vmul.f32 0.25, %v4647_v51  ;;  %v1709_v24 = vpop.f32.mrb[17].mxu0 }
 0x5aa   : > { %v4648_v26 = vpop.f32.mrb[18].mxu0  ;;  %v5760_v27 = vmul.f32 0.25, %v1709_v24 }
 0x5ab   : > { %v1712_v60 = vpop.f32.mrb[19].mxu0  ;;  %v1750_v28 = vsel %vm945_vm1, %v5758_v55, -inf  ;;  %v5770_v1 = vmul.f32 0.25, %v4648_v26 }
 0x5ac   : > { %v5766_v29 = vmul.f32 0.25, %v1712_v60  ;;  %1742 = vmax.xlane.f32.xlu0 %v1741_v0  ;;  %1751 = vmax.xlane.f32.xlu1 %v1750_v28  ;;  %v1744_v33 = vsel %vm945_vm1, %v5760_v27, -inf }
 0x5ad   : > { %v1753_v34 = vsel %vm945_vm1, %v5770_v1, -inf }
 0x5ae   : > { %v1747_v32 = vsel %vm945_vm1, %v5766_v29, -inf }
 0x5b0   : > { %1745 = vmax.xlane.f32.xlu1 %v1744_v33  ;;  %1748 = vmax.xlane.f32.xlu0 %v1747_v32 }
 0x5b4   : > { %1754 = vmax.xlane.f32.xlu0 %v1753_v34 }
 0x5c0   : > { %v4675_v35 = vpop.f32.mrb[20].mxu0 }
 0x5c1   : > { %v5776_v40 = vmul.f32 0.25, %v4675_v35  ;;  %v1985_v46 = vpop.f32.mrb[21].mxu0 }
 0x5c2   : > { %v4676_v48 = vpop.f32.mrb[22].mxu0  ;;  %v5778_v50 = vmul.f32 0.25, %v1985_v46 }
 0x5c3   : > { %v1988_v54 = vpop.f32.mrb[23].mxu0  ;;  %v2030_v56 = vsel %vm945_vm1, %v5776_v40, -inf  ;;  %v5784_v59 = vmul.f32 0.25, %v4676_v48 }
 0x5c4   : > { %v5782_v58 = vmul.f32 0.25, %v1988_v54  ;;  %2031 = vmax.xlane.f32.xlu1 %v2030_v56  ;;  %v2024_v4 = vsel %vm945_vm1, %v5778_v50, -inf }
 0x5c5   : > { %v2033_v39 = vsel %vm945_vm1, %v5784_v59, -inf }
 0x5c6   : > { %v2027_v61 = vsel %vm945_vm1, %v5782_v58, -inf }
 0x5c7   : > { %2028 = vmax.xlane.f32.xlu0 %v2027_v61 }
 0x5c8   : > { %2025 = vmax.xlane.f32.xlu1 %v2024_v4  ;;  %v4679_v8 = vpop.f32.mrb[24].mxu0 }
 0x5c9   : > { %v5790_v9 = vmul.f32 0.25, %v4679_v8  ;;  %v2001_v10 = vpop.f32.mrb[25].mxu0 }
 0x5ca   : > { %v4680_v31 = vpop.f32.mrb[26].mxu0  ;;  %v5794_v11 = vmul.f32 0.25, %v2001_v10 }
 0x5cb   : > { %v2004_v53 = vpop.f32.mrb[27].mxu0  ;;  %2034 = vmax.xlane.f32.xlu0 %v2033_v39  ;;  %v2042_v30 = vsel %vm945_vm1, %v5790_v9, -inf  ;;  %v5800_v16 = vmul.f32 0.25, %v4680_v31 }
 0x5cc   : > { %v5798_v38 = vmul.f32 0.25, %v2004_v53  ;;  %2043 = vmax.xlane.f32.xlu1 %v2042_v30  ;;  %v2036_v19 = vsel %vm945_vm1, %v5794_v11, -inf }
 0x5cd   : > { %v2045_v22 = vsel %vm945_vm1, %v5800_v16, -inf }
 0x5ce   : > { %v2039_v17 = vsel %vm945_vm1, %v5798_v38, -inf }
 0x5cf   : > { %2040 = vmax.xlane.f32.xlu0 %v2039_v17 }
 0x5d0   : > { %2037 = vmax.xlane.f32.xlu1 %v2036_v19 }
 0x5d3   : > { %2046 = vmax.xlane.f32.xlu0 %v2045_v22 }
 0x5e0   : > { %v5808_v51 = vpop.f32.mrb[28].mxu0 }
 0x5e1   : > { %2120 = vrot.lane.b32.xlu1 %v5650_v43, %s5193_s6  ;;  %v5812_v24 = vpop.f32.mrb[29].mxu0 }
 0x5e2   : > { %v5814_v26 = vpop.f32.mrb[30].mxu0 }
 0x5e3   : > { %v5816_v60 = vpop.f32.mrb[31].mxu0 }
 0x5e8   : > { %v5818_v0 = vpop.f32.mrb[32].mxu0 }
 0x5e9   : > { %v5820_v28 = vpop.f32.mrb[33].mxu0 }
 0x5ea   : > { %v5822_v32 = vpop.f32.mrb[34].mxu0 }
 0x5eb   : > { %v5824_v33 = vpop.f32.mrb[35].mxu0 }
 0x631   : > { %v1740_v34 = vpop.xlane.xlu0 %1739 }
 0x632   : > { %v1758_v35 = vsub.f32 %v5744_v14, %v1740_v34  ;;  %v1734_v46 = vpop.xlane.xlu1 %1733 }
 0x633   : > { %v1756_v48 = vsub.f32 %v5746_v15, %v1734_v46 }
 0x634   : > { %v1768_v54 = vmul.f32 1.442695, %v1758_v35 }
 0x635   : > { %v1764_v56 = vmul.f32 1.442695, %v1756_v48  ;;  %v1737_v61 = vpop.xlane.xlu0 %1736 }
 0x636   : > { %4987 = vpow2.f32 %v1768_v54  ;;  %v1757_v4 = vsub.f32 %v5750_v18, %v1737_v61 }
 0x637   : > { %4989 = vpow2.f32 %v1764_v56 }
 0x638   : > { %v1766_v53 = vmul.f32 1.442695, %v1757_v4 }
 0x639   : > { %v1743_v8 = vpop.xlane.xlu0 %1742  ;;  %v1752_v10 = vpop.xlane.xlu1 %1751 }
 0x63a   : > { %v1759_v31 = vsub.f32 %v5756_v23, %v1743_v8  ;;  %v1762_v39 = vsub.f32 %v5758_v55, %v1752_v10 }
 0x63c   : > { %v1770_v30 = vmul.f32 1.442695, %v1759_v31  ;;  %v1776_v17 = vmul.f32 1.442695, %v1762_v39 }
 0x63d   : > { %v1746_v14 = vpop.xlane.xlu1 %1745  ;;  %v1749_v19 = vpop.xlane.xlu0 %1748 }
 0x63e   : > { %4991 = vpow2.f32 %v1770_v30  ;;  %v1760_v15 = vsub.f32 %v5760_v27, %v1746_v14  ;;  %v1761_v18 = vsub.f32 %v5766_v29, %v1749_v19 }
 0x63f   : > { %4993 = vpow2.f32 %v1776_v17 }
 0x640   : > { %v5832_v22 = vpop.eup %4987  ;;  %4995 = vpow2.f32 %v1766_v53  ;;  %v1772_v34 = vmul.f32 1.442695, %v1760_v15  ;;  %v1774_v48 = vmul.f32 1.442695, %v1761_v18 }
 0x641   : > { %v1755_v35 = vpop.xlane.xlu0 %1754  ;;  %v1786_v23 = vsel %vm945_vm1, %v5832_v22, 0.0  ;;  %v5837_v55 = vpop.eup %4989 }
 0x642   : > { %4997 = vpow2.f32 %v1772_v34  ;;  %v1763_v46 = vsub.f32 %v5770_v1, %v1755_v35  ;;  %1787 = vadd.xlane.f32.xlu1 %v1786_v23  ;;  %v1780_v27 = vsel %vm945_vm1, %v5837_v55, 0.0 }
 0x644   : > { %v1778_v54 = vmul.f32 1.442695, %v1763_v46 }
 0x646   : > { %4999 = vpow2.f32 %v1778_v54  ;;  %1781 = vadd.xlane.f32.xlu1 %v1780_v27 }
 0x647   : > { %5001 = vpow2.f32 %v1774_v48 }
 0x648   : > { %v5842_v56 = vpop.eup %4991 }
 0x649   : > { %v5844_v29 = vpop.eup %4993  ;;  %v1789_v61 = vsel %vm945_vm1, %v5842_v56, 0.0 }
 0x64a   : > { %v5848_v4 = vpop.eup %4995  ;;  %v1798_v1 = vsel %vm945_vm1, %v5844_v29, 0.0  ;;  %1790 = vadd.xlane.f32.xlu0 %v1789_v61 }
 0x64b   : > { %1799 = vadd.xlane.f32.xlu1 %v1798_v1  ;;  %v1783_v31 = vsel %vm945_vm1, %v5848_v4, 0.0 }
 0x64c   : > { %v5852_v8 = vpop.eup %4997 }
 0x64d   : > { %v1792_v10 = vsel %vm945_vm1, %v5852_v8, 0.0 }
 0x64e   : > { %1784 = vadd.xlane.f32.xlu0 %v1783_v31 }
 0x64f   : > { %1793 = vadd.xlane.f32.xlu1 %v1792_v10 }
 0x650   : > { %v5858_v39 = vpop.eup %4999 }
 0x651   : > { %v2032_v53 = vpop.xlane.xlu1 %2031  ;;  %v1801_v30 = vsel %vm945_vm1, %v5858_v39, 0.0  ;;  %v5862_v17 = vpop.eup %5001 }
 0x652   : > { %v2050_v14 = vsub.f32 %v5776_v40, %v2032_v53  ;;  %1802 = vadd.xlane.f32.xlu0 %v1801_v30  ;;  %v1795_v18 = vsel %vm945_vm1, %v5862_v17, 0.0 }
 0x654   : > { %v2060_v19 = vmul.f32 1.442695, %v2050_v14  ;;  %v2029_v15 = vpop.xlane.xlu0 %2028 }
 0x655   : > { %v2026_v34 = vpop.xlane.xlu1 %2025  ;;  %v2049_v23 = vsub.f32 %v5782_v58, %v2029_v15 }
 0x656   : > { %5003 = vpow2.f32 %v2060_v19  ;;  %v2048_v35 = vsub.f32 %v5778_v50, %v2026_v34  ;;  %1796 = vadd.xlane.f32.xlu0 %v1795_v18 }
 0x657   : > { %v2058_v61 = vmul.f32 1.442695, %v2049_v23 }
 0x658   : > { %v2056_v46 = vmul.f32 1.442695, %v2048_v35  ;;  %v2035_v48 = vpop.xlane.xlu0 %2034 }
 0x659   : > { %v2051_v54 = vsub.f32 %v5784_v59, %v2035_v48  ;;  %v2044_v27 = vpop.xlane.xlu1 %2043 }
 0x65a   : > { %5005 = vpow2.f32 %v2056_v46  ;;  %v2054_v40 = vsub.f32 %v5790_v9, %v2044_v27 }
 0x65b   : > { %v2062_v1 = vmul.f32 1.442695, %v2051_v54 }
 0x65c   : > { %v2068_v10 = vmul.f32 1.442695, %v2054_v40  ;;  %v2041_v31 = vpop.xlane.xlu0 %2040 }
 0x65d   : > { %5007 = vpow2.f32 %v2062_v1  ;;  %v2038_v53 = vpop.xlane.xlu1 %2037  ;;  %v2053_v58 = vsub.f32 %v5798_v38, %v2041_v31 }
 0x65e   : > { %5009 = vpow2.f32 %v2068_v10  ;;  %v2052_v50 = vsub.f32 %v5794_v11, %v2038_v53  ;;  %v5928_v53 = vmul.f32 0.25, %v5812_v24 }
 0x65f   : > { %5011 = vpow2.f32 %v2058_v61  ;;  %v2066_v34 = vmul.f32 1.442695, %v2053_v58  ;;  %v5939_v58 = vmul.f32 0.25, %v5808_v51 }
 0x660   : > { %v5873_v30 = vpop.eup %5003  ;;  %v2064_v14 = vmul.f32 1.442695, %v2052_v50  ;;  %v2047_v59 = vpop.xlane.xlu0 %2046  ;;  %v5931_v50 = vmul.f32 0.25, %v5816_v60  ;;  %v5949_v60 = vmul.f32 0.25, %v5814_v26 }
 0x661   : > { %v2055_v19 = vsub.f32 %v5800_v16, %v2047_v59  ;;  %v5876_v15 = vpop.permute.xlu1 %2120  ;;  %v2078_v9 = vsel %vm945_vm1, %v5873_v30, 0.0  ;;  %v5961_v59 = vmul.f32 0.25, %v5822_v32 }
 0x662   : > { %5013 = vpow2.f32 %v2064_v14  ;;  %2079 = vadd.xlane.f32.xlu1 %v2078_v9  ;;  %4681 = vmatprep.subr.bf16.mxu1 %v5876_v15  ;;  %v5956_v14 = vmul.f32 0.25, %v5824_v33 }
 0x663   : > { %v2070_v11 = vmul.f32 1.442695, %v2055_v19  ;;  %v2515_v19 = vsel %vm945_vm1, %v5961_v59, -inf }
 0x664   : > { %v5881_v18 = vpop.eup %5005  ;;  %v2509_v26 = vsel %vm945_vm1, %v5956_v14, -inf }
 0x665   : > { %5015 = vpow2.f32 %v2070_v11  ;;  %v2072_v38 = vsel %vm945_vm1, %v5881_v18, 0.0 }
 0x666   : > { %2073 = vadd.xlane.f32.xlu1 %v2072_v38  ;;  %5017 = vpow2.f32 %v2066_v34 }
 0x667   : > { %v5885_v35 = vpop.eup %5007 }
 0x668   : > { %v5887_v16 = vpop.eup %5009  ;;  %v2081_v23 = vsel %vm945_vm1, %v5885_v35, 0.0 }
 0x669   : > { %v5891_v46 = vpop.eup %5011  ;;  %2082 = vadd.xlane.f32.xlu0 %v2081_v23  ;;  %v2090_v48 = vsel %vm945_vm1, %v5887_v16, 0.0 }
 0x66a   : > { %2091 = vadd.xlane.f32.xlu1 %v2090_v48  ;;  %v2075_v27 = vsel %vm945_vm1, %v5891_v46, 0.0 }
 0x66c   : > { %v5895_v54 = vpop.eup %5013 }
 0x66d   : > { %2076 = vadd.xlane.f32.xlu0 %v2075_v27  ;;  %v2084_v40 = vsel %vm945_vm1, %v5895_v54, 0.0 }
 0x66e   : > { %2085 = vadd.xlane.f32.xlu1 %v2084_v40 }
 0x66f   : > { %v5901_v61 = vpop.eup %5015 }
 0x670   : > { %v2093_v1 = vsel %vm945_vm1, %v5901_v61, 0.0  ;;  %v5905_v10 = vpop.eup %5017 }
 0x671   : > { %2094 = vadd.xlane.f32.xlu0 %v2093_v1  ;;  %v2087_v31 = vsel %vm945_vm1, %v5905_v10, 0.0 }
 0x675   : > { %2088 = vadd.xlane.f32.xlu0 %v2087_v31 }
 0x67f   : > { %2124 = vrot.lane.b32.xlu1 %v5668_v13, %s5193_s6 }
 0x683   : > { %2126 = vrot.lane.b32.xlu1 %v5677_v21, %s5193_s6 }
 0x687   : > { %2780 = vrot.lane.b32.xlu1 %v5648_v42, %s5196_s28 }
 0x68b   : > { %2784 = vrot.lane.b32.xlu1 %v5666_v12, %s5196_s28  ;;  %2122 = vrot.lane.b32.xlu0 %v5660_v63, %s5193_s6 }
 0x68f   : > { %2772 = vrot.lane.b32.xlu1 %v5648_v42, %s5197_s29  ;;  %2782 = vrot.lane.b32.xlu0 %v5658_v62, %s5196_s28  ;;  %v5934_v42 = vmul.f32 0.25, %v5820_v28  ;;  %v2500_v28 = vsel %vm945_vm1, %v5939_v58, -inf }
 0x691   : > { %v2506_v24 = vsel %vm945_vm1, %v5934_v42, -inf }
 0x693   : > { %2776 = vrot.lane.b32.xlu1 %v5666_v12, %s5197_s29  ;;  %2786 = vrot.lane.b32.xlu0 %v5675_v20, %s5196_s28  ;;  %v2494_v12 = vsel %vm945_vm1, %v5928_v53, -inf  ;;  %s6681_s28 = sld [smem:[#allocation11_spill]] }
 0x697   : > { %2774 = vrot.lane.b32.xlu0 %v5658_v62, %s5197_s29  ;;  %v2497_v62 = vsel %vm945_vm1, %v5931_v50, -inf }
 0x69b   : > { %2778 = vrot.lane.b32.xlu0 %v5675_v20, %s5197_s29  ;;  %v5944_v20 = vmul.f32 0.25, %v5818_v0  ;;  %v2503_v0 = vsel %vm945_vm1, %v5949_v60, -inf }
 0x69d   : > { %v2512_v51 = vsel %vm945_vm1, %v5944_v20, -inf }
 0x6b7   : > { %2495 = vmax.xlane.f32.xlu1 %v2494_v12 }
 0x6ba   : > { %2498 = vmax.xlane.f32.xlu0 %v2497_v62 }
 0x6bb   : > { %2507 = vmax.xlane.f32.xlu1 %v2506_v24 }
 0x6be   : > { %2501 = vmax.xlane.f32.xlu0 %v2500_v28 }
 0x6bf   : > { %2513 = vmax.xlane.f32.xlu1 %v2512_v51 }
 0x6c2   : > { %2504 = vmax.xlane.f32.xlu0 %v2503_v0 }
 0x6c6   : > { %2510 = vmax.xlane.f32.xlu0 %v2509_v26 }
 0x6ca   : > { %2516 = vmax.xlane.f32.xlu0 %v2515_v19 }
 0x6cf   : > { %v1788_v9 = vpop.xlane.xlu1 %1787 }
 0x6d0   : > { %2586 = vrot.lane.b32.xlu1 %v5650_v43, %s5195_s7 }
 0x6d3   : > { %v1782_v33 = vpop.xlane.xlu1 %1781 }
 0x6d7   : > { %v1791_v34 = vpop.xlane.xlu0 %1790 }
 0x6d8   : > { %v1800_v11 = vpop.xlane.xlu1 %1799  ;;  %5019 = vrcp.f32 %v1791_v34 }
 0x6d9   : > { %5021 = vrcp.f32 %v1782_v33 }
 0x6da   : > { %5023 = vrcp.f32 %v1788_v9 }
 0x6db   : > { %v1785_v32 = vpop.xlane.xlu0 %1784 }
 0x6dc   : > { %5025 = vrcp.f32 %v1785_v32  ;;  %v1794_v38 = vpop.xlane.xlu1 %1793 }
 0x6df   : > { %v1803_v23 = vpop.xlane.xlu0 %1802 }
 0x6e0   : > { %5027 = vrcp.f32 %v1803_v23 }
 0x6e1   : > { %5029 = vrcp.f32 %v1794_v38 }
 0x6e2   : > { %v5020_v48 = vpop.eup %5019  ;;  %5031 = vrcp.f32 %v1800_v11 }
 0x6e3   : > { %v1797_v27 = vpop.xlane.xlu0 %1796  ;;  %v5022_v40 = vpop.eup %5021  ;;  %v1815_v12 = vmul.f32 %v5020_v48, %v5842_v56 }
 0x6e4   : > { %5033 = vrcp.f32 %v1797_v27  ;;  %v5024_v1 = vpop.eup %5023  ;;  %v1812_v62 = vmul.f32 %v5022_v40, %v5837_v55 }
 0x6e5   : > { %v1814_v28 = vmul.f32 %v5024_v1, %v5832_v22 }
 0x6e6   : > { %v5026_v31 = vpop.eup %5025 }
 0x6e7   : > { %v1813_v24 = vmul.f32 %v5026_v31, %v5848_v4  ;;  %v1821_v0 = vpack.c.bf16 %v1815_v12, %v1814_v28 }
 0x6e9   : > { %v1820_v51 = vpack.c.bf16 %v1813_v24, %v1812_v62 }
 0x6ea   : > { %v5028_v26 = vpop.eup %5027 }
 0x6eb   : > { %4657 = vmatprep.mubr.msk.bf16.mxu1 %vm945_vm1, %v1820_v51  ;;  %v5030_v19 = vpop.eup %5029  ;;  %v1819_v56 = vmul.f32 %v5028_v26, %v5858_v39 }
 0x6ec   : > { %4658 = vmatmul.mubr.msk.bf16.vlgmr.msra.gmra.mrb[32].mxu1 %vm945_vm1, %v1821_v0  ;;  %v5032_v9 = vpop.eup %5031  ;;  %v1816_v55 = vmul.f32 %v5030_v19, %v5852_v8 }
 0x6ed   : > { %4682 = vmatpush3.bf16.msra.mxu1 %v5876_v15  ;;  %v1818_v22 = vmul.f32 %v5032_v9, %v5844_v29 }
 0x6ee   : > { %v5034_v33 = vpop.eup %5033 }
 0x6ef   : > { %v2080_v34 = vpop.xlane.xlu1 %2079  ;;  %v1817_v4 = vmul.f32 %v5034_v33, %v5862_v17  ;;  %v1823_v32 = vpack.c.bf16 %v1819_v56, %v1818_v22 }
 0x6f1   : > { %v1822_v11 = vpack.c.bf16 %v1817_v4, %v1816_v55 }
 0x6f3   : > { %v2074_v38 = vpop.xlane.xlu1 %2073  ;;  %4661 = vmatprep.mubr.msk.bf16.mxu1 %vm945_vm1, %v1822_v11 }
 0x6f4   : > { %4662 = vmatmul.mubr.msk.bf16.gmra.mrb[36].mxu1 %vm945_vm1, %v1823_v32  ;;  %5035 = vrcp.f32 %v2074_v38 }
 0x6f6   : > { %v2083_v23 = vpop.xlane.xlu0 %2082 }
 0x6f7   : > { %v2092_v48 = vpop.xlane.xlu1 %2091 }
 0x6fa   : > { %v2077_v15 = vpop.xlane.xlu0 %2076 }
 0x6fb   : > { %5037 = vrcp.f32 %v2077_v15  ;;  %v2086_v39 = vpop.xlane.xlu1 %2085 }
 0x6fc   : > { %5039 = vrcp.f32 %v2083_v23 }
 0x6fd   : > { %5041 = vrcp.f32 %v2080_v34 }
 0x6fe   : > { %v2095_v27 = vpop.xlane.xlu0 %2094  ;;  %5043 = vrcp.f32 %v2086_v39  ;;  %v5036_v29 = vpop.eup %5035 }
 0x6ff   : > { %v2125_v40 = vpop.permute.xlu1 %2124  ;;  %v2104_v12 = vmul.f32 %v5036_v29, %v5881_v18 }
 0x702   : > { %v2089_v8 = vpop.xlane.xlu0 %2088 }
 0x703   : > { %5045 = vrcp.f32 %v2089_v8  ;;  %v2127_v17 = vpop.permute.xlu1 %2126 }
 0x704   : > { %5047 = vrcp.f32 %v2095_v27 }
 0x705   : > { %v5038_v1 = vpop.eup %5037  ;;  %5049 = vrcp.f32 %v2092_v48 }
 0x706   : > { %v2123_v31 = vpop.permute.xlu0 %2122  ;;  %v2105_v62 = vmul.f32 %v5038_v1, %v5891_v46  ;;  %v5040_v0 = vpop.eup %5039 }
 0x707   : > { %v2781_v24 = vpop.permute.xlu1 %2780  ;;  %4683 = vmatprep.subr.bf16.mxu1 %v2123_v31  ;;  %v5042_v19 = vpop.eup %5041  ;;  %v2107_v33 = vmul.f32 %v5040_v0, %v5885_v35 }
 0x708   : > { %v2801_v28 = vsel %vm1634_vm2, %v2781_v24, 0  ;;  %4684 = vmatpush3.bf16.msra.mxu1 %v2123_v31  ;;  %4853 = vmatprep.subr.msk.bf16.mxu0 %vm1634_vm2, %v2781_v24  ;;  %v2112_v51 = vpack.c.bf16 %v2105_v62, %v2104_v12  ;;  %v5044_v46 = vpop.eup %5043  ;;  %v2106_v34 = vmul.f32 %v5042_v19, %v5873_v30 }
 0x709   : > { %4685 = vmatprep.subr.bf16.mxu1 %v2125_v40  ;;  %4760 = vmatpush3.bf16.xpose.msra.mxu0 %v2801_v28  ;;  %v2108_v22 = vmul.f32 %v5044_v46, %v5895_v54 }
 0x70a   : > { %4689 = vmatprep.mubr.msk.bf16.mxu1 %vm945_vm1, %v2112_v51  ;;  %v2783_v26 = vpop.permute.xlu0 %2782  ;;  %v2113_v11 = vpack.c.bf16 %v2107_v33, %v2106_v34 }
 0x70b   : > { %v2785_v18 = vpop.permute.xlu1 %2784  ;;  %4854 = vmatprep.subr.msk.bf16.mxu0 %vm1634_vm2, %v2783_v26  ;;  %v2804_v4 = vsel %vm1634_vm2, %v2783_v26, 0 }
 0x70c   : > { %4686 = vmatpush3.bf16.msra.mxu1 %v2125_v40  ;;  %v2807_v23 = vsel %vm1634_vm2, %v2785_v18, 0 }
 0x70d   : > { %v5046_v9 = vpop.eup %5045  ;;  %4687 = vmatprep.subr.bf16.mxu1 %v2127_v17 }
 0x70e   : > { %v2109_v56 = vmul.f32 %v5046_v9, %v5905_v10  ;;  %v5048_v32 = vpop.eup %5047  ;;  %v2787_v48 = vpop.permute.xlu0 %2786 }
 0x70f   : > { %v2773_v55 = vpop.permute.xlu1 %2772  ;;  %v5050_v35 = vpop.eup %5049  ;;  %v2111_v30 = vmul.f32 %v5048_v32, %v5901_v61  ;;  %v2810_v15 = vsel %vm1634_vm2, %v2787_v48, 0 }
 0x710   : > { %4688 = vmatpush3.bf16.msra.mxu1 %v2127_v17  ;;  %4767 = vmatprep.mubr.msk.bf16.mxu0 %vm1634_vm2, %v2773_v55  ;;  %v2114_v38 = vpack.c.bf16 %v2109_v56, %v2108_v22  ;;  %v2110_v10 = vmul.f32 %v5050_v35, %v5887_v16 }
 0x711   : > { %4762 = vmatpush3.bf16.xpose.msra.mxu0 %v2804_v4 }
 0x712   : > { %4855 = vmatprep.subr.msk.bf16.mxu0 %vm1634_vm2, %v2785_v18  ;;  %v2115_v54 = vpack.c.bf16 %v2111_v30, %v2110_v10  ;;  %v2775_v39 = vpop.permute.xlu0 %2774 }
 0x713   : > { %4690 = vmatmul.mubr.msk.bf16.vlgmr.msra.gmra.mrb[40].mxu1 %vm945_vm1, %v2113_v11  ;;  %v2777_v27 = vpop.permute.xlu1 %2776 }
 0x714   : > { %4693 = vmatprep.mubr.msk.bf16.mxu1 %vm945_vm1, %v2114_v38 }
 0x716   : > { %v2779_v61 = vpop.permute.xlu0 %2778 }
 0x719   : > { %4764 = vmatpush3.bf16.xpose.msra.mxu0 %v2807_v23  ;;  %v4927_v23 = vld [vmem:[%s6647_s13 + $0x8] sm:$0xff]  }
 0x71a   : > { %4856 = vmatprep.subr.msk.bf16.mxu0 %vm1634_vm2, %v2787_v48  ;;  %4697 = vmatprep.subr.bf16.mxu1 %v4927_v23 }
 0x71b   : > { %4694 = vmatmul.mubr.msk.bf16.gmra.mrb[44].mxu1 %vm945_vm1, %v2115_v54 }
 0x71c   : > { %4698 = vmatpush3.bf16.msra.mxu1 %v4927_v23 }
 0x721   : > { %4766 = vmatpush3.bf16.xpose.msra.mxu0 %v2810_v15  ;;  %v4928_v15 = vld [vmem:[%s6647_s13] sm:$0xff]  }
 0x722   : > { %4707 = vmatprep.subr.bf16.mxu1 %v4928_v15 }
 0x728   : > { %4768 = vmatmul.mubr.msk.bf16.vlgmr.msra.gmra.mrb[36].mxu0 %vm1634_vm2, %v2775_v39 }
 0x729   : > { %4771 = vmatprep.mubr.msk.bf16.mxu0 %vm1634_vm2, %v2777_v27 }
 0x730   : > { %4772 = vmatmul.mubr.msk.bf16.gmra.mrb[40].mxu0 %vm1634_vm2, %v2779_v61 }
 0x731   : > { %3435 = vmatprep.mubr.bf16.mxu0 %v5190_v25 }
 0x744   : > { %v2496_v16 = vpop.xlane.xlu1 %2495 }
 0x745   : > { %v2518_v29 = vsub.f32 %v5928_v53, %v2496_v16 }
 0x747   : > { %v2499_v40 = vpop.xlane.xlu0 %2498  ;;  %v2526_v62 = vmul.f32 1.442695, %v2518_v29 }
 0x748   : > { %v2508_v8 = vpop.xlane.xlu1 %2507  ;;  %v2519_v12 = vsub.f32 %v5931_v50, %v2499_v40 }
 0x749   : > { %v2522_v19 = vsub.f32 %v5934_v42, %v2508_v8 }
 0x74a   : > { %v2528_v26 = vmul.f32 1.442695, %v2519_v12 }
 0x74b   : > { %v2502_v17 = vpop.xlane.xlu0 %2501 }
 0x74c   : > { %v2520_v1 = vsub.f32 %v5939_v58, %v2502_v17  ;;  %v2514_v31 = vpop.xlane.xlu1 %2513  ;;  %v2534_v58 = vmul.f32 1.442695, %v2522_v19 }
 0x74d   : > { %v2524_v28 = vsub.f32 %v5944_v20, %v2514_v31 }
 0x74e   : > { %v2530_v24 = vmul.f32 1.442695, %v2520_v1 }
 0x74f   : > { %v2505_v51 = vpop.xlane.xlu0 %2504  ;;  %v2538_v18 = vmul.f32 1.442695, %v2524_v28 }
 0x750   : > { %5051 = vpow2.f32 %v2530_v24  ;;  %v2521_v0 = vsub.f32 %v5949_v60, %v2505_v51  ;;  %v2587_v24 = vpop.permute.xlu1 %2586 }
 0x751   : > { %5053 = vpow2.f32 %v2526_v62 }
 0x752   : > { %v2532_v53 = vmul.f32 1.442695, %v2521_v0 }
 0x753   : > { %v2511_v46 = vpop.xlane.xlu0 %2510 }
 0x754   : > { %5055 = vpow2.f32 %v2532_v53  ;;  %v2523_v50 = vsub.f32 %v5956_v14, %v2511_v46 }
 0x755   : > { %5057 = vpow2.f32 %v2528_v26 }
 0x756   : > { %5059 = vpow2.f32 %v2538_v18  ;;  %v2536_v60 = vmul.f32 1.442695, %v2523_v50 }
 0x757   : > { %v2517_v9 = vpop.xlane.xlu0 %2516  ;;  %5061 = vpow2.f32 %v2534_v58 }
 0x758   : > { %v2525_v20 = vsub.f32 %v5961_v59, %v2517_v9 }
 0x75a   : > { %v6015_v33 = vpop.eup %5051  ;;  %v2540_v56 = vmul.f32 1.442695, %v2525_v20 }
 0x75b   : > { %v2548_v42 = vsel %vm945_vm1, %v6015_v33, 0.0  ;;  %v6019_v34 = vpop.eup %5053 }
 0x75c   : > { %5063 = vpow2.f32 %v2540_v56  ;;  %2549 = vadd.xlane.f32.xlu1 %v2548_v42  ;;  %v2542_v14 = vsel %vm945_vm1, %v6019_v34, 0.0 }
 0x75d   : > { %5065 = vpow2.f32 %v2536_v60 }
 0x75e   : > { %v6021_v55 = vpop.eup %5055 }
 0x75f   : > { %v6023_v4 = vpop.eup %5057  ;;  %v2551_v59 = vsel %vm945_vm1, %v6021_v55, 0.0 }
 0x760   : > { %v6029_v22 = vpop.eup %5059  ;;  %2543 = vadd.xlane.f32.xlu1 %v2542_v14  ;;  %2552 = vadd.xlane.f32.xlu0 %v2551_v59  ;;  %v2545_v32 = vsel %vm945_vm1, %v6023_v4, 0.0 }
 0x761   : > { %v2560_v11 = vsel %vm945_vm1, %v6029_v22, 0.0  ;;  %v6035_v38 = vpop.eup %5061 }
 0x762   : > { %v2554_v30 = vsel %vm945_vm1, %v6035_v38, 0.0 }
 0x764   : > { %2561 = vadd.xlane.f32.xlu1 %v2560_v11  ;;  %2546 = vadd.xlane.f32.xlu0 %v2545_v32 }
 0x766   : > { %v6037_v35 = vpop.eup %5063 }
 0x767   : > { %v2563_v10 = vsel %vm945_vm1, %v6037_v35, 0.0  ;;  %v6046_v48 = vpop.eup %5065 }
 0x768   : > { %2555 = vadd.xlane.f32.xlu1 %v2554_v30  ;;  %2564 = vadd.xlane.f32.xlu0 %v2563_v10  ;;  %v2557_v54 = vsel %vm945_vm1, %v6046_v48, 0.0 }
 0x76c   : > { %2558 = vadd.xlane.f32.xlu0 %v2557_v54 }
 0x779   : > { %2590 = vrot.lane.b32.xlu1 %v5668_v13, %s5195_s7 }
 0x77d   : > { %2592 = vrot.lane.b32.xlu1 %v5677_v21, %s5195_s7 }
 0x782   : > { %2588 = vrot.lane.b32.xlu0 %v5660_v63, %s5195_s7 }
 0x7bf   : > { %v4659_v39 = vpop.f32.mrb[32].mxu1 }
 0x7c0   : > { %v1874_v27 = vpop.f32.mrb[33].mxu1 }
 0x7c1   : > { %v4660_v61 = vpop.f32.mrb[34].mxu1 }
 0x7c2   : > { %v1906_v16 = vpack.c.bf16 %v4660_v61, %v4659_v39  ;;  %v1877_v40 = vpop.f32.mrb[35].mxu1 }
 0x7c3   : > { %v1905_v8 = vpack.c.bf16 %v1877_v40, %v1874_v27 }
 0x7c7   : > { %v6059_v29 = vpop.f32.mrb[36].mxu1 }
 0x7c8   : > { %v1890_v17 = vpop.f32.mrb[37].mxu1 }
 0x7c9   : > { %v6061_v1 = vpop.f32.mrb[38].mxu1 }
 0x7ca   : > { %v1908_v31 = vpack.c.bf16 %v6061_v1, %v6059_v29  ;;  %v1893_v12 = vpop.f32.mrb[39].mxu1 }
 0x7cb   : > { %v1907_v62 = vpack.c.bf16 %v1893_v12, %v1890_v17 }
 0x7e6   : > { %v4691_v28 = vpop.f32.mrb[40].mxu1 }
 0x7e7   : > { %v2178_v51 = vpop.f32.mrb[41].mxu1 }
 0x7e8   : > { %v4692_v0 = vpop.f32.mrb[42].mxu1 }
 0x7e9   : > { %v2210_v26 = vpack.c.bf16 %v4692_v0, %v4691_v28  ;;  %v2181_v19 = vpop.f32.mrb[43].mxu1  ;;  %v2550_v18 = vpop.xlane.xlu1 %2549 }
 0x7ea   : > { %v2209_v53 = vpack.c.bf16 %v2181_v19, %v2178_v51 }
 0x7ec   : > { %4699 = vmatprep.mubr.msk.bf16.mxu1 %vm1634_vm2, %v2209_v53 }
 0x7ed   : > { %4700 = vmatmul.mubr.msk.bf16.vlgmr.msra.gmra.mrb[48].mxu1 %vm1634_vm2, %v2210_v26  ;;  %v2553_v46 = vpop.xlane.xlu0 %2552  ;;  %v2544_v58 = vpop.xlane.xlu1 %2543 }
 0x7ee   : > { %4708 = vmatpush3.bf16.msra.mxu1 %v4928_v15  ;;  %v4695_v50 = vpop.f32.mrb[44].mxu1 }
 0x7ef   : > { %4733 = vmatprep.subr.bf16.mxu1 %v2587_v24  ;;  %v2194_v9 = vpop.f32.mrb[45].mxu1 }
 0x7f0   : > { %v4696_v20 = vpop.f32.mrb[46].mxu1 }
 0x7f1   : > { %v2212_v60 = vpack.c.bf16 %v4696_v20, %v4695_v50  ;;  %v2197_v56 = vpop.f32.mrb[47].mxu1  ;;  %v2547_v14 = vpop.xlane.xlu0 %2546 }
 0x7f2   : > { %v2211_v42 = vpack.c.bf16 %v2197_v56, %v2194_v9  ;;  %v2562_v59 = vpop.xlane.xlu1 %2561  ;;  %5067 = vrcp.f32 %v2547_v14 }
 0x7f3   : > { %5069 = vrcp.f32 %v2544_v58 }
 0x7f4   : > { %4703 = vmatprep.mubr.msk.bf16.mxu1 %vm1634_vm2, %v2211_v42  ;;  %5071 = vrcp.f32 %v2553_v46 }
 0x7f5   : > { %4704 = vmatmul.mubr.msk.bf16.gmra.mrb[52].mxu1 %vm1634_vm2, %v2212_v60  ;;  %v2565_v11 = vpop.xlane.xlu0 %2564 }
 0x7f6   : > { %4709 = vmatprep.mubr.msk.bf16.mxu1 %vm1634_vm2, %v1905_v8  ;;  %v2556_v32 = vpop.xlane.xlu1 %2555 }
 0x7f9   : > { %v2559_v30 = vpop.xlane.xlu0 %2558 }
 0x7fa   : > { %5073 = vrcp.f32 %v2559_v30  ;;  %v2591_v12 = vpop.permute.xlu1 %2590 }
 0x7fb   : > { %v4769_v10 = vpop.f32.mrb[36].mxu0  ;;  %5075 = vrcp.f32 %v2550_v18 }
 0x7fc   : > { %v2846_v23 = vpop.f32.mrb[37].mxu0  ;;  %5077 = vrcp.f32 %v2556_v32  ;;  %v5068_v39 = vpop.eup %5067  ;;  %v6078_v28 = vmul.f32 0.25, %v4769_v10 }
 0x7fd   : > { %v6070_v54 = vmul.f32 0.25, %v2846_v23  ;;  %4710 = vmatmul.mubr.msk.bf16.vlgmr.msra.gmra.mrb[48].mxu1 %vm1634_vm2, %v1906_v16  ;;  %v4770_v15 = vpop.f32.mrb[38].mxu0  ;;  %v2589_v27 = vpop.permute.xlu0 %2588  ;;  %5079 = vrcp.f32 %v2565_v11 }
 0x7fe   : > { %4734 = vmatpush3.bf16.msra.mxu1 %v2587_v24  ;;  %4713 = vmatprep.mubr.msk.bf16.mxu1 %vm1634_vm2, %v1907_v62  ;;  %v2849_v61 = vpop.f32.mrb[39].mxu0  ;;  %v5070_v17 = vpop.eup %5069  ;;  %v2575_v24 = vmul.f32 %v5068_v39, %v6023_v4  ;;  %5081 = vrcp.f32 %v2562_v59  ;;  %v2880_v18 = vmul.f32 0.25, %v4770_v15  ;;  %v2891_v46 = vsel %vm945_vm1, %v6078_v28, -inf }
 0x7ff   : > { %4735 = vmatprep.subr.bf16.mxu1 %v2589_v27  ;;  %v6074_v40 = vmul.f32 0.25, %v2849_v61  ;;  %v2885_v8 = vsel %vm945_vm1, %v6070_v54, -inf  ;;  %v2574_v51 = vmul.f32 %v5070_v17, %v6019_v34  ;;  %v5072_v0 = vpop.eup %5071  ;;  %v2593_v9 = vpop.permute.xlu1 %2592 }
 0x800   : > { %2886 = vmax.xlane.f32.xlu1 %v2885_v8  ;;  %v2577_v60 = vmul.f32 %v5072_v0, %v6021_v55  ;;  %v2894_v14 = vsel %vm945_vm1, %v2880_v18, -inf }
 0x801   : > { %v2888_v16 = vsel %vm945_vm1, %v6074_v40, -inf  ;;  %v2582_v58 = vpack.c.bf16 %v2575_v24, %v2574_v51 }
 0x802   : > { %4736 = vmatpush3.bf16.msra.mxu1 %v2589_v27  ;;  %2889 = vmax.xlane.f32.xlu0 %v2888_v16  ;;  %v4929_v27 = vld [vmem:[%s6647_s13 + $0x10] sm:$0xff]  }
 0x803   : > { %4737 = vmatprep.subr.bf16.mxu1 %v2591_v12  ;;  %v4773_v62 = vpop.f32.mrb[40].mxu0 }
 0x804   : > { %v2862_v26 = vpop.f32.mrb[41].mxu0  ;;  %v5074_v19 = vpop.eup %5073  ;;  %v2883_v56 = vmul.f32 0.25, %v4773_v62 }
 0x805   : > { %v6084_v53 = vmul.f32 0.25, %v2862_v26  ;;  %4714 = vmatmul.mubr.msk.bf16.gmra.mrb[52].mxu1 %vm1634_vm2, %v1908_v31  ;;  %v4774_v4 = vpop.f32.mrb[42].mxu0  ;;  %v5076_v50 = vpop.eup %5075  ;;  %v2579_v1 = vmul.f32 %v5074_v19, %v6046_v48 }
 0x806   : > { %4738 = vmatpush3.bf16.msra.mxu1 %v2591_v12  ;;  %v2865_v34 = vpop.f32.mrb[43].mxu0  ;;  %2892 = vmax.xlane.f32.xlu0 %v2891_v46  ;;  %v5078_v20 = vpop.eup %5077  ;;  %v2576_v31 = vmul.f32 %v5076_v50, %v6015_v33  ;;  %v2903_v11 = vsel %vm945_vm1, %v2883_v56, -inf  ;;  %v2884_v10 = vmul.f32 0.25, %v4774_v4 }
 0x807   : > { %4739 = vmatprep.subr.bf16.mxu1 %v2593_v9  ;;  %4741 = vmatprep.mubr.msk.bf16.mxu1 %vm945_vm1, %v2582_v58  ;;  %v2897_v29 = vsel %vm945_vm1, %v6084_v53, -inf  ;;  %v6098_v42 = vmul.f32 0.25, %v2865_v34  ;;  %v2578_v55 = vmul.f32 %v5078_v20, %v6035_v38  ;;  %v5080_v32 = vpop.eup %5079 }
 0x808   : > { %2898 = vmax.xlane.f32.xlu1 %v2897_v29  ;;  %v2583_v59 = vpack.c.bf16 %v2577_v60, %v2576_v31  ;;  %v5082_v48 = vpop.eup %5081  ;;  %v2581_v23 = vmul.f32 %v5080_v32, %v6037_v35  ;;  %v2906_v38 = vsel %vm945_vm1, %v2884_v10, -inf }
 0x809   : > { %v2584_v30 = vpack.c.bf16 %v2579_v1, %v2578_v55  ;;  %v2900_v33 = vsel %vm945_vm1, %v6098_v42, -inf  ;;  %v2580_v15 = vmul.f32 %v5082_v48, %v6029_v22 }
 0x80a   : > { %4740 = vmatpush3.bf16.msra.mxu1 %v2593_v9  ;;  %2895 = vmax.xlane.f32.xlu0 %v2894_v14 }
 0x80b   : > { %v2585_v39 = vpack.c.bf16 %v2581_v23, %v2580_v15  ;;  %4749 = vmatprep.subr.bf16.mxu1 %v4929_v27 }
 0x80c   : > { %2904 = vmax.xlane.f32.xlu1 %v2903_v11 }
 0x80d   : > { %4742 = vmatmul.mubr.msk.bf16.vlgmr.msra.gmra.mrb[56].mxu1 %vm945_vm1, %v2583_v59 }
 0x80e   : > { %2901 = vmax.xlane.f32.xlu0 %v2900_v33  ;;  %4745 = vmatprep.mubr.msk.bf16.mxu1 %vm945_vm1, %v2584_v30 }
 0x80f   : > { %4750 = vmatpush3.bf16.msra.mxu1 %v4929_v27 }
 0x812   : > { %2907 = vmax.xlane.f32.xlu0 %v2906_v38 }
 0x815   : > { %4746 = vmatmul.mubr.msk.bf16.gmra.mrb[60].mxu1 %vm945_vm1, %v2585_v39 }
 0x81d   : > { %2977 = vrot.lane.b32.xlu1 %v5650_v43, %s5197_s29 }
 0x821   : > { %2979 = vrot.lane.b32.xlu1 %v5660_v63, %s5197_s29 }
 0x88d   : > { %v2887_v35 = vpop.xlane.xlu1 %2886 }
 0x88e   : > { %v2909_v22 = vsub.f32 %v6070_v54, %v2887_v35 }
 0x88f   : > { %v2890_v61 = vpop.xlane.xlu0 %2889 }
 0x890   : > { %v2917_v16 = vmul.f32 1.442695, %v2909_v22  ;;  %v2910_v24 = vsub.f32 %v6074_v40, %v2890_v61 }
 0x892   : > { %v2919_v26 = vmul.f32 1.442695, %v2910_v24 }
 0x893   : > { %v2893_v8 = vpop.xlane.xlu0 %2892 }
 0x894   : > { %v2911_v17 = vsub.f32 %v6078_v28, %v2893_v8 }
 0x895   : > { %v2899_v12 = vpop.xlane.xlu1 %2898 }
 0x896   : > { %v2921_v62 = vmul.f32 1.442695, %v2911_v17  ;;  %v2913_v54 = vsub.f32 %v6084_v53, %v2899_v12 }
 0x897   : > { %v2896_v51 = vpop.xlane.xlu0 %2895 }
 0x898   : > { %5083 = vpow2.f32 %v2921_v62  ;;  %v2912_v43 = vsub.f32 %v2880_v18, %v2896_v51  ;;  %v2925_v40 = vmul.f32 1.442695, %v2913_v54 }
 0x899   : > { %v2905_v0 = vpop.xlane.xlu1 %2904  ;;  %5085 = vpow2.f32 %v2917_v16 }
 0x89a   : > { %v2923_v19 = vmul.f32 1.442695, %v2912_v43  ;;  %v2915_v63 = vsub.f32 %v2883_v56, %v2905_v0 }
 0x89b   : > { %v2902_v4 = vpop.xlane.xlu0 %2901 }
 0x89c   : > { %5087 = vpow2.f32 %v2923_v19  ;;  %v2929_v28 = vmul.f32 1.442695, %v2915_v63  ;;  %v2914_v60 = vsub.f32 %v6098_v42, %v2902_v4 }
 0x89d   : > { %v2978_v46 = vpop.permute.xlu1 %2977  ;;  %5089 = vpow2.f32 %v2919_v26 }
 0x89e   : > { %4775 = vmatprep.subr.bf16.mxu1 %v2978_v46  ;;  %5091 = vpow2.f32 %v2929_v28  ;;  %v2927_v31 = vmul.f32 1.442695, %v2914_v60 }
 0x89f   : > { %v2908_v58 = vpop.xlane.xlu0 %2907  ;;  %5093 = vpow2.f32 %v2925_v40 }
 0x8a0   : > { %v2916_v9 = vsub.f32 %v2884_v10, %v2908_v58 }
 0x8a1   : > { %v2980_v35 = vpop.permute.xlu1 %2979 }
 0x8a2   : > { %v6122_v50 = vpop.eup %5083  ;;  %v2931_v53 = vmul.f32 1.442695, %v2916_v9 }
 0x8a3   : > { %v2939_v18 = vsel %vm945_vm1, %v6122_v50, 0.0  ;;  %v6126_v34 = vpop.eup %5085 }
 0x8a4   : > { %2940 = vadd.xlane.f32.xlu1 %v2939_v18  ;;  %v2933_v56 = vsel %vm945_vm1, %v6126_v34, 0.0  ;;  %5095 = vpow2.f32 %v2931_v53 }
 0x8a5   : > { %5097 = vpow2.f32 %v2927_v31 }
 0x8a6   : > { %v6128_v20 = vpop.eup %5087 }
 0x8a7   : > { %v2942_v29 = vsel %vm945_vm1, %v6128_v20, 0.0  ;;  %v5090_v1 = vpop.eup %5089 }
 0x8a8   : > { %2934 = vadd.xlane.f32.xlu1 %v2933_v56  ;;  %2943 = vadd.xlane.f32.xlu0 %v2942_v29  ;;  %v2936_v14 = vsel %vm945_vm1, %v5090_v1, 0.0  ;;  %v6136_v55 = vpop.eup %5091 }
 0x8a9   : > { %v2951_v42 = vsel %vm945_vm1, %v6136_v55, 0.0  ;;  %v6140_v59 = vpop.eup %5093 }
 0x8aa   : > { %v2945_v11 = vsel %vm945_vm1, %v6140_v59, 0.0 }
 0x8ac   : > { %2937 = vadd.xlane.f32.xlu0 %v2936_v14 }
 0x8ae   : > { %v6144_v32 = vpop.eup %5095 }
 0x8af   : > { %v2954_v30 = vsel %vm945_vm1, %v6144_v32, 0.0  ;;  %v6148_v10 = vpop.eup %5097 }
 0x8b0   : > { %2952 = vadd.xlane.f32.xlu0 %v2951_v42  ;;  %v2948_v33 = vsel %vm945_vm1, %v6148_v10, 0.0 }
 0x8b4   : > { %2946 = vadd.xlane.f32.xlu0 %v2945_v11 }
 0x8b8   : > { %2955 = vadd.xlane.f32.xlu0 %v2954_v30 }
 0x8b9   : > { %2983 = vrot.lane.b32.xlu1 %v5677_v21, %s5197_s29 }
 0x8bc   : > { %2949 = vadd.xlane.f32.xlu0 %v2948_v33 }
 0x8d2   : > { %2981 = vrot.lane.b32.xlu0 %v5668_v13, %s5197_s29 }
 0x8e0   : > { %v4743_v48 = vpop.f32.mrb[56].mxu1 }
 0x8e1   : > { %v2644_v23 = vpop.f32.mrb[57].mxu1 }
 0x8e2   : > { %v4744_v38 = vpop.f32.mrb[58].mxu1 }
 0x8e3   : > { %v2676_v15 = vpack.c.bf16 %v4744_v38, %v4743_v48  ;;  %v2647_v39 = vpop.f32.mrb[59].mxu1 }
 0x8e4   : > { %v2675_v27 = vpack.c.bf16 %v2647_v39, %v2644_v23 }
 0x8e6   : > { %4751 = vmatprep.mubr.msk.bf16.mxu1 %vm1634_vm2, %v2675_v27 }
 0x8e7   : > { %4752 = vmatmul.mubr.msk.bf16.vlgmr.msra.gmra.mrb[48].mxu1 %vm1634_vm2, %v2676_v15 }
 0x8e8   : > { %4776 = vmatpush3.bf16.msra.mxu1 %v2978_v46  ;;  %v4747_v21 = vpop.f32.mrb[60].mxu1 }
 0x8e9   : > { %4777 = vmatprep.subr.bf16.mxu1 %v2980_v35  ;;  %v2660_v61 = vpop.f32.mrb[61].mxu1 }
 0x8ea   : > { %v4748_v22 = vpop.f32.mrb[62].mxu1 }
 0x8eb   : > { %v2678_v8 = vpack.c.bf16 %v4748_v22, %v4747_v21  ;;  %v2663_v17 = vpop.f32.mrb[63].mxu1 }
 0x8ec   : > { %v2677_v12 = vpack.c.bf16 %v2663_v17, %v2660_v61  ;;  %4778 = vmatpush3.bf16.msra.mxu1 %v2980_v35  ;;  %v6183_v17 = vrot.slane %v5621_v57, %v5603_v37 }
 0x8ee   : > { %4755 = vmatprep.mubr.msk.bf16.mxu1 %vm1634_vm2, %v2677_v12 }
 0x8ef   : > { %4756 = vmatmul.mubr.msk.bf16.gmra.mrb[52].mxu1 %vm1634_vm2, %v2678_v8 }
 0x931   : > { %v2941_v13 = vpop.xlane.xlu1 %2940 }
 0x935   : > { %v2935_v16 = vpop.xlane.xlu1 %2934  ;;  %v2944_v24 = vpop.xlane.xlu0 %2943 }
 0x936   : > { %5099 = vrcp.f32 %v2935_v16 }
 0x939   : > { %v2938_v62 = vpop.xlane.xlu0 %2937  ;;  %v2984_v9 = vpop.permute.xlu1 %2983 }
 0x93a   : > { %5101 = vrcp.f32 %v2938_v62 }
 0x93b   : > { %5103 = vrcp.f32 %v2944_v24 }
 0x93c   : > { %5105 = vrcp.f32 %v2941_v13 }
 0x93d   : > { %v2953_v51 = vpop.xlane.xlu0 %2952 }
 0x940   : > { %v5100_v0 = vpop.eup %5099 }
 0x941   : > { %v2947_v43 = vpop.xlane.xlu0 %2946  ;;  %v2965_v63 = vmul.f32 %v5100_v0, %v6126_v34  ;;  %v4930_v34 = vld [vmem:[%s6647_s13 + $0x18] sm:$0xff]  }
 0x942   : > { %5107 = vrcp.f32 %v2947_v43 }
 0x944   : > { %v5102_v26 = vpop.eup %5101 }
 0x945   : > { %v2956_v19 = vpop.xlane.xlu0 %2955  ;;  %v2966_v4 = vmul.f32 %v5102_v26, %v5090_v1  ;;  %v5104_v28 = vpop.eup %5103 }
 0x946   : > { %v5106_v40 = vpop.eup %5105  ;;  %v2968_v18 = vmul.f32 %v5104_v28, %v6128_v20 }
 0x947   : > { %v2973_v46 = vpack.c.bf16 %v2966_v4, %v2965_v63  ;;  %v2967_v53 = vmul.f32 %v5106_v40, %v6122_v50 }
 0x949   : > { %4783 = vmatprep.mubr.msk.bf16.mxu1 %vm945_vm1, %v2973_v46  ;;  %v2950_v54 = vpop.xlane.xlu0 %2949  ;;  %v2974_v29 = vpack.c.bf16 %v2968_v18, %v2967_v53 }
 0x94a   : > { %5109 = vrcp.f32 %v2950_v54 }
 0x94b   : > { %5111 = vrcp.f32 %v2956_v19 }
 0x94c   : > { %5113 = vrcp.f32 %v2953_v51  ;;  %v5108_v60 = vpop.eup %5107 }
 0x94d   : > { %v2982_v58 = vpop.permute.xlu0 %2981  ;;  %v2969_v31 = vmul.f32 %v5108_v60, %v6140_v59 }
 0x94e   : > { %4779 = vmatprep.subr.bf16.mxu1 %v2982_v58 }
 0x94f   : > { %4780 = vmatpush3.bf16.msra.mxu1 %v2982_v58 }
 0x950   : > { %4781 = vmatprep.subr.bf16.mxu1 %v2984_v9 }
 0x953   : > { %4782 = vmatpush3.bf16.msra.mxu1 %v2984_v9 }
 0x954   : > { %v5110_v56 = vpop.eup %5109  ;;  %4791 = vmatprep.subr.bf16.mxu1 %v4930_v34 }
 0x955   : > { %v5112_v1 = vpop.eup %5111  ;;  %v2970_v14 = vmul.f32 %v5110_v56, %v6148_v10 }
 0x956   : > { %4784 = vmatmul.mubr.msk.bf16.vlgmr.msra.gmra.mrb[64].mxu1 %vm945_vm1, %v2974_v29  ;;  %v5114_v20 = vpop.eup %5113  ;;  %v2972_v11 = vmul.f32 %v5112_v1, %v6144_v32 }
 0x957   : > { %v2975_v42 = vpack.c.bf16 %v2970_v14, %v2969_v31  ;;  %4792 = vmatpush3.bf16.msra.mxu1 %v4930_v34  ;;  %v2971_v50 = vmul.f32 %v5114_v20, %v6136_v55  ;;  %v4354_v55 = vld [vmem:[%s6648_s14] ss:$0 sm:$0xff] }
 0x959   : > { %4787 = vmatprep.mubr.msk.bf16.mxu1 %vm945_vm1, %v2975_v42  ;;  %v2976_v30 = vpack.c.bf16 %v2972_v11, %v2971_v50 }
 0x95e   : > { %4788 = vmatmul.mubr.msk.bf16.gmra.mrb[68].mxu1 %vm945_vm1, %v2976_v30 }
 0xa29   : > { %v4785_v33 = vpop.f32.mrb[64].mxu1 }
 0xa2a   : > { %v3035_v48 = vpop.f32.mrb[65].mxu1 }
 0xa2b   : > { %v4786_v23 = vpop.f32.mrb[66].mxu1 }
 0xa2c   : > { %v3067_v59 = vpack.c.bf16 %v4786_v23, %v4785_v33  ;;  %v3038_v38 = vpop.f32.mrb[67].mxu1 }
 0xa2d   : > { %v3066_v10 = vpack.c.bf16 %v3038_v38, %v3035_v48 }
 0xa2f   : > { %4793 = vmatprep.mubr.msk.bf16.mxu1 %vm1634_vm2, %v3066_v10 }
 0xa30   : > { %4794 = vmatmul.mubr.msk.bf16.vlgmr.msra.gmra.mrb[48].mxu1 %vm1634_vm2, %v3067_v59 }
 0xa31   : > { %v4789_v15 = vpop.f32.mrb[68].mxu1 }
 0xa32   : > { %v3051_v39 = vpop.f32.mrb[69].mxu1 }
 0xa33   : > { %v4790_v32 = vpop.f32.mrb[70].mxu1 }
 0xa34   : > { %v3069_v27 = vpack.c.bf16 %v4790_v32, %v4789_v15  ;;  %v3054_v35 = vpop.f32.mrb[71].mxu1 }
 0xa35   : > { %v3068_v21 = vpack.c.bf16 %v3054_v35, %v3051_v39 }
 0xa37   : > { %4797 = vmatprep.mubr.msk.bf16.mxu1 %vm1634_vm2, %v3068_v21 }
 0xa38   : > { %4798 = vmatmul.mubr.msk.bf16.gmra.mrb[52].mxu1 %vm1634_vm2, %v3069_v27 }
 0xb03   : > { %v4795_v61 = vpop.f32.mrb[48].mxu1 }
 0xb04   : > { %v3172_v22 = vadd.f32 %v4795_v61, %v4354_v55  ;;  %v3124_v8 = vpop.f32.mrb[49].mxu1 }
 0xb05   : > { %v3170_v12 = vadd.f32 %v4354_v55, %v3124_v8  ;;  %v4796_v13 = vpop.f32.mrb[50].mxu1 }
 0xb06   : > { %v3173_v16 = vadd.f32 %v4796_v13, %v4354_v55  ;;  %v3127_v24 = vpop.f32.mrb[51].mxu1  ;;  %v3184_v62 = vmul.f32 %v6183_v17, %v3172_v22 }
 0xb07   : > { %v3182_v51 = vmul.f32 %v6183_v17, %v3170_v12  ;;  %v3171_v43 = vadd.f32 %v4354_v55, %v3127_v24 }
 0xb08   : > { %v3185_v19 = vmul.f32 %v6183_v17, %v3173_v16  ;;  %v6193_v63 = vadd.f32 %v3184_v62, %v5421_v41 }
 0xb09   : > { %v6188_v0 = vadd.f32 %v3182_v51, %v5426_v45  ;;  %v3183_v26 = vmul.f32 %v6183_v17, %v3171_v43 }
 0xb0a   : > { %v6203_v40 = vadd.f32 %v3185_v19, %v5428_v47  ;;  %v3204_v60 = vsel %vm945_vm1, %v6193_v63, 0.0 }
 0xb0b   : > { %v6196_v57 = vadd.f32 %v3183_v26, %v5432_v49  ;;  %v4799_v4 = vpop.f32.mrb[52].mxu1  ;;  %v3198_v46 = vsel %vm945_vm1, %v6188_v0, 0.0 }
 0xb0c   : > { %3199 = vadd.xlane.f32.xlu1 %v3198_v46  ;;  %v3140_v54 = vpop.f32.mrb[53].mxu1  ;;  %v3176_v18 = vadd.f32 %v4799_v4, %v4354_v55  ;;  %v3207_v31 = vsel %vm945_vm1, %v6203_v40, 0.0 }
 0xb0d   : > { %v3174_v28 = vadd.f32 %v4354_v55, %v3140_v54  ;;  %v4800_v58 = vpop.f32.mrb[54].mxu1  ;;  %v3201_v45 = vsel %vm945_vm1, %v6196_v57, 0.0 }
 0xb0e   : > { %v3177_v9 = vadd.f32 %v4800_v58, %v4354_v55  ;;  %3202 = vadd.xlane.f32.xlu0 %v3201_v45  ;;  %v3143_v41 = vpop.f32.mrb[55].mxu1  ;;  %v3188_v29 = vmul.f32 %v6183_v17, %v3176_v18 }
 0xb0f   : > { %v3186_v49 = vmul.f32 %v6183_v17, %v3174_v28  ;;  %v3175_v34 = vadd.f32 %v4354_v55, %v3143_v41 }
 0xb10   : > { %3205 = vadd.xlane.f32.xlu1 %v3204_v60  ;;  %v3189_v53 = vmul.f32 %v6183_v17, %v3177_v9  ;;  %v6225_v42 = vadd.f32 %v3188_v29, %v5452_v2  ;;  %v4933_v60 = vld [vmem:[%s6649_s15 + $0x4] ss:$8 sps:$4 sm:$0xff]   ;;  %v4934_v29 = vld [vmem:[%s6649_s15 + $0x10] ss:$8 sps:$4 sm:$0xff]  }
 0xb11   : > { %v3187_v56 = vmul.f32 %v6183_v17, %v3175_v34  ;;  %v6212_v47 = vadd.f32 %v3186_v49, %v5454_v3  ;;  %3403 = vmatprep.subr.bf16.mxu0 %v4933_v60 }
 0xb12   : > { %v6220_v14 = vadd.f32 %v3189_v53, %v5456_v6  ;;  %v3216_v11 = vsel %vm945_vm1, %v6225_v42, 0.0  ;;  %v4931_v53 = vld [vmem:[%s6649_s15] ss:$8 sps:$4 sm:$0xff]  }
 0xb13   : > { %v6215_v1 = vadd.f32 %v3187_v56, %v5458_v7  ;;  %v3210_v3 = vsel %vm945_vm1, %v6212_v47, 0.0  ;;  %3404 = vmatpush1.bf16.msra.mxu0 %v4931_v53  ;;  %v4936_v56 = vld [vmem:[%s6649_s15 + $0x14] ss:$8 sps:$4 sm:$0xff]  }
 0xb14   : > { %3208 = vadd.xlane.f32.xlu1 %v3207_v31  ;;  %v3219_v7 = vsel %vm945_vm1, %v6220_v14, 0.0  ;;  %3405 = vmatprep.subr.bf16.mxu0 %v4936_v56  ;;  %v4939_v31 = vld [vmem:[%s6649_s15 + $0x24] ss:$8 sps:$4 sm:$0xff]  }
 0xb15   : > { %v3213_v20 = vsel %vm945_vm1, %v6215_v1, 0.0 }
 0xb16   : > { %3214 = vadd.xlane.f32.xlu0 %v3213_v20  ;;  %v4937_v20 = vld [vmem:[%s6649_s15 + $0x20] ss:$8 sps:$4 sm:$0xff]  }
 0xb17   : > { %3406 = vmatpush1.bf16.msra.mxu0 %v4934_v29 }
 0xb18   : > { %3211 = vadd.xlane.f32.xlu1 %v3210_v3  ;;  %3407 = vmatprep.subr.bf16.mxu0 %v4939_v31  ;;  %v4942_v3 = vld [vmem:[%s6649_s15 + $0x34] ss:$8 sps:$4 sm:$0xff]  }
 0xb1a   : > { %3220 = vadd.xlane.f32.xlu0 %v3219_v7  ;;  %v4940_v7 = vld [vmem:[%s6649_s15 + $0x30] ss:$8 sps:$4 sm:$0xff]  }
 0xb1b   : > { %3408 = vmatpush1.bf16.msra.mxu0 %v4937_v20 }
 0xb1c   : > { %3217 = vadd.xlane.f32.xlu1 %v3216_v11  ;;  %3409 = vmatprep.subr.bf16.mxu0 %v4942_v3  ;;  %v1173_v11 = vsub.s32 2, %v5600_v36 }
 0xb1f   : > { %3410 = vmatpush1.bf16.msra.mxu0 %v4940_v7 }
 0xb99   : > { %v3200_v6 = vpop.xlane.xlu1 %3199 }
 0xb9a   : > { %v3222_v50 = vmul.f32 0.015625, %v3200_v6 }
 0xb9b   : > { %v3203_v30 = vpop.xlane.xlu0 %3202 }
 0xb9c   : > { %v6234_v33 = vsub.f32 %v6188_v0, %v3222_v50  ;;  %v3223_v2 = vmul.f32 0.015625, %v3203_v30 }
 0xb9d   : > { %v3206_v48 = vpop.xlane.xlu1 %3205 }
 0xb9e   : > { %v6237_v23 = vsub.f32 %v6196_v57, %v3223_v2  ;;  %v3224_v59 = vmul.f32 0.015625, %v3206_v48  ;;  %v3238_v38 = vmul.f32 %v6234_v33, %v6234_v33 }
 0xba0   : > { %v6242_v10 = vsub.f32 %v6193_v63, %v3224_v59  ;;  %v3246_v15 = vsel %vm945_vm1, %v3238_v38, 0.0  ;;  %v3239_v39 = vmul.f32 %v6237_v23, %v6237_v23 }
 0xba1   : > { %v3209_v32 = vpop.xlane.xlu1 %3208  ;;  %3247 = vadd.xlane.f32.xlu1 %v3246_v15 }
 0xba2   : > { %v3225_v27 = vmul.f32 0.015625, %v3209_v32  ;;  %v3249_v35 = vsel %vm945_vm1, %v3239_v39, 0.0  ;;  %v3240_v21 = vmul.f32 %v6242_v10, %v6242_v10 }
 0xba3   : > { %3250 = vadd.xlane.f32.xlu0 %v3249_v35  ;;  %v3215_v55 = vpop.xlane.xlu0 %3214 }
 0xba4   : > { %v6251_v61 = vsub.f32 %v6203_v40, %v3225_v27  ;;  %v3227_v22 = vmul.f32 0.015625, %v3215_v55  ;;  %v3252_v8 = vsel %vm945_vm1, %v3240_v21, 0.0 }
 0xba5   : > { %3253 = vadd.xlane.f32.xlu1 %v3252_v8  ;;  %v3212_v12 = vpop.xlane.xlu1 %3211 }
 0xba6   : > { %v6255_v13 = vsub.f32 %v6215_v1, %v3227_v22  ;;  %v3226_v16 = vmul.f32 0.015625, %v3212_v12  ;;  %v3241_v24 = vmul.f32 %v6251_v61, %v6251_v61 }
 0xba7   : > { %v3221_v62 = vpop.xlane.xlu0 %3220 }
 0xba8   : > { %v6260_v51 = vsub.f32 %v6212_v47, %v3226_v16  ;;  %v3229_v43 = vmul.f32 0.015625, %v3221_v62  ;;  %v3255_v26 = vsel %vm945_vm1, %v3241_v24, 0.0  ;;  %v3243_v19 = vmul.f32 %v6255_v13, %v6255_v13 }
 0xba9   : > { %v3218_v4 = vpop.xlane.xlu1 %3217  ;;  %3256 = vadd.xlane.f32.xlu0 %v3255_v26 }
 0xbaa   : > { %v6266_v46 = vsub.f32 %v6220_v14, %v3229_v43  ;;  %v3228_v54 = vmul.f32 0.015625, %v3218_v4  ;;  %v3242_v28 = vmul.f32 %v6260_v51, %v6260_v51  ;;  %v3261_v9 = vsel %vm945_vm1, %v3243_v19, 0.0 }
 0xbac   : > { %v6271_v58 = vsub.f32 %v6225_v42, %v3228_v54  ;;  %v3258_v45 = vsel %vm945_vm1, %v3242_v28, 0.0  ;;  %v3245_v41 = vmul.f32 %v6266_v46, %v6266_v46 }
 0xbad   : > { %3259 = vadd.xlane.f32.xlu1 %v3258_v45  ;;  %3262 = vadd.xlane.f32.xlu0 %v3261_v9 }
 0xbae   : > { %v3244_v18 = vmul.f32 %v6271_v58, %v6271_v58  ;;  %v3267_v34 = vsel %vm945_vm1, %v3245_v41, 0.0 }
 0xbb0   : > { %v3264_v49 = vsel %vm945_vm1, %v3244_v18, 0.0 }
 0xbb1   : > { %3265 = vadd.xlane.f32.xlu1 %v3264_v49  ;;  %3268 = vadd.xlane.f32.xlu0 %v3267_v34 }
 0xbc2   : > { %3316 = vrot.lane.b32.xlu1 %v6183_v17, %s5191_s24  ;;  %v5179_v17 = vld [vmem:[%s6644_s10] sm:$0x7] }
 0xbc3   : > { %v1174_v59 = vrot.slane %v5179_v17, %v1173_v11 }
 0xbc5   : > { %v6312_v27 = vadd.f32 %v5625_v5, %v1174_v59 }
 0xbc7   : > { %v3302_v55 = vadd.f32 1.0, %v6312_v27 }
 0xbc9   : > { %v3306_v26 = vrot.slane %v3302_v55, %v5603_v37 }
 0xc2e   : > { %v3248_v6 = vpop.xlane.xlu1 %3247 }
 0xc2f   : > { %v3270_v50 = vmul.f32 0.015625, %v3248_v6 }
 0xc30   : > { %v3251_v30 = vpop.xlane.xlu0 %3250 }
 0xc31   : > { %v3278_v2 = vadd.f32 1e-06, %v3270_v50  ;;  %v3271_v48 = vmul.f32 0.015625, %v3251_v30 }
 0xc32   : > { %v3254_v38 = vpop.xlane.xlu1 %3253 }
 0xc33   : > { %5115 = vrsqrt.f32 %v3278_v2  ;;  %v3279_v15 = vadd.f32 1e-06, %v3271_v48  ;;  %v3272_v39 = vmul.f32 0.015625, %v3254_v38 }
 0xc35   : > { %5117 = vrsqrt.f32 %v3279_v15  ;;  %v3280_v32 = vadd.f32 1e-06, %v3272_v39 }
 0xc36   : > { %v3257_v36 = vpop.xlane.xlu0 %3256 }
 0xc37   : > { %5119 = vrsqrt.f32 %v3280_v32  ;;  %v3273_v35 = vmul.f32 0.015625, %v3257_v36 }
 0xc39   : > { %v3281_v21 = vadd.f32 1e-06, %v3273_v35 }
 0xc3a   : > { %v3260_v22 = vpop.xlane.xlu1 %3259  ;;  %v3263_v8 = vpop.xlane.xlu0 %3262 }
 0xc3b   : > { %5121 = vrsqrt.f32 %v3281_v21  ;;  %v3274_v12 = vmul.f32 0.015625, %v3260_v22  ;;  %v3275_v16 = vmul.f32 0.015625, %v3263_v8  ;;  %v4945_v8 = vld [vmem:[%s6651_s17 + $0x48] sm:$0xff]  }
 0xc3d   : > { %v5116_v24 = vpop.eup %5115  ;;  %v3282_v62 = vadd.f32 1e-06, %v3274_v12  ;;  %v3283_v43 = vadd.f32 1e-06, %v3275_v16  ;;  %v4947_v12 = vld [vmem:[%s6651_s17 + $0x50] sm:$0xff]  }
 0xc3e   : > { %v3294_v19 = vmul.f32 %v5116_v24, %v6234_v33  ;;  %v3266_v5 = vpop.xlane.xlu1 %3265  ;;  %v3269_v4 = vpop.xlane.xlu0 %3268  ;;  %v4948_v16 = vld [vmem:[%s6651_s17 + $0x10] sm:$0xff]   ;;  %v4949_v24 = vld [vmem:[%s6651_s17 + $0x58] sm:$0xff]  }
 0xc3f   : > { %v5118_v54 = vpop.eup %5117  ;;  %5123 = vrsqrt.f32 %v3282_v62  ;;  %v3276_v28 = vmul.f32 0.015625, %v3266_v5  ;;  %v3277_v45 = vmul.f32 0.015625, %v3269_v4  ;;  %v4950_v62 = vld [vmem:[%s6651_s17 + $0x18] sm:$0xff]   ;;  %v4954_v5 = vld [vmem:[%s6651_s17 + $0x28] sm:$0xff]   ;;  %v4955_v4 = vld [vmem:[%s6651_s17 + $0x70] sm:$0xff]  }
 0xc40   : > { %v3307_v9 = vmul.f32 %v3306_v26, %v3294_v19  ;;  %v3295_v41 = vmul.f32 %v5118_v54, %v6237_v23  ;;  %5125 = vrsqrt.f32 %v3283_v43  ;;  %v4951_v43 = vld [vmem:[%s6651_s17 + $0x60] sm:$0xff]   ;;  %v4953_v19 = vld [vmem:[%s6651_s17 + $0x68] sm:$0xff]   ;;  %v4956_v54 = vld [vmem:[%s6651_s17 + $0x30] sm:$0xff]  }
 0xc41   : > { %v5120_v18 = vpop.eup %5119  ;;  %v3284_v49 = vadd.f32 1e-06, %v3276_v28  ;;  %v3285_v34 = vadd.f32 1e-06, %v3277_v45  ;;  %v4957_v28 = vld [vmem:[%s6651_s17 + $0x78] sm:$0xff]  }
 0xc42   : > { %v3308_v60 = vmul.f32 %v3306_v26, %v3295_v41  ;;  %v3317_v53 = vpop.permute.xlu1 %3316  ;;  %v3296_v29 = vmul.f32 %v5120_v18, %v6242_v10  ;;  %v4958_v45 = vld [vmem:[%s6651_s17 + $0x38] sm:$0xff]  }
 0xc43   : > { %v3319_v56 = vadd.f32 %v3317_v53, %v3307_v9  ;;  %5127 = vrsqrt.f32 %v3284_v49  ;;  %v3339_v9 = vld [vmem:[%s6650_s16] sm:$0x3] }
 0xc44   : > { %v3320_v33 = vadd.f32 %v3317_v53, %v3308_v60  ;;  %5129 = vrsqrt.f32 %v3285_v34  ;;  %v3309_v7 = vmul.f32 %v3306_v26, %v3296_v29  ;;  %v6383_v41 = vrot.slane %v3339_v9, %v5603_v37 }
 0xc45   : > { %v5122_v31 = vpop.eup %5121  ;;  %v6386_v18 = vrot.slane %v3339_v9, %v5615_v44 }
 0xc46   : > { %v3297_v20 = vmul.f32 %v5122_v31, %v6251_v61  ;;  %v3327_v3 = vpack.c.bf16 %v3320_v33, %v3319_v56  ;;  %v3321_v2 = vadd.f32 %v3317_v53, %v3309_v7 }
 0xc48   : > { %4363 = vmatmul.mubr.msk.bf16.vlgmr.msra.gmra.mrb[44].mxu0 %vm945_vm1, %v3327_v3  ;;  %v3310_v23 = vmul.f32 %v3306_v26, %v3297_v20 }
 0xc49   : > { %v5124_v11 = vpop.eup %5123  ;;  %3445 = vmatprep.mubr.bf16.mxu0 %v5190_v25 }
 0xc4a   : > { %v5126_v6 = vpop.eup %5125  ;;  %v3298_v50 = vmul.f32 %v5124_v11, %v6260_v51  ;;  %v3322_v30 = vadd.f32 %v3317_v53, %v3310_v23 }
 0xc4b   : > { %v3299_v10 = vmul.f32 %v5126_v6, %v6255_v13 }
 0xc4c   : > { %v3328_v17 = vpack.c.bf16 %v3322_v30, %v3321_v2  ;;  %v3311_v59 = vmul.f32 %v3306_v26, %v3298_v50 }
 0xc4d   : > { %v5128_v48 = vpop.eup %5127  ;;  %v3312_v38 = vmul.f32 %v3306_v26, %v3299_v10 }
 0xc4e   : > { %v5130_v61 = vpop.eup %5129  ;;  %v3300_v15 = vmul.f32 %v5128_v48, %v6271_v58  ;;  %v3323_v32 = vadd.f32 %v3317_v53, %v3311_v59  ;;  %v4943_v58 = vld [vmem:[%s6651_s17 + $0x40] sm:$0xff]  }
 0xc4f   : > { %v3301_v39 = vmul.f32 %v5130_v61, %v6266_v46  ;;  %v3324_v36 = vadd.f32 %v3317_v53, %v3312_v38  ;;  %v4944_v46 = vld [vmem:[%s6651_s17] sm:$0xff]   ;;  %4513 = vmatprep.subr.bf16.mxu0 %v4943_v58 }
 0xc50   : > { %4364 = vmatmul.mubr.msk.bf16.gmra.mrb[48].mxu0 %vm945_vm1, %v3328_v17  ;;  %v3313_v35 = vmul.f32 %v3306_v26, %v3300_v15 }
 0xc51   : > { %3455 = vmatprep.mubr.bf16.mxu0 %v5190_v25  ;;  %v3329_v51 = vpack.c.bf16 %v3324_v36, %v3323_v32  ;;  %v3314_v21 = vmul.f32 %v3306_v26, %v3301_v39  ;;  %4514 = vmatpush3.bf16.msra.mxu0 %v4944_v46  ;;  %v4952_v26 = vld [vmem:[%s6651_s17 + $0x20] sm:$0xff]  }
 0xc52   : > { %v3325_v13 = vadd.f32 %v3317_v53, %v3313_v35  ;;  %4515 = vmatprep.subr.bf16.mxu0 %v4945_v8 }
 0xc53   : > { %v3326_v55 = vadd.f32 %v3317_v53, %v3314_v21 }
 0xc55   : > { %v3330_v22 = vpack.c.bf16 %v3326_v55, %v3325_v13 }
 0xc58   : > { %4365 = vmatmul.mubr.msk.bf16.gmra.mrb[52].mxu0 %vm945_vm1, %v3329_v51 }
 0xc59   : > { %3465 = vmatprep.mubr.bf16.mxu0 %v5190_v25  ;;  %v4946_v25 = vld [vmem:[%s6651_s17 + $0x8] sm:$0xff]  }
 0xc5a   : > { %4516 = vmatpush3.bf16.msra.mxu0 %v4946_v25 }
 0xc5b   : > { %4517 = vmatprep.subr.bf16.mxu0 %v4947_v12 }
 0xc5e   : > { %4518 = vmatpush3.bf16.msra.mxu0 %v4948_v16 }
 0xc5f   : > { %4519 = vmatprep.subr.bf16.mxu0 %v4949_v24 }
 0xc60   : > { %4366 = vmatmul.mubr.msk.bf16.gmra.mrb[56].mxu0 %vm945_vm1, %v3330_v22 }
 0xc62   : > { %4520 = vmatpush3.bf16.msra.mxu0 %v4950_v62 }
 0xc63   : > { %4521 = vmatprep.subr.bf16.mxu0 %v4951_v43 }
 0xc66   : > { %4522 = vmatpush3.bf16.msra.mxu0 %v4952_v26 }
 0xc67   : > { %4523 = vmatprep.subr.bf16.mxu0 %v4953_v19 }
 0xc6a   : > { %4524 = vmatpush3.bf16.msra.mxu0 %v4954_v5 }
 0xc6b   : > { %4525 = vmatprep.subr.bf16.mxu0 %v4955_v4 }
 0xc6e   : > { %4526 = vmatpush3.bf16.msra.mxu0 %v4956_v54 }
 0xc6f   : > { %4527 = vmatprep.subr.bf16.mxu0 %v4957_v28 }
 0xc72   : > { %4528 = vmatpush3.bf16.msra.mxu0 %v4958_v45 }
 0xd1b   : > { %v3437_v49 = vpop.f32.mrb[44].mxu0 }
 0xd1c   : > { %v6389_v34 = vadd.f32 %v3437_v49, %v6383_v41  ;;  %v3439_v60 = vpop.f32.mrb[45].mxu0 }
 0xd1d   : > { %v6392_v53 = vadd.f32 %v3439_v60, %v6386_v18  ;;  %v3441_v56 = vpop.f32.mrb[46].mxu0 }
 0xd1e   : > { %v3476_v29 = vmul.f32 %v6389_v34, %v6389_v34  ;;  %v6397_v33 = vadd.f32 %v3441_v56, %v6383_v41  ;;  %v3443_v31 = vpop.f32.mrb[47].mxu0 }
 0xd1f   : > { %v3477_v44 = vmul.f32 %v6392_v53, %v6392_v53  ;;  %v6402_v20 = vadd.f32 %v3443_v31, %v6386_v18 }
 0xd20   : > { %v3492_v3 = vmul.f32 %v3476_v29, %v6389_v34  ;;  %v3478_v7 = vmul.f32 %v6397_v33, %v6397_v33 }
 0xd21   : > { %v3493_v23 = vmul.f32 %v3477_v44, %v6392_v53  ;;  %v3479_v11 = vmul.f32 %v6402_v20, %v6402_v20 }
 0xd22   : > { %v3508_v6 = vmul.f32 0.044715, %v3492_v3  ;;  %v3494_v50 = vmul.f32 %v3478_v7, %v6397_v33 }
 0xd23   : > { %v3509_v30 = vmul.f32 0.044715, %v3493_v23  ;;  %v3495_v10 = vmul.f32 %v3479_v11, %v6402_v20  ;;  %v3447_v2 = vpop.f32.mrb[48].mxu0 }
 0xd24   : > { %v3524_v48 = vadd.f32 %v3508_v6, %v6389_v34  ;;  %v3510_v17 = vmul.f32 0.044715, %v3494_v50  ;;  %v6414_v59 = vadd.f32 %v3447_v2, %v6383_v41  ;;  %v3449_v38 = vpop.f32.mrb[49].mxu0 }
 0xd25   : > { %v3525_v61 = vadd.f32 %v3509_v30, %v6392_v53  ;;  %v3511_v15 = vmul.f32 0.044715, %v3495_v10  ;;  %v6418_v39 = vadd.f32 %v3449_v38, %v6386_v18  ;;  %v3451_v32 = vpop.f32.mrb[50].mxu0 }
 0xd26   : > { %v3540_v36 = vmul.f32 0.7978846, %v3524_v48  ;;  %v3526_v51 = vadd.f32 %v3510_v17, %v6397_v33  ;;  %v3480_v35 = vmul.f32 %v6414_v59, %v6414_v59  ;;  %v6424_v21 = vadd.f32 %v3451_v32, %v6383_v41  ;;  %v3453_v13 = vpop.f32.mrb[51].mxu0 }
 0xd27   : > { %v3541_v55 = vmul.f32 0.7978846, %v3525_v61  ;;  %v3527_v22 = vadd.f32 %v3511_v15, %v6402_v20  ;;  %v3481_v58 = vmul.f32 %v6418_v39, %v6418_v39  ;;  %v6430_v46 = vadd.f32 %v3453_v13, %v6386_v18 }
 0xd28   : > { %5131 = vtanh.f32 %v3540_v36  ;;  %v3542_v8 = vmul.f32 0.7978846, %v3526_v51  ;;  %v3496_v25 = vmul.f32 %v3480_v35, %v6414_v59  ;;  %v3482_v12 = vmul.f32 %v6424_v21, %v6424_v21 }
 0xd29   : > { %5133 = vtanh.f32 %v3541_v55  ;;  %v3543_v16 = vmul.f32 0.7978846, %v3527_v22  ;;  %v3497_v24 = vmul.f32 %v3481_v58, %v6418_v39  ;;  %v3483_v62 = vmul.f32 %v6430_v46, %v6430_v46 }
 0xd2a   : > { %5135 = vtanh.f32 %v3542_v8  ;;  %v3512_v43 = vmul.f32 0.044715, %v3496_v25  ;;  %v3498_v26 = vmul.f32 %v3482_v12, %v6424_v21 }
 0xd2b   : > { %v3513_v19 = vmul.f32 0.044715, %v3497_v24  ;;  %v3499_v5 = vmul.f32 %v3483_v62, %v6430_v46  ;;  %v3457_v4 = vpop.f32.mrb[52].mxu0  ;;  %5137 = vtanh.f32 %v3543_v16 }
 0xd2c   : > { %v3528_v54 = vadd.f32 %v3512_v43, %v6414_v59  ;;  %v3514_v28 = vmul.f32 0.044715, %v3498_v26  ;;  %v6442_v45 = vadd.f32 %v3457_v4, %v6383_v41  ;;  %v3459_v9 = vpop.f32.mrb[53].mxu0 }
 0xd2d   : > { %v3529_v49 = vadd.f32 %v3513_v19, %v6418_v39  ;;  %v3515_v60 = vmul.f32 0.044715, %v3499_v5  ;;  %v6446_v56 = vadd.f32 %v3459_v9, %v6386_v18  ;;  %v3461_v29 = vpop.f32.mrb[54].mxu0 }
 0xd2e   : > { %v3544_v31 = vmul.f32 0.7978846, %v3528_v54  ;;  %v3530_v44 = vadd.f32 %v3514_v28, %v6424_v21  ;;  %v3484_v3 = vmul.f32 %v6442_v45, %v6442_v45  ;;  %v6452_v7 = vadd.f32 %v3461_v29, %v6383_v41  ;;  %v3463_v23 = vpop.f32.mrb[55].mxu0 }
 0xd2f   : > { %v3545_v11 = vmul.f32 0.7978846, %v3529_v49  ;;  %v3531_v6 = vadd.f32 %v3515_v60, %v6430_v46  ;;  %v3485_v50 = vmul.f32 %v6446_v56, %v6446_v56  ;;  %v6458_v30 = vadd.f32 %v3463_v23, %v6386_v18 }
 0xd30   : > { %5139 = vtanh.f32 %v3544_v31  ;;  %v3546_v10 = vmul.f32 0.7978846, %v3530_v44  ;;  %v3500_v2 = vmul.f32 %v3484_v3, %v6442_v45  ;;  %v3486_v48 = vmul.f32 %v6452_v7, %v6452_v7 }
 0xd31   : > { %5141 = vtanh.f32 %v3545_v11  ;;  %v3547_v17 = vmul.f32 0.7978846, %v3531_v6  ;;  %v3501_v38 = vmul.f32 %v3485_v50, %v6446_v56  ;;  %v3487_v61 = vmul.f32 %v6458_v30, %v6458_v30 }
 0xd32   : > { %v5132_v15 = vpop.eup %5131  ;;  %5143 = vtanh.f32 %v3546_v10  ;;  %v3516_v32 = vmul.f32 0.044715, %v3500_v2  ;;  %v3502_v36 = vmul.f32 %v3486_v48, %v6452_v7 }
 0xd33   : > { %v5134_v51 = vpop.eup %5133  ;;  %v3572_v35 = vadd.f32 1.0, %v5132_v15  ;;  %5145 = vtanh.f32 %v3547_v17  ;;  %v3517_v13 = vmul.f32 0.044715, %v3501_v38  ;;  %v3503_v55 = vmul.f32 %v3487_v61, %v6458_v30  ;;  %v3467_v22 = vpop.f32.mrb[56].mxu0 }
 0xd34   : > { %v5136_v58 = vpop.eup %5135  ;;  %v3532_v8 = vadd.f32 %v3516_v32, %v6442_v45  ;;  %v3518_v25 = vmul.f32 0.044715, %v3502_v36  ;;  %v6470_v12 = vadd.f32 %v3467_v22, %v6383_v41  ;;  %v3469_v16 = vpop.f32.mrb[57].mxu0  ;;  %v3573_v24 = vadd.f32 1.0, %v5134_v51 }
 0xd35   : > { %v3588_v62 = vmul.f32 0.5, %v3572_v35  ;;  %v3574_v43 = vadd.f32 1.0, %v5136_v58  ;;  %v3533_v26 = vadd.f32 %v3517_v13, %v6446_v56  ;;  %v3519_v19 = vmul.f32 0.044715, %v3503_v55  ;;  %v3471_v5 = vpop.f32.mrb[58].mxu0  ;;  %v5138_v60 = vpop.eup %5137 }
 0xd36   : > { %v3548_v4 = vmul.f32 0.7978846, %v3532_v8  ;;  %v3534_v54 = vadd.f32 %v3518_v25, %v6452_v7  ;;  %v3488_v28 = vmul.f32 %v6470_v12, %v6470_v12  ;;  %v6477_v9 = vadd.f32 %v3469_v16, %v6386_v18  ;;  %v3473_v49 = vpop.f32.mrb[59].mxu0 }
 0xd37   : > { %v3604_v29 = vmul.f32 %v3588_v62, %v6389_v34  ;;  %v3590_v31 = vmul.f32 0.5, %v3574_v43  ;;  %v3549_v44 = vmul.f32 0.7978846, %v3533_v26  ;;  %v3535_v3 = vadd.f32 %v3519_v19, %v6458_v30 }
 0xd38   : > { %5147 = vtanh.f32 %v3548_v4  ;;  %v3550_v23 = vmul.f32 0.7978846, %v3534_v54  ;;  %v3504_v11 = vmul.f32 %v3488_v28, %v6470_v12  ;;  %v3489_v6 = vmul.f32 %v6477_v9, %v6477_v9 }
 0xd39   : > { %v3606_v50 = vmul.f32 %v3590_v31, %v6397_v33  ;;  %5149 = vtanh.f32 %v3549_v44  ;;  %v3551_v10 = vmul.f32 0.7978846, %v3535_v3  ;;  %v6486_v2 = vadd.f32 %v3471_v5, %v6383_v41 }
 0xd3a   : > { %v5140_v48 = vpop.eup %5139  ;;  %5151 = vtanh.f32 %v3550_v23  ;;  %v3520_v34 = vmul.f32 0.044715, %v3504_v11  ;;  %v3505_v17 = vmul.f32 %v3489_v6, %v6477_v9  ;;  %v6490_v38 = vadd.f32 %v3473_v49, %v6386_v18 }
 0xd3b   : > { %v5142_v61 = vpop.eup %5141  ;;  %v3620_v15 = vpack.c.bf16 %v3606_v50, %v3604_v29  ;;  %5153 = vtanh.f32 %v3551_v10  ;;  %v3490_v32 = vmul.f32 %v6486_v2, %v6486_v2  ;;  %v3575_v33 = vadd.f32 1.0, %v5138_v60 }
 0xd3c   : > { %v5144_v36 = vpop.eup %5143  ;;  %v3536_v51 = vadd.f32 %v3520_v34, %v6470_v12  ;;  %v3521_v41 = vmul.f32 0.044715, %v3505_v17  ;;  %v3491_v35 = vmul.f32 %v6490_v38, %v6490_v38  ;;  %v3589_v13 = vmul.f32 0.5, %v3573_v24 }
 0xd3d   : > { %v5146_v55 = vpop.eup %5145  ;;  %v3506_v22 = vmul.f32 %v3490_v32, %v6486_v2  ;;  %v3591_v18 = vmul.f32 0.5, %v3575_v33  ;;  %v3577_v58 = vadd.f32 1.0, %v5142_v61  ;;  %v3576_v8 = vadd.f32 1.0, %v5140_v48 }
 0xd3e   : > { %v3552_v25 = vmul.f32 0.7978846, %v3536_v51  ;;  %v3537_v16 = vadd.f32 %v3521_v41, %v6477_v9  ;;  %v3507_v62 = vmul.f32 %v3491_v35, %v6490_v38  ;;  %v3605_v43 = vmul.f32 %v3589_v13, %v6392_v53 }
 0xd3f   : > { %v3522_v26 = vmul.f32 0.044715, %v3506_v22  ;;  %v3607_v19 = vmul.f32 %v3591_v18, %v6402_v20  ;;  %v3579_v5 = vadd.f32 1.0, %v5146_v55  ;;  %v3593_v4 = vmul.f32 0.5, %v3577_v58 }
 0xd40   : > { %5155 = vtanh.f32 %v3552_v25  ;;  %v3553_v24 = vmul.f32 0.7978846, %v3537_v16  ;;  %v3523_v54 = vmul.f32 0.044715, %v3507_v62  ;;  %v3578_v28 = vadd.f32 1.0, %v5144_v36 }
 0xd41   : > { %v3538_v49 = vadd.f32 %v3522_v26, %v6486_v2  ;;  %v3621_v60 = vpack.c.bf16 %v3607_v19, %v3605_v43  ;;  %v3595_v29 = vmul.f32 0.5, %v3579_v5  ;;  %v3592_v3 = vmul.f32 0.5, %v3576_v8 }
 0xd42   : > { %v5148_v31 = vpop.eup %5147  ;;  %5157 = vtanh.f32 %v3553_v24  ;;  %v3539_v44 = vadd.f32 %v3523_v54, %v6490_v38  ;;  %v3594_v23 = vmul.f32 0.5, %v3578_v28  ;;  %v3609_v20 = vmul.f32 %v3593_v4, %v6418_v39 }
 0xd43   : > { %v5150_v53 = vpop.eup %5149  ;;  %v3554_v11 = vmul.f32 0.7978846, %v3538_v49  ;;  %3795 = vmatprep.mubr.bf16.mxu0 %v3621_v60  ;;  %v3611_v6 = vmul.f32 %v3595_v29, %v6430_v46  ;;  %v3580_v50 = vadd.f32 1.0, %v5148_v31  ;;  %v3608_v34 = vmul.f32 %v3592_v3, %v6414_v59  ;;  %v4367_v29 = vld [vmem:[%s6652_s18] ss:$0 sm:$0xff] }
 0xd44   : > { %v5152_v10 = vpop.eup %5151  ;;  %v3555_v48 = vmul.f32 0.7978846, %v3539_v44  ;;  %3796 = vmatmul.mubr.bf16.vlgmr.msra.gmra.mrb[60].mxu0 %v3620_v15  ;;  %v3610_v17 = vmul.f32 %v3594_v23, %v6424_v21  ;;  %v3581_v61 = vadd.f32 1.0, %v5150_v53 }
 0xd45   : > { %v5154_v32 = vpop.eup %5153  ;;  %5159 = vtanh.f32 %v3554_v11  ;;  %v3623_v33 = vpack.c.bf16 %v3611_v6, %v3609_v20  ;;  %v3582_v36 = vadd.f32 1.0, %v5152_v10  ;;  %v3596_v51 = vmul.f32 0.5, %v3580_v50 }
 0xd46   : > { %5161 = vtanh.f32 %v3555_v48  ;;  %v3622_v41 = vpack.c.bf16 %v3610_v17, %v3608_v34  ;;  %v3583_v35 = vadd.f32 1.0, %v5154_v32  ;;  %v3597_v39 = vmul.f32 0.5, %v3581_v61 }
 0xd47   : > { %3803 = vmatprep.mubr.bf16.mxu0 %v3623_v33  ;;  %v3598_v46 = vmul.f32 0.5, %v3582_v36  ;;  %v3612_v55 = vmul.f32 %v3596_v51, %v6442_v45 }
 0xd48   : > { %v3599_v13 = vmul.f32 0.5, %v3583_v35  ;;  %v3613_v21 = vmul.f32 %v3597_v39, %v6446_v56 }
 0xd49   : > { %v3614_v15 = vmul.f32 %v3598_v46, %v6452_v7 }
 0xd4a   : > { %v5156_v59 = vpop.eup %5155  ;;  %v3615_v22 = vmul.f32 %v3599_v13, %v6458_v30 }
 0xd4b   : > { %v3624_v18 = vpack.c.bf16 %v3614_v15, %v3612_v55  ;;  %v3584_v25 = vadd.f32 1.0, %v5156_v59 }
 0xd4c   : > { %v5158_v58 = vpop.eup %5157  ;;  %3804 = vmatmul.mubr.bf16.gmra.mrb[64].mxu0 %v3622_v41  ;;  %v3625_v8 = vpack.c.bf16 %v3615_v22, %v3613_v21  ;;  %v3831_v22 = vrot.slane %v6312_v27, %v5603_v37 }
 0xd4d   : > { %v3585_v16 = vadd.f32 1.0, %v5158_v58  ;;  %v3600_v19 = vmul.f32 0.5, %v3584_v25 }
 0xd4e   : > { %3811 = vmatprep.mubr.bf16.mxu0 %v3625_v8 }
 0xd4f   : > { %v5160_v62 = vpop.eup %5159  ;;  %v3601_v45 = vmul.f32 0.5, %v3585_v16  ;;  %v3616_v56 = vmul.f32 %v3600_v19, %v6470_v12 }
 0xd50   : > { %v5162_v43 = vpop.eup %5161  ;;  %v3586_v26 = vadd.f32 1.0, %v5160_v62 }
 0xd51   : > { %v3587_v5 = vadd.f32 1.0, %v5162_v43  ;;  %v3617_v24 = vmul.f32 %v3601_v45, %v6477_v9 }
 0xd52   : > { %v3602_v4 = vmul.f32 0.5, %v3586_v26 }
 0xd53   : > { %v3603_v7 = vmul.f32 0.5, %v3587_v5 }
 0xd54   : > { %3812 = vmatmul.mubr.bf16.gmra.mrb[68].mxu0 %v3624_v18  ;;  %v3618_v30 = vmul.f32 %v3602_v4, %v6486_v2 }
 0xd55   : > { %v3619_v54 = vmul.f32 %v3603_v7, %v6490_v38 }
 0xd56   : > { %v3626_v28 = vpack.c.bf16 %v3618_v30, %v3616_v56 }
 0xd57   : > { %v3627_v49 = vpack.c.bf16 %v3619_v54, %v3617_v24 }
 0xd59   : > { %3819 = vmatprep.mubr.bf16.mxu0 %v3627_v49 }
 0xd5c   : > { %3820 = vmatmul.mubr.bf16.gmra.mrb[72].mxu0 %v3626_v28 }
 0xe17   : > { %v4529_v60 = vpop.f32.mrb[60].mxu0 }
 0xe18   : > { %v4530_v31 = vpop.f32.mrb[61].mxu0 }
 0xe19   : > { %v4531_v44 = vadd.f32 %v4530_v31, %v4529_v60  ;;  %v4532_v3 = vpop.f32.mrb[62].mxu0 }
 0xe1a   : > { %v4533_v23 = vpop.f32.mrb[63].mxu0 }
 0xe1b   : > { %v3798_v12 = vadd.f32 %v4531_v44, %v4367_v29  ;;  %v4534_v53 = vadd.f32 %v4533_v23, %v4532_v3 }
 0xe1d   : > { %v3801_v2 = vadd.f32 %v4534_v53, %v4367_v29  ;;  %3840 = vrot.lane.b32.xlu0 %v3798_v12, %s5191_s24 }
 0xe1f   : > { %v4535_v9 = vpop.f32.mrb[64].mxu0  ;;  %3842 = vrot.lane.b32.xlu1 %v3801_v2, %s5191_s24 }
 0xe20   : > { %v4536_v38 = vpop.f32.mrb[65].mxu0 }
 0xe21   : > { %v4537_v11 = vadd.f32 %v4536_v38, %v4535_v9  ;;  %v4538_v20 = vpop.f32.mrb[66].mxu0 }
 0xe22   : > { %v4539_v6 = vpop.f32.mrb[67].mxu0 }
 0xe23   : > { %v3806_v50 = vadd.f32 %v4537_v11, %v4367_v29  ;;  %v4540_v10 = vadd.f32 %v4539_v6, %v4538_v20 }
 0xe25   : > { %3844 = vrot.lane.b32.xlu1 %v3806_v50, %s5191_s24  ;;  %v3809_v48 = vadd.f32 %v4540_v10, %v4367_v29 }
 0xe27   : > { %v4541_v34 = vpop.f32.mrb[68].mxu0 }
 0xe28   : > { %v4542_v17 = vpop.f32.mrb[69].mxu0 }
 0xe29   : > { %v4543_v61 = vadd.f32 %v4542_v17, %v4541_v34  ;;  %v4544_v32 = vpop.f32.mrb[70].mxu0  ;;  %3846 = vrot.lane.b32.xlu1 %v3809_v48, %s5191_s24 }
 0xe2a   : > { %v4545_v33 = vpop.f32.mrb[71].mxu0 }
 0xe2b   : > { %v3814_v36 = vadd.f32 %v4543_v61, %v4367_v29  ;;  %v4546_v51 = vadd.f32 %v4545_v33, %v4544_v32 }
 0xe2d   : > { %v3817_v41 = vadd.f32 %v4546_v51, %v4367_v29  ;;  %3848 = vrot.lane.b32.xlu0 %v3814_v36, %s5191_s24 }
 0xe2f   : > { %3850 = vrot.lane.b32.xlu1 %v3817_v41, %s5191_s24  ;;  %v4547_v35 = vpop.f32.mrb[72].mxu0 }
 0xe30   : > { %v4548_v39 = vpop.f32.mrb[73].mxu0 }
 0xe31   : > { %v4549_v46 = vadd.f32 %v4548_v39, %v4547_v35  ;;  %v4550_v13 = vpop.f32.mrb[74].mxu0 }
 0xe32   : > { %v4551_v55 = vpop.f32.mrb[75].mxu0 }
 0xe33   : > { %v3822_v15 = vadd.f32 %v4549_v46, %v4367_v29  ;;  %v4552_v59 = vadd.f32 %v4551_v55, %v4550_v13 }
 0xe35   : > { %v3825_v21 = vadd.f32 %v4552_v59, %v4367_v29  ;;  %3852 = vrot.lane.b32.xlu0 %v3822_v15, %s5191_s24 }
 0xe37   : > { %3854 = vrot.lane.b32.xlu1 %v3825_v21, %s5191_s24 }
 0xe8f   : > { %v3841_v18 = vpop.permute.xlu0 %3840 }
 0xe90   : > { %v3864_v58 = vmul.f32 %v3841_v18, %v3831_v22 }
 0xe91   : > { %v3843_v8 = vpop.permute.xlu1 %3842 }
 0xe92   : > { %v3865_v25 = vmul.f32 %v3843_v8, %v3831_v22  ;;  %3880 = vrot.lane.b32.xlu0 %v3864_v58, %s5191_s24 }
 0xe94   : > { %3882 = vrot.lane.b32.xlu1 %v3865_v25, %s5191_s24 }
 0xe97   : > { %v3845_v16 = vpop.permute.xlu1 %3844 }
 0xe98   : > { %v3866_v62 = vmul.f32 %v3845_v16, %v3831_v22 }
 0xe9a   : > { %3884 = vrot.lane.b32.xlu0 %v3866_v62, %s5191_s24 }
 0xe9b   : > { %v3847_v43 = vpop.permute.xlu1 %3846 }
 0xe9c   : > { %v3867_v26 = vmul.f32 %v3847_v43, %v3831_v22 }
 0xe9e   : > { %3886 = vrot.lane.b32.xlu1 %v3867_v26, %s5191_s24 }
 0xe9f   : > { %v3849_v19 = vpop.permute.xlu0 %3848 }
 0xea0   : > { %v3868_v5 = vmul.f32 %v3849_v19, %v3831_v22 }
 0xea1   : > { %v3851_v45 = vpop.permute.xlu1 %3850 }
 0xea2   : > { %v3869_v27 = vmul.f32 %v3851_v45, %v3831_v22  ;;  %3888 = vrot.lane.b32.xlu0 %v3868_v5, %s5191_s24 }
 0xea4   : > { %3890 = vrot.lane.b32.xlu1 %v3869_v27, %s5191_s24 }
 0xea7   : > { %v3853_v4 = vpop.permute.xlu0 %3852 }
 0xea8   : > { %v3870_v7 = vmul.f32 %v3853_v4, %v3831_v22 }
 0xea9   : > { %v3855_v56 = vpop.permute.xlu1 %3854 }
 0xeaa   : > { %v3871_v30 = vmul.f32 %v3855_v56, %v3831_v22  ;;  %3892 = vrot.lane.b32.xlu0 %v3870_v7, %s5191_s24 }
 0xeac   : > { %3894 = vrot.lane.b32.xlu1 %v3871_v30, %s5191_s24 }
 0xf04   : > { %v3881_v24 = vpop.permute.xlu0 %3880 }
 0xf05   : > { %v3904_v54 = vadd.f32 %v3881_v24, %v6188_v0 }
 0xf06   : > { %v3883_v28 = vpop.permute.xlu1 %3882 }
 0xf07   : > { %v3905_v49 = vadd.f32 %v3883_v28, %v6196_v57  ;;  %v3912_v60 = vsel %vm945_vm1, %v3904_v54, 0.0  ;;  %v4959_v28 = vld [vmem:[%s6655_s21] sm:$0xff]  }
 0xf08   : > { %3913 = vadd.xlane.f32.xlu0 %v3912_v60  ;;  %4801 = vmatprep.subr.bf16.mxu1 %v4959_v28 }
 0xf09   : > { %v3915_v29 = vsel %vm945_vm1, %v3905_v49, 0.0  ;;  %4802 = vmatpush3.bf16.msra.mxu1 %v4959_v28 }
 0xf0a   : > { %3916 = vadd.xlane.f32.xlu1 %v3915_v29  ;;  %v4960_v29 = vld [vmem:[%s6655_s21 + $0x8] sm:$0xff]  }
 0xf0b   : > { %4803 = vmatprep.subr.bf16.mxu1 %v4960_v29 }
 0xf0c   : > { %v3885_v31 = vpop.permute.xlu0 %3884 }
 0xf0d   : > { %v3906_v44 = vadd.f32 %v3885_v31, %v6193_v63  ;;  %4804 = vmatpush3.bf16.msra.mxu1 %v4960_v29 }
 0xf0f   : > { %v3918_v3 = vsel %vm945_vm1, %v3906_v44, 0.0 }
 0xf10   : > { %v3887_v23 = vpop.permute.xlu1 %3886  ;;  %3919 = vadd.xlane.f32.xlu0 %v3918_v3 }
 0xf11   : > { %v3907_v12 = vadd.f32 %v3887_v23, %v6203_v40  ;;  %v4962_v23 = vld [vmem:[%s6655_s21 + $0x18] sm:$0xff]  }
 0xf13   : > { %v3921_v0 = vsel %vm945_vm1, %v3907_v12, 0.0 }
 0xf14   : > { %3922 = vadd.xlane.f32.xlu0 %v3921_v0  ;;  %v3889_v53 = vpop.permute.xlu0 %3888 }
 0xf15   : > { %v3908_v57 = vadd.f32 %v3889_v53, %v6212_v47 }
 0xf16   : > { %v3891_v2 = vpop.permute.xlu1 %3890 }
 0xf17   : > { %v3909_v9 = vadd.f32 %v3891_v2, %v6215_v1  ;;  %v3924_v38 = vsel %vm945_vm1, %v3908_v57, 0.0 }
 0xf18   : > { %3925 = vadd.xlane.f32.xlu0 %v3924_v38 }
 0xf19   : > { %v3927_v63 = vsel %vm945_vm1, %v3909_v9, 0.0 }
 0xf1a   : > { %3928 = vadd.xlane.f32.xlu1 %v3927_v63 }
 0xf1c   : > { %v3893_v11 = vpop.permute.xlu0 %3892 }
 0xf1d   : > { %v3910_v20 = vadd.f32 %v3893_v11, %v6225_v42 }
 0xf1e   : > { %v3895_v6 = vpop.permute.xlu1 %3894 }
 0xf1f   : > { %v3911_v40 = vadd.f32 %v3895_v6, %v6220_v14  ;;  %v3930_v50 = vsel %vm945_vm1, %v3910_v20, 0.0 }
 0xf20   : > { %3931 = vadd.xlane.f32.xlu0 %v3930_v50 }
 0xf21   : > { %v3933_v47 = vsel %vm945_vm1, %v3911_v40, 0.0 }
 0xf22   : > { %3934 = vadd.xlane.f32.xlu1 %v3933_v47 }
 0xf95   : > { %v3914_v10 = vpop.xlane.xlu0 %3913 }
 0xf96   : > { %v3936_v1 = vmul.f32 0.015625, %v3914_v10 }
 0xf97   : > { %v3917_v48 = vpop.xlane.xlu1 %3916 }
 0xf98   : > { %v6553_v34 = vsub.f32 %v3904_v54, %v3936_v1  ;;  %v3937_v17 = vmul.f32 0.015625, %v3917_v48 }
 0xf9a   : > { %v6555_v61 = vsub.f32 %v3905_v49, %v3937_v17  ;;  %v3952_v42 = vmul.f32 %v6553_v34, %v6553_v34  ;;  %v1270_v49 = vld [vmem:[%s6654_s20] sm:$0x1] }
 0xf9b   : > { %v1330_v60 = vadd.f32 %v5619_v52, %v1270_v49 }
 0xf9c   : > { %v3960_v32 = vsel %vm945_vm1, %v3952_v42, 0.0  ;;  %v3953_v14 = vmul.f32 %v6555_v61, %v6555_v61 }
 0xf9d   : > { %3961 = vadd.xlane.f32.xlu0 %v3960_v32  ;;  %v3920_v33 = vpop.xlane.xlu0 %3919  ;;  %v4016_v31 = vadd.f32 1.0, %v1330_v60 }
 0xf9e   : > { %v3938_v36 = vmul.f32 0.015625, %v3920_v33  ;;  %v3963_v51 = vsel %vm945_vm1, %v3953_v14, 0.0 }
 0xf9f   : > { %3964 = vadd.xlane.f32.xlu1 %v3963_v51  ;;  %v4020_v3 = vrot.slane %v4016_v31, %v5603_v37 }
 0xfa0   : > { %v6563_v41 = vsub.f32 %v3906_v44, %v3938_v36  ;;  %v4961_v44 = vld [vmem:[%s6655_s21 + $0x10] sm:$0xff]  }
 0xfa1   : > { %v3923_v35 = vpop.xlane.xlu0 %3922  ;;  %4805 = vmatprep.subr.bf16.mxu1 %v4961_v44 }
 0xfa2   : > { %v3939_v39 = vmul.f32 0.015625, %v3923_v35  ;;  %v3954_v46 = vmul.f32 %v6563_v41, %v6563_v41  ;;  %4806 = vmatpush3.bf16.msra.mxu1 %v4961_v44 }
 0xfa3   : > { %4807 = vmatprep.subr.bf16.mxu1 %v4962_v23 }
 0xfa4   : > { %v6567_v13 = vsub.f32 %v3907_v12, %v3939_v39  ;;  %v3966_v55 = vsel %vm945_vm1, %v3954_v46, 0.0 }
 0xfa5   : > { %3967 = vadd.xlane.f32.xlu0 %v3966_v55  ;;  %v3926_v15 = vpop.xlane.xlu0 %3925 }
 0xfa6   : > { %v3940_v59 = vmul.f32 0.015625, %v3926_v15  ;;  %v3955_v21 = vmul.f32 %v6567_v13, %v6567_v13  ;;  %4808 = vmatpush3.bf16.msra.mxu1 %v4962_v23  ;;  %v4036_v15 = vrot.slane %v1330_v60, %v5603_v37 }
 0xfa7   : > { %v3929_v22 = vpop.xlane.xlu1 %3928 }
 0xfa8   : > { %v6572_v18 = vsub.f32 %v3908_v57, %v3940_v59  ;;  %v3941_v58 = vmul.f32 0.015625, %v3929_v22  ;;  %v3969_v8 = vsel %vm945_vm1, %v3955_v21, 0.0 }
 0xfa9   : > { %3970 = vadd.xlane.f32.xlu1 %v3969_v8 }
 0xfaa   : > { %v6575_v25 = vsub.f32 %v3909_v9, %v3941_v58  ;;  %v3956_v16 = vmul.f32 %v6572_v18, %v6572_v18 }
 0xfac   : > { %v3972_v62 = vsel %vm945_vm1, %v3956_v16, 0.0  ;;  %v3957_v43 = vmul.f32 %v6575_v25, %v6575_v25 }
 0xfad   : > { %3973 = vadd.xlane.f32.xlu0 %v3972_v62  ;;  %v3932_v26 = vpop.xlane.xlu0 %3931 }
 0xfae   : > { %v3942_v19 = vmul.f32 0.015625, %v3932_v26  ;;  %v3975_v5 = vsel %vm945_vm1, %v3957_v43, 0.0 }
 0xfaf   : > { %v3935_v45 = vpop.xlane.xlu1 %3934  ;;  %3976 = vadd.xlane.f32.xlu1 %v3975_v5 }
 0xfb0   : > { %v6583_v27 = vsub.f32 %v3910_v20, %v3942_v19  ;;  %v3943_v4 = vmul.f32 0.015625, %v3935_v45 }
 0xfb2   : > { %v6585_v7 = vsub.f32 %v3911_v40, %v3943_v4  ;;  %v3958_v56 = vmul.f32 %v6583_v27, %v6583_v27 }
 0xfb4   : > { %v3978_v30 = vsel %vm945_vm1, %v3958_v56, 0.0  ;;  %v3959_v24 = vmul.f32 %v6585_v7, %v6585_v7 }
 0xfb5   : > { %3979 = vadd.xlane.f32.xlu0 %v3978_v30 }
 0xfb6   : > { %v3981_v54 = vsel %vm945_vm1, %v3959_v24, 0.0 }
 0xfb7   : > { %3982 = vadd.xlane.f32.xlu1 %v3981_v54 }
 0xfcb   : > { %4022 = vrot.lane.b32.xlu0 %v4020_v3, %s5191_s24  ;;  %s4396_s24 = sshll.u32 %s6684_s30, 6 }
 0xfcc   : > { %s724_s29 = scalar_lea.vmem %s6681_s28, %s4396_s24 }
0x102a   : > { %v3962_v52 = vpop.xlane.xlu0 %3961 }
0x102b   : > { %v3984_v0 = vmul.f32 0.015625, %v3962_v52  ;;  %v4384_v52 = vld [vmem:[%s6656_s22] ss:$0 sm:$0xff] }
0x102c   : > { %v3965_v12 = vpop.xlane.xlu1 %3964 }
0x102d   : > { %v3985_v53 = vmul.f32 0.015625, %v3965_v12  ;;  %v3992_v2 = vadd.f32 1e-06, %v3984_v0 }
0x102f   : > { %v3993_v38 = vadd.f32 1e-06, %v3985_v53  ;;  %5163 = vrsqrt.f32 %v3992_v2 }
0x1032   : > { %v3968_v57 = vpop.xlane.xlu0 %3967 }
0x1033   : > { %v3986_v9 = vmul.f32 0.015625, %v3968_v57 }
0x1035   : > { %v3994_v63 = vadd.f32 1e-06, %v3986_v9 }
0x1036   : > { %v3971_v11 = vpop.xlane.xlu1 %3970 }
0x1037   : > { %v3987_v20 = vmul.f32 0.015625, %v3971_v11  ;;  %5165 = vrsqrt.f32 %v3994_v63 }
0x1038   : > { %5167 = vrsqrt.f32 %v3993_v38 }
0x1039   : > { %v3995_v6 = vadd.f32 1e-06, %v3987_v20  ;;  %v5164_v17 = vpop.eup %5163 }
0x103a   : > { %v3974_v40 = vpop.xlane.xlu0 %3973  ;;  %v4008_v35 = vmul.f32 %v5164_v17, %v6553_v34 }
0x103b   : > { %5169 = vrsqrt.f32 %v3995_v6  ;;  %v3988_v50 = vmul.f32 0.015625, %v3974_v40 }
0x103c   : > { %v3977_v47 = vpop.xlane.xlu1 %3976 }
0x103d   : > { %v3996_v10 = vadd.f32 1e-06, %v3988_v50  ;;  %v3989_v1 = vmul.f32 0.015625, %v3977_v47 }
0x103f   : > { %5171 = vrsqrt.f32 %v3996_v10  ;;  %v3997_v48 = vadd.f32 1e-06, %v3989_v1 }
0x1041   : > { %5173 = vrsqrt.f32 %v3997_v48  ;;  %v5166_v42 = vpop.eup %5165 }
0x1042   : > { %v3980_v32 = vpop.xlane.xlu0 %3979  ;;  %v5168_v14 = vpop.eup %5167  ;;  %v4010_v39 = vmul.f32 %v5166_v42, %v6563_v41 }
0x1043   : > { %v3990_v33 = vmul.f32 0.015625, %v3980_v32  ;;  %v4009_v59 = vmul.f32 %v5168_v14, %v6555_v61 }
0x1044   : > { %v3983_v36 = vpop.xlane.xlu1 %3982 }
0x1045   : > { %v5170_v51 = vpop.eup %5169  ;;  %v3998_v46 = vadd.f32 1e-06, %v3990_v33  ;;  %v3991_v55 = vmul.f32 0.015625, %v3983_v36 }
0x1046   : > { %v4011_v21 = vmul.f32 %v5170_v51, %v6567_v13  ;;  %v4023_v22 = vpop.permute.xlu0 %4022 }
0x1047   : > { %5175 = vrsqrt.f32 %v3998_v46  ;;  %v3999_v58 = vadd.f32 1e-06, %v3991_v55  ;;  %v4027_v8 = vmul.f32 %v4023_v22, %v4010_v39  ;;  %v4025_v16 = vmul.f32 %v4023_v22, %v4008_v35 }
0x1048   : > { %v4028_v62 = vmul.f32 %v4023_v22, %v4011_v21  ;;  %v4026_v43 = vmul.f32 %v4023_v22, %v4009_v59 }
0x1049   : > { %v5172_v26 = vpop.eup %5171  ;;  %5177 = vrsqrt.f32 %v3999_v58  ;;  %v4039_v34 = vadd.f32 %v4036_v15, %v4027_v8  ;;  %v4037_v19 = vadd.f32 %v4036_v15, %v4025_v16 }
0x104a   : > { %v4012_v41 = vmul.f32 %v5172_v26, %v6572_v18  ;;  %v4040_v5 = vadd.f32 %v4036_v15, %v4028_v62  ;;  %v4038_v45 = vadd.f32 %v4036_v15, %v4026_v43 }
0x104b   : > { %v5174_v37 = vpop.eup %5173 }
0x104c   : > { %v4013_v61 = vmul.f32 %v5174_v37, %v6575_v25  ;;  %v4045_v4 = vpack.c.bf16 %v4038_v45, %v4037_v19  ;;  %v4046_v13 = vpack.c.bf16 %v4040_v5, %v4039_v34  ;;  %v4029_v56 = vmul.f32 %v4023_v22, %v4012_v41 }
0x104e   : > { %4809 = vmatprep.mubr.msk.bf16.mxu1 %vm945_vm1, %v4045_v4  ;;  %v4030_v30 = vmul.f32 %v4023_v22, %v4013_v61  ;;  %v4041_v24 = vadd.f32 %v4036_v15, %v4029_v56 }
0x104f   : > { %4810 = vmatmul.mubr.msk.bf16.vlgmr.msra.gmra.mrb[72].mxu1 %vm945_vm1, %v4046_v13 }
0x1050   : > { %v4042_v54 = vadd.f32 %v4036_v15, %v4030_v30 }
0x1051   : > { %v5176_v28 = vpop.eup %5175 }
0x1052   : > { %v4014_v49 = vmul.f32 %v5176_v28, %v6583_v27  ;;  %v4047_v18 = vpack.c.bf16 %v4042_v54, %v4041_v24 }
0x1053   : > { %v5178_v60 = vpop.eup %5177 }
0x1054   : > { %v4015_v29 = vmul.f32 %v5178_v60, %v6585_v7  ;;  %4813 = vmatprep.mubr.msk.bf16.mxu1 %vm945_vm1, %v4047_v18  ;;  %v4031_v25 = vmul.f32 %v4023_v22, %v4014_v49 }
0x1056   : > { %v4032_v31 = vmul.f32 %v4023_v22, %v4015_v29  ;;  %v4043_v44 = vadd.f32 %v4036_v15, %v4031_v25 }
0x1058   : > { %v4044_v3 = vadd.f32 %v4036_v15, %v4032_v31 }
0x105a   : > { %v4048_v23 = vpack.c.bf16 %v4044_v3, %v4043_v44 }
0x105c   : > { %4814 = vmatmul.mubr.msk.bf16.gmra.mrb[76].mxu1 %vm945_vm1, %v4048_v23 }
0x1122   : > { %v4811_v27 = vpop.f32.mrb[72].mxu1 }
0x1123   : > { %v4143_v7 = vadd.f32 %v4811_v27, %v4384_v52  ;;  %v4134_v12 = vpop.f32.mrb[73].mxu1 }
0x1124   : > { %v4135_v0 = vadd.f32 %v4384_v52, %v4134_v12  ;;  %v4812_v53 = vpop.f32.mrb[74].mxu1 }
0x1125   : > { %4167 = vst [vmem:[%s724_s29 + $0x10] sm:$0xff] %v4143_v7  ;;  %v4146_v57 = vadd.f32 %v4812_v53, %v4384_v52  ;;  %v4137_v2 = vpop.f32.mrb[75].mxu1 }
0x1126   : > { %4165 = vst [vmem:[%s724_s29] sm:$0xff] %v4135_v0  ;;  %v4138_v9 = vadd.f32 %v4384_v52, %v4137_v2 }
0x1127   : > { %4168 = vst [vmem:[%s724_s29 + $0x18] sm:$0xff] %v4146_v57 }
0x1128   : > { %4166 = vst [vmem:[%s724_s29 + $0x8] sm:$0xff] %v4138_v9 }
0x112f   : > { %v4815_v38 = vpop.f32.mrb[76].mxu1 }
0x1130   : > { %v4159_v63 = vadd.f32 %v4815_v38, %v4384_v52  ;;  %v4150_v11 = vpop.f32.mrb[77].mxu1 }
0x1131   : > { %v4151_v20 = vadd.f32 %v4384_v52, %v4150_v11  ;;  %v4816_v6 = vpop.f32.mrb[78].mxu1 }
0x1132   : > { %4171 = vst [vmem:[%s724_s29 + $0x30] sm:$0xff] %v4159_v63  ;;  %v4162_v40 = vadd.f32 %v4816_v6, %v4384_v52  ;;  %v4153_v50 = vpop.f32.mrb[79].mxu1 }
0x1133   : > { %4169 = vst [vmem:[%s724_s29 + $0x20] sm:$0xff] %v4151_v20  ;;  %v4154_v47 = vadd.f32 %v4384_v52, %v4153_v50 }
0x1134   : > { %4172 = vst [vmem:[%s724_s29 + $0x38] sm:$0xff] %v4162_v40 }
0x1135   : > { %4170 = vst [vmem:[%s724_s29 + $0x28] sm:$0xff] %v4154_v47 }
0x1136 PF: > { %s6682_s30 = sld [smem:[#allocation2_spill]] }
0x113c   : > { %s33_s4 = sadd.s32 1, %s6682_s30  }
0x113d   : > { %p30_p4 = scmp.ge.s32.totalorder %s33_s4, 4  }
0x113f   :  { %32 = sbr.rel (!%p30_p4) target bundleno = 10 (0xa), region = 145 }

// kernel: transformer_devil_forward.4
= control target key start
LH: loop header
LB: loop body
LE: loop exit
PB: predicated region body
PF: predicated region fallthrough
CT: control target
= control target key end

     0   :  { %s983_s21 = smov 0   ;;  %s1372_s0 = inlined_call_operand.vmem [shape: f32[2,27,256], index: 0, kind: input, shape index: {}]   ;;  %s1373_s1 = inlined_call_operand.vmem [shape: f32[2,3,256], index: 1, kind: input, shape index: {}]   ;;  %s1374_s2 = inlined_call_operand.vmem [shape: f32[9,256], index: 2, kind: input, shape index: {}]   ;;  %s1375_s3 = inlined_call_operand.vmem [shape: f32[3,3], index: 3, kind: input, shape index: {}]   ;;  %s1376_s4 = inlined_call_operand.vmem [shape: f32[3,1], index: 4, kind: input, shape index: {}]   ;;  %s1377_s5 = inlined_call_operand.vmem [shape: f32[2,1,1], index: 5, kind: input, shape index: {}]   ;;  %s1378_s6 = inlined_call_operand.vmem [shape: f32[2,3,256], index: 6, kind: output, shape index: {}]  }
   0x1 LB: > { %s850_s22 = sadd.s32 4294967295, %s944_s21   ;;  %p854_p0 = scmp.ge.s32.totalorder %s944_s21, 1  ;;  %s944_s21 = sphi %s983_s21, %s16_s21  }
   0x2   : > { %p230_p1 = scmp.lt.s32.totalorder %s944_s21, 3 }
   0x4   : > { %p231_p2 = pnand %p854_p0, %p230_p1 }
   0x5   : > { %p268_p3 = scmp.lt.s32.totalorder (!%p231_p2), %s850_s22, 1  ;;  %v946_v0 = vmov (!%p231_p2), 0.0   ;;  %v288_v1 = vld [vmem:[%s1376_s4] sm:$0x7] (!%p231_p2)  ;;  %v947_v2 = vmov (!%p231_p2), 0   ;;  %vm300_vm0 = vcmask (!%p231_p2), 1042432   ;;  %v399_v10 = vlaneseq (!%p231_p2) }
   0x6   : > { %234 = sbr.rel (%p231_p2) target bundleno = 255 (0xff), region = 44  ;;  %369 = vmatprep.mubr.f32.mxu0 (!%p231_p2), %v946_v0  ;;  %888 = vset.pattern.permute.xlu0 (!%p231_p2), %v947_v2  ;;  %v287_v5 = vld [vmem:[%s1375_s3] sm:$0x7] (!%p231_p2)  ;;  %vm296_vm1 = vcmask (!%p231_p2), 23552  }
   0x7   : > { %291 = vperm.xlu0 (!%p231_p2), %888, %v288_v1   ;;  %v865_v13 = vld [vmem:[%s1374_s2 + $0x1] ss:$8 sm:$0x3] (!%p231_p2)  ;;  %v866_v20 = vld [vmem:[%s1374_s2 + $0x2] ss:$8 sm:$0x3] (!%p231_p2) }
   0x8   : > { %v400_v21 = vshrl.u32 (!%p231_p2), %v399_v10, 7  ;;  %v867_v23 = vld [vmem:[%s1374_s2 + $0x3] ss:$8 sm:$0x3] (!%p231_p2)  ;;  %vm417_vm2 = vcmp.gt.f32.partialorder (!%p231_p2), %v865_v13, 0.0  ;;  %vm457_vm3 = vcmp.gt.f32.partialorder (!%p231_p2), %v866_v20, 0.0 }
   0x9   : > { %v388_v26 = vld [vmem:[%s1374_s2] ss:$8 sm:$0x3] (!%p231_p2)  ;;  %v868_v28 = vld [vmem:[%s1374_s2 + $0x4] ss:$8 sm:$0x3] (!%p231_p2) }
   0xa   : > { %v1040_v30 = vsub.s32 (!%p231_p2), 0, %v400_v21  ;;  %v869_v32 = vld [vmem:[%s1374_s2 + $0x5] ss:$8 sm:$0x3] (!%p231_p2)  ;;  %v432_v33 = vsel (!%p231_p2), %vm417_vm2, 1, %v947_v2  ;;  %vm389_vm4 = vcmp.gt.f32.partialorder (!%p231_p2), %v388_v26, 0.0 }
   0xb   : > { %vm518_vm5 = vcmp.gt.f32.partialorder (!%p231_p2), %v867_v23, 0.0  ;;  %vm558_vm6 = vcmp.gt.f32.partialorder (!%p231_p2), %v868_v28, 0.0  ;;  %v485_v38 = vsel (!%p231_p2), %vm457_vm3, 1, %v947_v2  ;;  %v1051_v41 = vsub.s32 (!%p231_p2), 1, %v400_v21 }
   0xc   : > { %v1056_v42 = vld [vmem:[%s1374_s2 + $0x6] ss:$8 sm:$0x3] (!%p231_p2)  ;;  %v398_v43 = vsel (!%p231_p2), %vm389_vm4, 1, %v947_v2  ;;  %v436_v44 = vrot.slane (!%p231_p2), %v432_v33, %v1040_v30  ;;  %v1061_v46 = vsel (!%p231_p2), %vm518_vm5, 1, %v947_v2  ;;  %vm598_vm7 = vcmp.gt.f32.partialorder (!%p231_p2), %v869_v32, 0.0 }
   0xd   : > { %s1432_s22 = smov (!%p268_p3, %s850_s22), 1  ;;  %v489_v50 = vrot.slane %v485_v38, %v1040_v30  ;;  %vm659_vm8 = vcmp.gt.f32.partialorder %v1056_v42, 0.0  ;;  %v1073_v54 = vsel %vm558_vm6, 1, %v947_v2  ;;  %v402_v55 = vrot.slane %v398_v43, %v1040_v30  ;;  %v1083_v59 = vld [vmem:[%s1374_s2 + $0x7] ss:$8 sm:$0x3] }
   0xe   : > { %s876_s25 = sshll.u32 %s1432_s22, 3  ;;  %s280_s7 = scalar_lea.vmem %s1377_s5, %s1432_s22  ;;  %v440_v56 = vrot.slane %v432_v33, %v1051_v41  ;;  %vm1085_vm9 = vcmp.eq.s32.totalorder %v436_v44, 1  ;;  %v493_v61 = vrot.slane %v485_v38, %v1051_v41  ;;  %vm699_vm14 = vcmp.gt.f32.partialorder %v1083_v59, 0.0 }
   0xf   : > { %s277_s28 = scalar_lea.vmem %s1373_s1, %s876_s25  ;;  %v864_v6 = vld [vmem:[%s280_s7] ss:$0 sm:$0xff]  ;;  %s875_s10 = sshll.u32 %s1432_s22, 6  ;;  %vm1100_vm10 = vcmp.eq.s32.totalorder %v489_v50, 1  ;;  %vm1106_vm11 = vcmp.eq.s32.totalorder %v402_v55, 1  ;;  %v541_v28 = vrot.slane %v1061_v46, %v1051_v41  ;;  %v577_v33 = vrot.slane %v1073_v54, %v1040_v30 }
  0x10   : > { %v286_v3 = vld [vmem:[%s277_s28] sm:$0x77]  ;;  %383 = vperm.xlu0 %888, %v864_v6   ;;  %s1014_s13 = scalar_lea.vmem %s1372_s0, %s875_s10  ;;  %vm1114_vm12 = vcmp.eq.s32.totalorder %v440_v56, 1  ;;  %vm1120_vm13 = vcmp.eq.s32.totalorder %v493_v61, 1 }
  0x11   : > { %v295_v4 = vcombine.high %v286_v3, %v286_v3  ;;  %v418_v7 = vld [vmem:[%s1014_s13] sm:$0x38]  ;;  %v458_v8 = vld [vmem:[%s1014_s13] sm:$0xc0]  ;;  %v390_v9 = vld [vmem:[%s1014_s13] sm:$0x7] }
  0x12   : > { %v420_v11 = vmul.f32 1.442695, %v418_v7  ;;  %v460_v12 = vld [vmem:[%s1014_s13 + $0x10] sm:$0x1]  ;;  %v462_v14 = vmul.f32 1.442695, %v458_v8 }
  0x13   : > { %861 = vmatprep.subr.msk.mxu0 %vm300_vm0, %v295_v4  ;;  %v419_v15 = vld [vmem:[%s1014_s13 + $0x8] sm:$0x38]  ;;  %v392_v16 = vmul.f32 1.442695, %v390_v9  ;;  %v459_v17 = vld [vmem:[%s1014_s13 + $0x8] sm:$0xc0] }
  0x14   : > { %862 = vmatpush1.msk.msra.mxu0 %vm300_vm0, %v286_v3  ;;  %v466_v18 = vmul.f32 1.442695, %v460_v12  ;;  %v461_v19 = vld [vmem:[%s1014_s13 + $0x18] sm:$0x1]  ;;  %890 = vpow2.f32 %v420_v11  ;;  %v422_v22 = vmul.f32 1.442695, %v419_v15  ;;  %v406_v11 = vrot.slane %v398_v43, %v1051_v41 }
  0x15   : > { %863 = vmatmul.mubr.msk.f32.vlgmr.msra.gmra.mrb[0].mxu0 %vm296_vm1, %v287_v5  ;;  %892 = vpow2.f32 %v462_v14  ;;  %v391_v24 = vld [vmem:[%s1014_s13 + $0x8] sm:$0x7]  ;;  %v464_v25 = vmul.f32 1.442695, %v459_v17  ;;  %v468_v27 = vmul.f32 1.442695, %v461_v19  ;;  %v537_v19 = vrot.slane %v1061_v46, %v1040_v30 }
  0x16   : > { %894 = vpow2.f32 %v392_v16  ;;  %v519_v29 = vld [vmem:[%s1014_s13 + $0x10] sm:$0xe]  ;;  %v559_v31 = vld [vmem:[%s1014_s13 + $0x10] sm:$0x70]  ;;  %v599_v34 = vld [vmem:[%s1014_s13 + $0x10] sm:$0x80] }
  0x17   : > { %896 = vpow2.f32 %v466_v18  ;;  %v394_v35 = vmul.f32 1.442695, %v391_v24  ;;  %v521_v36 = vmul.f32 1.442695, %v519_v29  ;;  %v520_v37 = vld [vmem:[%s1014_s13 + $0x18] sm:$0xe] }
  0x18   : > { %898 = vpow2.f32 %v422_v22  ;;  %v561_v39 = vmul.f32 1.442695, %v559_v31  ;;  %v601_v40 = vld [vmem:[%s1014_s13 + $0x20] sm:$0x3]  ;;  %v603_v45 = vmul.f32 1.442695, %v599_v34 }
  0x19   : > { %900 = vpow2.f32 %v464_v25  ;;  %v523_v47 = vmul.f32 1.442695, %v520_v37  ;;  %v560_v48 = vld [vmem:[%s1014_s13 + $0x18] sm:$0x70]  ;;  %v607_v51 = vmul.f32 1.442695, %v601_v40 }
  0x1a   : > { %902 = vpow2.f32 %v468_v27  ;;  %v600_v52 = vld [vmem:[%s1014_s13 + $0x18] sm:$0x80]  ;;  %v602_v57 = vld [vmem:[%s1014_s13 + $0x28] sm:$0x3]  ;;  %v563_v62 = vmul.f32 1.442695, %v560_v48 }
  0x1b   : > { %904 = vpow2.f32 %v394_v35  ;;  %v660_v0 = vld [vmem:[%s1014_s13 + $0x20] sm:$0x1c]  ;;  %v700_v1 = vld [vmem:[%s1014_s13 + $0x20] sm:$0xe0]  ;;  %v605_v3 = vmul.f32 1.442695, %v600_v52 }
  0x1c   : > { %906 = vpow2.f32 %v521_v36  ;;  %v1098_v5 = vsel %vm598_vm7, 1, %v947_v2  ;;  %v609_v7 = vmul.f32 1.442695, %v602_v57  ;;  %v662_v14 = vmul.f32 1.442695, %v660_v0 }
  0x1d   : > { %908 = vpow2.f32 %v561_v39  ;;  %v702_v15 = vmul.f32 1.442695, %v700_v1  ;;  %v661_v23 = vld [vmem:[%s1014_s13 + $0x28] sm:$0x1c]  ;;  %vm1142_vm15 = vcmp.eq.s32.totalorder %v406_v11, 1  ;;  %vm1379_vm0 = vcmask 1041408  }
  0x1e   : > { %v1064_v49 = vpop.eup %890  ;;  %910 = vpow2.f32 %v603_v45  ;;  %vm1160_vm1 = vcmp.eq.s32.totalorder %v537_v19, 1  ;;  %v630_v36 = vrot.slane %v1098_v5, %v1040_v30  ;;  %v664_v38 = vmul.f32 1.442695, %v661_v23  ;;  %v701_v46 = vld [vmem:[%s1014_s13 + $0x28] sm:$0xe0] }
  0x1f   : > { %v1068_v53 = vpop.eup %892  ;;  %912 = vpow2.f32 %v523_v47  ;;  %v445_v10 = vsel %vm1085_vm9, %v1064_v49, 0.0  ;;  %v674_v40 = vsel %vm659_vm8, 1, %v947_v2  ;;  %vm1177_vm2 = vcmp.eq.s32.totalorder %v541_v28, 1 }
  0x20   : > { %v1078_v58 = vpop.eup %894  ;;  %914 = vpow2.f32 %v607_v51  ;;  %v498_v17 = vsel %vm1100_vm10, %v1068_v53, 0.0  ;;  %v449_v21 = vrot.slane %v445_v10, 3  ;;  %v581_v51 = vrot.slane %v1073_v54, %v1051_v41 }
  0x21   : > { %v1090_v63 = vpop.eup %896  ;;  %916 = vpow2.f32 %v563_v62  ;;  %v411_v20 = vsel %vm1106_vm11, %v1078_v58, 0.0  ;;  %v506_v31 = vrot.slane %v498_v17, 6  ;;  %vm1189_vm3 = vcmp.eq.s32.totalorder %v577_v33, 1 }
  0x22   : > { %v1094_v4 = vpop.eup %898  ;;  %v500_v18 = vsel %vm1100_vm10, %v1090_v63, 0.0  ;;  %918 = vpow2.f32 %v605_v3  ;;  %v453_v48 = vadd.f32 %v449_v21, %v411_v20  ;;  %v634_v57 = vrot.slane %v1098_v5, %v1051_v41 }
  0x23   : > { %v1104_v8 = vpop.eup %900  ;;  %v446_v22 = vsel %vm1114_vm12, %v1094_v4, 0.0  ;;  %920 = vpow2.f32 %v609_v7  ;;  %v507_v32 = vrot.slane %v500_v18, 6  ;;  %vm1195_vm4 = vcmp.eq.s32.totalorder %v630_v36, 1 }
  0x24   : > { %v1118_v13 = vpop.eup %902  ;;  %v499_v26 = vsel %vm1120_vm13, %v1104_v8, 0.0  ;;  %v450_v37 = vrot.slane %v446_v22, 3  ;;  %922 = vpow2.f32 %v662_v14  ;;  %v704_v62 = vmul.f32 1.442695, %v701_v46  ;;  %v740_v14 = vld [vmem:[%s1014_s13 + $0x30] sm:$0x7] }
  0x25   : > { %v1140_v24 = vpop.eup %904  ;;  %v501_v27 = vsel %vm1120_vm13, %v1118_v13, 0.0  ;;  %v509_v44 = vrot.slane %v499_v26, 6  ;;  %v508_v52 = vsel %vm1379_vm0, %v506_v31, %v507_v32  ;;  %924 = vpow2.f32 %v664_v38  ;;  %v741_v31 = vld [vmem:[%s1014_s13 + $0x38] sm:$0x7]  ;;  %s285_s13 = scalar_lea.vmem %s1378_s6, %s876_s25 }
  0x26   : > { %v1154_v29 = vpop.eup %906  ;;  %v412_v43 = vsel %vm1142_vm15, %v1140_v24, 0.0  ;;  %v510_v45 = vrot.slane %v501_v27, 6  ;;  %926 = vpow2.f32 %v702_v15  ;;  %v514_v10 = vadd.f32 %v508_v52, %v453_v48  ;;  %v872_v32 = vld [vmem:[%s1374_s2 + $0x10] ss:$8 sm:$0x3] }
  0x27   : > { %v1158_v34 = vpop.eup %908  ;;  %v546_v55 = vsel %vm1160_vm1, %v1154_v29, 0.0  ;;  %v454_v54 = vadd.f32 %v450_v37, %v412_v43  ;;  %vm1211_vm5 = vcmp.eq.s32.totalorder %v581_v51, 1  ;;  %v1406_v17 = vmov 0 }
  0x28   : > { %v1166_v39 = vpop.eup %910  ;;  %v511_v1 = vsel %vm1379_vm0, %v509_v44, %v510_v45  ;;  %v550_v5 = vrot.slane %v546_v55, 1  ;;  %v586_v11 = vsel %vm1189_vm3, %v1158_v34, 0.0  ;;  %v1407_v17 = vsel %vm1211_vm5, 4294967295, %v1406_v17 }
  0x29   : > { %v1175_v47 = vpop.eup %912  ;;  %v714_v18 = vsel %vm699_vm14, 1, %v947_v2  ;;  %v639_v19 = vsel %vm1195_vm4, %v1166_v39, 0.0  ;;  %v678_v20 = vrot.slane %v674_v40, %v1040_v30  ;;  %vm1224_vm6 = vcmp.eq.s32.totalorder %v634_v57, 1 }
  0x2a   : > { %v1183_v42 = vpop.eup %914  ;;  %v547_v3 = vsel %vm1177_vm2, %v1175_v47, 0.0  ;;  %v1408_v21 = vmov 0  ;;  %v515_v23 = vadd.f32 %v511_v1, %v454_v54  ;;  %928 = vpow2.f32 %v704_v62 }
  0x2b   : > { %v1199_v0 = vpop.eup %916  ;;  %v1409_v21 = vsel %vm1224_vm6, 4294967295, %v1408_v21  ;;  %v641_v22 = vsel %vm1195_vm4, %v1183_v42, 0.0  ;;  %v551_v26 = vrot.slane %v547_v3, 1  ;;  %v590_v27 = vrot.slane %v586_v11, 4 }
  0x2c   : > { %v1205_v7 = vpop.eup %918  ;;  %v742_v59 = vmul.f32 1.442695, %v740_v14  ;;  %v587_v28 = vsel %vm1211_vm5, %v1199_v0, 0.0  ;;  %v554_v33 = vadd.f32 %v550_v5, %v514_v10  ;;  %v682_v38 = vrot.slane %v674_v40, %v1051_v41 }
  0x2d   : > { %v1215_v15 = vpop.eup %920  ;;  %v640_v36 = vsel %vm1224_vm6, %v1205_v7, 0.0  ;;  %vm1382_vm7 = vcmask 1040384   ;;  %v647_v43 = vrot.slane %v639_v19, 7  ;;  %v648_v44 = vrot.slane %v641_v22, 7 }
  0x2e   : > { %v642_v37 = vsel %vm1224_vm6, %v1215_v15, 0.0  ;;  %vm1245_vm8 = vcmp.eq.s32.totalorder %v678_v20, 1  ;;  %v1249_v46 = vpop.eup %922  ;;  %v718_v48 = vrot.slane %v714_v18, %v1040_v30  ;;  %v555_v51 = vadd.f32 %v551_v26, %v515_v23 }
  0x2f   : > { %v591_v52 = vrot.slane %v587_v28, 4  ;;  %v744_v55 = vmul.f32 1.442695, %v741_v31  ;;  %vm739_vm14 = vcmp.gt.f32.partialorder %v872_v32, 0.0  ;;  %v650_v57 = vrot.slane %v640_v36, 7  ;;  %v1252_v62 = vpop.eup %924 }
  0x30   : > { %v651_v54 = vrot.slane %v642_v37, 7  ;;  %v594_v40 = vadd.f32 %v590_v27, %v554_v33  ;;  %930 = vpow2.f32 %v742_v59  ;;  %vm1254_vm0 = vcmp.eq.s32.totalorder %v682_v38, 1  ;;  %v1259_v10 = vpop.eup %926 }
  0x31   : > { %v1412_v1 = vmov 0  ;;  %v722_v3 = vrot.slane %v714_v18, %v1051_v41  ;;  %v649_v5 = vsel %vm1382_vm7, %v647_v43, %v648_v44  ;;  %v687_v11 = vsel %vm1245_vm8, %v1249_v46, 0.0 }
  0x32   : > { %v1413_v1 = vsel %vm1254_vm0, 4294967295, %v1412_v1  ;;  %vm1265_vm6 = vcmp.eq.s32.totalorder %v718_v48, 1  ;;  %v595_v19 = vadd.f32 %v591_v52, %v555_v51  ;;  %932 = vpow2.f32 %v744_v55 }
  0x33   : > { %v748_v20 = vsel %vm739_vm14, 1, %v947_v2  ;;  %v652_v22 = vsel %vm1382_vm7, %v650_v57, %v651_v54  ;;  %v688_v18 = vsel %vm1254_vm0, %v1252_v62, 0.0  ;;  %v655_v26 = vadd.f32 %v649_v5, %v594_v40 }
  0x34   : > { %v1274_v23 = vpop.eup %928  ;;  %v691_v27 = vrot.slane %v687_v11, 2  ;;  %vm1276_vm5 = vcmp.eq.s32.totalorder %v722_v3, 1  ;;  %v1416_v59 = vmov 0  ;;  %v727_v28 = vsel %vm1265_vm6, %v1259_v10, 0.0 }
  0x35   : > { %v1417_v59 = vsel %vm1276_vm5, 4294967295, %v1416_v59  ;;  %v752_v2 = vrot.slane %v748_v20, %v1040_v30  ;;  %v656_v31 = vadd.f32 %v652_v22, %v595_v19  ;;  %v692_v32 = vrot.slane %v688_v18, 2 }
  0x36   : > { %v728_v33 = vsel %vm1276_vm5, %v1274_v23, 0.0  ;;  %v695_v36 = vadd.f32 %v691_v27, %v655_v26  ;;  %v731_v37 = vrot.slane %v727_v28, 5  ;;  %v756_v38 = vrot.slane %v748_v20, %v1051_v41 }
  0x37   : > { %vm1288_vm14 = vcmp.eq.s32.totalorder %v752_v2, 1  ;;  %v696_v48 = vadd.f32 %v692_v32, %v656_v31  ;;  %v732_v51 = vrot.slane %v728_v33, 5  ;;  %v1420_v55 = vmov 0 }
  0x38   : > { %v735_v30 = vadd.f32 %v731_v37, %v695_v36  ;;  %vm1294_vm7 = vcmp.eq.s32.totalorder %v756_v38, 1  ;;  %v475_v41 = vrot.slane %v1068_v53, 6  ;;  %v476_v40 = vrot.slane %v1090_v63, 6 }
  0x39   : > { %v1421_v55 = vsel %vm1294_vm7, 4294967295, %v1420_v55  ;;  %v736_v3 = vadd.f32 %v732_v51, %v696_v48  ;;  %v616_v5 = vrot.slane %v1166_v39, 7  ;;  %v617_v11 = vrot.slane %v1183_v42, 7 }
  0x3a   : > { %v931_v43 = vpop.eup %930  ;;  %v478_v22 = vrot.slane %v1104_v8, 6  ;;  %v479_v18 = vrot.slane %v1118_v13, 6  ;;  %v426_v26 = vrot.slane %v1064_v49, 3  ;;  %v527_v53 = vrot.slane %v1154_v29, 1 }
  0x3b   : > { %v761_v57 = vsel %vm1288_vm14, %v931_v43, 0.0  ;;  %v567_v63 = vrot.slane %v1158_v34, 4  ;;  %vm1422_vm5 = vcmask 1041408   ;;  %v619_v42 = vrot.slane %v1205_v7, 7 }
  0x3c   : > { %v1292_v52 = vpop.eup %932  ;;  %v763_v20 = vadd.f32 %v761_v57, %v735_v30  ;;  %v477_v39 = vsel %vm1422_vm5, %v475_v41, %v476_v40  ;;  %v620_v28 = vrot.slane %v1215_v15, 7  ;;  %v668_v8 = vrot.slane %v1249_v46, 2  ;;  %vm1424_vm0 = vmmov %vm1422_vm5 }
  0x3d   : > { %v762_v19 = vsel %vm1294_vm7, %v1292_v52, 0.0  ;;  %vm1423_vm7 = vcmask 1040384   ;;  %v708_v13 = vrot.slane %v1259_v10, 5  ;;  %v427_v34 = vrot.slane %v1094_v4, 3 }
  0x3e   : > { %v764_v2 = vadd.f32 %v762_v19, %v736_v3  ;;  %v618_v32 = vsel %vm1423_vm7, %v616_v5, %v617_v11  ;;  %934 = vrcp.f32 %v763_v20  ;;  %v480_v36 = vsel %vm1424_vm0, %v478_v22, %v479_v18  ;;  %vm1425_vm5 = vmmov %vm1423_vm7 }
  0x3f   : > { %v528_v7 = vrot.slane %v1175_v47, 1  ;;  %v568_v15 = vrot.slane %v1199_v0, 4  ;;  %v669_v38 = vrot.slane %v1252_v62, 2  ;;  %v621_v46 = vsel %vm1425_vm5, %v619_v42, %v620_v28 }
  0x40   : > { %v709_v10 = vrot.slane %v1274_v23, 5  ;;  %936 = vrcp.f32 %v764_v2 }
  0x48   : > { %v935_v25 = vpop.eup %934 }
  0x86   : > { %v292_v54 = vpop.permute.xlu0 %291 }
  0x8f   : > { %v384_v33 = vpop.permute.xlu0 %383 }
  0xe8   : > { %v371_v27 = vpop.f32.mrb[0].mxu0 }
  0xe9   : > { %v372_v31 = vadd.f32 %v371_v27, %v292_v54  ;;  %v373_v49 = vpop.f32.mrb[1].mxu0  ;;  %v937_v27 = vpop.eup %936 }
  0xea   : > { %v374_v29 = vadd.f32 %v373_v49, %v292_v54 }
  0xeb   : > { %v386_v37 = vmul.f32 %v384_v33, %v372_v31 }
  0xec   : > { %v387_v48 = vmul.f32 %v384_v33, %v374_v29 }
  0xed   : > { %v396_v51 = vmul.f32 %v1078_v58, %v386_v37  ;;  %v430_v30 = vmul.f32 %v426_v26, %v386_v37  ;;  %v483_v57 = vmul.f32 %v477_v39, %v386_v37  ;;  %v531_v4 = vmul.f32 %v527_v53, %v386_v37 }
  0xee   : > { %v571_v54 = vmul.f32 %v567_v63, %v386_v37  ;;  %v624_v41 = vmul.f32 %v618_v32, %v386_v37  ;;  %v672_v40 = vmul.f32 %v668_v8, %v386_v37  ;;  %v712_v3 = vmul.f32 %v708_v13, %v386_v37 }
  0xef   : > { %v409_v47 = vsel %vm1106_vm11, %v396_v51, 0.0  ;;  %v746_v0 = vmul.f32 %v931_v43, %v386_v37  ;;  %v397_v62 = vmul.f32 %v1140_v24, %v387_v48  ;;  %v431_v5 = vmul.f32 %v427_v34, %v387_v48 }
  0xf0   : > { %v443_v23 = vsel %vm1085_vm9, %v430_v30, %v409_v47  ;;  %v484_v11 = vmul.f32 %v480_v36, %v387_v48  ;;  %v532_v19 = vmul.f32 %v528_v7, %v387_v48  ;;  %v572_v58 = vmul.f32 %v568_v15, %v387_v48 }
  0xf1   : > { %v496_v20 = vsel %vm1100_vm10, %v483_v57, %v443_v23  ;;  %v410_v22 = vsel %vm1142_vm15, %v397_v62, 0.0  ;;  %v625_v18 = vmul.f32 %v621_v46, %v387_v48  ;;  %v673_v26 = vmul.f32 %v669_v38, %v387_v48 }
  0xf2   : > { %v544_v9 = vsel %vm1160_vm1, %v531_v4, %v496_v20  ;;  %v444_v24 = vsel %vm1114_vm12, %v431_v5, %v410_v22  ;;  %v713_v43 = vmul.f32 %v709_v10, %v387_v48  ;;  %v747_v60 = vmul.f32 %v1292_v52, %v387_v48 }
  0xf3   : > { %v584_v53 = vsel %vm1189_vm3, %v571_v54, %v544_v9  ;;  %v497_v6 = vsel %vm1120_vm13, %v484_v11, %v444_v24  ;;  %vm1426_vm9 = vnez %v1407_v17  ;;  %vm1427_vm10 = vnez %v1409_v21 }
  0xf4   : > { %v637_v63 = vsel %vm1195_vm4, %v624_v41, %v584_v53  ;;  %v545_v35 = vsel %vm1177_vm2, %v532_v19, %v497_v6  ;;  %vm1428_vm11 = vnez %v1413_v1  ;;  %vm1429_vm12 = vnez %v1417_v59 }
  0xf5   : > { %v685_v12 = vsel %vm1245_vm8, %v672_v40, %v637_v63  ;;  %v585_v52 = vsel %vm1426_vm9, %v572_v58, %v545_v35  ;;  %vm1430_vm13 = vnez %v1421_v55 }
  0xf6   : > { %v725_v56 = vsel %vm1265_vm6, %v712_v3, %v685_v12  ;;  %v638_v16 = vsel %vm1427_vm10, %v625_v18, %v585_v52 }
  0xf7   : > { %v759_v61 = vsel %vm1288_vm14, %v746_v0, %v725_v56  ;;  %v686_v50 = vsel %vm1428_vm11, %v673_v26, %v638_v16 }
  0xf8   : > { %v767_v39 = vmul.f32 %v935_v25, %v759_v61  ;;  %v726_v45 = vsel %vm1429_vm12, %v713_v43, %v686_v50 }
  0xf9   : > { %v760_v17 = vsel %vm1430_vm13, %v747_v60, %v726_v45 }
  0xfa   : > { %v768_v42 = vmul.f32 %v937_v27, %v760_v17 }
  0xfc   : > { %v771_v21 = vcombine.low %v767_v39, %v768_v42 }
  0xfe   : > { %773 = vst [vmem:[%s285_s13] sm:$0x77] %v771_v21 }
  0xff PF: > { %s16_s21 = sadd.s32 1, %s944_s21  }
 0x100   : > { %p13_p4 = scmp.ge.s32.totalorder %s16_s21, 4  }
 0x102   :  { %15 = sbr.rel (!%p13_p4) target bundleno = 1 (0x1), region = 88 }

// kernel: transformer_devil_forward.5
= control target key start
LH: loop header
LB: loop body
LE: loop exit
PB: predicated region body
PF: predicated region fallthrough
CT: control target
= control target key end

     0   :  { %s7109_s0 = inlined_call_operand.vmem [shape: bf16[2,64,128], index: 0, kind: input, shape index: {}]   ;;  %s7110_s1 = inlined_call_operand.vmem [shape: f32[2,1,64], index: 1, kind: input, shape index: {}]   ;;  %s7111_s2 = inlined_call_operand.vmem [shape: f32[64,64], index: 2, kind: input, shape index: {}]   ;;  %s7112_s3 = inlined_call_operand.vmem [shape: bf16[128,64], index: 3, kind: input, shape index: {}]   ;;  %s7113_s4 = inlined_call_operand.vmem [shape: f32[1,64], index: 4, kind: input, shape index: {}]   ;;  %s7114_s5 = inlined_call_operand.vmem [shape: bf16[64,64], index: 5, kind: input, shape index: {}]   ;;  %s7115_s6 = inlined_call_operand.vmem [shape: f32[1,64], index: 6, kind: input, shape index: {}]   ;;  %s7116_s7 = inlined_call_operand.vmem [shape: bf16[64,64], index: 7, kind: input, shape index: {}]   ;;  %s7117_s8 = inlined_call_operand.hbm [shape: f32[1,64], index: 8, kind: input, shape index: {}]   ;;  %s7118_s9 = inlined_call_operand.vmem [shape: bf16[64,384], index: 9, kind: input, shape index: {}]   ;;  %s7119_s10 = inlined_call_operand.vmem [shape: f32[1,384], index: 10, kind: input, shape index: {}]   ;;  %s7120_s11 = inlined_call_operand.vmem [shape: bf16[64,192], index: 11, kind: input, shape index: {}]   ;;  %s7121_s12 = inlined_call_operand.vmem [shape: f32[1,192], index: 12, kind: input, shape index: {}]   ;;  %s7122_s13 = inlined_call_operand.vmem [shape: bf16[64,64], index: 13, kind: input, shape index: {}]   ;;  %s7123_s14 = inlined_call_operand.hbm [shape: f32[1,64], index: 14, kind: input, shape index: {}]   ;;  %s7124_s15 = inlined_call_operand.vmem [shape: bf16[64,256], index: 15, kind: input, shape index: {}]   ;;  %s7125_s16 = inlined_call_operand.vmem [shape: f32[1,256], index: 16, kind: input, shape index: {}]   ;;  %s7126_s17 = inlined_call_operand.vmem [shape: bf16[256,64], index: 17, kind: input, shape index: {}]   ;;  %s7127_s18 = inlined_call_operand.hbm [shape: f32[1,64], index: 18, kind: input, shape index: {}]   ;;  %s7128_s19 = inlined_call_operand.vmem [shape: bf16[64,128], index: 19, kind: input, shape index: {}]   ;;  %s7129_s20 = inlined_call_operand.hbm [shape: f32[1,128], index: 20, kind: input, shape index: {}]   ;;  %s7130_s21 = inlined_call_operand.vmem [shape: bf16[64,128], index: 21, kind: input, shape index: {}]   ;;  %s7131_s22 = inlined_call_operand.hbm [shape: f32[1,128], index: 22, kind: input, shape index: {}]   ;;  %s7132_s23 = inlined_call_operand.vmem [shape: f32[2,64,128], index: 23, kind: output, shape index: {}]  }
   0x1   :  { %7141 = sst [smem:[#allocation14_spill]] %s7109_s0 }
   0x2   :  { %7142 = sst [smem:[#allocation15_spill]] %s7110_s1 }
   0x3   :  { %7143 = sst [smem:[#allocation16_spill]] %s7111_s2 }
   0x4   :  { %7144 = sst [smem:[#allocation17_spill]] %s7112_s3 }
   0x5   :  { %7145 = sst [smem:[#allocation18_spill]] %s7113_s4 }
   0x6   :  { %7146 = sst [smem:[#allocation19_spill]] %s7114_s5 }
   0x7   :  { %7147 = sst [smem:[#allocation20_spill]] %s7115_s6 }
   0x8   :  { %7148 = sst [smem:[#allocation21_spill]] %s7116_s7 }
   0x9   :  { %7149 = sst [smem:[#allocation22_spill]] %s7130_s21 }
   0xa   :  { %7150 = sst [smem:[#allocation23_spill]] %s7132_s23 }
   0xb   :  { %28 = vsyncpa [#allocation3], 0 }
   0xc   :  { %29 = vsyncpa [#allocation5], 0 }
   0xd   :  { %30 = vsyncpa [#allocation8], 0  ;;  %s5649_s4 = smov 0  }
   0xe LB: > { %7151 = sst [smem:[#allocation13_spill]] %s5512_s4  ;;  %s5514_s30 = smov [#allocation4]   ;;  %s5512_s4 = sphi %s5649_s4, %s36_s4  }
   0xf   : > { %s617_s24 = sshll.u32 %s5514_s30, 4  ;;  %s5655_s25 = sadd.s32 4294967295, %s5512_s4   ;;  %s5660_s24 = int_to_ptr.vmem [resolvable:$true] %s617_s24 }
  0x10   : > { %p4352_p0 = scmp.ge.s32.totalorder %s5512_s4, 1  ;;  %p560_p1 = scmp.lt.s32.totalorder %s5512_s4, 3 }
  0x11   : > { %p7139_p2 = scmp.eq.s32.totalorder %s5655_s25, 0  ;;  %s5515_s1 = smov [#allocation7]  }
  0x12   : > { %p5662_p3 = pnand %p4352_p0, %p560_p1  ;;  %s651_s26 = sshll.u32 %s5515_s1, 4  ;;  %s5668_s26 = int_to_ptr.vmem [resolvable:$true] %s651_s26 }
  0x13   : > { %s5516_s2 = smov [#allocation2]   ;;  %s5517_s7 = smov [#allocation6]  }
  0x14   : > { %s7152_s5 = scalar_select %p5662_p3, 1, 0 }
  0x15   : > { %p5000_p4 = pneg %p5662_p3  ;;  %s591_s6 = sshll.u32 %s5516_s2, 4  ;;  %s5676_s6 = int_to_ptr.vmem [resolvable:$true] %s591_s6 }
  0x16   : > { %s637_s28 = sshll.u32 %s5517_s7, 4  ;;  %s5354_s0 = scalar_lea.hbm %s7123_s14, 16  ;;  %s5678_s28 = int_to_ptr.vmem [resolvable:$true] %s637_s28 }
  0x17   : > { %p5672_p5 = pnand %p7139_p2, %p5000_p4  ;;  %p5355_p6 = scmp.ne.s32.totalorder %s7123_s14, %s5354_s0 }
  0x18   : > { %p5361_p10 = scmp.lt.u32.totalorder %s5354_s0, %s7123_s14 }
  0x19   : > { %p5688_p7 = pneg %p5672_p5 }
  0x1b   : > { %p5357_p8 = pnand %p5688_p7, %p5355_p6 }
  0x1d   : > { %p5358_p9 = pneg %p5357_p8 }
  0x1f   : > { %p5363_p11 = pnand %p5361_p10, %p5358_p9 }
  0x21   : > { %5366 = shalt.err (!%p5363_p11)
}
  0x22   : > { %s5367_s29 = scalar_lea.vmem %s5660_s24, 16  ;;  %s5374_s3 = scalar_lea.vmem %s5660_s24, 32 }
  0x23   : > { %p5368_p12 = scmp.ne.s32.totalorder %s5660_s24, %s5367_s29  ;;  %p5375_p1 = scmp.lt.s32.totalorder %s5660_s24, %s5660_s24 }
  0x24   : > { %p5376_p4 = scmp.lt.s32.totalorder %s5374_s3, %s5367_s29 }
  0x25   : > { %p5370_p13 = pnand %p5368_p12, %p5688_p7 }
  0x26   : > { %p5377_p6 = por %p5376_p4, %p5375_p1 }
  0x27   : > { %p5371_p0 = pneg %p5370_p13 }
  0x29   : > { %p5378_p8 = pnand %p5377_p6, %p5371_p0 }
  0x2b   : > { %5381 = shalt.err (!%p5378_p8)
}
  0x2c   : > { %5006 = dma.hbm_to_vmem [thread:$0]  (!%p5672_p5), %s7123_s14, 16, %s5660_s24, [#allocation5]  }
  0x2d   : > { %s5382_s7 = scalar_lea.hbm %s7129_s20, 16 }
  0x2e   : > { %p5383_p9 = scmp.ne.s32.totalorder %s7129_s20, %s5382_s7  ;;  %p5389_p12 = scmp.lt.u32.totalorder %s5382_s7, %s7129_s20 }
  0x30   : > { %p5385_p10 = pnand %p5383_p9, %p5688_p7 }
  0x32   : > { %p5386_p11 = pneg %p5385_p10 }
  0x34   : > { %p5391_p13 = pnand %p5389_p12, %p5386_p11 }
  0x36   : > { %5394 = shalt.err (!%p5391_p13)
}
  0x37   : > { %s5395_s24 = scalar_lea.vmem %s5668_s26, 16  ;;  %s5402_s21 = scalar_lea.vmem %s5668_s26, 32 }
  0x38   : > { %p5396_p0 = scmp.ne.s32.totalorder %s5668_s26, %s5395_s24  ;;  %p5403_p6 = scmp.lt.s32.totalorder %s5668_s26, %s5668_s26 }
  0x39   : > { %p5404_p8 = scmp.lt.s32.totalorder %s5402_s21, %s5395_s24 }
  0x3a   : > { %p5398_p1 = pnand %p5396_p0, %p5688_p7 }
  0x3b   : > { %p5405_p9 = por %p5404_p8, %p5403_p6 }
  0x3c   : > { %p5399_p4 = pneg %p5398_p1 }
  0x3e   : > { %p5406_p10 = pnand %p5405_p9, %p5399_p4 }
  0x40   : > { %5409 = shalt.err (!%p5406_p10)
}
  0x41   : > { %5012 = dma.hbm_to_vmem [thread:$0]  (!%p5672_p5), %s7129_s20, 16, %s5668_s26, [#allocation8]  }
  0x42   : > { %s5410_s1 = scalar_lea.hbm %s7117_s8, 16 }
  0x43   : > { %p5411_p11 = scmp.ne.s32.totalorder %s7117_s8, %s5410_s1  ;;  %p5417_p0 = scmp.lt.u32.totalorder %s5410_s1, %s7117_s8 }
  0x45   : > { %p5413_p12 = pnand %p5411_p11, %p5688_p7 }
  0x47   : > { %p5414_p13 = pneg %p5413_p12 }
  0x49   : > { %p5419_p1 = pnand %p5417_p0, %p5414_p13 }
  0x4b   : > { %5422 = shalt.err (!%p5419_p1)
}
  0x4c   : > { %s5423_s26 = scalar_lea.vmem %s5676_s6, 16  ;;  %s5430_s21 = scalar_lea.vmem %s5676_s6, 32 }
  0x4d   : > { %p5424_p4 = scmp.ne.s32.totalorder %s5676_s6, %s5423_s26  ;;  %p5431_p9 = scmp.lt.s32.totalorder %s5676_s6, %s5676_s6 }
  0x4e   : > { %p5432_p10 = scmp.lt.s32.totalorder %s5430_s21, %s5423_s26 }
  0x4f   : > { %p5426_p6 = pnand %p5424_p4, %p5688_p7 }
  0x50   : > { %p5433_p11 = por %p5432_p10, %p5431_p9 }
  0x51   : > { %p5427_p8 = pneg %p5426_p6 }
  0x53   : > { %p5434_p12 = pnand %p5433_p11, %p5427_p8 }
  0x55   : > { %5437 = shalt.err (!%p5434_p12)
}
  0x56   : > { %5003 = dma.hbm_to_vmem [thread:$0]  (!%p5672_p5), %s7117_s8, 16, %s5676_s6, [#allocation3]  }
  0x57   : > { %s5438_s1 = scalar_lea.hbm %s7127_s18, 16 }
  0x58   : > { %p5439_p13 = scmp.ne.s32.totalorder %s7127_s18, %s5438_s1  ;;  %p5445_p4 = scmp.lt.u32.totalorder %s5438_s1, %s7127_s18 }
  0x5a   : > { %p5441_p0 = pnand %p5439_p13, %p5688_p7 }
  0x5c   : > { %p5442_p1 = pneg %p5441_p0 }
  0x5e   : > { %p5447_p6 = pnand %p5445_p4, %p5442_p1 }
  0x60   : > { %5450 = shalt.err (!%p5447_p6)
}
  0x61   : > { %s5451_s6 = scalar_lea.vmem %s5678_s28, 16  ;;  %s5458_s26 = scalar_lea.vmem %s5678_s28, 32 }
  0x62   : > { %p5452_p8 = scmp.ne.s32.totalorder %s5678_s28, %s5451_s6  ;;  %p5459_p11 = scmp.lt.s32.totalorder %s5678_s28, %s5678_s28 }
  0x63   : > { %p5460_p12 = scmp.lt.s32.totalorder %s5458_s26, %s5451_s6 }
  0x64   : > { %p5454_p9 = pnand %p5452_p8, %p5688_p7 }
  0x65   : > { %p5461_p13 = por %p5460_p12, %p5459_p11 }
  0x66   : > { %p5455_p10 = pneg %p5454_p9 }
  0x68   : > { %p5462_p0 = pnand %p5461_p13, %p5455_p10 }
  0x6a   : > { %5465 = shalt.err (!%p5462_p0)
}
  0x6b   : > { %5009 = dma.hbm_to_vmem [thread:$0]  (!%p5672_p5), %s7127_s18, 16, %s5678_s28, [#allocation5]  }
  0x6c   : > { %s5518_s4 = smov [#allocation9]   ;;  %s5466_s7 = scalar_lea.hbm %s7131_s22, 16 }
  0x6d   : > { %s665_s0 = sshll.u32 %s5518_s4, 4  ;;  %p5467_p1 = scmp.ne.s32.totalorder %s7131_s22, %s5466_s7  ;;  %s666_s0 = int_to_ptr.vmem [resolvable:$true] %s665_s0 }
  0x6e   : > { %p5473_p8 = scmp.lt.u32.totalorder %s5466_s7, %s7131_s22 }
  0x6f   : > { %p5469_p4 = pnand %p5467_p1, %p5688_p7 }
  0x71   : > { %p5470_p6 = pneg %p5469_p4 }
  0x73   : > { %p5475_p9 = pnand %p5473_p8, %p5470_p6 }
  0x75   : > { %5478 = shalt.err (!%p5475_p9)
}
  0x76   : > { %s5479_s28 = scalar_lea.vmem %s666_s0, 16  ;;  %s5486_s26 = scalar_lea.vmem %s666_s0, 32 }
  0x77   : > { %p5480_p10 = scmp.ne.s32.totalorder %s666_s0, %s5479_s28  ;;  %p5487_p13 = scmp.lt.s32.totalorder %s666_s0, %s666_s0 }
  0x78   : > { %p5488_p0 = scmp.lt.s32.totalorder %s5486_s26, %s5479_s28 }
  0x79   : > { %p5482_p11 = pnand %p5480_p10, %p5688_p7 }
  0x7a   : > { %p5489_p2 = por %p5488_p0, %p5487_p13 }
  0x7b   : > { %p5483_p12 = pneg %p5482_p11 }
  0x7d   : > { %p5490_p3 = pnand %p5489_p2, %p5483_p12 }
  0x7f   : > { %5493 = shalt.err (!%p5490_p3)
}
  0x80   : > { %5015 = dma.hbm_to_vmem [thread:$0]  (!%p5672_p5), %s7131_s22, 16, %s666_s0, [#allocation8]  }
  0x81   : > { %p7155_p1 = scmp.ne.s32.totalorder %s7152_s5, 0 }
  0x82   : > { %p7156_p4 = scmp.eq.s32.totalorder (!%p7155_p1), %s5655_s25, 0 }
  0x83   : > { %692 = sbr.rel (%p7155_p1) target bundleno = 4538 (0x11ba), region = 112 }
  0x8a   : > { %5499 = dma.done.wait (%p7156_p4), [#allocation3], 16   ;;  %p7157_p7 = pmov %p7156_p4 }
  0x8b   : > { %p7158_p6 = pmov %p7156_p4 }
  0x8c   : > { %5501 = vsyncadd (%p7157_p7), [#allocation3], 4294967280 }
  0x8d   : > { %5503 = dma.done.wait (%p7158_p6), [#allocation5], 32   ;;  %p7159_p2 = pmov %p7156_p4 }
  0x8f   : > { %5505 = vsyncadd (%p7159_p2), [#allocation5], 4294967264  ;;  %p7160_p3 = pmov %p7159_p2 }
  0x90   : > { %p7161_p5 = pmov %p7159_p2 }
  0x91   : > { %5507 = dma.done.wait (%p7160_p3), [#allocation8], 32  }
  0x92   : > { %5509 = vsyncadd (%p7161_p5), [#allocation8], 4294967264  ;;  %v5519_v0 = vmov 0.0   ;;  %vm5520_vm0 = vmmov 0   ;;  %s7162_s2 = sld [smem:[#allocation17_spill]]  ;;  %p775_p8 = scmp.lt.s32.totalorder %s5655_s25, 1 }
  0x93   : > { %4708 = vmatprep.subr.bf16.mxu1 %v5519_v0  ;;  %4716 = vmatprep.mubr.msk.bf16.mxu1 %vm5520_vm0, %v5519_v0  ;;  %s7163_s30 = sld [smem:[#allocation19_spill]]  ;;  %s7164_s0 = sld [smem:[#allocation15_spill]]  ;;  %vm1008_vm1 = vcmask 523264   ;;  %vm1697_vm2 = vcmask 130048  }
  0x94   : > { %s7174_s25 = smov (!%p775_p8, %s5655_s25), 1  ;;  %s7165_s6 = sld [smem:[#allocation14_spill]] }
  0x95   : > { %s4518_s21 = sshll.u32 %s7174_s25, 5  ;;  %s7166_s3 = sld [smem:[#allocation21_spill]] }
  0x96   : > { %s7167_s4 = sld [smem:[#allocation20_spill]]  ;;  %s7168_s7 = sld [smem:[#allocation18_spill]] }
  0x97   : > { %s5522_s5 = smov 64   ;;  %s5526_s29 = smov 96  }
  0x98   : > { %v5049_v1 = vld [vmem:[%s7162_s2] sm:$0xff]   ;;  %v5051_v3 = vld [vmem:[%s7162_s2 + $0x8] sm:$0xff]   ;;  %v5053_v5 = vld [vmem:[%s7162_s2 + $0x10] sm:$0xff]   ;;  %s5527_s24 = smov 16   ;;  %s5528_s26 = smov 80  }
  0x99   : > { %v5050_v2 = vld [vmem:[%s7163_s30] sm:$0xff]   ;;  %4684 = vmatprep.subr.bf16.mxu0 %v5049_v1  ;;  %v5052_v4 = vld [vmem:[%s7163_s30 + $0x8] sm:$0xff]   ;;  %v5054_v6 = vld [vmem:[%s7163_s30 + $0x10] sm:$0xff]   ;;  %s782_s1 = scalar_lea.vmem %s7164_s0, %s7174_s25  ;;  %s5523_s0 = smov 48  }
  0x9a   : > { %4709 = vmatpush3.bf16.msra.mxu1 %v5050_v2  ;;  %4685 = vmatpush3.bf16.msra.mxu0 %v5049_v1  ;;  %v5055_v7 = vld [vmem:[%s7162_s2 + $0x18] sm:$0xff]   ;;  %s5855_s28 = scalar_lea.vmem %s7165_s6, %s4518_s21  ;;  %v973_v9 = vld [vmem:[%s782_s1] sm:$0x1]  ;;  %v5058_v13 = vld [vmem:[%s7162_s2 + $0x28] sm:$0xff]   ;;  %s7169_s6 = sld [smem:[#allocation16_spill]] }
  0x9b   : > { %4710 = vmatprep.subr.bf16.mxu1 %v5519_v0  ;;  %4686 = vmatprep.subr.bf16.mxu0 %v5051_v3  ;;  %v5056_v8 = vld [vmem:[%s7163_s30 + $0x18] sm:$0xff]   ;;  %v5057_v10 = vld [vmem:[%s7162_s2 + $0x20] sm:$0xff]   ;;  %v974_v12 = vpack.c.bf16 %v973_v9, %v973_v9  ;;  %v5059_v14 = vld [vmem:[%s7162_s2 + $0x30] sm:$0xff]   ;;  %s5524_s1 = smov 112  }
  0x9c   : > { %v5061_v11 = vld [vmem:[%s5855_s28] sm:$0xff]   ;;  %v5060_v15 = vld [vmem:[%s7162_s2 + $0x38] sm:$0xff]   ;;  %v5062_v16 = vld [vmem:[%s5855_s28 + $0x8] sm:$0xff]  }
  0x9d   : > { %4700 = vmatprep.mubr.bf16.mxu0 %v5061_v11  ;;  %v5063_v17 = vld [vmem:[%s5855_s28 + $0x10] sm:$0xff]   ;;  %v5064_v18 = vld [vmem:[%s5855_s28 + $0x18] sm:$0xff]   ;;  %v5065_v19 = vld [vmem:[%s7166_s3] sm:$0xff]  }
  0x9e   : > { %4711 = vmatpush3.bf16.msra.mxu1 %v5052_v4  ;;  %4687 = vmatpush3.bf16.msra.mxu0 %v5051_v3  ;;  %v5066_v20 = vld [vmem:[%s7166_s3 + $0x8] sm:$0xff]   ;;  %v5067_v21 = vld [vmem:[%s7166_s3 + $0x10] sm:$0xff]   ;;  %v5068_v22 = vld [vmem:[%s7166_s3 + $0x18] sm:$0xff]  }
  0x9f   : > { %4712 = vmatprep.subr.bf16.mxu1 %v5519_v0  ;;  %4688 = vmatprep.subr.bf16.mxu0 %v5053_v5  ;;  %v983_v23 = vld [vmem:[%s7167_s4] sm:$0x1] }
  0xa0   : > { %v4369_v31 = vld [vmem:[%s7168_s7] ss:$0 sm:$0xff]  ;;  %v959_v34 = vld [vmem:[%s7169_s6 + $0x10] sm:$0xff]  ;;  %v960_v40 = vld [vmem:[%s7169_s6 + $0x18] sm:$0xff]  ;;  %s5525_s7 = smov 32  }
  0xa1   : > { %v957_v37 = vld [vmem:[%s7169_s6] sm:$0xff]  ;;  %v958_v44 = vld [vmem:[%s7169_s6 + $0x8] sm:$0xff]  ;;  %v963_v55 = vld [vmem:[%s7169_s6 + $0x30] sm:$0xff] }
  0xa2   : > { %4713 = vmatpush3.bf16.msra.mxu1 %v5054_v6  ;;  %4689 = vmatpush3.bf16.msra.mxu0 %v5053_v5  ;;  %v961_v57 = vld [vmem:[%s7169_s6 + $0x20] sm:$0xff]  ;;  %v964_v61 = vld [vmem:[%s7169_s6 + $0x38] sm:$0xff]  ;;  %v962_v63 = vld [vmem:[%s7169_s6 + $0x28] sm:$0xff] }
  0xa3   : > { %4714 = vmatprep.subr.bf16.mxu1 %v5519_v0  ;;  %4690 = vmatprep.subr.bf16.mxu0 %v5055_v7 }
  0xa6   : > { %4715 = vmatpush3.bf16.msra.mxu1 %v5056_v8  ;;  %4691 = vmatpush3.bf16.msra.mxu0 %v5055_v7 }
  0xa7   : > { %4692 = vmatprep.subr.bf16.mxu0 %v5057_v10  ;;  %4720 = vmatprep.subr.bf16.mxu1 %v5519_v0 }
  0xa9   : > { %4717 = vmatmul.mubr.msk.bf16.vlgmr.msra.gmra.mrb[0].mxu1 %vm1008_vm1, %v974_v12 }
  0xaa   : > { %4693 = vmatpush3.bf16.msra.mxu0 %v5057_v10  ;;  %4728 = vmatprep.mubr.msk.bf16.mxu1 %vm5520_vm0, %v5519_v0 }
  0xab   : > { %4694 = vmatprep.subr.bf16.mxu0 %v5058_v13  ;;  %4721 = vmatpush3.bf16.msra.mxu1 %v5065_v19  ;;  %v5079_v19 = vld [vmem:[%s7118_s9 + $0x34] ss:$12 sps:$4 sm:$0xff]  }
  0xac   : > { %4722 = vmatprep.subr.bf16.mxu1 %v5519_v0 }
  0xae   : > { %4695 = vmatpush3.bf16.msra.mxu0 %v5058_v13  ;;  %v5071_v13 = vld [vmem:[%s7118_s9 + $0x4] ss:$12 sps:$4 sm:$0xff]  }
  0xaf   : > { %4696 = vmatprep.subr.bf16.mxu0 %v5059_v14  ;;  %4723 = vmatpush3.bf16.msra.mxu1 %v5066_v20  ;;  %v5077_v20 = vld [vmem:[%s7118_s9 + $0x30] ss:$12 sps:$4 sm:$0xff]  }
  0xb0   : > { %4724 = vmatprep.subr.bf16.mxu1 %v5519_v0 }
  0xb2   : > { %4697 = vmatpush3.bf16.msra.mxu0 %v5059_v14  ;;  %v5069_v14 = vld [vmem:[%s7118_s9] ss:$12 sps:$4 sm:$0xff]  }
  0xb3   : > { %4698 = vmatprep.subr.bf16.mxu0 %v5060_v15  ;;  %4725 = vmatpush3.bf16.msra.mxu1 %v5067_v21  ;;  %v5080_v21 = vld [vmem:[%s7128_s19 + $0x10] sm:$0xff]  }
  0xb4   : > { %4726 = vmatprep.subr.bf16.mxu1 %v5519_v0 }
  0xb6   : > { %4699 = vmatpush3.bf16.msra.mxu0 %v5060_v15  ;;  %v5072_v15 = vld [vmem:[%s7128_s19] sm:$0xff]  }
  0xb7   : > { %4744 = vmatprep.subr.bf16.mxu0 %v5519_v0  ;;  %4727 = vmatpush3.bf16.msra.mxu1 %v5068_v22  ;;  %v5083_v22 = vld [vmem:[%s7118_s9 + $0x4c] ss:$12 sps:$4 sm:$0xff]  }
  0xb8   : > { %1244 = vmatprep.subr.bf16.mxu1 %v5071_v13 }
  0xb9   : > { %4701 = vmatmul.mubr.bf16.vlgmr.msra.gmra.mrb[0].mxu0 %v5062_v16  ;;  %v5075_v16 = vld [vmem:[%s7118_s9 + $0x1c] ss:$12 sps:$4 sm:$0xff]  }
  0xba   : > { %4704 = vmatprep.mubr.bf16.mxu0 %v5063_v17  ;;  %4745 = vmatpush3.bf16.msra.mxu0 %v5072_v15  ;;  %v5073_v17 = vld [vmem:[%s7118_s9 + $0x18] ss:$12 sps:$4 sm:$0xff]  }
  0xbb   : > { %4746 = vmatprep.subr.bf16.mxu0 %v5519_v0 }
  0xc1   : > { %4705 = vmatmul.mubr.bf16.gmra.mrb[4].mxu0 %v5064_v18  ;;  %v5076_v18 = vld [vmem:[%s7128_s19 + $0x8] sm:$0xff]  }
  0xc2   : > { %4752 = vmatprep.mubr.msk.bf16.mxu0 %vm5520_vm0, %v5519_v0  ;;  %4747 = vmatpush3.bf16.msra.mxu0 %v5076_v18 }
  0xc3   : > { %4748 = vmatprep.subr.bf16.mxu0 %v5519_v0 }
  0xc6   : > { %4749 = vmatpush3.bf16.msra.mxu0 %v5080_v21 }
  0xc7   : > { %4750 = vmatprep.subr.bf16.mxu0 %v5519_v0 }
 0x17c   : > { %v1046_v24 = vpop.f32.mrb[0].mxu1 }
 0x17d   : > { %v1047_v25 = vadd.f32 %v1046_v24, %v983_v23  ;;  %v4718_v26 = vpop.f32.mrb[1].mxu1  ;;  %v5081_v23 = vld [vmem:[%s7118_s9 + $0x48] ss:$12 sps:$4 sm:$0xff]   ;;  %v5084_v24 = vld [vmem:[%s7128_s19 + $0x18] sm:$0xff]  }
 0x17e   : > { %v1049_v27 = vpop.f32.mrb[2].mxu1  ;;  %4751 = vmatpush3.bf16.msra.mxu0 %v5084_v24  ;;  %v5086_v24 = vld [vmem:[%s7118_s9 + $0x20] ss:$12 sps:$4 sm:$0xff]  }
 0x17f   : > { %v4387_v28 = vmul.f32 -1.442695, %v1047_v25  ;;  %v4719_v29 = vpop.f32.mrb[3].mxu1 }
 0x181   : > { %5137 = vpow2.f32 %v4387_v28 }
 0x18b   : > { %v5138_v30 = vpop.eup %5137 }
 0x18c   : > { %v1055_v32 = vadd.f32 1.0, %v5138_v30  ;;  %v4702_v33 = vpop.f32.mrb[0].mxu0 }
 0x18d   : > { %v935_v35 = vadd.f32 %v4702_v33, %v4369_v31  ;;  %v926_v36 = vpop.f32.mrb[1].mxu0 }
 0x18e   : > { %5139 = vrcp.f32 %v1055_v32  ;;  %v927_v38 = vadd.f32 %v4369_v31, %v926_v36  ;;  %v4703_v39 = vpop.f32.mrb[2].mxu0 }
 0x18f   : > { %v5911_v41 = vadd.f32 %v959_v34, %v935_v35  ;;  %v938_v42 = vadd.f32 %v4703_v39, %v4369_v31  ;;  %v929_v43 = vpop.f32.mrb[3].mxu0 }
 0x190   : > { %v5916_v45 = vadd.f32 %v957_v37, %v927_v38  ;;  %v930_v46 = vadd.f32 %v4369_v31, %v929_v43 }
 0x191   : > { %v5918_v47 = vadd.f32 %v960_v40, %v938_v42  ;;  %v1404_v48 = vsel %vm1008_vm1, %v5911_v41, 0.0 }
 0x192   : > { %v5922_v49 = vadd.f32 %v958_v44, %v930_v46  ;;  %v1398_v50 = vsel %vm1008_vm1, %v5916_v45, 0.0  ;;  %1405 = vadd.xlane.f32.xlu1 %v1404_v48 }
 0x193   : > { %1399 = vadd.xlane.f32.xlu0 %v1398_v50  ;;  %v1407_v51 = vsel %vm1008_vm1, %v5918_v47, 0.0 }
 0x194   : > { %v4706_v52 = vpop.f32.mrb[4].mxu0  ;;  %v1401_v53 = vsel %vm1008_vm1, %v5922_v49, 0.0 }
 0x195   : > { %v951_v54 = vadd.f32 %v4706_v52, %v4369_v31  ;;  %v942_v56 = vpop.f32.mrb[5].mxu0 }
 0x196   : > { %v943_v58 = vadd.f32 %v4369_v31, %v942_v56  ;;  %v4707_v59 = vpop.f32.mrb[6].mxu0  ;;  %1408 = vadd.xlane.f32.xlu1 %v1407_v51 }
 0x197   : > { %1402 = vadd.xlane.f32.xlu0 %v1401_v53  ;;  %v954_v60 = vadd.f32 %v4707_v59, %v4369_v31  ;;  %v945_v62 = vpop.f32.mrb[7].mxu0  ;;  %v5942_v2 = vadd.f32 %v963_v55, %v951_v54 }
 0x198   : > { %v5140_v1 = vpop.eup %5139  ;;  %v5944_v3 = vadd.f32 %v961_v57, %v943_v58  ;;  %v946_v4 = vadd.f32 %v4369_v31, %v945_v62 }
 0x199   : > { %v1058_v5 = vmul.f32 %v5140_v1, %v1047_v25  ;;  %v5946_v6 = vadd.f32 %v964_v61, %v954_v60  ;;  %v1416_v11 = vsel %vm1008_vm1, %v5942_v2, 0.0  ;;  %v5521_v25 = vmov 0  }
 0x19a   : > { %v5948_v7 = vadd.f32 %v962_v63, %v946_v4  ;;  %v1410_v8 = vsel %vm1008_vm1, %v5944_v3, 0.0 }
 0x19b   : > { %v1059_v9 = vpack.c.bf16 %v1058_v5, %v1058_v5  ;;  %1411 = vadd.xlane.f32.xlu0 %v1410_v8  ;;  %v1419_v12 = vsel %vm1008_vm1, %v5946_v6, 0.0 }
 0x19c   : > { %v1413_v10 = vsel %vm1008_vm1, %v5948_v7, 0.0 }
 0x19d   : > { %4729 = vmatmul.mubr.msk.bf16.vlgmr.msra.gmra.mrb[4].mxu1 %vm1008_vm1, %v1059_v9  ;;  %1414 = vadd.xlane.f32.xlu1 %v1413_v10 }
 0x19e   : > { %1245 = vmatpush1.bf16.msra.mxu1 %v5069_v14  ;;  %1276 = vmatprep.mubr.bf16.mxu1 %v5521_v25 }
 0x19f   : > { %1417 = vadd.xlane.f32.xlu0 %v1416_v11  ;;  %1246 = vmatprep.subr.bf16.mxu1 %v5075_v16  ;;  %v1068_v11 = vld [vmem:[#allocation2] sm:$0x1] }
 0x1a1   : > { %1420 = vadd.xlane.f32.xlu1 %v1419_v12 }
 0x1a2   : > { %1247 = vmatpush1.bf16.msra.mxu1 %v5073_v17 }
 0x1a3   : > { %1248 = vmatprep.subr.bf16.mxu1 %v5079_v19 }
 0x1a6   : > { %1249 = vmatpush1.bf16.msra.mxu1 %v5077_v20 }
 0x1a7   : > { %1250 = vmatprep.subr.bf16.mxu1 %v5083_v22  ;;  %v5085_v22 = vld [vmem:[%s7118_s9 + $0x8] ss:$12 sps:$4 sm:$0xff]  }
 0x1aa   : > { %1251 = vmatpush1.bf16.msra.mxu1 %v5081_v23 }
 0x1ab   : > { %4732 = vmatprep.subr.bf16.mxu1 %v5519_v0 }
 0x21f   : > { %v1406_v26 = vpop.xlane.xlu1 %1405 }
 0x220   : > { %v1400_v27 = vpop.xlane.xlu0 %1399  ;;  %v1425_v28 = vmul.f32 0.015625, %v1406_v26  ;;  %v5087_v26 = vld [vmem:[%s7118_s9 + $0x38] ss:$12 sps:$4 sm:$0xff]  }
 0x221   : > { %v1423_v29 = vmul.f32 0.015625, %v1400_v27  ;;  %v5088_v27 = vld [vmem:[%s7118_s9 + $0x50] ss:$12 sps:$4 sm:$0xff]  }
 0x222   : > { %v6001_v30 = vsub.f32 %v5911_v41, %v1425_v28  ;;  %v5089_v28 = vld [vmem:[%s7120_s11] ss:$8 sps:$4 sm:$0xff]  }
 0x223   : > { %v6004_v31 = vsub.f32 %v5916_v45, %v1423_v29  ;;  %v1409_v32 = vpop.xlane.xlu1 %1408  ;;  %v5091_v29 = vld [vmem:[%s7120_s11 + $0x4] ss:$8 sps:$4 sm:$0xff]  }
 0x224   : > { %v1403_v33 = vpop.xlane.xlu0 %1402  ;;  %v1426_v34 = vmul.f32 0.015625, %v1409_v32  ;;  %v1441_v37 = vmul.f32 %v6001_v30, %v6001_v30  ;;  %v5094_v32 = vld [vmem:[%s7120_s11 + $0x14] ss:$8 sps:$4 sm:$0xff]  }
 0x225   : > { %v1424_v35 = vmul.f32 0.015625, %v1403_v33  ;;  %v1439_v36 = vmul.f32 %v6004_v31, %v6004_v31  ;;  %v5097_v33 = vld [vmem:[%s7120_s11 + $0x24] ss:$8 sps:$4 sm:$0xff]  }
 0x226   : > { %v6011_v38 = vsub.f32 %v5918_v47, %v1426_v34  ;;  %v1453_v44 = vsel %vm1008_vm1, %v1441_v37, 0.0  ;;  %v5095_v34 = vld [vmem:[%s7120_s11 + $0x20] ss:$8 sps:$4 sm:$0xff]  }
 0x227   : > { %v6014_v39 = vsub.f32 %v5922_v49, %v1424_v35  ;;  %v1447_v40 = vsel %vm1008_vm1, %v1439_v36, 0.0  ;;  %v1226_v35 = vlaneseq }
 0x228   : > { %1448 = vadd.xlane.f32.xlu0 %v1447_v40  ;;  %v1412_v42 = vpop.xlane.xlu0 %1411  ;;  %v1442_v48 = vmul.f32 %v6011_v38, %v6011_v38  ;;  %v5098_v40 = vld [vmem:[%s7120_s11 + $0x30] ss:$8 sps:$4 sm:$0xff]  }
 0x229   : > { %v1427_v43 = vmul.f32 0.015625, %v1412_v42  ;;  %v1440_v46 = vmul.f32 %v6014_v39, %v6014_v39  ;;  %v6087_v36 = vshrl.u32 %v1226_v35, 7  ;;  %v5100_v42 = vld [vmem:[%s7120_s11 + $0x34] ss:$8 sps:$4 sm:$0xff]  }
 0x22a   : > { %v1415_v50 = vpop.xlane.xlu1 %1414  ;;  %v1456_v57 = vsel %vm1008_vm1, %v1442_v48, 0.0 }
 0x22b   : > { %v6023_v51 = vsub.f32 %v5944_v3, %v1427_v43  ;;  %v1428_v52 = vmul.f32 0.015625, %v1415_v50  ;;  %v1450_v53 = vsel %vm1008_vm1, %v1440_v46, 0.0  ;;  %v6090_v37 = vsub.s32 0, %v6087_v36  ;;  %v1160_v43 = vld [vmem:[%s7119_s10] sm:$0x7] }
 0x22c   : > { %1454 = vadd.xlane.f32.xlu0 %v1453_v44  ;;  %1451 = vadd.xlane.f32.xlu1 %v1450_v53  ;;  %v1418_v54 = vpop.xlane.xlu0 %1417  ;;  %v6102_v44 = vsub.s32 1, %v6087_v36 }
 0x22d   : > { %v6027_v55 = vsub.f32 %v5948_v7, %v1428_v52  ;;  %v1429_v56 = vmul.f32 0.015625, %v1418_v54  ;;  %v1443_v58 = vmul.f32 %v6023_v51, %v6023_v51  ;;  %v1229_v46 = vrot.slane %v1160_v43, %v6090_v37 }
 0x22e   : > { %v1421_v59 = vpop.xlane.xlu1 %1420  ;;  %v1233_v48 = vrot.slane %v1160_v43, %v6102_v44 }
 0x22f   : > { %v6033_v60 = vsub.f32 %v5942_v2, %v1429_v56  ;;  %v1430_v61 = vmul.f32 0.015625, %v1421_v59  ;;  %v1459_v62 = vsel %vm1008_vm1, %v1443_v58, 0.0  ;;  %v1444_v63 = vmul.f32 %v6027_v55, %v6027_v55 }
 0x230   : > { %1457 = vadd.xlane.f32.xlu1 %v1456_v57  ;;  %1460 = vadd.xlane.f32.xlu0 %v1459_v62 }
 0x231   : > { %v6039_v1 = vsub.f32 %v5946_v6, %v1430_v61  ;;  %v1462_v4 = vsel %vm1008_vm1, %v1444_v63, 0.0  ;;  %v1445_v5 = vmul.f32 %v6033_v60, %v6033_v60 }
 0x233   : > { %v1465_v8 = vsel %vm1008_vm1, %v1445_v5, 0.0  ;;  %v1446_v9 = vmul.f32 %v6039_v1, %v6039_v1 }
 0x234   : > { %1463 = vadd.xlane.f32.xlu1 %v1462_v4  ;;  %1466 = vadd.xlane.f32.xlu0 %v1465_v8 }
 0x235   : > { %v1468_v10 = vsel %vm1008_vm1, %v1446_v9, 0.0 }
 0x238   : > { %1469 = vadd.xlane.f32.xlu1 %v1468_v10 }
 0x270   : > { %v1130_v12 = vpop.f32.mrb[4].mxu1 }
 0x271   : > { %v1131_v13 = vadd.f32 %v1130_v12, %v1068_v11  ;;  %v4730_v14 = vpop.f32.mrb[5].mxu1 }
 0x272   : > { %v1133_v15 = vpop.f32.mrb[6].mxu1 }
 0x273   : > { %v4393_v16 = vmul.f32 -1.442695, %v1131_v13  ;;  %v4731_v17 = vpop.f32.mrb[7].mxu1 }
 0x275   : > { %5141 = vpow2.f32 %v4393_v16 }
 0x27f   : > { %v5142_v18 = vpop.eup %5141 }
 0x280   : > { %v1139_v19 = vadd.f32 1.0, %v5142_v18 }
 0x282   : > { %5143 = vrcp.f32 %v1139_v19 }
 0x28c   : > { %v5144_v20 = vpop.eup %5143 }
 0x28d   : > { %v1142_v21 = vmul.f32 %v5144_v20, %v1131_v13 }
 0x28f   : > { %v1143_v23 = vpack.c.bf16 %v1142_v21, %v1142_v21 }
 0x291   : > { %4406 = vmatmul.mubr.msk.bf16.vlgmr.msra.gmra.mrb[8].mxu1 %vm1008_vm1, %v1143_v23  ;;  %4753 = vmatmul.mubr.msk.bf16.vlgmr.msra.gmra.mrb[8].mxu0 %vm1008_vm1, %v1143_v23 }
 0x292   : > { %4733 = vmatpush3.bf16.msra.mxu1 %v5085_v22  ;;  %4740 = vmatprep.mubr.msk.bf16.mxu1 %vm5520_vm0, %v5519_v0 }
 0x293   : > { %4734 = vmatprep.subr.bf16.mxu1 %v5519_v0 }
 0x296   : > { %4735 = vmatpush3.bf16.msra.mxu1 %v5086_v24 }
 0x297   : > { %4736 = vmatprep.subr.bf16.mxu1 %v5519_v0 }
 0x29a   : > { %4737 = vmatpush3.bf16.msra.mxu1 %v5087_v26 }
 0x29b   : > { %4738 = vmatprep.subr.bf16.mxu1 %v5519_v0  ;;  %v5092_v0 = vld [vmem:[%s7120_s11 + $0x10] ss:$8 sps:$4 sm:$0xff]  }
 0x29e   : > { %4739 = vmatpush3.bf16.msra.mxu1 %v5088_v27 }
 0x29f   : > { %1608 = vmatprep.subr.bf16.mxu1 %v5091_v29 }
 0x2a1   : > { %4741 = vmatmul.mubr.msk.bf16.vlgmr.msra.gmra.mrb[12].mxu1 %vm1008_vm1, %v1143_v23 }
 0x2a2   : > { %1640 = vmatprep.mubr.bf16.mxu1 %v5521_v25  ;;  %1609 = vmatpush1.bf16.msra.mxu1 %v5089_v28 }
 0x2a3   : > { %1610 = vmatprep.subr.bf16.mxu1 %v5094_v32 }
 0x2a6   : > { %1611 = vmatpush1.bf16.msra.mxu1 %v5092_v0 }
 0x2a7   : > { %1612 = vmatprep.subr.bf16.mxu1 %v5097_v33 }
 0x2aa   : > { %1613 = vmatpush1.bf16.msra.mxu1 %v5095_v34 }
 0x2ab   : > { %1614 = vmatprep.subr.bf16.mxu1 %v5100_v42 }
 0x2ae   : > { %1615 = vmatpush1.bf16.msra.mxu1 %v5098_v40 }
 0x2b5   : > { %v1449_v11 = vpop.xlane.xlu0 %1448 }
 0x2b6   : > { %v1471_v13 = vmul.f32 0.015625, %v1449_v11 }
 0x2b8   : > { %v1479_v17 = vadd.f32 1e-06, %v1471_v13 }
 0x2b9   : > { %v1452_v12 = vpop.xlane.xlu1 %1451  ;;  %v1455_v15 = vpop.xlane.xlu0 %1454 }
 0x2ba   : > { %v1472_v14 = vmul.f32 0.015625, %v1452_v12  ;;  %v1473_v18 = vmul.f32 0.015625, %v1455_v15  ;;  %5145 = vrsqrt.f32 %v1479_v17 }
 0x2bc   : > { %v1480_v19 = vadd.f32 1e-06, %v1472_v14  ;;  %v1481_v21 = vadd.f32 1e-06, %v1473_v18 }
 0x2bd   : > { %v1458_v16 = vpop.xlane.xlu1 %1457  ;;  %v1461_v23 = vpop.xlane.xlu0 %1460 }
 0x2be   : > { %v1474_v20 = vmul.f32 0.015625, %v1458_v16  ;;  %5147 = vrsqrt.f32 %v1480_v19  ;;  %v1475_v26 = vmul.f32 0.015625, %v1461_v23 }
 0x2bf   : > { %5149 = vrsqrt.f32 %v1481_v21 }
 0x2c0   : > { %v1482_v22 = vadd.f32 1e-06, %v1474_v20  ;;  %v1483_v28 = vadd.f32 1e-06, %v1475_v26 }
 0x2c1   : > { %v1464_v24 = vpop.xlane.xlu1 %1463  ;;  %v1467_v32 = vpop.xlane.xlu0 %1466 }
 0x2c2   : > { %5151 = vrsqrt.f32 %v1482_v22  ;;  %v1476_v27 = vmul.f32 0.015625, %v1464_v24  ;;  %v1477_v35 = vmul.f32 0.015625, %v1467_v32 }
 0x2c3   : > { %5153 = vrsqrt.f32 %v1483_v28 }
 0x2c4   : > { %v1484_v29 = vadd.f32 1e-06, %v1476_v27  ;;  %v5146_v0 = vpop.eup %5145  ;;  %v1544_v27 = vld [vmem:[%s7121_s12] sm:$0x3] }
 0x2c5   : > { %v1470_v33 = vpop.xlane.xlu1 %1469  ;;  %v1495_v43 = vmul.f32 %v5146_v0, %v6004_v31 }
 0x2c6   : > { %5155 = vrsqrt.f32 %v1484_v29  ;;  %v1478_v40 = vmul.f32 0.015625, %v1470_v33 }
 0x2c8   : > { %v5148_v34 = vpop.eup %5147 }
 0x2c9   : > { %v5150_v42 = vpop.eup %5149 }
 0x364   : > { %v1278_v50 = vpop.f32.mrb[8].mxu1  ;;  %v6106_v52 = vpop.f32.mrb[8].mxu0 }
 0x365   : > { %v1279_v53 = vadd.f32 %v1278_v50, %v1229_v46  ;;  %v1280_v54 = vpop.f32.mrb[9].mxu1  ;;  %v4754_v56 = vpop.f32.mrb[9].mxu0  ;;  %v1496_v46 = vmul.f32 %v5148_v34, %v6014_v39 }
 0x366   : > { %v6108_v57 = vadd.f32 %v1280_v54, %v1233_v48  ;;  %v1282_v58 = vpop.f32.mrb[10].mxu1  ;;  %v1395_v59 = vpop.f32.mrb[10].mxu0  ;;  %v1485_v54 = vadd.f32 1e-06, %v1477_v35 }
 0x367   : > { %v1503_v61 = vadd.f32 1.0, %v1279_v53  ;;  %v1283_v62 = vpop.f32.mrb[11].mxu1  ;;  %v4755_v63 = vpop.f32.mrb[11].mxu0  ;;  %v1523_v56 = vrot.slane %v1279_v53, %v6090_v37 }
 0x368   : > { %v5152_v48 = vpop.eup %5151  ;;  %5157 = vrsqrt.f32 %v1485_v54 }
 0x369   : > { %v1507_v4 = vrot.slane %v1503_v61, %v6090_v37  ;;  %v1486_v61 = vadd.f32 1e-06, %v1478_v40  ;;  %v5154_v39 = vpop.eup %5153 }
 0x36a   : > { %v5156_v11 = vpop.eup %5155  ;;  %v1499_v13 = vmul.f32 %v5154_v39, %v6023_v51 }
 0x36b   : > { %1509 = vrot.lane.b32.xlu0 %v1507_v4, %s5522_s5  ;;  %v1497_v4 = vmul.f32 %v5150_v42, %v6001_v30  ;;  %5159 = vrsqrt.f32 %v1486_v61  ;;  %v1500_v14 = vmul.f32 %v5156_v11, %v6027_v55 }
 0x372   : > { %v5158_v16 = vpop.eup %5157 }
 0x373   : > { %v1501_v20 = vmul.f32 %v5158_v16, %v6033_v60  ;;  %v1549_v60 = vrot.slane %v1544_v27, %v6090_v37 }
 0x374   : > { %v6112_v5 = vpop.f32.mrb[12].mxu1 }
 0x375   : > { %v4742_v8 = vpop.f32.mrb[13].mxu1  ;;  %v5160_v17 = vpop.eup %5159 }
 0x376   : > { %v1322_v9 = vpop.f32.mrb[14].mxu1  ;;  %v1498_v8 = vmul.f32 %v5152_v48, %v6011_v38  ;;  %v1502_v21 = vmul.f32 %v5160_v17, %v6039_v1  ;;  %v1553_v1 = vrot.slane %v1544_v27, %v6102_v44 }
 0x377   : > { %v4743_v10 = vpop.f32.mrb[15].mxu1 }
 0x3dd   : > { %v1510_v50 = vpop.permute.xlu0 %1509 }
 0x3de   : > { %v1512_v58 = vmul.f32 %v1510_v50, %v1495_v43  ;;  %v1513_v59 = vmul.f32 %v1510_v50, %v1496_v46  ;;  %v1514_v10 = vmul.f32 %v1510_v50, %v1497_v4  ;;  %v1515_v31 = vmul.f32 %v1510_v50, %v1498_v8 }
 0x3df   : > { %v1516_v15 = vmul.f32 %v1510_v50, %v1499_v13  ;;  %v1517_v38 = vmul.f32 %v1510_v50, %v1500_v14  ;;  %v1518_v23 = vmul.f32 %v1510_v50, %v1501_v20  ;;  %v1519_v51 = vmul.f32 %v1510_v50, %v1502_v21 }
 0x3e0   : > { %v1524_v62 = vadd.f32 %v1523_v56, %v1512_v58  ;;  %v1525_v63 = vadd.f32 %v1523_v56, %v1513_v59  ;;  %v1526_v53 = vadd.f32 %v1523_v56, %v1514_v10  ;;  %v1527_v12 = vadd.f32 %v1523_v56, %v1515_v31 }
 0x3e1   : > { %v1528_v18 = vadd.f32 %v1523_v56, %v1516_v15  ;;  %v1529_v19 = vadd.f32 %v1523_v56, %v1517_v38  ;;  %v1530_v55 = vadd.f32 %v1523_v56, %v1518_v23  ;;  %v1531_v24 = vadd.f32 %v1523_v56, %v1519_v51 }
 0x3e2   : > { %v1532_v9 = vpack.c.bf16 %v1525_v63, %v1524_v62  ;;  %v1533_v30 = vpack.c.bf16 %v1527_v12, %v1526_v53 }
 0x3e3   : > { %v1534_v22 = vpack.c.bf16 %v1529_v19, %v1528_v18  ;;  %v1535_v26 = vpack.c.bf16 %v1531_v24, %v1530_v55 }
 0x3e4   : > { %4421 = vmatmul.mubr.msk.bf16.vlgmr.msra.gmra.mrb[16].mxu1 %vm1008_vm1, %v1532_v9 }
 0x3e5   : > { %1650 = vmatprep.mubr.bf16.mxu1 %v5521_v25 }
 0x3ec   : > { %4422 = vmatmul.mubr.msk.bf16.gmra.mrb[20].mxu1 %vm1008_vm1, %v1533_v30 }
 0x3ed   : > { %1660 = vmatprep.mubr.bf16.mxu1 %v5521_v25 }
 0x3f4   : > { %4423 = vmatmul.mubr.msk.bf16.gmra.mrb[24].mxu1 %vm1008_vm1, %v1534_v22 }
 0x3f5   : > { %1670 = vmatprep.mubr.bf16.mxu1 %v5521_v25 }
 0x3fc   : > { %4424 = vmatmul.mubr.msk.bf16.gmra.mrb[28].mxu1 %vm1008_vm1, %v1535_v26 }
 0x4b7   : > { %v1642_v28 = vpop.f32.mrb[16].mxu1 }
 0x4b8   : > { %v1644_v29 = vpop.f32.mrb[17].mxu1  ;;  %v1643_v0 = vadd.f32 %v1642_v28, %v1549_v60 }
 0x4b9   : > { %v1646_v32 = vpop.f32.mrb[18].mxu1  ;;  %v1645_v35 = vadd.f32 %v1644_v29, %v1553_v1 }
 0x4ba   : > { %v1647_v33 = vadd.f32 %v1646_v32, %v1549_v60  ;;  %v1648_v34 = vpop.f32.mrb[19].mxu1 }
 0x4bb   : > { %v1649_v40 = vadd.f32 %v1648_v34, %v1553_v1 }
 0x4bc   : > { %v6135_v42 = vpack.c.bf16 %v1647_v33, %v1643_v0 }
 0x4bd   : > { %v6137_v43 = vpack.c.bf16 %v1649_v40, %v1645_v35 }
 0x4be   : > { %1689 = vrot.lane.b32.xlu1 %v6135_v42, %s5522_s5  ;;  %4764 = vmatprep.mubr.msk.bf16.mxu0 %vm1697_vm2, %v6135_v42 }
 0x4bf   : > { %v1652_v46 = vpop.f32.mrb[20].mxu1  ;;  %4772 = vmatprep.subr.bf16.mxu1 %v6137_v43 }
 0x4c0   : > { %v1654_v48 = vpop.f32.mrb[21].mxu1  ;;  %4773 = vmatpush3.bf16.msra.mxu1 %v6137_v43  ;;  %v1653_v54 = vadd.f32 %v1652_v46, %v1549_v60 }
 0x4c1   : > { %v1656_v50 = vpop.f32.mrb[22].mxu1  ;;  %v1655_v59 = vadd.f32 %v1654_v48, %v1553_v1 }
 0x4c2   : > { %v1657_v56 = vadd.f32 %v1656_v50, %v1549_v60  ;;  %v1658_v58 = vpop.f32.mrb[23].mxu1 }
 0x4c3   : > { %v1659_v61 = vadd.f32 %v1658_v58, %v1553_v1 }
 0x4c4   : > { %v6145_v62 = vpack.c.bf16 %v1657_v56, %v1653_v54 }
 0x4c5   : > { %v6147_v63 = vpack.c.bf16 %v1659_v61, %v1655_v59 }
 0x4c6   : > { %1691 = vrot.lane.b32.xlu1 %v6145_v62, %s5522_s5 }
 0x4c7   : > { %v1662_v4 = vpop.f32.mrb[24].mxu1  ;;  %4774 = vmatprep.subr.bf16.mxu1 %v6147_v63 }
 0x4c8   : > { %v1664_v8 = vpop.f32.mrb[25].mxu1  ;;  %4775 = vmatpush3.bf16.msra.mxu1 %v6147_v63  ;;  %v1663_v10 = vadd.f32 %v1662_v4, %v1549_v60 }
 0x4c9   : > { %v1666_v9 = vpop.f32.mrb[26].mxu1  ;;  %v1665_v11 = vadd.f32 %v1664_v8, %v1553_v1 }
 0x4ca   : > { %v1667_v31 = vadd.f32 %v1666_v9, %v1549_v60  ;;  %v1668_v39 = vpop.f32.mrb[27].mxu1 }
 0x4cb   : > { %v1669_v53 = vadd.f32 %v1668_v39, %v1553_v1 }
 0x4cc   : > { %v6153_v12 = vpack.c.bf16 %v1667_v31, %v1663_v10 }
 0x4cd   : > { %v6155_v13 = vpack.c.bf16 %v1669_v53, %v1665_v11 }
 0x4ce   : > { %1693 = vrot.lane.b32.xlu1 %v6153_v12, %s5522_s5 }
 0x4cf   : > { %v1672_v14 = vpop.f32.mrb[28].mxu1  ;;  %4776 = vmatprep.subr.bf16.mxu1 %v6155_v13 }
 0x4d0   : > { %v1674_v30 = vpop.f32.mrb[29].mxu1  ;;  %4777 = vmatpush3.bf16.msra.mxu1 %v6155_v13  ;;  %v1673_v38 = vadd.f32 %v1672_v14, %v1549_v60 }
 0x4d1   : > { %v1676_v15 = vpop.f32.mrb[30].mxu1  ;;  %v1675_v18 = vadd.f32 %v1674_v30, %v1553_v1 }
 0x4d2   : > { %v1677_v16 = vadd.f32 %v1676_v15, %v1549_v60  ;;  %v1678_v17 = vpop.f32.mrb[31].mxu1  ;;  %1982 = vrot.lane.b32.xlu1 %v6135_v42, %s5523_s0 }
 0x4d3   : > { %v1679_v19 = vadd.f32 %v1678_v17, %v1553_v1 }
 0x4d4   : > { %v6162_v20 = vpack.c.bf16 %v1677_v16, %v1673_v38 }
 0x4d5   : > { %v6164_v21 = vpack.c.bf16 %v1679_v19, %v1675_v18 }
 0x4d6   : > { %1695 = vrot.lane.b32.xlu0 %v6162_v20, %s5522_s5  ;;  %1986 = vrot.lane.b32.xlu1 %v6153_v12, %s5523_s0 }
 0x4d7   : > { %4778 = vmatprep.subr.bf16.mxu1 %v6164_v21 }
 0x4d8   : > { %4779 = vmatpush3.bf16.msra.mxu1 %v6164_v21 }
 0x4da   : > { %1984 = vrot.lane.b32.xlu0 %v6145_v62, %s5523_s0  ;;  %1974 = vrot.lane.b32.xlu1 %v6135_v42, %s5524_s1 }
 0x4de   : > { %1988 = vrot.lane.b32.xlu0 %v6162_v20, %s5523_s0  ;;  %1978 = vrot.lane.b32.xlu1 %v6153_v12, %s5524_s1  ;;  %s7171_s0 = sld [smem:[#allocation23_spill]] }
 0x4e2   : > { %1976 = vrot.lane.b32.xlu0 %v6145_v62, %s5524_s1  ;;  %2452 = vrot.lane.b32.xlu1 %v6135_v42, %s5525_s7 }
 0x4e6   : > { %1980 = vrot.lane.b32.xlu0 %v6162_v20, %s5524_s1  ;;  %2456 = vrot.lane.b32.xlu1 %v6153_v12, %s5525_s7 }
 0x4ea   : > { %2454 = vrot.lane.b32.xlu0 %v6145_v62, %s5525_s7  ;;  %2444 = vrot.lane.b32.xlu1 %v6135_v42, %s5526_s29 }
 0x4ee   : > { %2446 = vrot.lane.b32.xlu0 %v6145_v62, %s5526_s29  ;;  %2448 = vrot.lane.b32.xlu1 %v6153_v12, %s5526_s29 }
 0x4f2   : > { %2458 = vrot.lane.b32.xlu0 %v6162_v20, %s5525_s7  ;;  %s7170_s7 = sld [smem:[#allocation22_spill]] }
 0x4f6   : > { %2450 = vrot.lane.b32.xlu0 %v6162_v20, %s5526_s29 }
 0x530   : > { %v1690_v22 = vpop.permute.xlu1 %1689 }
 0x531   : > { %4964 = vmatprep.subr.msk.bf16.mxu0 %vm1697_vm2, %v1690_v22  ;;  %v1711_v23 = vsel %vm1697_vm2, %v1690_v22, 0 }
 0x532   : > { %4757 = vmatpush3.bf16.xpose.msra.mxu0 %v1711_v23 }
 0x538   : > { %v1692_v51 = vpop.permute.xlu1 %1691 }
 0x539   : > { %4965 = vmatprep.subr.msk.bf16.mxu0 %vm1697_vm2, %v1692_v51  ;;  %v1714_v55 = vsel %vm1697_vm2, %v1692_v51, 0 }
 0x53a   : > { %4759 = vmatpush3.bf16.xpose.msra.mxu0 %v1714_v55 }
 0x540   : > { %v1694_v24 = vpop.permute.xlu1 %1693 }
 0x541   : > { %4966 = vmatprep.subr.msk.bf16.mxu0 %vm1697_vm2, %v1694_v24  ;;  %v1717_v26 = vsel %vm1697_vm2, %v1694_v24, 0 }
 0x542   : > { %4761 = vmatpush3.bf16.xpose.msra.mxu0 %v1717_v26 }
 0x544   : > { %v1983_v1 = vpop.permute.xlu1 %1982 }
 0x545   : > { %v2003_v28 = vsel %vm1697_vm2, %v1983_v1, 0 }
 0x548   : > { %v1696_v27 = vpop.permute.xlu0 %1695  ;;  %v1987_v32 = vpop.permute.xlu1 %1986 }
 0x549   : > { %4967 = vmatprep.subr.msk.bf16.mxu0 %vm1697_vm2, %v1696_v27  ;;  %v1720_v60 = vsel %vm1697_vm2, %v1696_v27, 0  ;;  %v2009_v35 = vsel %vm1697_vm2, %v1987_v32, 0 }
 0x54a   : > { %4763 = vmatpush3.bf16.xpose.msra.mxu0 %v1720_v60 }
 0x54b   : > { %4968 = vmatprep.subr.msk.bf16.mxu0 %vm1697_vm2, %v1983_v1 }
 0x54c   : > { %v1985_v29 = vpop.permute.xlu0 %1984  ;;  %v1975_v0 = vpop.permute.xlu1 %1974 }
 0x54d   : > { %v2006_v33 = vsel %vm1697_vm2, %v1985_v29, 0 }
 0x550   : > { %v1989_v34 = vpop.permute.xlu0 %1988  ;;  %v1979_v40 = vpop.permute.xlu1 %1978 }
 0x551   : > { %4765 = vmatmul.mubr.msk.bf16.vlgmr.msra.gmra.mrb[12].mxu0 %vm1697_vm2, %v6145_v62  ;;  %v2012_v48 = vsel %vm1697_vm2, %v1989_v34, 0 }
 0x552   : > { %4768 = vmatprep.mubr.msk.bf16.mxu0 %vm1697_vm2, %v6153_v12  ;;  %4789 = vmatpush3.bf16.xpose.msra.mxu0 %v2003_v28 }
 0x553   : > { %4969 = vmatprep.subr.msk.bf16.mxu0 %vm1697_vm2, %v1985_v29 }
 0x554   : > { %v1977_v46 = vpop.permute.xlu0 %1976  ;;  %v2453_v50 = vpop.permute.xlu1 %2452 }
 0x555   : > { %v2473_v56 = vsel %vm1697_vm2, %v2453_v50, 0 }
 0x558   : > { %v1981_v54 = vpop.permute.xlu0 %1980  ;;  %v2457_v59 = vpop.permute.xlu1 %2456 }
 0x559   : > { %4769 = vmatmul.mubr.msk.bf16.gmra.mrb[16].mxu0 %vm1697_vm2, %v6162_v20  ;;  %v2479_v9 = vsel %vm1697_vm2, %v2457_v59, 0 }
 0x55a   : > { %4791 = vmatpush3.bf16.xpose.msra.mxu0 %v2006_v33  ;;  %4796 = vmatprep.mubr.msk.bf16.mxu0 %vm1697_vm2, %v1975_v0 }
 0x55b   : > { %4970 = vmatprep.subr.msk.bf16.mxu0 %vm1697_vm2, %v1987_v32 }
 0x55c   : > { %v2455_v58 = vpop.permute.xlu0 %2454  ;;  %v2445_v61 = vpop.permute.xlu1 %2444 }
 0x55d   : > { %v2476_v4 = vsel %vm1697_vm2, %v2455_v58, 0 }
 0x560   : > { %v2447_v8 = vpop.permute.xlu0 %2446  ;;  %v2449_v39 = vpop.permute.xlu1 %2448 }
 0x562   : > { %4793 = vmatpush3.bf16.xpose.msra.mxu0 %v2009_v35 }
 0x563   : > { %4971 = vmatprep.subr.msk.bf16.mxu0 %vm1697_vm2, %v1989_v34 }
 0x564   : > { %v2459_v10 = vpop.permute.xlu0 %2458 }
 0x565   : > { %v2482_v31 = vsel %vm1697_vm2, %v2459_v10, 0 }
 0x568   : > { %v2451_v11 = vpop.permute.xlu0 %2450 }
 0x56a   : > { %4795 = vmatpush3.bf16.xpose.msra.mxu0 %v2012_v48 }
 0x56b   : > { %4972 = vmatprep.subr.msk.bf16.mxu0 %vm1697_vm2, %v2453_v50 }
 0x571   : > { %4797 = vmatmul.mubr.msk.bf16.vlgmr.msra.gmra.mrb[20].mxu0 %vm1697_vm2, %v1977_v46 }
 0x572   : > { %4800 = vmatprep.mubr.msk.bf16.mxu0 %vm1697_vm2, %v1979_v40  ;;  %4841 = vmatpush3.bf16.xpose.msra.mxu0 %v2473_v56 }
 0x573   : > { %4973 = vmatprep.subr.msk.bf16.mxu0 %vm1697_vm2, %v2455_v58 }
 0x579   : > { %4801 = vmatmul.mubr.msk.bf16.gmra.mrb[24].mxu0 %vm1697_vm2, %v1981_v54 }
 0x57a   : > { %4843 = vmatpush3.bf16.xpose.msra.mxu0 %v2476_v4  ;;  %4848 = vmatprep.mubr.msk.bf16.mxu0 %vm1697_vm2, %v2445_v61 }
 0x57b   : > { %4974 = vmatprep.subr.msk.bf16.mxu0 %vm1697_vm2, %v2457_v59 }
 0x582   : > { %4845 = vmatpush3.bf16.xpose.msra.mxu0 %v2479_v9 }
 0x583   : > { %4975 = vmatprep.subr.msk.bf16.mxu0 %vm1697_vm2, %v2459_v10 }
 0x58a   : > { %4847 = vmatpush3.bf16.xpose.msra.mxu0 %v2482_v31 }
 0x591   : > { %4849 = vmatmul.mubr.msk.bf16.vlgmr.msra.gmra.mrb[28].mxu0 %vm1697_vm2, %v2447_v8 }
 0x592   : > { %4852 = vmatprep.mubr.msk.bf16.mxu0 %vm1697_vm2, %v2449_v39 }
 0x599   : > { %4853 = vmatmul.mubr.msk.bf16.gmra.mrb[32].mxu0 %vm1697_vm2, %v2451_v11 }
 0x624   : > { %v4766_v53 = vpop.f32.mrb[12].mxu0 }
 0x625   : > { %v6231_v14 = vmul.f32 0.25, %v4766_v53  ;;  %v1756_v30 = vpop.f32.mrb[13].mxu0 }
 0x626   : > { %v6233_v15 = vmul.f32 0.25, %v1756_v30  ;;  %v4767_v38 = vpop.f32.mrb[14].mxu0 }
 0x627   : > { %v1759_v16 = vpop.f32.mrb[15].mxu0  ;;  %v1801_v17 = vsel %vm1008_vm1, %v6231_v14, -inf  ;;  %v6243_v23 = vmul.f32 0.25, %v4767_v38 }
 0x628   : > { %v6237_v18 = vmul.f32 0.25, %v1759_v16  ;;  %1802 = vmax.xlane.f32.xlu0 %v1801_v17  ;;  %v1795_v19 = vsel %vm1008_vm1, %v6233_v15, -inf }
 0x629   : > { %1796 = vmax.xlane.f32.xlu1 %v1795_v19  ;;  %v1804_v1 = vsel %vm1008_vm1, %v6243_v23, -inf }
 0x62a   : > { %v1798_v22 = vsel %vm1008_vm1, %v6237_v18, -inf }
 0x62c   : > { %1799 = vmax.xlane.f32.xlu0 %v1798_v22  ;;  %v4770_v51 = vpop.f32.mrb[16].mxu0 }
 0x62d   : > { %v6245_v55 = vmul.f32 0.25, %v4770_v51  ;;  %v1772_v24 = vpop.f32.mrb[17].mxu0 }
 0x62e   : > { %v4771_v26 = vpop.f32.mrb[18].mxu0  ;;  %v6247_v27 = vmul.f32 0.25, %v1772_v24 }
 0x62f   : > { %v1775_v60 = vpop.f32.mrb[19].mxu0  ;;  %v1813_v28 = vsel %vm1008_vm1, %v6245_v55, -inf  ;;  %v6257_v0 = vmul.f32 0.25, %v4771_v26 }
 0x630   : > { %v6253_v29 = vmul.f32 0.25, %v1775_v60  ;;  %1805 = vmax.xlane.f32.xlu0 %v1804_v1  ;;  %1814 = vmax.xlane.f32.xlu1 %v1813_v28  ;;  %v1807_v33 = vsel %vm1008_vm1, %v6247_v27, -inf }
 0x631   : > { %v1816_v34 = vsel %vm1008_vm1, %v6257_v0, -inf }
 0x632   : > { %v1810_v32 = vsel %vm1008_vm1, %v6253_v29, -inf }
 0x634   : > { %1808 = vmax.xlane.f32.xlu1 %v1807_v33  ;;  %1811 = vmax.xlane.f32.xlu0 %v1810_v32 }
 0x638   : > { %1817 = vmax.xlane.f32.xlu0 %v1816_v34 }
 0x644   : > { %v4798_v35 = vpop.f32.mrb[20].mxu0 }
 0x645   : > { %v6263_v40 = vmul.f32 0.25, %v4798_v35  ;;  %v2048_v46 = vpop.f32.mrb[21].mxu0 }
 0x646   : > { %v4799_v48 = vpop.f32.mrb[22].mxu0  ;;  %v6265_v50 = vmul.f32 0.25, %v2048_v46 }
 0x647   : > { %v2051_v54 = vpop.f32.mrb[23].mxu0  ;;  %v2093_v56 = vsel %vm1008_vm1, %v6263_v40, -inf  ;;  %v6271_v59 = vmul.f32 0.25, %v4799_v48 }
 0x648   : > { %v6269_v58 = vmul.f32 0.25, %v2051_v54  ;;  %2094 = vmax.xlane.f32.xlu1 %v2093_v56  ;;  %v2087_v4 = vsel %vm1008_vm1, %v6265_v50, -inf }
 0x649   : > { %v2096_v39 = vsel %vm1008_vm1, %v6271_v59, -inf }
 0x64a   : > { %v2090_v61 = vsel %vm1008_vm1, %v6269_v58, -inf }
 0x64b   : > { %2091 = vmax.xlane.f32.xlu0 %v2090_v61 }
 0x64c   : > { %2088 = vmax.xlane.f32.xlu1 %v2087_v4  ;;  %v4802_v8 = vpop.f32.mrb[24].mxu0 }
 0x64d   : > { %v6277_v9 = vmul.f32 0.25, %v4802_v8  ;;  %v2064_v10 = vpop.f32.mrb[25].mxu0 }
 0x64e   : > { %v4803_v31 = vpop.f32.mrb[26].mxu0  ;;  %v6281_v11 = vmul.f32 0.25, %v2064_v10 }
 0x64f   : > { %v2067_v53 = vpop.f32.mrb[27].mxu0  ;;  %2097 = vmax.xlane.f32.xlu0 %v2096_v39  ;;  %v2105_v30 = vsel %vm1008_vm1, %v6277_v9, -inf  ;;  %v6287_v16 = vmul.f32 0.25, %v4803_v31 }
 0x650   : > { %v6285_v38 = vmul.f32 0.25, %v2067_v53  ;;  %2106 = vmax.xlane.f32.xlu1 %v2105_v30  ;;  %v2099_v19 = vsel %vm1008_vm1, %v6281_v11, -inf }
 0x651   : > { %v2108_v22 = vsel %vm1008_vm1, %v6287_v16, -inf }
 0x652   : > { %v2102_v17 = vsel %vm1008_vm1, %v6285_v38, -inf }
 0x653   : > { %2103 = vmax.xlane.f32.xlu0 %v2102_v17 }
 0x654   : > { %2100 = vmax.xlane.f32.xlu1 %v2099_v19 }
 0x657   : > { %2109 = vmax.xlane.f32.xlu0 %v2108_v22 }
 0x664   : > { %v6295_v51 = vpop.f32.mrb[28].mxu0 }
 0x665   : > { %2183 = vrot.lane.b32.xlu1 %v6137_v43, %s5524_s1  ;;  %v6299_v24 = vpop.f32.mrb[29].mxu0 }
 0x666   : > { %v6301_v26 = vpop.f32.mrb[30].mxu0 }
 0x667   : > { %v6303_v60 = vpop.f32.mrb[31].mxu0 }
 0x66c   : > { %v6305_v1 = vpop.f32.mrb[32].mxu0 }
 0x66d   : > { %v6307_v28 = vpop.f32.mrb[33].mxu0 }
 0x66e   : > { %v6309_v32 = vpop.f32.mrb[34].mxu0 }
 0x66f   : > { %v6311_v33 = vpop.f32.mrb[35].mxu0 }
 0x6b5   : > { %v1803_v34 = vpop.xlane.xlu0 %1802 }
 0x6b6   : > { %v1821_v35 = vsub.f32 %v6231_v14, %v1803_v34  ;;  %v1797_v46 = vpop.xlane.xlu1 %1796 }
 0x6b7   : > { %v1819_v48 = vsub.f32 %v6233_v15, %v1797_v46 }
 0x6b8   : > { %v1831_v54 = vmul.f32 1.442695, %v1821_v35 }
 0x6b9   : > { %v1827_v56 = vmul.f32 1.442695, %v1819_v48  ;;  %v1800_v61 = vpop.xlane.xlu0 %1799 }
 0x6ba   : > { %5161 = vpow2.f32 %v1831_v54  ;;  %v1820_v4 = vsub.f32 %v6237_v18, %v1800_v61 }
 0x6bb   : > { %5163 = vpow2.f32 %v1827_v56 }
 0x6bc   : > { %v1829_v53 = vmul.f32 1.442695, %v1820_v4 }
 0x6bd   : > { %v1806_v8 = vpop.xlane.xlu0 %1805  ;;  %v1815_v10 = vpop.xlane.xlu1 %1814 }
 0x6be   : > { %v1822_v31 = vsub.f32 %v6243_v23, %v1806_v8  ;;  %v1825_v39 = vsub.f32 %v6245_v55, %v1815_v10 }
 0x6c0   : > { %v1833_v30 = vmul.f32 1.442695, %v1822_v31  ;;  %v1839_v17 = vmul.f32 1.442695, %v1825_v39 }
 0x6c1   : > { %v1809_v14 = vpop.xlane.xlu1 %1808  ;;  %v1812_v19 = vpop.xlane.xlu0 %1811 }
 0x6c2   : > { %5165 = vpow2.f32 %v1833_v30  ;;  %v1823_v15 = vsub.f32 %v6247_v27, %v1809_v14  ;;  %v1824_v18 = vsub.f32 %v6253_v29, %v1812_v19 }
 0x6c3   : > { %5167 = vpow2.f32 %v1839_v17 }
 0x6c4   : > { %v6319_v22 = vpop.eup %5161  ;;  %5169 = vpow2.f32 %v1829_v53  ;;  %v1835_v34 = vmul.f32 1.442695, %v1823_v15  ;;  %v1837_v48 = vmul.f32 1.442695, %v1824_v18 }
 0x6c5   : > { %v1818_v35 = vpop.xlane.xlu0 %1817  ;;  %v1849_v23 = vsel %vm1008_vm1, %v6319_v22, 0.0  ;;  %v6324_v55 = vpop.eup %5163 }
 0x6c6   : > { %5171 = vpow2.f32 %v1835_v34  ;;  %v1826_v46 = vsub.f32 %v6257_v0, %v1818_v35  ;;  %1850 = vadd.xlane.f32.xlu1 %v1849_v23  ;;  %v1843_v27 = vsel %vm1008_vm1, %v6324_v55, 0.0 }
 0x6c8   : > { %v1841_v54 = vmul.f32 1.442695, %v1826_v46 }
 0x6ca   : > { %5173 = vpow2.f32 %v1841_v54  ;;  %1844 = vadd.xlane.f32.xlu1 %v1843_v27 }
 0x6cb   : > { %5175 = vpow2.f32 %v1837_v48 }
 0x6cc   : > { %v6329_v56 = vpop.eup %5165 }
 0x6cd   : > { %v6331_v29 = vpop.eup %5167  ;;  %v1852_v61 = vsel %vm1008_vm1, %v6329_v56, 0.0 }
 0x6ce   : > { %v6335_v4 = vpop.eup %5169  ;;  %v1861_v0 = vsel %vm1008_vm1, %v6331_v29, 0.0  ;;  %1853 = vadd.xlane.f32.xlu0 %v1852_v61 }
 0x6cf   : > { %1862 = vadd.xlane.f32.xlu1 %v1861_v0  ;;  %v1846_v31 = vsel %vm1008_vm1, %v6335_v4, 0.0 }
 0x6d0   : > { %v6339_v8 = vpop.eup %5171 }
 0x6d1   : > { %v1855_v10 = vsel %vm1008_vm1, %v6339_v8, 0.0 }
 0x6d2   : > { %1847 = vadd.xlane.f32.xlu0 %v1846_v31 }
 0x6d3   : > { %1856 = vadd.xlane.f32.xlu1 %v1855_v10 }
 0x6d4   : > { %v6345_v39 = vpop.eup %5173 }
 0x6d5   : > { %v2095_v53 = vpop.xlane.xlu1 %2094  ;;  %v1864_v30 = vsel %vm1008_vm1, %v6345_v39, 0.0  ;;  %v6349_v17 = vpop.eup %5175 }
 0x6d6   : > { %v2113_v14 = vsub.f32 %v6263_v40, %v2095_v53  ;;  %1865 = vadd.xlane.f32.xlu0 %v1864_v30  ;;  %v1858_v18 = vsel %vm1008_vm1, %v6349_v17, 0.0 }
 0x6d8   : > { %v2123_v19 = vmul.f32 1.442695, %v2113_v14  ;;  %v2092_v15 = vpop.xlane.xlu0 %2091 }
 0x6d9   : > { %v2089_v34 = vpop.xlane.xlu1 %2088  ;;  %v2112_v23 = vsub.f32 %v6269_v58, %v2092_v15 }
 0x6da   : > { %5177 = vpow2.f32 %v2123_v19  ;;  %v2111_v35 = vsub.f32 %v6265_v50, %v2089_v34  ;;  %1859 = vadd.xlane.f32.xlu0 %v1858_v18 }
 0x6db   : > { %v2121_v61 = vmul.f32 1.442695, %v2112_v23 }
 0x6dc   : > { %v2119_v46 = vmul.f32 1.442695, %v2111_v35  ;;  %v2098_v48 = vpop.xlane.xlu0 %2097 }
 0x6dd   : > { %v2114_v54 = vsub.f32 %v6271_v59, %v2098_v48  ;;  %v2107_v27 = vpop.xlane.xlu1 %2106 }
 0x6de   : > { %5179 = vpow2.f32 %v2119_v46  ;;  %v2117_v40 = vsub.f32 %v6277_v9, %v2107_v27 }
 0x6df   : > { %v2125_v0 = vmul.f32 1.442695, %v2114_v54 }
 0x6e0   : > { %v2131_v10 = vmul.f32 1.442695, %v2117_v40  ;;  %v2104_v31 = vpop.xlane.xlu0 %2103 }
 0x6e1   : > { %5181 = vpow2.f32 %v2125_v0  ;;  %v2101_v53 = vpop.xlane.xlu1 %2100  ;;  %v2116_v58 = vsub.f32 %v6285_v38, %v2104_v31 }
 0x6e2   : > { %5183 = vpow2.f32 %v2131_v10  ;;  %v2115_v50 = vsub.f32 %v6281_v11, %v2101_v53  ;;  %v6415_v53 = vmul.f32 0.25, %v6299_v24 }
 0x6e3   : > { %5185 = vpow2.f32 %v2121_v61  ;;  %v2129_v34 = vmul.f32 1.442695, %v2116_v58  ;;  %v6426_v58 = vmul.f32 0.25, %v6295_v51 }
 0x6e4   : > { %v6360_v30 = vpop.eup %5177  ;;  %v2127_v14 = vmul.f32 1.442695, %v2115_v50  ;;  %v2110_v59 = vpop.xlane.xlu0 %2109  ;;  %v6418_v50 = vmul.f32 0.25, %v6303_v60  ;;  %v6436_v60 = vmul.f32 0.25, %v6301_v26 }
 0x6e5   : > { %v2118_v19 = vsub.f32 %v6287_v16, %v2110_v59  ;;  %v6363_v15 = vpop.permute.xlu1 %2183  ;;  %v2141_v9 = vsel %vm1008_vm1, %v6360_v30, 0.0  ;;  %v6448_v59 = vmul.f32 0.25, %v6309_v32 }
 0x6e6   : > { %5187 = vpow2.f32 %v2127_v14  ;;  %2142 = vadd.xlane.f32.xlu1 %v2141_v9  ;;  %4804 = vmatprep.subr.bf16.mxu1 %v6363_v15  ;;  %v6443_v14 = vmul.f32 0.25, %v6311_v33 }
 0x6e7   : > { %v2133_v11 = vmul.f32 1.442695, %v2118_v19  ;;  %v2578_v19 = vsel %vm1008_vm1, %v6448_v59, -inf }
 0x6e8   : > { %v6368_v18 = vpop.eup %5179  ;;  %v2572_v26 = vsel %vm1008_vm1, %v6443_v14, -inf }
 0x6e9   : > { %5189 = vpow2.f32 %v2133_v11  ;;  %v2135_v38 = vsel %vm1008_vm1, %v6368_v18, 0.0 }
 0x6ea   : > { %2136 = vadd.xlane.f32.xlu1 %v2135_v38  ;;  %5191 = vpow2.f32 %v2129_v34 }
 0x6eb   : > { %v6372_v35 = vpop.eup %5181 }
 0x6ec   : > { %v6374_v16 = vpop.eup %5183  ;;  %v2144_v23 = vsel %vm1008_vm1, %v6372_v35, 0.0 }
 0x6ed   : > { %v6378_v46 = vpop.eup %5185  ;;  %2145 = vadd.xlane.f32.xlu0 %v2144_v23  ;;  %v2153_v48 = vsel %vm1008_vm1, %v6374_v16, 0.0 }
 0x6ee   : > { %2154 = vadd.xlane.f32.xlu1 %v2153_v48  ;;  %v2138_v27 = vsel %vm1008_vm1, %v6378_v46, 0.0 }
 0x6f0   : > { %v6382_v54 = vpop.eup %5187 }
 0x6f1   : > { %2139 = vadd.xlane.f32.xlu0 %v2138_v27  ;;  %v2147_v40 = vsel %vm1008_vm1, %v6382_v54, 0.0 }
 0x6f2   : > { %2148 = vadd.xlane.f32.xlu1 %v2147_v40 }
 0x6f3   : > { %v6388_v61 = vpop.eup %5189 }
 0x6f4   : > { %v2156_v0 = vsel %vm1008_vm1, %v6388_v61, 0.0  ;;  %v6392_v10 = vpop.eup %5191 }
 0x6f5   : > { %2157 = vadd.xlane.f32.xlu0 %v2156_v0  ;;  %v2150_v31 = vsel %vm1008_vm1, %v6392_v10, 0.0 }
 0x6f9   : > { %2151 = vadd.xlane.f32.xlu0 %v2150_v31 }
 0x703   : > { %2187 = vrot.lane.b32.xlu1 %v6155_v13, %s5524_s1 }
 0x707   : > { %2189 = vrot.lane.b32.xlu1 %v6164_v21, %s5524_s1 }
 0x70b   : > { %2843 = vrot.lane.b32.xlu1 %v6135_v42, %s5527_s24 }
 0x70f   : > { %2847 = vrot.lane.b32.xlu1 %v6153_v12, %s5527_s24  ;;  %2185 = vrot.lane.b32.xlu0 %v6147_v63, %s5524_s1 }
 0x713   : > { %2835 = vrot.lane.b32.xlu1 %v6135_v42, %s5528_s26  ;;  %2845 = vrot.lane.b32.xlu0 %v6145_v62, %s5527_s24  ;;  %v6421_v42 = vmul.f32 0.25, %v6307_v28  ;;  %v2563_v28 = vsel %vm1008_vm1, %v6426_v58, -inf }
 0x715   : > { %v2569_v24 = vsel %vm1008_vm1, %v6421_v42, -inf }
 0x717   : > { %2839 = vrot.lane.b32.xlu1 %v6153_v12, %s5528_s26  ;;  %2849 = vrot.lane.b32.xlu0 %v6162_v20, %s5527_s24  ;;  %v2557_v12 = vsel %vm1008_vm1, %v6415_v53, -inf }
 0x71b   : > { %2837 = vrot.lane.b32.xlu0 %v6145_v62, %s5528_s26  ;;  %v2560_v62 = vsel %vm1008_vm1, %v6418_v50, -inf }
 0x71f   : > { %2841 = vrot.lane.b32.xlu0 %v6162_v20, %s5528_s26  ;;  %v6431_v20 = vmul.f32 0.25, %v6305_v1  ;;  %v2566_v1 = vsel %vm1008_vm1, %v6436_v60, -inf }
 0x721   : > { %v2575_v51 = vsel %vm1008_vm1, %v6431_v20, -inf }
 0x73b   : > { %2558 = vmax.xlane.f32.xlu1 %v2557_v12 }
 0x73e   : > { %2561 = vmax.xlane.f32.xlu0 %v2560_v62 }
 0x73f   : > { %2570 = vmax.xlane.f32.xlu1 %v2569_v24 }
 0x742   : > { %2564 = vmax.xlane.f32.xlu0 %v2563_v28 }
 0x743   : > { %2576 = vmax.xlane.f32.xlu1 %v2575_v51 }
 0x746   : > { %2567 = vmax.xlane.f32.xlu0 %v2566_v1 }
 0x74a   : > { %2573 = vmax.xlane.f32.xlu0 %v2572_v26 }
 0x74e   : > { %2579 = vmax.xlane.f32.xlu0 %v2578_v19 }
 0x753   : > { %v1851_v9 = vpop.xlane.xlu1 %1850 }
 0x754   : > { %2649 = vrot.lane.b32.xlu1 %v6137_v43, %s5526_s29 }
 0x757   : > { %v1845_v33 = vpop.xlane.xlu1 %1844 }
 0x75b   : > { %v1854_v34 = vpop.xlane.xlu0 %1853 }
 0x75c   : > { %v1863_v11 = vpop.xlane.xlu1 %1862  ;;  %5193 = vrcp.f32 %v1854_v34 }
 0x75d   : > { %5195 = vrcp.f32 %v1845_v33 }
 0x75e   : > { %5197 = vrcp.f32 %v1851_v9 }
 0x75f   : > { %v1848_v32 = vpop.xlane.xlu0 %1847 }
 0x760   : > { %5199 = vrcp.f32 %v1848_v32  ;;  %v1857_v38 = vpop.xlane.xlu1 %1856 }
 0x763   : > { %v1866_v23 = vpop.xlane.xlu0 %1865 }
 0x764   : > { %5201 = vrcp.f32 %v1866_v23 }
 0x765   : > { %5203 = vrcp.f32 %v1857_v38 }
 0x766   : > { %v5194_v48 = vpop.eup %5193  ;;  %5205 = vrcp.f32 %v1863_v11 }
 0x767   : > { %v1860_v27 = vpop.xlane.xlu0 %1859  ;;  %v5196_v40 = vpop.eup %5195  ;;  %v1878_v12 = vmul.f32 %v5194_v48, %v6329_v56 }
 0x768   : > { %5207 = vrcp.f32 %v1860_v27  ;;  %v5198_v0 = vpop.eup %5197  ;;  %v1875_v62 = vmul.f32 %v5196_v40, %v6324_v55 }
 0x769   : > { %v1877_v28 = vmul.f32 %v5198_v0, %v6319_v22 }
 0x76a   : > { %v5200_v31 = vpop.eup %5199 }
 0x76b   : > { %v1876_v24 = vmul.f32 %v5200_v31, %v6335_v4  ;;  %v1884_v1 = vpack.c.bf16 %v1878_v12, %v1877_v28 }
 0x76d   : > { %v1883_v51 = vpack.c.bf16 %v1876_v24, %v1875_v62 }
 0x76e   : > { %v5202_v26 = vpop.eup %5201 }
 0x76f   : > { %4780 = vmatprep.mubr.msk.bf16.mxu1 %vm1008_vm1, %v1883_v51  ;;  %v5204_v19 = vpop.eup %5203  ;;  %v1882_v56 = vmul.f32 %v5202_v26, %v6345_v39 }
 0x770   : > { %4781 = vmatmul.mubr.msk.bf16.vlgmr.msra.gmra.mrb[32].mxu1 %vm1008_vm1, %v1884_v1  ;;  %v5206_v9 = vpop.eup %5205  ;;  %v1879_v55 = vmul.f32 %v5204_v19, %v6339_v8 }
 0x771   : > { %4805 = vmatpush3.bf16.msra.mxu1 %v6363_v15  ;;  %v1881_v22 = vmul.f32 %v5206_v9, %v6331_v29 }
 0x772   : > { %v5208_v33 = vpop.eup %5207 }
 0x773   : > { %v2143_v34 = vpop.xlane.xlu1 %2142  ;;  %v1880_v4 = vmul.f32 %v5208_v33, %v6349_v17  ;;  %v1886_v32 = vpack.c.bf16 %v1882_v56, %v1881_v22 }
 0x775   : > { %v1885_v11 = vpack.c.bf16 %v1880_v4, %v1879_v55 }
 0x777   : > { %v2137_v38 = vpop.xlane.xlu1 %2136  ;;  %4784 = vmatprep.mubr.msk.bf16.mxu1 %vm1008_vm1, %v1885_v11 }
 0x778   : > { %4785 = vmatmul.mubr.msk.bf16.gmra.mrb[36].mxu1 %vm1008_vm1, %v1886_v32  ;;  %5209 = vrcp.f32 %v2137_v38 }
 0x77a   : > { %v2146_v23 = vpop.xlane.xlu0 %2145 }
 0x77b   : > { %v2155_v48 = vpop.xlane.xlu1 %2154 }
 0x77e   : > { %v2140_v15 = vpop.xlane.xlu0 %2139 }
 0x77f   : > { %5211 = vrcp.f32 %v2140_v15  ;;  %v2149_v39 = vpop.xlane.xlu1 %2148 }
 0x780   : > { %5213 = vrcp.f32 %v2146_v23 }
 0x781   : > { %5215 = vrcp.f32 %v2143_v34 }
 0x782   : > { %v2158_v27 = vpop.xlane.xlu0 %2157  ;;  %5217 = vrcp.f32 %v2149_v39  ;;  %v5210_v29 = vpop.eup %5209 }
 0x783   : > { %v2188_v40 = vpop.permute.xlu1 %2187  ;;  %v2167_v12 = vmul.f32 %v5210_v29, %v6368_v18 }
 0x786   : > { %v2152_v8 = vpop.xlane.xlu0 %2151 }
 0x787   : > { %5219 = vrcp.f32 %v2152_v8  ;;  %v2190_v17 = vpop.permute.xlu1 %2189 }
 0x788   : > { %5221 = vrcp.f32 %v2158_v27 }
 0x789   : > { %v5212_v0 = vpop.eup %5211  ;;  %5223 = vrcp.f32 %v2155_v48 }
 0x78a   : > { %v2186_v31 = vpop.permute.xlu0 %2185  ;;  %v2168_v62 = vmul.f32 %v5212_v0, %v6378_v46  ;;  %v5214_v1 = vpop.eup %5213 }
 0x78b   : > { %v2844_v24 = vpop.permute.xlu1 %2843  ;;  %4806 = vmatprep.subr.bf16.mxu1 %v2186_v31  ;;  %v5216_v19 = vpop.eup %5215  ;;  %v2170_v33 = vmul.f32 %v5214_v1, %v6372_v35 }
 0x78c   : > { %v2864_v28 = vsel %vm1697_vm2, %v2844_v24, 0  ;;  %4807 = vmatpush3.bf16.msra.mxu1 %v2186_v31  ;;  %4976 = vmatprep.subr.msk.bf16.mxu0 %vm1697_vm2, %v2844_v24  ;;  %v2175_v51 = vpack.c.bf16 %v2168_v62, %v2167_v12  ;;  %v5218_v46 = vpop.eup %5217  ;;  %v2169_v34 = vmul.f32 %v5216_v19, %v6360_v30 }
 0x78d   : > { %4808 = vmatprep.subr.bf16.mxu1 %v2188_v40  ;;  %4883 = vmatpush3.bf16.xpose.msra.mxu0 %v2864_v28  ;;  %v2171_v22 = vmul.f32 %v5218_v46, %v6382_v54 }
 0x78e   : > { %4812 = vmatprep.mubr.msk.bf16.mxu1 %vm1008_vm1, %v2175_v51  ;;  %v2846_v26 = vpop.permute.xlu0 %2845  ;;  %v2176_v11 = vpack.c.bf16 %v2170_v33, %v2169_v34 }
 0x78f   : > { %v2848_v18 = vpop.permute.xlu1 %2847  ;;  %4977 = vmatprep.subr.msk.bf16.mxu0 %vm1697_vm2, %v2846_v26  ;;  %v2867_v4 = vsel %vm1697_vm2, %v2846_v26, 0 }
 0x790   : > { %4809 = vmatpush3.bf16.msra.mxu1 %v2188_v40  ;;  %v2870_v23 = vsel %vm1697_vm2, %v2848_v18, 0 }
 0x791   : > { %v5220_v9 = vpop.eup %5219  ;;  %4810 = vmatprep.subr.bf16.mxu1 %v2190_v17 }
 0x792   : > { %v2172_v56 = vmul.f32 %v5220_v9, %v6392_v10  ;;  %v5222_v32 = vpop.eup %5221  ;;  %v2850_v48 = vpop.permute.xlu0 %2849 }
 0x793   : > { %v2836_v55 = vpop.permute.xlu1 %2835  ;;  %v5224_v35 = vpop.eup %5223  ;;  %v2174_v30 = vmul.f32 %v5222_v32, %v6388_v61  ;;  %v2873_v15 = vsel %vm1697_vm2, %v2850_v48, 0 }
 0x794   : > { %4811 = vmatpush3.bf16.msra.mxu1 %v2190_v17  ;;  %4890 = vmatprep.mubr.msk.bf16.mxu0 %vm1697_vm2, %v2836_v55  ;;  %v2177_v38 = vpack.c.bf16 %v2172_v56, %v2171_v22  ;;  %v2173_v10 = vmul.f32 %v5224_v35, %v6374_v16 }
 0x795   : > { %4885 = vmatpush3.bf16.xpose.msra.mxu0 %v2867_v4 }
 0x796   : > { %4978 = vmatprep.subr.msk.bf16.mxu0 %vm1697_vm2, %v2848_v18  ;;  %v2178_v54 = vpack.c.bf16 %v2174_v30, %v2173_v10  ;;  %v2838_v39 = vpop.permute.xlu0 %2837 }
 0x797   : > { %4813 = vmatmul.mubr.msk.bf16.vlgmr.msra.gmra.mrb[40].mxu1 %vm1008_vm1, %v2176_v11  ;;  %v2840_v27 = vpop.permute.xlu1 %2839 }
 0x798   : > { %4816 = vmatprep.mubr.msk.bf16.mxu1 %vm1008_vm1, %v2177_v38 }
 0x79a   : > { %v2842_v61 = vpop.permute.xlu0 %2841 }
 0x79d   : > { %4887 = vmatpush3.bf16.xpose.msra.mxu0 %v2870_v23  ;;  %v5101_v23 = vld [vmem:[%s7122_s13 + $0x8] sm:$0xff]  }
 0x79e   : > { %4979 = vmatprep.subr.msk.bf16.mxu0 %vm1697_vm2, %v2850_v48  ;;  %4820 = vmatprep.subr.bf16.mxu1 %v5101_v23 }
 0x79f   : > { %4817 = vmatmul.mubr.msk.bf16.gmra.mrb[44].mxu1 %vm1008_vm1, %v2178_v54 }
 0x7a0   : > { %4821 = vmatpush3.bf16.msra.mxu1 %v5101_v23 }
 0x7a5   : > { %4889 = vmatpush3.bf16.xpose.msra.mxu0 %v2873_v15  ;;  %v5102_v15 = vld [vmem:[%s7122_s13] sm:$0xff]  }
 0x7a6   : > { %4830 = vmatprep.subr.bf16.mxu1 %v5102_v15 }
 0x7ac   : > { %4891 = vmatmul.mubr.msk.bf16.vlgmr.msra.gmra.mrb[36].mxu0 %vm1697_vm2, %v2838_v39 }
 0x7ad   : > { %4894 = vmatprep.mubr.msk.bf16.mxu0 %vm1697_vm2, %v2840_v27 }
 0x7b4   : > { %4895 = vmatmul.mubr.msk.bf16.gmra.mrb[40].mxu0 %vm1697_vm2, %v2842_v61 }
 0x7b5   : > { %3498 = vmatprep.mubr.bf16.mxu0 %v5521_v25 }
 0x7c8   : > { %v2559_v16 = vpop.xlane.xlu1 %2558 }
 0x7c9   : > { %v2581_v29 = vsub.f32 %v6415_v53, %v2559_v16 }
 0x7cb   : > { %v2562_v40 = vpop.xlane.xlu0 %2561  ;;  %v2589_v62 = vmul.f32 1.442695, %v2581_v29 }
 0x7cc   : > { %v2571_v8 = vpop.xlane.xlu1 %2570  ;;  %v2582_v12 = vsub.f32 %v6418_v50, %v2562_v40 }
 0x7cd   : > { %v2585_v19 = vsub.f32 %v6421_v42, %v2571_v8 }
 0x7ce   : > { %v2591_v26 = vmul.f32 1.442695, %v2582_v12 }
 0x7cf   : > { %v2565_v17 = vpop.xlane.xlu0 %2564 }
 0x7d0   : > { %v2583_v0 = vsub.f32 %v6426_v58, %v2565_v17  ;;  %v2577_v31 = vpop.xlane.xlu1 %2576  ;;  %v2597_v58 = vmul.f32 1.442695, %v2585_v19 }
 0x7d1   : > { %v2587_v28 = vsub.f32 %v6431_v20, %v2577_v31 }
 0x7d2   : > { %v2593_v24 = vmul.f32 1.442695, %v2583_v0 }
 0x7d3   : > { %v2568_v51 = vpop.xlane.xlu0 %2567  ;;  %v2601_v18 = vmul.f32 1.442695, %v2587_v28 }
 0x7d4   : > { %5225 = vpow2.f32 %v2593_v24  ;;  %v2584_v1 = vsub.f32 %v6436_v60, %v2568_v51  ;;  %v2650_v24 = vpop.permute.xlu1 %2649 }
 0x7d5   : > { %5227 = vpow2.f32 %v2589_v62 }
 0x7d6   : > { %v2595_v53 = vmul.f32 1.442695, %v2584_v1 }
 0x7d7   : > { %v2574_v46 = vpop.xlane.xlu0 %2573 }
 0x7d8   : > { %5229 = vpow2.f32 %v2595_v53  ;;  %v2586_v50 = vsub.f32 %v6443_v14, %v2574_v46 }
 0x7d9   : > { %5231 = vpow2.f32 %v2591_v26 }
 0x7da   : > { %5233 = vpow2.f32 %v2601_v18  ;;  %v2599_v60 = vmul.f32 1.442695, %v2586_v50 }
 0x7db   : > { %v2580_v9 = vpop.xlane.xlu0 %2579  ;;  %5235 = vpow2.f32 %v2597_v58 }
 0x7dc   : > { %v2588_v20 = vsub.f32 %v6448_v59, %v2580_v9 }
 0x7de   : > { %v6502_v33 = vpop.eup %5225  ;;  %v2603_v56 = vmul.f32 1.442695, %v2588_v20 }
 0x7df   : > { %v2611_v42 = vsel %vm1008_vm1, %v6502_v33, 0.0  ;;  %v6506_v34 = vpop.eup %5227 }
 0x7e0   : > { %5237 = vpow2.f32 %v2603_v56  ;;  %2612 = vadd.xlane.f32.xlu1 %v2611_v42  ;;  %v2605_v14 = vsel %vm1008_vm1, %v6506_v34, 0.0 }
 0x7e1   : > { %5239 = vpow2.f32 %v2599_v60 }
 0x7e2   : > { %v6508_v55 = vpop.eup %5229 }
 0x7e3   : > { %v6510_v4 = vpop.eup %5231  ;;  %v2614_v59 = vsel %vm1008_vm1, %v6508_v55, 0.0 }
 0x7e4   : > { %v6516_v22 = vpop.eup %5233  ;;  %2606 = vadd.xlane.f32.xlu1 %v2605_v14  ;;  %2615 = vadd.xlane.f32.xlu0 %v2614_v59  ;;  %v2608_v32 = vsel %vm1008_vm1, %v6510_v4, 0.0 }
 0x7e5   : > { %v2623_v11 = vsel %vm1008_vm1, %v6516_v22, 0.0  ;;  %v6522_v38 = vpop.eup %5235 }
 0x7e6   : > { %v2617_v30 = vsel %vm1008_vm1, %v6522_v38, 0.0 }
 0x7e8   : > { %2624 = vadd.xlane.f32.xlu1 %v2623_v11  ;;  %2609 = vadd.xlane.f32.xlu0 %v2608_v32 }
 0x7ea   : > { %v6524_v35 = vpop.eup %5237 }
 0x7eb   : > { %v2626_v10 = vsel %vm1008_vm1, %v6524_v35, 0.0  ;;  %v6533_v48 = vpop.eup %5239 }
 0x7ec   : > { %2618 = vadd.xlane.f32.xlu1 %v2617_v30  ;;  %2627 = vadd.xlane.f32.xlu0 %v2626_v10  ;;  %v2620_v54 = vsel %vm1008_vm1, %v6533_v48, 0.0 }
 0x7f0   : > { %2621 = vadd.xlane.f32.xlu0 %v2620_v54 }
 0x7fd   : > { %2653 = vrot.lane.b32.xlu1 %v6155_v13, %s5526_s29 }
 0x801   : > { %2655 = vrot.lane.b32.xlu1 %v6164_v21, %s5526_s29 }
 0x806   : > { %2651 = vrot.lane.b32.xlu0 %v6147_v63, %s5526_s29 }
 0x843   : > { %v4782_v39 = vpop.f32.mrb[32].mxu1 }
 0x844   : > { %v1937_v27 = vpop.f32.mrb[33].mxu1 }
 0x845   : > { %v4783_v61 = vpop.f32.mrb[34].mxu1 }
 0x846   : > { %v1969_v16 = vpack.c.bf16 %v4783_v61, %v4782_v39  ;;  %v1940_v40 = vpop.f32.mrb[35].mxu1 }
 0x847   : > { %v1968_v8 = vpack.c.bf16 %v1940_v40, %v1937_v27 }
 0x84b   : > { %v6546_v29 = vpop.f32.mrb[36].mxu1 }
 0x84c   : > { %v1953_v17 = vpop.f32.mrb[37].mxu1 }
 0x84d   : > { %v6548_v0 = vpop.f32.mrb[38].mxu1 }
 0x84e   : > { %v1971_v31 = vpack.c.bf16 %v6548_v0, %v6546_v29  ;;  %v1956_v12 = vpop.f32.mrb[39].mxu1 }
 0x84f   : > { %v1970_v62 = vpack.c.bf16 %v1956_v12, %v1953_v17 }
 0x86a   : > { %v4814_v28 = vpop.f32.mrb[40].mxu1 }
 0x86b   : > { %v2241_v51 = vpop.f32.mrb[41].mxu1 }
 0x86c   : > { %v4815_v1 = vpop.f32.mrb[42].mxu1 }
 0x86d   : > { %v2273_v26 = vpack.c.bf16 %v4815_v1, %v4814_v28  ;;  %v2244_v19 = vpop.f32.mrb[43].mxu1  ;;  %v2613_v18 = vpop.xlane.xlu1 %2612 }
 0x86e   : > { %v2272_v53 = vpack.c.bf16 %v2244_v19, %v2241_v51 }
 0x870   : > { %4822 = vmatprep.mubr.msk.bf16.mxu1 %vm1697_vm2, %v2272_v53 }
 0x871   : > { %4823 = vmatmul.mubr.msk.bf16.vlgmr.msra.gmra.mrb[48].mxu1 %vm1697_vm2, %v2273_v26  ;;  %v2616_v46 = vpop.xlane.xlu0 %2615  ;;  %v2607_v58 = vpop.xlane.xlu1 %2606 }
 0x872   : > { %4831 = vmatpush3.bf16.msra.mxu1 %v5102_v15  ;;  %v4818_v50 = vpop.f32.mrb[44].mxu1 }
 0x873   : > { %4856 = vmatprep.subr.bf16.mxu1 %v2650_v24  ;;  %v2257_v9 = vpop.f32.mrb[45].mxu1 }
 0x874   : > { %v4819_v20 = vpop.f32.mrb[46].mxu1 }
 0x875   : > { %v2275_v60 = vpack.c.bf16 %v4819_v20, %v4818_v50  ;;  %v2260_v56 = vpop.f32.mrb[47].mxu1  ;;  %v2610_v14 = vpop.xlane.xlu0 %2609 }
 0x876   : > { %v2274_v42 = vpack.c.bf16 %v2260_v56, %v2257_v9  ;;  %v2625_v59 = vpop.xlane.xlu1 %2624  ;;  %5241 = vrcp.f32 %v2610_v14 }
 0x877   : > { %5243 = vrcp.f32 %v2607_v58 }
 0x878   : > { %4826 = vmatprep.mubr.msk.bf16.mxu1 %vm1697_vm2, %v2274_v42  ;;  %5245 = vrcp.f32 %v2616_v46 }
 0x879   : > { %4827 = vmatmul.mubr.msk.bf16.gmra.mrb[52].mxu1 %vm1697_vm2, %v2275_v60  ;;  %v2628_v11 = vpop.xlane.xlu0 %2627 }
 0x87a   : > { %4832 = vmatprep.mubr.msk.bf16.mxu1 %vm1697_vm2, %v1968_v8  ;;  %v2619_v32 = vpop.xlane.xlu1 %2618 }
 0x87d   : > { %v2622_v30 = vpop.xlane.xlu0 %2621 }
 0x87e   : > { %5247 = vrcp.f32 %v2622_v30  ;;  %v2654_v12 = vpop.permute.xlu1 %2653 }
 0x87f   : > { %v4892_v10 = vpop.f32.mrb[36].mxu0  ;;  %5249 = vrcp.f32 %v2613_v18 }
 0x880   : > { %v2909_v23 = vpop.f32.mrb[37].mxu0  ;;  %5251 = vrcp.f32 %v2619_v32  ;;  %v5242_v39 = vpop.eup %5241  ;;  %v6565_v28 = vmul.f32 0.25, %v4892_v10 }
 0x881   : > { %v6557_v54 = vmul.f32 0.25, %v2909_v23  ;;  %4833 = vmatmul.mubr.msk.bf16.vlgmr.msra.gmra.mrb[48].mxu1 %vm1697_vm2, %v1969_v16  ;;  %v4893_v15 = vpop.f32.mrb[38].mxu0  ;;  %v2652_v27 = vpop.permute.xlu0 %2651  ;;  %5253 = vrcp.f32 %v2628_v11 }
 0x882   : > { %4857 = vmatpush3.bf16.msra.mxu1 %v2650_v24  ;;  %4836 = vmatprep.mubr.msk.bf16.mxu1 %vm1697_vm2, %v1970_v62  ;;  %v2912_v61 = vpop.f32.mrb[39].mxu0  ;;  %v5244_v17 = vpop.eup %5243  ;;  %v2638_v24 = vmul.f32 %v5242_v39, %v6510_v4  ;;  %5255 = vrcp.f32 %v2625_v59  ;;  %v2943_v18 = vmul.f32 0.25, %v4893_v15  ;;  %v2954_v46 = vsel %vm1008_vm1, %v6565_v28, -inf }
 0x883   : > { %4858 = vmatprep.subr.bf16.mxu1 %v2652_v27  ;;  %v6561_v40 = vmul.f32 0.25, %v2912_v61  ;;  %v2948_v8 = vsel %vm1008_vm1, %v6557_v54, -inf  ;;  %v2637_v51 = vmul.f32 %v5244_v17, %v6506_v34  ;;  %v5246_v1 = vpop.eup %5245  ;;  %v2656_v9 = vpop.permute.xlu1 %2655 }
 0x884   : > { %2949 = vmax.xlane.f32.xlu1 %v2948_v8  ;;  %v2640_v60 = vmul.f32 %v5246_v1, %v6508_v55  ;;  %v2957_v14 = vsel %vm1008_vm1, %v2943_v18, -inf }
 0x885   : > { %v2951_v16 = vsel %vm1008_vm1, %v6561_v40, -inf  ;;  %v2645_v58 = vpack.c.bf16 %v2638_v24, %v2637_v51 }
 0x886   : > { %4859 = vmatpush3.bf16.msra.mxu1 %v2652_v27  ;;  %2952 = vmax.xlane.f32.xlu0 %v2951_v16  ;;  %v5103_v27 = vld [vmem:[%s7122_s13 + $0x10] sm:$0xff]  }
 0x887   : > { %4860 = vmatprep.subr.bf16.mxu1 %v2654_v12  ;;  %v4896_v62 = vpop.f32.mrb[40].mxu0 }
 0x888   : > { %v2925_v26 = vpop.f32.mrb[41].mxu0  ;;  %v5248_v19 = vpop.eup %5247  ;;  %v2946_v56 = vmul.f32 0.25, %v4896_v62 }
 0x889   : > { %v6571_v53 = vmul.f32 0.25, %v2925_v26  ;;  %4837 = vmatmul.mubr.msk.bf16.gmra.mrb[52].mxu1 %vm1697_vm2, %v1971_v31  ;;  %v4897_v4 = vpop.f32.mrb[42].mxu0  ;;  %v5250_v50 = vpop.eup %5249  ;;  %v2642_v0 = vmul.f32 %v5248_v19, %v6533_v48 }
 0x88a   : > { %4861 = vmatpush3.bf16.msra.mxu1 %v2654_v12  ;;  %v2928_v34 = vpop.f32.mrb[43].mxu0  ;;  %2955 = vmax.xlane.f32.xlu0 %v2954_v46  ;;  %v5252_v20 = vpop.eup %5251  ;;  %v2639_v31 = vmul.f32 %v5250_v50, %v6502_v33  ;;  %v2966_v11 = vsel %vm1008_vm1, %v2946_v56, -inf  ;;  %v2947_v10 = vmul.f32 0.25, %v4897_v4 }
 0x88b   : > { %4862 = vmatprep.subr.bf16.mxu1 %v2656_v9  ;;  %4864 = vmatprep.mubr.msk.bf16.mxu1 %vm1008_vm1, %v2645_v58  ;;  %v2960_v29 = vsel %vm1008_vm1, %v6571_v53, -inf  ;;  %v6585_v42 = vmul.f32 0.25, %v2928_v34  ;;  %v2641_v55 = vmul.f32 %v5252_v20, %v6522_v38  ;;  %v5254_v32 = vpop.eup %5253 }
 0x88c   : > { %2961 = vmax.xlane.f32.xlu1 %v2960_v29  ;;  %v2646_v59 = vpack.c.bf16 %v2640_v60, %v2639_v31  ;;  %v5256_v48 = vpop.eup %5255  ;;  %v2644_v23 = vmul.f32 %v5254_v32, %v6524_v35  ;;  %v2969_v38 = vsel %vm1008_vm1, %v2947_v10, -inf }
 0x88d   : > { %v2647_v30 = vpack.c.bf16 %v2642_v0, %v2641_v55  ;;  %v2963_v33 = vsel %vm1008_vm1, %v6585_v42, -inf  ;;  %v2643_v15 = vmul.f32 %v5256_v48, %v6516_v22 }
 0x88e   : > { %4863 = vmatpush3.bf16.msra.mxu1 %v2656_v9  ;;  %2958 = vmax.xlane.f32.xlu0 %v2957_v14 }
 0x88f   : > { %v2648_v39 = vpack.c.bf16 %v2644_v23, %v2643_v15  ;;  %4872 = vmatprep.subr.bf16.mxu1 %v5103_v27 }
 0x890   : > { %2967 = vmax.xlane.f32.xlu1 %v2966_v11 }
 0x891   : > { %4865 = vmatmul.mubr.msk.bf16.vlgmr.msra.gmra.mrb[56].mxu1 %vm1008_vm1, %v2646_v59 }
 0x892   : > { %2964 = vmax.xlane.f32.xlu0 %v2963_v33  ;;  %4868 = vmatprep.mubr.msk.bf16.mxu1 %vm1008_vm1, %v2647_v30 }
 0x893   : > { %4873 = vmatpush3.bf16.msra.mxu1 %v5103_v27 }
 0x896   : > { %2970 = vmax.xlane.f32.xlu0 %v2969_v38 }
 0x899   : > { %4869 = vmatmul.mubr.msk.bf16.gmra.mrb[60].mxu1 %vm1008_vm1, %v2648_v39 }
 0x8a1   : > { %3040 = vrot.lane.b32.xlu1 %v6137_v43, %s5528_s26 }
 0x8a5   : > { %3042 = vrot.lane.b32.xlu1 %v6147_v63, %s5528_s26 }
 0x911   : > { %v2950_v35 = vpop.xlane.xlu1 %2949 }
 0x912   : > { %v2972_v22 = vsub.f32 %v6557_v54, %v2950_v35 }
 0x913   : > { %v2953_v61 = vpop.xlane.xlu0 %2952 }
 0x914   : > { %v2980_v16 = vmul.f32 1.442695, %v2972_v22  ;;  %v2973_v24 = vsub.f32 %v6561_v40, %v2953_v61 }
 0x916   : > { %v2982_v26 = vmul.f32 1.442695, %v2973_v24 }
 0x917   : > { %v2956_v8 = vpop.xlane.xlu0 %2955 }
 0x918   : > { %v2974_v17 = vsub.f32 %v6565_v28, %v2956_v8 }
 0x919   : > { %v2962_v12 = vpop.xlane.xlu1 %2961 }
 0x91a   : > { %v2984_v62 = vmul.f32 1.442695, %v2974_v17  ;;  %v2976_v54 = vsub.f32 %v6571_v53, %v2962_v12 }
 0x91b   : > { %v2959_v51 = vpop.xlane.xlu0 %2958 }
 0x91c   : > { %5257 = vpow2.f32 %v2984_v62  ;;  %v2975_v43 = vsub.f32 %v2943_v18, %v2959_v51  ;;  %v2988_v40 = vmul.f32 1.442695, %v2976_v54 }
 0x91d   : > { %v2968_v1 = vpop.xlane.xlu1 %2967  ;;  %5259 = vpow2.f32 %v2980_v16 }
 0x91e   : > { %v2986_v19 = vmul.f32 1.442695, %v2975_v43  ;;  %v2978_v63 = vsub.f32 %v2946_v56, %v2968_v1 }
 0x91f   : > { %v2965_v4 = vpop.xlane.xlu0 %2964 }
 0x920   : > { %5261 = vpow2.f32 %v2986_v19  ;;  %v2992_v28 = vmul.f32 1.442695, %v2978_v63  ;;  %v2977_v60 = vsub.f32 %v6585_v42, %v2965_v4 }
 0x921   : > { %v3041_v46 = vpop.permute.xlu1 %3040  ;;  %5263 = vpow2.f32 %v2982_v26 }
 0x922   : > { %4898 = vmatprep.subr.bf16.mxu1 %v3041_v46  ;;  %5265 = vpow2.f32 %v2992_v28  ;;  %v2990_v31 = vmul.f32 1.442695, %v2977_v60 }
 0x923   : > { %v2971_v58 = vpop.xlane.xlu0 %2970  ;;  %5267 = vpow2.f32 %v2988_v40 }
 0x924   : > { %v2979_v9 = vsub.f32 %v2947_v10, %v2971_v58 }
 0x925   : > { %v3043_v35 = vpop.permute.xlu1 %3042 }
 0x926   : > { %v6609_v50 = vpop.eup %5257  ;;  %v2994_v53 = vmul.f32 1.442695, %v2979_v9 }
 0x927   : > { %v3002_v18 = vsel %vm1008_vm1, %v6609_v50, 0.0  ;;  %v6613_v34 = vpop.eup %5259 }
 0x928   : > { %3003 = vadd.xlane.f32.xlu1 %v3002_v18  ;;  %v2996_v56 = vsel %vm1008_vm1, %v6613_v34, 0.0  ;;  %5269 = vpow2.f32 %v2994_v53 }
 0x929   : > { %5271 = vpow2.f32 %v2990_v31 }
 0x92a   : > { %v6615_v20 = vpop.eup %5261 }
 0x92b   : > { %v3005_v29 = vsel %vm1008_vm1, %v6615_v20, 0.0  ;;  %v5264_v0 = vpop.eup %5263 }
 0x92c   : > { %2997 = vadd.xlane.f32.xlu1 %v2996_v56  ;;  %3006 = vadd.xlane.f32.xlu0 %v3005_v29  ;;  %v2999_v14 = vsel %vm1008_vm1, %v5264_v0, 0.0  ;;  %v6623_v55 = vpop.eup %5265 }
 0x92d   : > { %v3014_v42 = vsel %vm1008_vm1, %v6623_v55, 0.0  ;;  %v6627_v59 = vpop.eup %5267 }
 0x92e   : > { %v3008_v11 = vsel %vm1008_vm1, %v6627_v59, 0.0 }
 0x930   : > { %3000 = vadd.xlane.f32.xlu0 %v2999_v14 }
 0x932   : > { %v6631_v32 = vpop.eup %5269 }
 0x933   : > { %v3017_v30 = vsel %vm1008_vm1, %v6631_v32, 0.0  ;;  %v6635_v10 = vpop.eup %5271 }
 0x934   : > { %3015 = vadd.xlane.f32.xlu0 %v3014_v42  ;;  %v3011_v33 = vsel %vm1008_vm1, %v6635_v10, 0.0 }
 0x938   : > { %3009 = vadd.xlane.f32.xlu0 %v3008_v11 }
 0x93c   : > { %3018 = vadd.xlane.f32.xlu0 %v3017_v30 }
 0x93d   : > { %3046 = vrot.lane.b32.xlu1 %v6164_v21, %s5528_s26 }
 0x940   : > { %3012 = vadd.xlane.f32.xlu0 %v3011_v33 }
 0x956   : > { %3044 = vrot.lane.b32.xlu0 %v6155_v13, %s5528_s26 }
 0x964   : > { %v4866_v48 = vpop.f32.mrb[56].mxu1 }
 0x965   : > { %v2707_v23 = vpop.f32.mrb[57].mxu1 }
 0x966   : > { %v4867_v38 = vpop.f32.mrb[58].mxu1 }
 0x967   : > { %v2739_v15 = vpack.c.bf16 %v4867_v38, %v4866_v48  ;;  %v2710_v39 = vpop.f32.mrb[59].mxu1 }
 0x968   : > { %v2738_v27 = vpack.c.bf16 %v2710_v39, %v2707_v23 }
 0x96a   : > { %4874 = vmatprep.mubr.msk.bf16.mxu1 %vm1697_vm2, %v2738_v27 }
 0x96b   : > { %4875 = vmatmul.mubr.msk.bf16.vlgmr.msra.gmra.mrb[48].mxu1 %vm1697_vm2, %v2739_v15 }
 0x96c   : > { %4899 = vmatpush3.bf16.msra.mxu1 %v3041_v46  ;;  %v4870_v21 = vpop.f32.mrb[60].mxu1 }
 0x96d   : > { %4900 = vmatprep.subr.bf16.mxu1 %v3043_v35  ;;  %v2723_v61 = vpop.f32.mrb[61].mxu1 }
 0x96e   : > { %v4871_v22 = vpop.f32.mrb[62].mxu1 }
 0x96f   : > { %v2741_v8 = vpack.c.bf16 %v4871_v22, %v4870_v21  ;;  %v2726_v17 = vpop.f32.mrb[63].mxu1 }
 0x970   : > { %v2740_v12 = vpack.c.bf16 %v2726_v17, %v2723_v61  ;;  %4901 = vmatpush3.bf16.msra.mxu1 %v3043_v35  ;;  %v6667_v17 = vrot.slane %v6108_v57, %v6090_v37 }
 0x972   : > { %4878 = vmatprep.mubr.msk.bf16.mxu1 %vm1697_vm2, %v2740_v12 }
 0x973   : > { %4879 = vmatmul.mubr.msk.bf16.gmra.mrb[52].mxu1 %vm1697_vm2, %v2741_v8 }
 0x9b5   : > { %v3004_v13 = vpop.xlane.xlu1 %3003 }
 0x9b9   : > { %v2998_v16 = vpop.xlane.xlu1 %2997  ;;  %v3007_v24 = vpop.xlane.xlu0 %3006 }
 0x9ba   : > { %5273 = vrcp.f32 %v2998_v16 }
 0x9bd   : > { %v3001_v62 = vpop.xlane.xlu0 %3000  ;;  %v3047_v9 = vpop.permute.xlu1 %3046 }
 0x9be   : > { %5275 = vrcp.f32 %v3001_v62 }
 0x9bf   : > { %5277 = vrcp.f32 %v3007_v24 }
 0x9c0   : > { %5279 = vrcp.f32 %v3004_v13 }
 0x9c1   : > { %v3016_v51 = vpop.xlane.xlu0 %3015 }
 0x9c4   : > { %v5274_v1 = vpop.eup %5273 }
 0x9c5   : > { %v3010_v43 = vpop.xlane.xlu0 %3009  ;;  %v3028_v63 = vmul.f32 %v5274_v1, %v6613_v34  ;;  %v5104_v34 = vld [vmem:[%s7122_s13 + $0x18] sm:$0xff]  }
 0x9c6   : > { %5281 = vrcp.f32 %v3010_v43 }
 0x9c8   : > { %v5276_v26 = vpop.eup %5275 }
 0x9c9   : > { %v3019_v19 = vpop.xlane.xlu0 %3018  ;;  %v3029_v4 = vmul.f32 %v5276_v26, %v5264_v0  ;;  %v5278_v28 = vpop.eup %5277 }
 0x9ca   : > { %v5280_v40 = vpop.eup %5279  ;;  %v3031_v18 = vmul.f32 %v5278_v28, %v6615_v20 }
 0x9cb   : > { %v3036_v46 = vpack.c.bf16 %v3029_v4, %v3028_v63  ;;  %v3030_v53 = vmul.f32 %v5280_v40, %v6609_v50 }
 0x9cd   : > { %4906 = vmatprep.mubr.msk.bf16.mxu1 %vm1008_vm1, %v3036_v46  ;;  %v3013_v54 = vpop.xlane.xlu0 %3012  ;;  %v3037_v29 = vpack.c.bf16 %v3031_v18, %v3030_v53 }
 0x9ce   : > { %5283 = vrcp.f32 %v3013_v54 }
 0x9cf   : > { %5285 = vrcp.f32 %v3019_v19 }
 0x9d0   : > { %5287 = vrcp.f32 %v3016_v51  ;;  %v5282_v60 = vpop.eup %5281 }
 0x9d1   : > { %v3045_v58 = vpop.permute.xlu0 %3044  ;;  %v3032_v31 = vmul.f32 %v5282_v60, %v6627_v59 }
 0x9d2   : > { %4902 = vmatprep.subr.bf16.mxu1 %v3045_v58 }
 0x9d3   : > { %4903 = vmatpush3.bf16.msra.mxu1 %v3045_v58 }
 0x9d4   : > { %4904 = vmatprep.subr.bf16.mxu1 %v3047_v9 }
 0x9d7   : > { %4905 = vmatpush3.bf16.msra.mxu1 %v3047_v9 }
 0x9d8   : > { %v5284_v56 = vpop.eup %5283  ;;  %4914 = vmatprep.subr.bf16.mxu1 %v5104_v34 }
 0x9d9   : > { %v5286_v0 = vpop.eup %5285  ;;  %v3033_v14 = vmul.f32 %v5284_v56, %v6635_v10 }
 0x9da   : > { %4907 = vmatmul.mubr.msk.bf16.vlgmr.msra.gmra.mrb[64].mxu1 %vm1008_vm1, %v3037_v29  ;;  %v5288_v20 = vpop.eup %5287  ;;  %v3035_v11 = vmul.f32 %v5286_v0, %v6631_v32 }
 0x9db   : > { %v3038_v42 = vpack.c.bf16 %v3033_v14, %v3032_v31  ;;  %4915 = vmatpush3.bf16.msra.mxu1 %v5104_v34  ;;  %v3034_v50 = vmul.f32 %v5288_v20, %v6623_v55  ;;  %v4477_v55 = vld [vmem:[#allocation4] ss:$0 sm:$0xff] }
 0x9dd   : > { %4910 = vmatprep.mubr.msk.bf16.mxu1 %vm1008_vm1, %v3038_v42  ;;  %v3039_v30 = vpack.c.bf16 %v3035_v11, %v3034_v50 }
 0x9e2   : > { %4911 = vmatmul.mubr.msk.bf16.gmra.mrb[68].mxu1 %vm1008_vm1, %v3039_v30 }
 0xaad   : > { %v4908_v33 = vpop.f32.mrb[64].mxu1 }
 0xaae   : > { %v3098_v48 = vpop.f32.mrb[65].mxu1 }
 0xaaf   : > { %v4909_v23 = vpop.f32.mrb[66].mxu1 }
 0xab0   : > { %v3130_v59 = vpack.c.bf16 %v4909_v23, %v4908_v33  ;;  %v3101_v38 = vpop.f32.mrb[67].mxu1 }
 0xab1   : > { %v3129_v10 = vpack.c.bf16 %v3101_v38, %v3098_v48 }
 0xab3   : > { %4916 = vmatprep.mubr.msk.bf16.mxu1 %vm1697_vm2, %v3129_v10 }
 0xab4   : > { %4917 = vmatmul.mubr.msk.bf16.vlgmr.msra.gmra.mrb[48].mxu1 %vm1697_vm2, %v3130_v59 }
 0xab5   : > { %v4912_v15 = vpop.f32.mrb[68].mxu1 }
 0xab6   : > { %v3114_v39 = vpop.f32.mrb[69].mxu1 }
 0xab7   : > { %v4913_v32 = vpop.f32.mrb[70].mxu1 }
 0xab8   : > { %v3132_v27 = vpack.c.bf16 %v4913_v32, %v4912_v15  ;;  %v3117_v35 = vpop.f32.mrb[71].mxu1 }
 0xab9   : > { %v3131_v21 = vpack.c.bf16 %v3117_v35, %v3114_v39 }
 0xabb   : > { %4920 = vmatprep.mubr.msk.bf16.mxu1 %vm1697_vm2, %v3131_v21 }
 0xabc   : > { %4921 = vmatmul.mubr.msk.bf16.gmra.mrb[52].mxu1 %vm1697_vm2, %v3132_v27 }
 0xb87   : > { %v4918_v61 = vpop.f32.mrb[48].mxu1 }
 0xb88   : > { %v3235_v22 = vadd.f32 %v4918_v61, %v4477_v55  ;;  %v3187_v8 = vpop.f32.mrb[49].mxu1 }
 0xb89   : > { %v3233_v12 = vadd.f32 %v4477_v55, %v3187_v8  ;;  %v4919_v13 = vpop.f32.mrb[50].mxu1 }
 0xb8a   : > { %v3236_v16 = vadd.f32 %v4919_v13, %v4477_v55  ;;  %v3190_v24 = vpop.f32.mrb[51].mxu1  ;;  %v3247_v62 = vmul.f32 %v6667_v17, %v3235_v22 }
 0xb8b   : > { %v3245_v51 = vmul.f32 %v6667_v17, %v3233_v12  ;;  %v3234_v43 = vadd.f32 %v4477_v55, %v3190_v24 }
 0xb8c   : > { %v3248_v19 = vmul.f32 %v6667_v17, %v3236_v16  ;;  %v6677_v63 = vadd.f32 %v3247_v62, %v5911_v41 }
 0xb8d   : > { %v6672_v1 = vadd.f32 %v3245_v51, %v5916_v45  ;;  %v3246_v26 = vmul.f32 %v6667_v17, %v3234_v43 }
 0xb8e   : > { %v6687_v40 = vadd.f32 %v3248_v19, %v5918_v47  ;;  %v3267_v60 = vsel %vm1008_vm1, %v6677_v63, 0.0 }
 0xb8f   : > { %v6680_v57 = vadd.f32 %v3246_v26, %v5922_v49  ;;  %v4922_v4 = vpop.f32.mrb[52].mxu1  ;;  %v3261_v46 = vsel %vm1008_vm1, %v6672_v1, 0.0 }
 0xb90   : > { %3262 = vadd.xlane.f32.xlu1 %v3261_v46  ;;  %v3203_v54 = vpop.f32.mrb[53].mxu1  ;;  %v3239_v18 = vadd.f32 %v4922_v4, %v4477_v55  ;;  %v3270_v31 = vsel %vm1008_vm1, %v6687_v40, 0.0 }
 0xb91   : > { %v3237_v28 = vadd.f32 %v4477_v55, %v3203_v54  ;;  %v4923_v58 = vpop.f32.mrb[54].mxu1  ;;  %v3264_v45 = vsel %vm1008_vm1, %v6680_v57, 0.0 }
 0xb92   : > { %v3240_v9 = vadd.f32 %v4923_v58, %v4477_v55  ;;  %3265 = vadd.xlane.f32.xlu0 %v3264_v45  ;;  %v3206_v41 = vpop.f32.mrb[55].mxu1  ;;  %v3251_v29 = vmul.f32 %v6667_v17, %v3239_v18 }
 0xb93   : > { %v3249_v49 = vmul.f32 %v6667_v17, %v3237_v28  ;;  %v3238_v34 = vadd.f32 %v4477_v55, %v3206_v41 }
 0xb94   : > { %3268 = vadd.xlane.f32.xlu1 %v3267_v60  ;;  %v3252_v53 = vmul.f32 %v6667_v17, %v3240_v9  ;;  %v6709_v42 = vadd.f32 %v3251_v29, %v5942_v2  ;;  %v5107_v60 = vld [vmem:[%s7124_s15 + $0x4] ss:$8 sps:$4 sm:$0xff]   ;;  %v5108_v29 = vld [vmem:[%s7124_s15 + $0x10] ss:$8 sps:$4 sm:$0xff]  }
 0xb95   : > { %v3250_v56 = vmul.f32 %v6667_v17, %v3238_v34  ;;  %v6696_v47 = vadd.f32 %v3249_v49, %v5944_v3  ;;  %3466 = vmatprep.subr.bf16.mxu0 %v5107_v60 }
 0xb96   : > { %v6704_v14 = vadd.f32 %v3252_v53, %v5946_v6  ;;  %v3279_v11 = vsel %vm1008_vm1, %v6709_v42, 0.0  ;;  %v5105_v53 = vld [vmem:[%s7124_s15] ss:$8 sps:$4 sm:$0xff]  }
 0xb97   : > { %v6699_v0 = vadd.f32 %v3250_v56, %v5948_v7  ;;  %v3273_v3 = vsel %vm1008_vm1, %v6696_v47, 0.0  ;;  %3467 = vmatpush1.bf16.msra.mxu0 %v5105_v53  ;;  %v5110_v56 = vld [vmem:[%s7124_s15 + $0x14] ss:$8 sps:$4 sm:$0xff]  }
 0xb98   : > { %3271 = vadd.xlane.f32.xlu1 %v3270_v31  ;;  %v3282_v7 = vsel %vm1008_vm1, %v6704_v14, 0.0  ;;  %3468 = vmatprep.subr.bf16.mxu0 %v5110_v56  ;;  %v5113_v31 = vld [vmem:[%s7124_s15 + $0x24] ss:$8 sps:$4 sm:$0xff]  }
 0xb99   : > { %v3276_v20 = vsel %vm1008_vm1, %v6699_v0, 0.0 }
 0xb9a   : > { %3277 = vadd.xlane.f32.xlu0 %v3276_v20  ;;  %v5111_v20 = vld [vmem:[%s7124_s15 + $0x20] ss:$8 sps:$4 sm:$0xff]  }
 0xb9b   : > { %3469 = vmatpush1.bf16.msra.mxu0 %v5108_v29 }
 0xb9c   : > { %3274 = vadd.xlane.f32.xlu1 %v3273_v3  ;;  %3470 = vmatprep.subr.bf16.mxu0 %v5113_v31  ;;  %v5116_v3 = vld [vmem:[%s7124_s15 + $0x34] ss:$8 sps:$4 sm:$0xff]  }
 0xb9e   : > { %3283 = vadd.xlane.f32.xlu0 %v3282_v7  ;;  %v5114_v7 = vld [vmem:[%s7124_s15 + $0x30] ss:$8 sps:$4 sm:$0xff]  }
 0xb9f   : > { %3471 = vmatpush1.bf16.msra.mxu0 %v5111_v20 }
 0xba0   : > { %3280 = vadd.xlane.f32.xlu1 %v3279_v11  ;;  %3472 = vmatprep.subr.bf16.mxu0 %v5116_v3  ;;  %v1236_v11 = vsub.s32 2, %v6087_v36 }
 0xba3   : > { %3473 = vmatpush1.bf16.msra.mxu0 %v5114_v7 }
 0xc1d   : > { %v3263_v6 = vpop.xlane.xlu1 %3262 }
 0xc1e   : > { %v3285_v50 = vmul.f32 0.015625, %v3263_v6 }
 0xc1f   : > { %v3266_v30 = vpop.xlane.xlu0 %3265 }
 0xc20   : > { %v6718_v33 = vsub.f32 %v6672_v1, %v3285_v50  ;;  %v3286_v2 = vmul.f32 0.015625, %v3266_v30 }
 0xc21   : > { %v3269_v48 = vpop.xlane.xlu1 %3268 }
 0xc22   : > { %v6721_v23 = vsub.f32 %v6680_v57, %v3286_v2  ;;  %v3287_v59 = vmul.f32 0.015625, %v3269_v48  ;;  %v3301_v38 = vmul.f32 %v6718_v33, %v6718_v33 }
 0xc24   : > { %v6726_v10 = vsub.f32 %v6677_v63, %v3287_v59  ;;  %v3309_v15 = vsel %vm1008_vm1, %v3301_v38, 0.0  ;;  %v3302_v39 = vmul.f32 %v6721_v23, %v6721_v23 }
 0xc25   : > { %v3272_v32 = vpop.xlane.xlu1 %3271  ;;  %3310 = vadd.xlane.f32.xlu1 %v3309_v15 }
 0xc26   : > { %v3288_v27 = vmul.f32 0.015625, %v3272_v32  ;;  %v3312_v35 = vsel %vm1008_vm1, %v3302_v39, 0.0  ;;  %v3303_v21 = vmul.f32 %v6726_v10, %v6726_v10 }
 0xc27   : > { %3313 = vadd.xlane.f32.xlu0 %v3312_v35  ;;  %v3278_v55 = vpop.xlane.xlu0 %3277 }
 0xc28   : > { %v6735_v61 = vsub.f32 %v6687_v40, %v3288_v27  ;;  %v3290_v22 = vmul.f32 0.015625, %v3278_v55  ;;  %v3315_v8 = vsel %vm1008_vm1, %v3303_v21, 0.0 }
 0xc29   : > { %3316 = vadd.xlane.f32.xlu1 %v3315_v8  ;;  %v3275_v12 = vpop.xlane.xlu1 %3274 }
 0xc2a   : > { %v6739_v13 = vsub.f32 %v6699_v0, %v3290_v22  ;;  %v3289_v16 = vmul.f32 0.015625, %v3275_v12  ;;  %v3304_v24 = vmul.f32 %v6735_v61, %v6735_v61 }
 0xc2b   : > { %v3284_v62 = vpop.xlane.xlu0 %3283 }
 0xc2c   : > { %v6744_v51 = vsub.f32 %v6696_v47, %v3289_v16  ;;  %v3292_v43 = vmul.f32 0.015625, %v3284_v62  ;;  %v3318_v26 = vsel %vm1008_vm1, %v3304_v24, 0.0  ;;  %v3306_v19 = vmul.f32 %v6739_v13, %v6739_v13 }
 0xc2d   : > { %v3281_v4 = vpop.xlane.xlu1 %3280  ;;  %3319 = vadd.xlane.f32.xlu0 %v3318_v26 }
 0xc2e   : > { %v6750_v46 = vsub.f32 %v6704_v14, %v3292_v43  ;;  %v3291_v54 = vmul.f32 0.015625, %v3281_v4  ;;  %v3305_v28 = vmul.f32 %v6744_v51, %v6744_v51  ;;  %v3324_v9 = vsel %vm1008_vm1, %v3306_v19, 0.0 }
 0xc30   : > { %v6755_v58 = vsub.f32 %v6709_v42, %v3291_v54  ;;  %v3321_v45 = vsel %vm1008_vm1, %v3305_v28, 0.0  ;;  %v3308_v41 = vmul.f32 %v6750_v46, %v6750_v46 }
 0xc31   : > { %3322 = vadd.xlane.f32.xlu1 %v3321_v45  ;;  %3325 = vadd.xlane.f32.xlu0 %v3324_v9 }
 0xc32   : > { %v3307_v18 = vmul.f32 %v6755_v58, %v6755_v58  ;;  %v3330_v34 = vsel %vm1008_vm1, %v3308_v41, 0.0 }
 0xc34   : > { %v3327_v49 = vsel %vm1008_vm1, %v3307_v18, 0.0 }
 0xc35   : > { %3328 = vadd.xlane.f32.xlu1 %v3327_v49  ;;  %3331 = vadd.xlane.f32.xlu0 %v3330_v34 }
 0xc46   : > { %3379 = vrot.lane.b32.xlu1 %v6667_v17, %s5522_s5  ;;  %v5353_v17 = vld [vmem:[%s7119_s10] sm:$0x7] }
 0xc47   : > { %v1237_v59 = vrot.slane %v5353_v17, %v1236_v11 }
 0xc49   : > { %v6796_v27 = vadd.f32 %v6112_v5, %v1237_v59 }
 0xc4b   : > { %v3365_v55 = vadd.f32 1.0, %v6796_v27 }
 0xc4d   : > { %v3369_v26 = vrot.slane %v3365_v55, %v6090_v37 }
 0xcb2   : > { %v3311_v6 = vpop.xlane.xlu1 %3310 }
 0xcb3   : > { %v3333_v50 = vmul.f32 0.015625, %v3311_v6 }
 0xcb4   : > { %v3314_v30 = vpop.xlane.xlu0 %3313 }
 0xcb5   : > { %v3341_v2 = vadd.f32 1e-06, %v3333_v50  ;;  %v3334_v48 = vmul.f32 0.015625, %v3314_v30 }
 0xcb6   : > { %v3317_v38 = vpop.xlane.xlu1 %3316 }
 0xcb7   : > { %5289 = vrsqrt.f32 %v3341_v2  ;;  %v3342_v15 = vadd.f32 1e-06, %v3334_v48  ;;  %v3335_v39 = vmul.f32 0.015625, %v3317_v38 }
 0xcb9   : > { %5291 = vrsqrt.f32 %v3342_v15  ;;  %v3343_v32 = vadd.f32 1e-06, %v3335_v39 }
 0xcba   : > { %v3320_v36 = vpop.xlane.xlu0 %3319 }
 0xcbb   : > { %5293 = vrsqrt.f32 %v3343_v32  ;;  %v3336_v35 = vmul.f32 0.015625, %v3320_v36 }
 0xcbd   : > { %v3344_v21 = vadd.f32 1e-06, %v3336_v35 }
 0xcbe   : > { %v3323_v22 = vpop.xlane.xlu1 %3322  ;;  %v3326_v8 = vpop.xlane.xlu0 %3325 }
 0xcbf   : > { %5295 = vrsqrt.f32 %v3344_v21  ;;  %v3337_v12 = vmul.f32 0.015625, %v3323_v22  ;;  %v3338_v16 = vmul.f32 0.015625, %v3326_v8  ;;  %v5119_v8 = vld [vmem:[%s7126_s17 + $0x48] sm:$0xff]  }
 0xcc1   : > { %v5290_v24 = vpop.eup %5289  ;;  %v3345_v62 = vadd.f32 1e-06, %v3337_v12  ;;  %v3346_v43 = vadd.f32 1e-06, %v3338_v16  ;;  %v5121_v12 = vld [vmem:[%s7126_s17 + $0x50] sm:$0xff]  }
 0xcc2   : > { %v3357_v19 = vmul.f32 %v5290_v24, %v6718_v33  ;;  %v3329_v5 = vpop.xlane.xlu1 %3328  ;;  %v3332_v4 = vpop.xlane.xlu0 %3331  ;;  %v5122_v16 = vld [vmem:[%s7126_s17 + $0x10] sm:$0xff]   ;;  %v5123_v24 = vld [vmem:[%s7126_s17 + $0x58] sm:$0xff]  }
 0xcc3   : > { %v5292_v54 = vpop.eup %5291  ;;  %5297 = vrsqrt.f32 %v3345_v62  ;;  %v3339_v28 = vmul.f32 0.015625, %v3329_v5  ;;  %v3340_v45 = vmul.f32 0.015625, %v3332_v4  ;;  %v5124_v62 = vld [vmem:[%s7126_s17 + $0x18] sm:$0xff]   ;;  %v5128_v5 = vld [vmem:[%s7126_s17 + $0x28] sm:$0xff]   ;;  %v5129_v4 = vld [vmem:[%s7126_s17 + $0x70] sm:$0xff]  }
 0xcc4   : > { %v3370_v9 = vmul.f32 %v3369_v26, %v3357_v19  ;;  %v3358_v41 = vmul.f32 %v5292_v54, %v6721_v23  ;;  %5299 = vrsqrt.f32 %v3346_v43  ;;  %v5125_v43 = vld [vmem:[%s7126_s17 + $0x60] sm:$0xff]   ;;  %v5127_v19 = vld [vmem:[%s7126_s17 + $0x68] sm:$0xff]   ;;  %v5130_v54 = vld [vmem:[%s7126_s17 + $0x30] sm:$0xff]  }
 0xcc5   : > { %v5294_v18 = vpop.eup %5293  ;;  %v3347_v49 = vadd.f32 1e-06, %v3339_v28  ;;  %v3348_v34 = vadd.f32 1e-06, %v3340_v45  ;;  %v5131_v28 = vld [vmem:[%s7126_s17 + $0x78] sm:$0xff]  }
 0xcc6   : > { %v3371_v60 = vmul.f32 %v3369_v26, %v3358_v41  ;;  %v3380_v53 = vpop.permute.xlu1 %3379  ;;  %v3359_v29 = vmul.f32 %v5294_v18, %v6726_v10  ;;  %v5132_v45 = vld [vmem:[%s7126_s17 + $0x38] sm:$0xff]  }
 0xcc7   : > { %v3382_v56 = vadd.f32 %v3380_v53, %v3370_v9  ;;  %5301 = vrsqrt.f32 %v3347_v49  ;;  %v3402_v9 = vld [vmem:[%s7125_s16] sm:$0x3] }
 0xcc8   : > { %v3383_v33 = vadd.f32 %v3380_v53, %v3371_v60  ;;  %5303 = vrsqrt.f32 %v3348_v34  ;;  %v3372_v7 = vmul.f32 %v3369_v26, %v3359_v29  ;;  %v6867_v41 = vrot.slane %v3402_v9, %v6090_v37 }
 0xcc9   : > { %v5296_v31 = vpop.eup %5295  ;;  %v6870_v18 = vrot.slane %v3402_v9, %v6102_v44 }
 0xcca   : > { %v3360_v20 = vmul.f32 %v5296_v31, %v6735_v61  ;;  %v3390_v3 = vpack.c.bf16 %v3383_v33, %v3382_v56  ;;  %v3384_v2 = vadd.f32 %v3380_v53, %v3372_v7 }
 0xccc   : > { %4486 = vmatmul.mubr.msk.bf16.vlgmr.msra.gmra.mrb[44].mxu0 %vm1008_vm1, %v3390_v3  ;;  %v3373_v23 = vmul.f32 %v3369_v26, %v3360_v20 }
 0xccd   : > { %v5298_v11 = vpop.eup %5297  ;;  %3508 = vmatprep.mubr.bf16.mxu0 %v5521_v25 }
 0xcce   : > { %v5300_v6 = vpop.eup %5299  ;;  %v3361_v50 = vmul.f32 %v5298_v11, %v6744_v51  ;;  %v3385_v30 = vadd.f32 %v3380_v53, %v3373_v23 }
 0xccf   : > { %v3362_v10 = vmul.f32 %v5300_v6, %v6739_v13 }
 0xcd0   : > { %v3391_v17 = vpack.c.bf16 %v3385_v30, %v3384_v2  ;;  %v3374_v59 = vmul.f32 %v3369_v26, %v3361_v50 }
 0xcd1   : > { %v5302_v48 = vpop.eup %5301  ;;  %v3375_v38 = vmul.f32 %v3369_v26, %v3362_v10 }
 0xcd2   : > { %v5304_v61 = vpop.eup %5303  ;;  %v3363_v15 = vmul.f32 %v5302_v48, %v6755_v58  ;;  %v3386_v32 = vadd.f32 %v3380_v53, %v3374_v59  ;;  %v5117_v58 = vld [vmem:[%s7126_s17 + $0x40] sm:$0xff]  }
 0xcd3   : > { %v3364_v39 = vmul.f32 %v5304_v61, %v6750_v46  ;;  %v3387_v36 = vadd.f32 %v3380_v53, %v3375_v38  ;;  %v5118_v46 = vld [vmem:[%s7126_s17] sm:$0xff]   ;;  %4636 = vmatprep.subr.bf16.mxu0 %v5117_v58 }
 0xcd4   : > { %4487 = vmatmul.mubr.msk.bf16.gmra.mrb[48].mxu0 %vm1008_vm1, %v3391_v17  ;;  %v3376_v35 = vmul.f32 %v3369_v26, %v3363_v15 }
 0xcd5   : > { %3518 = vmatprep.mubr.bf16.mxu0 %v5521_v25  ;;  %v3392_v51 = vpack.c.bf16 %v3387_v36, %v3386_v32  ;;  %v3377_v21 = vmul.f32 %v3369_v26, %v3364_v39  ;;  %4637 = vmatpush3.bf16.msra.mxu0 %v5118_v46  ;;  %v5126_v26 = vld [vmem:[%s7126_s17 + $0x20] sm:$0xff]  }
 0xcd6   : > { %v3388_v13 = vadd.f32 %v3380_v53, %v3376_v35  ;;  %4638 = vmatprep.subr.bf16.mxu0 %v5119_v8 }
 0xcd7   : > { %v3389_v55 = vadd.f32 %v3380_v53, %v3377_v21 }
 0xcd9   : > { %v3393_v22 = vpack.c.bf16 %v3389_v55, %v3388_v13 }
 0xcdc   : > { %4488 = vmatmul.mubr.msk.bf16.gmra.mrb[52].mxu0 %vm1008_vm1, %v3392_v51 }
 0xcdd   : > { %3528 = vmatprep.mubr.bf16.mxu0 %v5521_v25  ;;  %v5120_v25 = vld [vmem:[%s7126_s17 + $0x8] sm:$0xff]  }
 0xcde   : > { %4639 = vmatpush3.bf16.msra.mxu0 %v5120_v25 }
 0xcdf   : > { %4640 = vmatprep.subr.bf16.mxu0 %v5121_v12 }
 0xce2   : > { %4641 = vmatpush3.bf16.msra.mxu0 %v5122_v16 }
 0xce3   : > { %4642 = vmatprep.subr.bf16.mxu0 %v5123_v24 }
 0xce4   : > { %4489 = vmatmul.mubr.msk.bf16.gmra.mrb[56].mxu0 %vm1008_vm1, %v3393_v22 }
 0xce6   : > { %4643 = vmatpush3.bf16.msra.mxu0 %v5124_v62 }
 0xce7   : > { %4644 = vmatprep.subr.bf16.mxu0 %v5125_v43 }
 0xcea   : > { %4645 = vmatpush3.bf16.msra.mxu0 %v5126_v26 }
 0xceb   : > { %4646 = vmatprep.subr.bf16.mxu0 %v5127_v19 }
 0xcee   : > { %4647 = vmatpush3.bf16.msra.mxu0 %v5128_v5 }
 0xcef   : > { %4648 = vmatprep.subr.bf16.mxu0 %v5129_v4 }
 0xcf2   : > { %4649 = vmatpush3.bf16.msra.mxu0 %v5130_v54 }
 0xcf3   : > { %4650 = vmatprep.subr.bf16.mxu0 %v5131_v28 }
 0xcf6   : > { %4651 = vmatpush3.bf16.msra.mxu0 %v5132_v45 }
 0xd9f   : > { %v3500_v49 = vpop.f32.mrb[44].mxu0 }
 0xda0   : > { %v6873_v34 = vadd.f32 %v3500_v49, %v6867_v41  ;;  %v3502_v60 = vpop.f32.mrb[45].mxu0 }
 0xda1   : > { %v6876_v53 = vadd.f32 %v3502_v60, %v6870_v18  ;;  %v3504_v56 = vpop.f32.mrb[46].mxu0 }
 0xda2   : > { %v3539_v29 = vmul.f32 %v6873_v34, %v6873_v34  ;;  %v6881_v33 = vadd.f32 %v3504_v56, %v6867_v41  ;;  %v3506_v31 = vpop.f32.mrb[47].mxu0 }
 0xda3   : > { %v3540_v44 = vmul.f32 %v6876_v53, %v6876_v53  ;;  %v6886_v20 = vadd.f32 %v3506_v31, %v6870_v18 }
 0xda4   : > { %v3555_v3 = vmul.f32 %v3539_v29, %v6873_v34  ;;  %v3541_v7 = vmul.f32 %v6881_v33, %v6881_v33 }
 0xda5   : > { %v3556_v23 = vmul.f32 %v3540_v44, %v6876_v53  ;;  %v3542_v11 = vmul.f32 %v6886_v20, %v6886_v20 }
 0xda6   : > { %v3571_v6 = vmul.f32 0.044715, %v3555_v3  ;;  %v3557_v50 = vmul.f32 %v3541_v7, %v6881_v33 }
 0xda7   : > { %v3572_v30 = vmul.f32 0.044715, %v3556_v23  ;;  %v3558_v10 = vmul.f32 %v3542_v11, %v6886_v20  ;;  %v3510_v2 = vpop.f32.mrb[48].mxu0 }
 0xda8   : > { %v3587_v48 = vadd.f32 %v3571_v6, %v6873_v34  ;;  %v3573_v17 = vmul.f32 0.044715, %v3557_v50  ;;  %v6898_v59 = vadd.f32 %v3510_v2, %v6867_v41  ;;  %v3512_v38 = vpop.f32.mrb[49].mxu0 }
 0xda9   : > { %v3588_v61 = vadd.f32 %v3572_v30, %v6876_v53  ;;  %v3574_v15 = vmul.f32 0.044715, %v3558_v10  ;;  %v6902_v39 = vadd.f32 %v3512_v38, %v6870_v18  ;;  %v3514_v32 = vpop.f32.mrb[50].mxu0 }
 0xdaa   : > { %v3603_v36 = vmul.f32 0.7978846, %v3587_v48  ;;  %v3589_v51 = vadd.f32 %v3573_v17, %v6881_v33  ;;  %v3543_v35 = vmul.f32 %v6898_v59, %v6898_v59  ;;  %v6908_v21 = vadd.f32 %v3514_v32, %v6867_v41  ;;  %v3516_v13 = vpop.f32.mrb[51].mxu0 }
 0xdab   : > { %v3604_v55 = vmul.f32 0.7978846, %v3588_v61  ;;  %v3590_v22 = vadd.f32 %v3574_v15, %v6886_v20  ;;  %v3544_v58 = vmul.f32 %v6902_v39, %v6902_v39  ;;  %v6914_v46 = vadd.f32 %v3516_v13, %v6870_v18 }
 0xdac   : > { %5305 = vtanh.f32 %v3603_v36  ;;  %v3605_v8 = vmul.f32 0.7978846, %v3589_v51  ;;  %v3559_v25 = vmul.f32 %v3543_v35, %v6898_v59  ;;  %v3545_v12 = vmul.f32 %v6908_v21, %v6908_v21 }
 0xdad   : > { %5307 = vtanh.f32 %v3604_v55  ;;  %v3606_v16 = vmul.f32 0.7978846, %v3590_v22  ;;  %v3560_v24 = vmul.f32 %v3544_v58, %v6902_v39  ;;  %v3546_v62 = vmul.f32 %v6914_v46, %v6914_v46 }
 0xdae   : > { %5309 = vtanh.f32 %v3605_v8  ;;  %v3575_v43 = vmul.f32 0.044715, %v3559_v25  ;;  %v3561_v26 = vmul.f32 %v3545_v12, %v6908_v21 }
 0xdaf   : > { %v3576_v19 = vmul.f32 0.044715, %v3560_v24  ;;  %v3562_v5 = vmul.f32 %v3546_v62, %v6914_v46  ;;  %v3520_v4 = vpop.f32.mrb[52].mxu0  ;;  %5311 = vtanh.f32 %v3606_v16 }
 0xdb0   : > { %v3591_v54 = vadd.f32 %v3575_v43, %v6898_v59  ;;  %v3577_v28 = vmul.f32 0.044715, %v3561_v26  ;;  %v6926_v45 = vadd.f32 %v3520_v4, %v6867_v41  ;;  %v3522_v9 = vpop.f32.mrb[53].mxu0 }
 0xdb1   : > { %v3592_v49 = vadd.f32 %v3576_v19, %v6902_v39  ;;  %v3578_v60 = vmul.f32 0.044715, %v3562_v5  ;;  %v6930_v56 = vadd.f32 %v3522_v9, %v6870_v18  ;;  %v3524_v29 = vpop.f32.mrb[54].mxu0 }
 0xdb2   : > { %v3607_v31 = vmul.f32 0.7978846, %v3591_v54  ;;  %v3593_v44 = vadd.f32 %v3577_v28, %v6908_v21  ;;  %v3547_v3 = vmul.f32 %v6926_v45, %v6926_v45  ;;  %v6936_v7 = vadd.f32 %v3524_v29, %v6867_v41  ;;  %v3526_v23 = vpop.f32.mrb[55].mxu0 }
 0xdb3   : > { %v3608_v11 = vmul.f32 0.7978846, %v3592_v49  ;;  %v3594_v6 = vadd.f32 %v3578_v60, %v6914_v46  ;;  %v3548_v50 = vmul.f32 %v6930_v56, %v6930_v56  ;;  %v6942_v30 = vadd.f32 %v3526_v23, %v6870_v18 }
 0xdb4   : > { %5313 = vtanh.f32 %v3607_v31  ;;  %v3609_v10 = vmul.f32 0.7978846, %v3593_v44  ;;  %v3563_v2 = vmul.f32 %v3547_v3, %v6926_v45  ;;  %v3549_v48 = vmul.f32 %v6936_v7, %v6936_v7 }
 0xdb5   : > { %5315 = vtanh.f32 %v3608_v11  ;;  %v3610_v17 = vmul.f32 0.7978846, %v3594_v6  ;;  %v3564_v38 = vmul.f32 %v3548_v50, %v6930_v56  ;;  %v3550_v61 = vmul.f32 %v6942_v30, %v6942_v30 }
 0xdb6   : > { %v5306_v15 = vpop.eup %5305  ;;  %5317 = vtanh.f32 %v3609_v10  ;;  %v3579_v32 = vmul.f32 0.044715, %v3563_v2  ;;  %v3565_v36 = vmul.f32 %v3549_v48, %v6936_v7 }
 0xdb7   : > { %v5308_v51 = vpop.eup %5307  ;;  %v3635_v35 = vadd.f32 1.0, %v5306_v15  ;;  %5319 = vtanh.f32 %v3610_v17  ;;  %v3580_v13 = vmul.f32 0.044715, %v3564_v38  ;;  %v3566_v55 = vmul.f32 %v3550_v61, %v6942_v30  ;;  %v3530_v22 = vpop.f32.mrb[56].mxu0 }
 0xdb8   : > { %v5310_v58 = vpop.eup %5309  ;;  %v3595_v8 = vadd.f32 %v3579_v32, %v6926_v45  ;;  %v3581_v25 = vmul.f32 0.044715, %v3565_v36  ;;  %v6954_v12 = vadd.f32 %v3530_v22, %v6867_v41  ;;  %v3532_v16 = vpop.f32.mrb[57].mxu0  ;;  %v3636_v24 = vadd.f32 1.0, %v5308_v51 }
 0xdb9   : > { %v3651_v62 = vmul.f32 0.5, %v3635_v35  ;;  %v3637_v43 = vadd.f32 1.0, %v5310_v58  ;;  %v3596_v26 = vadd.f32 %v3580_v13, %v6930_v56  ;;  %v3582_v19 = vmul.f32 0.044715, %v3566_v55  ;;  %v3534_v5 = vpop.f32.mrb[58].mxu0  ;;  %v5312_v60 = vpop.eup %5311 }
 0xdba   : > { %v3611_v4 = vmul.f32 0.7978846, %v3595_v8  ;;  %v3597_v54 = vadd.f32 %v3581_v25, %v6936_v7  ;;  %v3551_v28 = vmul.f32 %v6954_v12, %v6954_v12  ;;  %v6961_v9 = vadd.f32 %v3532_v16, %v6870_v18  ;;  %v3536_v49 = vpop.f32.mrb[59].mxu0 }
 0xdbb   : > { %v3667_v29 = vmul.f32 %v3651_v62, %v6873_v34  ;;  %v3653_v31 = vmul.f32 0.5, %v3637_v43  ;;  %v3612_v44 = vmul.f32 0.7978846, %v3596_v26  ;;  %v3598_v3 = vadd.f32 %v3582_v19, %v6942_v30 }
 0xdbc   : > { %5321 = vtanh.f32 %v3611_v4  ;;  %v3613_v23 = vmul.f32 0.7978846, %v3597_v54  ;;  %v3567_v11 = vmul.f32 %v3551_v28, %v6954_v12  ;;  %v3552_v6 = vmul.f32 %v6961_v9, %v6961_v9 }
 0xdbd   : > { %v3669_v50 = vmul.f32 %v3653_v31, %v6881_v33  ;;  %5323 = vtanh.f32 %v3612_v44  ;;  %v3614_v10 = vmul.f32 0.7978846, %v3598_v3  ;;  %v6970_v2 = vadd.f32 %v3534_v5, %v6867_v41 }
 0xdbe   : > { %v5314_v48 = vpop.eup %5313  ;;  %5325 = vtanh.f32 %v3613_v23  ;;  %v3583_v34 = vmul.f32 0.044715, %v3567_v11  ;;  %v3568_v17 = vmul.f32 %v3552_v6, %v6961_v9  ;;  %v6974_v38 = vadd.f32 %v3536_v49, %v6870_v18 }
 0xdbf   : > { %v5316_v61 = vpop.eup %5315  ;;  %v3683_v15 = vpack.c.bf16 %v3669_v50, %v3667_v29  ;;  %5327 = vtanh.f32 %v3614_v10  ;;  %v3553_v32 = vmul.f32 %v6970_v2, %v6970_v2  ;;  %v3638_v33 = vadd.f32 1.0, %v5312_v60 }
 0xdc0   : > { %v5318_v36 = vpop.eup %5317  ;;  %v3599_v51 = vadd.f32 %v3583_v34, %v6954_v12  ;;  %v3584_v41 = vmul.f32 0.044715, %v3568_v17  ;;  %v3554_v35 = vmul.f32 %v6974_v38, %v6974_v38  ;;  %v3652_v13 = vmul.f32 0.5, %v3636_v24 }
 0xdc1   : > { %v5320_v55 = vpop.eup %5319  ;;  %v3569_v22 = vmul.f32 %v3553_v32, %v6970_v2  ;;  %v3654_v18 = vmul.f32 0.5, %v3638_v33  ;;  %v3640_v58 = vadd.f32 1.0, %v5316_v61  ;;  %v3639_v8 = vadd.f32 1.0, %v5314_v48 }
 0xdc2   : > { %v3615_v25 = vmul.f32 0.7978846, %v3599_v51  ;;  %v3600_v16 = vadd.f32 %v3584_v41, %v6961_v9  ;;  %v3570_v62 = vmul.f32 %v3554_v35, %v6974_v38  ;;  %v3668_v43 = vmul.f32 %v3652_v13, %v6876_v53 }
 0xdc3   : > { %v3585_v26 = vmul.f32 0.044715, %v3569_v22  ;;  %v3670_v19 = vmul.f32 %v3654_v18, %v6886_v20  ;;  %v3642_v5 = vadd.f32 1.0, %v5320_v55  ;;  %v3656_v4 = vmul.f32 0.5, %v3640_v58 }
 0xdc4   : > { %5329 = vtanh.f32 %v3615_v25  ;;  %v3616_v24 = vmul.f32 0.7978846, %v3600_v16  ;;  %v3586_v54 = vmul.f32 0.044715, %v3570_v62  ;;  %v3641_v28 = vadd.f32 1.0, %v5318_v36 }
 0xdc5   : > { %v3601_v49 = vadd.f32 %v3585_v26, %v6970_v2  ;;  %v3684_v60 = vpack.c.bf16 %v3670_v19, %v3668_v43  ;;  %v3658_v29 = vmul.f32 0.5, %v3642_v5  ;;  %v3655_v3 = vmul.f32 0.5, %v3639_v8 }
 0xdc6   : > { %v5322_v31 = vpop.eup %5321  ;;  %5331 = vtanh.f32 %v3616_v24  ;;  %v3602_v44 = vadd.f32 %v3586_v54, %v6974_v38  ;;  %v3657_v23 = vmul.f32 0.5, %v3641_v28  ;;  %v3672_v20 = vmul.f32 %v3656_v4, %v6902_v39 }
 0xdc7   : > { %v5324_v53 = vpop.eup %5323  ;;  %v3617_v11 = vmul.f32 0.7978846, %v3601_v49  ;;  %3858 = vmatprep.mubr.bf16.mxu0 %v3684_v60  ;;  %v3674_v6 = vmul.f32 %v3658_v29, %v6914_v46  ;;  %v3643_v50 = vadd.f32 1.0, %v5322_v31  ;;  %v3671_v34 = vmul.f32 %v3655_v3, %v6898_v59  ;;  %v4490_v29 = vld [vmem:[#allocation6] ss:$0 sm:$0xff] }
 0xdc8   : > { %v5326_v10 = vpop.eup %5325  ;;  %v3618_v48 = vmul.f32 0.7978846, %v3602_v44  ;;  %3859 = vmatmul.mubr.bf16.vlgmr.msra.gmra.mrb[60].mxu0 %v3683_v15  ;;  %v3673_v17 = vmul.f32 %v3657_v23, %v6908_v21  ;;  %v3644_v61 = vadd.f32 1.0, %v5324_v53 }
 0xdc9   : > { %v5328_v32 = vpop.eup %5327  ;;  %5333 = vtanh.f32 %v3617_v11  ;;  %v3686_v33 = vpack.c.bf16 %v3674_v6, %v3672_v20  ;;  %v3645_v36 = vadd.f32 1.0, %v5326_v10  ;;  %v3659_v51 = vmul.f32 0.5, %v3643_v50 }
 0xdca   : > { %5335 = vtanh.f32 %v3618_v48  ;;  %v3685_v41 = vpack.c.bf16 %v3673_v17, %v3671_v34  ;;  %v3646_v35 = vadd.f32 1.0, %v5328_v32  ;;  %v3660_v39 = vmul.f32 0.5, %v3644_v61 }
 0xdcb   : > { %3866 = vmatprep.mubr.bf16.mxu0 %v3686_v33  ;;  %v3661_v46 = vmul.f32 0.5, %v3645_v36  ;;  %v3675_v55 = vmul.f32 %v3659_v51, %v6926_v45 }
 0xdcc   : > { %v3662_v13 = vmul.f32 0.5, %v3646_v35  ;;  %v3676_v21 = vmul.f32 %v3660_v39, %v6930_v56 }
 0xdcd   : > { %v3677_v15 = vmul.f32 %v3661_v46, %v6936_v7 }
 0xdce   : > { %v5330_v59 = vpop.eup %5329  ;;  %v3678_v22 = vmul.f32 %v3662_v13, %v6942_v30 }
 0xdcf   : > { %v3687_v18 = vpack.c.bf16 %v3677_v15, %v3675_v55  ;;  %v3647_v25 = vadd.f32 1.0, %v5330_v59 }
 0xdd0   : > { %v5332_v58 = vpop.eup %5331  ;;  %3867 = vmatmul.mubr.bf16.gmra.mrb[64].mxu0 %v3685_v41  ;;  %v3688_v8 = vpack.c.bf16 %v3678_v22, %v3676_v21  ;;  %v3894_v22 = vrot.slane %v6796_v27, %v6090_v37 }
 0xdd1   : > { %v3648_v16 = vadd.f32 1.0, %v5332_v58  ;;  %v3663_v19 = vmul.f32 0.5, %v3647_v25 }
 0xdd2   : > { %3874 = vmatprep.mubr.bf16.mxu0 %v3688_v8 }
 0xdd3   : > { %v5334_v62 = vpop.eup %5333  ;;  %v3664_v45 = vmul.f32 0.5, %v3648_v16  ;;  %v3679_v56 = vmul.f32 %v3663_v19, %v6954_v12 }
 0xdd4   : > { %v5336_v43 = vpop.eup %5335  ;;  %v3649_v26 = vadd.f32 1.0, %v5334_v62 }
 0xdd5   : > { %v3650_v5 = vadd.f32 1.0, %v5336_v43  ;;  %v3680_v24 = vmul.f32 %v3664_v45, %v6961_v9 }
 0xdd6   : > { %v3665_v4 = vmul.f32 0.5, %v3649_v26 }
 0xdd7   : > { %v3666_v7 = vmul.f32 0.5, %v3650_v5 }
 0xdd8   : > { %3875 = vmatmul.mubr.bf16.gmra.mrb[68].mxu0 %v3687_v18  ;;  %v3681_v30 = vmul.f32 %v3665_v4, %v6970_v2 }
 0xdd9   : > { %v3682_v54 = vmul.f32 %v3666_v7, %v6974_v38 }
 0xdda   : > { %v3689_v28 = vpack.c.bf16 %v3681_v30, %v3679_v56 }
 0xddb   : > { %v3690_v49 = vpack.c.bf16 %v3682_v54, %v3680_v24 }
 0xddd   : > { %3882 = vmatprep.mubr.bf16.mxu0 %v3690_v49 }
 0xde0   : > { %3883 = vmatmul.mubr.bf16.gmra.mrb[72].mxu0 %v3689_v28 }
 0xe9b   : > { %v4652_v60 = vpop.f32.mrb[60].mxu0 }
 0xe9c   : > { %v4653_v31 = vpop.f32.mrb[61].mxu0 }
 0xe9d   : > { %v4654_v44 = vadd.f32 %v4653_v31, %v4652_v60  ;;  %v4655_v3 = vpop.f32.mrb[62].mxu0 }
 0xe9e   : > { %v4656_v23 = vpop.f32.mrb[63].mxu0 }
 0xe9f   : > { %v3861_v53 = vadd.f32 %v4654_v44, %v4490_v29  ;;  %v4657_v11 = vadd.f32 %v4656_v23, %v4655_v3 }
 0xea1   : > { %v3864_v20 = vadd.f32 %v4657_v11, %v4490_v29  ;;  %3903 = vrot.lane.b32.xlu0 %v3861_v53, %s5522_s5 }
 0xea3   : > { %v4658_v12 = vpop.f32.mrb[64].mxu0  ;;  %3905 = vrot.lane.b32.xlu1 %v3864_v20, %s5522_s5 }
 0xea4   : > { %v4659_v9 = vpop.f32.mrb[65].mxu0 }
 0xea5   : > { %v4660_v2 = vadd.f32 %v4659_v9, %v4658_v12  ;;  %v4661_v38 = vpop.f32.mrb[66].mxu0 }
 0xea6   : > { %v4662_v6 = vpop.f32.mrb[67].mxu0 }
 0xea7   : > { %v3869_v50 = vadd.f32 %v4660_v2, %v4490_v29  ;;  %v4663_v10 = vadd.f32 %v4662_v6, %v4661_v38 }
 0xea9   : > { %3907 = vrot.lane.b32.xlu1 %v3869_v50, %s5522_s5  ;;  %v3872_v48 = vadd.f32 %v4663_v10, %v4490_v29 }
 0xeab   : > { %v4664_v34 = vpop.f32.mrb[68].mxu0 }
 0xeac   : > { %v4665_v17 = vpop.f32.mrb[69].mxu0 }
 0xead   : > { %v4666_v61 = vadd.f32 %v4665_v17, %v4664_v34  ;;  %v4667_v32 = vpop.f32.mrb[70].mxu0  ;;  %3909 = vrot.lane.b32.xlu1 %v3872_v48, %s5522_s5 }
 0xeae   : > { %v4668_v33 = vpop.f32.mrb[71].mxu0 }
 0xeaf   : > { %v3877_v36 = vadd.f32 %v4666_v61, %v4490_v29  ;;  %v4669_v51 = vadd.f32 %v4668_v33, %v4667_v32 }
 0xeb1   : > { %v3880_v41 = vadd.f32 %v4669_v51, %v4490_v29  ;;  %3911 = vrot.lane.b32.xlu0 %v3877_v36, %s5522_s5 }
 0xeb3   : > { %3913 = vrot.lane.b32.xlu1 %v3880_v41, %s5522_s5  ;;  %v4670_v35 = vpop.f32.mrb[72].mxu0 }
 0xeb4   : > { %v4671_v39 = vpop.f32.mrb[73].mxu0 }
 0xeb5   : > { %v4672_v46 = vadd.f32 %v4671_v39, %v4670_v35  ;;  %v4673_v13 = vpop.f32.mrb[74].mxu0 }
 0xeb6   : > { %v4674_v55 = vpop.f32.mrb[75].mxu0 }
 0xeb7   : > { %v3885_v15 = vadd.f32 %v4672_v46, %v4490_v29  ;;  %v4675_v59 = vadd.f32 %v4674_v55, %v4673_v13 }
 0xeb9   : > { %v3888_v21 = vadd.f32 %v4675_v59, %v4490_v29  ;;  %3915 = vrot.lane.b32.xlu0 %v3885_v15, %s5522_s5 }
 0xebb   : > { %3917 = vrot.lane.b32.xlu1 %v3888_v21, %s5522_s5 }
 0xf13   : > { %v3904_v18 = vpop.permute.xlu0 %3903 }
 0xf14   : > { %v3927_v58 = vmul.f32 %v3904_v18, %v3894_v22 }
 0xf15   : > { %v3906_v8 = vpop.permute.xlu1 %3905 }
 0xf16   : > { %v3928_v25 = vmul.f32 %v3906_v8, %v3894_v22  ;;  %3943 = vrot.lane.b32.xlu0 %v3927_v58, %s5522_s5 }
 0xf18   : > { %3945 = vrot.lane.b32.xlu1 %v3928_v25, %s5522_s5 }
 0xf1b   : > { %v3908_v16 = vpop.permute.xlu1 %3907 }
 0xf1c   : > { %v3929_v62 = vmul.f32 %v3908_v16, %v3894_v22 }
 0xf1e   : > { %3947 = vrot.lane.b32.xlu0 %v3929_v62, %s5522_s5 }
 0xf1f   : > { %v3910_v43 = vpop.permute.xlu1 %3909 }
 0xf20   : > { %v3930_v26 = vmul.f32 %v3910_v43, %v3894_v22 }
 0xf22   : > { %3949 = vrot.lane.b32.xlu1 %v3930_v26, %s5522_s5 }
 0xf23   : > { %v3912_v19 = vpop.permute.xlu0 %3911 }
 0xf24   : > { %v3931_v5 = vmul.f32 %v3912_v19, %v3894_v22 }
 0xf25   : > { %v3914_v45 = vpop.permute.xlu1 %3913 }
 0xf26   : > { %v3932_v27 = vmul.f32 %v3914_v45, %v3894_v22  ;;  %3951 = vrot.lane.b32.xlu0 %v3931_v5, %s5522_s5 }
 0xf28   : > { %3953 = vrot.lane.b32.xlu1 %v3932_v27, %s5522_s5 }
 0xf2b   : > { %v3916_v4 = vpop.permute.xlu0 %3915 }
 0xf2c   : > { %v3933_v7 = vmul.f32 %v3916_v4, %v3894_v22 }
 0xf2d   : > { %v3918_v56 = vpop.permute.xlu1 %3917 }
 0xf2e   : > { %v3934_v30 = vmul.f32 %v3918_v56, %v3894_v22  ;;  %3955 = vrot.lane.b32.xlu0 %v3933_v7, %s5522_s5 }
 0xf30   : > { %3957 = vrot.lane.b32.xlu1 %v3934_v30, %s5522_s5 }
 0xf88   : > { %v3944_v24 = vpop.permute.xlu0 %3943 }
 0xf89   : > { %v3967_v54 = vadd.f32 %v3944_v24, %v6672_v1 }
 0xf8a   : > { %v3946_v28 = vpop.permute.xlu1 %3945 }
 0xf8b   : > { %v3968_v49 = vadd.f32 %v3946_v28, %v6680_v57  ;;  %v3975_v60 = vsel %vm1008_vm1, %v3967_v54, 0.0  ;;  %v5133_v28 = vld [vmem:[%s7170_s7] sm:$0xff]  }
 0xf8c   : > { %3976 = vadd.xlane.f32.xlu0 %v3975_v60  ;;  %4924 = vmatprep.subr.bf16.mxu1 %v5133_v28 }
 0xf8d   : > { %v3978_v29 = vsel %vm1008_vm1, %v3968_v49, 0.0  ;;  %4925 = vmatpush3.bf16.msra.mxu1 %v5133_v28 }
 0xf8e   : > { %3979 = vadd.xlane.f32.xlu1 %v3978_v29  ;;  %v5134_v29 = vld [vmem:[%s7170_s7 + $0x8] sm:$0xff]  }
 0xf8f   : > { %4926 = vmatprep.subr.bf16.mxu1 %v5134_v29 }
 0xf90   : > { %v3948_v31 = vpop.permute.xlu0 %3947 }
 0xf91   : > { %v3969_v44 = vadd.f32 %v3948_v31, %v6677_v63  ;;  %4927 = vmatpush3.bf16.msra.mxu1 %v5134_v29 }
 0xf93   : > { %v3981_v3 = vsel %vm1008_vm1, %v3969_v44, 0.0 }
 0xf94   : > { %v3950_v23 = vpop.permute.xlu1 %3949  ;;  %3982 = vadd.xlane.f32.xlu0 %v3981_v3 }
 0xf95   : > { %v3970_v53 = vadd.f32 %v3950_v23, %v6687_v40  ;;  %v5136_v23 = vld [vmem:[%s7170_s7 + $0x18] sm:$0xff]  }
 0xf97   : > { %v3984_v1 = vsel %vm1008_vm1, %v3970_v53, 0.0 }
 0xf98   : > { %3985 = vadd.xlane.f32.xlu0 %v3984_v1  ;;  %v3952_v11 = vpop.permute.xlu0 %3951 }
 0xf99   : > { %v3971_v57 = vadd.f32 %v3952_v11, %v6696_v47 }
 0xf9a   : > { %v3954_v20 = vpop.permute.xlu1 %3953 }
 0xf9b   : > { %v3972_v12 = vadd.f32 %v3954_v20, %v6699_v0  ;;  %v3987_v9 = vsel %vm1008_vm1, %v3971_v57, 0.0 }
 0xf9c   : > { %3988 = vadd.xlane.f32.xlu0 %v3987_v9 }
 0xf9d   : > { %v3990_v63 = vsel %vm1008_vm1, %v3972_v12, 0.0 }
 0xf9e   : > { %3991 = vadd.xlane.f32.xlu1 %v3990_v63 }
 0xfa0   : > { %v3956_v2 = vpop.permute.xlu0 %3955 }
 0xfa1   : > { %v3973_v38 = vadd.f32 %v3956_v2, %v6709_v42 }
 0xfa2   : > { %v3958_v6 = vpop.permute.xlu1 %3957 }
 0xfa3   : > { %v3974_v40 = vadd.f32 %v3958_v6, %v6704_v14  ;;  %v3993_v50 = vsel %vm1008_vm1, %v3973_v38, 0.0 }
 0xfa4   : > { %3994 = vadd.xlane.f32.xlu0 %v3993_v50 }
 0xfa5   : > { %v3996_v47 = vsel %vm1008_vm1, %v3974_v40, 0.0 }
 0xfa6   : > { %3997 = vadd.xlane.f32.xlu1 %v3996_v47 }
0x1019   : > { %v3977_v10 = vpop.xlane.xlu0 %3976 }
0x101a   : > { %v3999_v0 = vmul.f32 0.015625, %v3977_v10 }
0x101b   : > { %v3980_v48 = vpop.xlane.xlu1 %3979 }
0x101c   : > { %v7034_v34 = vsub.f32 %v3967_v54, %v3999_v0  ;;  %v4000_v17 = vmul.f32 0.015625, %v3980_v48 }
0x101e   : > { %v7036_v61 = vsub.f32 %v3968_v49, %v4000_v17  ;;  %v4015_v42 = vmul.f32 %v7034_v34, %v7034_v34  ;;  %v1333_v49 = vld [vmem:[#allocation7] sm:$0x1] }
0x101f   : > { %v1393_v60 = vadd.f32 %v6106_v52, %v1333_v49 }
0x1020   : > { %v4023_v32 = vsel %vm1008_vm1, %v4015_v42, 0.0  ;;  %v4016_v14 = vmul.f32 %v7036_v61, %v7036_v61 }
0x1021   : > { %4024 = vadd.xlane.f32.xlu0 %v4023_v32  ;;  %v3983_v33 = vpop.xlane.xlu0 %3982  ;;  %v4079_v31 = vadd.f32 1.0, %v1393_v60 }
0x1022   : > { %v4001_v36 = vmul.f32 0.015625, %v3983_v33  ;;  %v4026_v51 = vsel %vm1008_vm1, %v4016_v14, 0.0 }
0x1023   : > { %4027 = vadd.xlane.f32.xlu1 %v4026_v51  ;;  %v4083_v3 = vrot.slane %v4079_v31, %v6090_v37 }
0x1024   : > { %v7044_v41 = vsub.f32 %v3969_v44, %v4001_v36  ;;  %v5135_v44 = vld [vmem:[%s7170_s7 + $0x10] sm:$0xff]  }
0x1025   : > { %v3986_v35 = vpop.xlane.xlu0 %3985  ;;  %4928 = vmatprep.subr.bf16.mxu1 %v5135_v44 }
0x1026   : > { %v4002_v39 = vmul.f32 0.015625, %v3986_v35  ;;  %v4017_v46 = vmul.f32 %v7044_v41, %v7044_v41  ;;  %4929 = vmatpush3.bf16.msra.mxu1 %v5135_v44 }
0x1027   : > { %4930 = vmatprep.subr.bf16.mxu1 %v5136_v23 }
0x1028   : > { %v7048_v13 = vsub.f32 %v3970_v53, %v4002_v39  ;;  %v4029_v55 = vsel %vm1008_vm1, %v4017_v46, 0.0 }
0x1029   : > { %4030 = vadd.xlane.f32.xlu0 %v4029_v55  ;;  %v3989_v15 = vpop.xlane.xlu0 %3988 }
0x102a   : > { %v4003_v59 = vmul.f32 0.015625, %v3989_v15  ;;  %v4018_v21 = vmul.f32 %v7048_v13, %v7048_v13  ;;  %4931 = vmatpush3.bf16.msra.mxu1 %v5136_v23  ;;  %v4099_v15 = vrot.slane %v1393_v60, %v6090_v37 }
0x102b   : > { %v3992_v22 = vpop.xlane.xlu1 %3991 }
0x102c   : > { %v7053_v18 = vsub.f32 %v3971_v57, %v4003_v59  ;;  %v4004_v58 = vmul.f32 0.015625, %v3992_v22  ;;  %v4032_v8 = vsel %vm1008_vm1, %v4018_v21, 0.0 }
0x102d   : > { %4033 = vadd.xlane.f32.xlu1 %v4032_v8 }
0x102e   : > { %v7056_v25 = vsub.f32 %v3972_v12, %v4004_v58  ;;  %v4019_v16 = vmul.f32 %v7053_v18, %v7053_v18 }
0x1030   : > { %v4035_v62 = vsel %vm1008_vm1, %v4019_v16, 0.0  ;;  %v4020_v43 = vmul.f32 %v7056_v25, %v7056_v25 }
0x1031   : > { %4036 = vadd.xlane.f32.xlu0 %v4035_v62  ;;  %v3995_v26 = vpop.xlane.xlu0 %3994 }
0x1032   : > { %v4005_v19 = vmul.f32 0.015625, %v3995_v26  ;;  %v4038_v5 = vsel %vm1008_vm1, %v4020_v43, 0.0 }
0x1033   : > { %v3998_v45 = vpop.xlane.xlu1 %3997  ;;  %4039 = vadd.xlane.f32.xlu1 %v4038_v5 }
0x1034   : > { %v7064_v27 = vsub.f32 %v3973_v38, %v4005_v19  ;;  %v4006_v4 = vmul.f32 0.015625, %v3998_v45 }
0x1036   : > { %v7066_v7 = vsub.f32 %v3974_v40, %v4006_v4  ;;  %v4021_v56 = vmul.f32 %v7064_v27, %v7064_v27 }
0x1038   : > { %v4041_v30 = vsel %vm1008_vm1, %v4021_v56, 0.0  ;;  %v4022_v24 = vmul.f32 %v7066_v7, %v7066_v7 }
0x1039   : > { %4042 = vadd.xlane.f32.xlu0 %v4041_v30 }
0x103a   : > { %v4044_v54 = vsel %vm1008_vm1, %v4022_v24, 0.0 }
0x103b   : > { %4045 = vadd.xlane.f32.xlu1 %v4044_v54 }
0x104f   : > { %4085 = vrot.lane.b32.xlu0 %v4083_v3, %s5522_s5  ;;  %s4519_s5 = sshll.u32 %s7174_s25, 6 }
0x1050   : > { %s787_s1 = scalar_lea.vmem %s7171_s0, %s4519_s5 }
0x10ae   : > { %v4025_v52 = vpop.xlane.xlu0 %4024 }
0x10af   : > { %v4047_v1 = vmul.f32 0.015625, %v4025_v52  ;;  %v4507_v52 = vld [vmem:[#allocation9] ss:$0 sm:$0xff] }
0x10b0   : > { %v4028_v53 = vpop.xlane.xlu1 %4027 }
0x10b1   : > { %v4048_v11 = vmul.f32 0.015625, %v4028_v53  ;;  %v4055_v20 = vadd.f32 1e-06, %v4047_v1 }
0x10b3   : > { %v4056_v9 = vadd.f32 1e-06, %v4048_v11  ;;  %5337 = vrsqrt.f32 %v4055_v20 }
0x10b6   : > { %v4031_v57 = vpop.xlane.xlu0 %4030 }
0x10b7   : > { %v4049_v12 = vmul.f32 0.015625, %v4031_v57 }
0x10b9   : > { %v4057_v63 = vadd.f32 1e-06, %v4049_v12 }
0x10ba   : > { %v4034_v2 = vpop.xlane.xlu1 %4033 }
0x10bb   : > { %v4050_v38 = vmul.f32 0.015625, %v4034_v2  ;;  %5339 = vrsqrt.f32 %v4057_v63 }
0x10bc   : > { %5341 = vrsqrt.f32 %v4056_v9 }
0x10bd   : > { %v4058_v6 = vadd.f32 1e-06, %v4050_v38  ;;  %v5338_v17 = vpop.eup %5337 }
0x10be   : > { %v4037_v40 = vpop.xlane.xlu0 %4036  ;;  %v4071_v35 = vmul.f32 %v5338_v17, %v7034_v34 }
0x10bf   : > { %5343 = vrsqrt.f32 %v4058_v6  ;;  %v4051_v50 = vmul.f32 0.015625, %v4037_v40 }
0x10c0   : > { %v4040_v47 = vpop.xlane.xlu1 %4039 }
0x10c1   : > { %v4059_v10 = vadd.f32 1e-06, %v4051_v50  ;;  %v4052_v0 = vmul.f32 0.015625, %v4040_v47 }
0x10c3   : > { %5345 = vrsqrt.f32 %v4059_v10  ;;  %v4060_v48 = vadd.f32 1e-06, %v4052_v0 }
0x10c5   : > { %5347 = vrsqrt.f32 %v4060_v48  ;;  %v5340_v42 = vpop.eup %5339 }
0x10c6   : > { %v4043_v32 = vpop.xlane.xlu0 %4042  ;;  %v5342_v14 = vpop.eup %5341  ;;  %v4073_v39 = vmul.f32 %v5340_v42, %v7044_v41 }
0x10c7   : > { %v4053_v33 = vmul.f32 0.015625, %v4043_v32  ;;  %v4072_v59 = vmul.f32 %v5342_v14, %v7036_v61 }
0x10c8   : > { %v4046_v36 = vpop.xlane.xlu1 %4045 }
0x10c9   : > { %v5344_v51 = vpop.eup %5343  ;;  %v4061_v46 = vadd.f32 1e-06, %v4053_v33  ;;  %v4054_v55 = vmul.f32 0.015625, %v4046_v36 }
0x10ca   : > { %v4074_v21 = vmul.f32 %v5344_v51, %v7048_v13  ;;  %v4086_v22 = vpop.permute.xlu0 %4085 }
0x10cb   : > { %5349 = vrsqrt.f32 %v4061_v46  ;;  %v4062_v58 = vadd.f32 1e-06, %v4054_v55  ;;  %v4090_v8 = vmul.f32 %v4086_v22, %v4073_v39  ;;  %v4088_v16 = vmul.f32 %v4086_v22, %v4071_v35 }
0x10cc   : > { %v4091_v62 = vmul.f32 %v4086_v22, %v4074_v21  ;;  %v4089_v43 = vmul.f32 %v4086_v22, %v4072_v59 }
0x10cd   : > { %v5346_v26 = vpop.eup %5345  ;;  %5351 = vrsqrt.f32 %v4062_v58  ;;  %v4102_v34 = vadd.f32 %v4099_v15, %v4090_v8  ;;  %v4100_v19 = vadd.f32 %v4099_v15, %v4088_v16 }
0x10ce   : > { %v4075_v41 = vmul.f32 %v5346_v26, %v7053_v18  ;;  %v4103_v5 = vadd.f32 %v4099_v15, %v4091_v62  ;;  %v4101_v45 = vadd.f32 %v4099_v15, %v4089_v43 }
0x10cf   : > { %v5348_v37 = vpop.eup %5347 }
0x10d0   : > { %v4076_v61 = vmul.f32 %v5348_v37, %v7056_v25  ;;  %v4108_v4 = vpack.c.bf16 %v4101_v45, %v4100_v19  ;;  %v4109_v13 = vpack.c.bf16 %v4103_v5, %v4102_v34  ;;  %v4092_v56 = vmul.f32 %v4086_v22, %v4075_v41 }
0x10d2   : > { %4932 = vmatprep.mubr.msk.bf16.mxu1 %vm1008_vm1, %v4108_v4  ;;  %v4093_v30 = vmul.f32 %v4086_v22, %v4076_v61  ;;  %v4104_v24 = vadd.f32 %v4099_v15, %v4092_v56 }
0x10d3   : > { %4933 = vmatmul.mubr.msk.bf16.vlgmr.msra.gmra.mrb[72].mxu1 %vm1008_vm1, %v4109_v13 }
0x10d4   : > { %v4105_v54 = vadd.f32 %v4099_v15, %v4093_v30 }
0x10d5   : > { %v5350_v28 = vpop.eup %5349 }
0x10d6   : > { %v4077_v49 = vmul.f32 %v5350_v28, %v7064_v27  ;;  %v4110_v18 = vpack.c.bf16 %v4105_v54, %v4104_v24 }
0x10d7   : > { %v5352_v60 = vpop.eup %5351 }
0x10d8   : > { %v4078_v29 = vmul.f32 %v5352_v60, %v7066_v7  ;;  %4936 = vmatprep.mubr.msk.bf16.mxu1 %vm1008_vm1, %v4110_v18  ;;  %v4094_v25 = vmul.f32 %v4086_v22, %v4077_v49 }
0x10da   : > { %v4095_v31 = vmul.f32 %v4086_v22, %v4078_v29  ;;  %v4106_v44 = vadd.f32 %v4099_v15, %v4094_v25 }
0x10dc   : > { %v4107_v3 = vadd.f32 %v4099_v15, %v4095_v31 }
0x10de   : > { %v4111_v23 = vpack.c.bf16 %v4107_v3, %v4106_v44 }
0x10e0   : > { %4937 = vmatmul.mubr.msk.bf16.gmra.mrb[76].mxu1 %vm1008_vm1, %v4111_v23 }
0x11a6   : > { %v4934_v27 = vpop.f32.mrb[72].mxu1 }
0x11a7   : > { %v4206_v53 = vadd.f32 %v4934_v27, %v4507_v52  ;;  %v4197_v1 = vpop.f32.mrb[73].mxu1 }
0x11a8   : > { %v4198_v11 = vadd.f32 %v4507_v52, %v4197_v1  ;;  %v4935_v7 = vpop.f32.mrb[74].mxu1 }
0x11a9   : > { %4230 = vst [vmem:[%s787_s1 + $0x10] sm:$0xff] %v4206_v53  ;;  %v4209_v57 = vadd.f32 %v4935_v7, %v4507_v52  ;;  %v4200_v20 = vpop.f32.mrb[75].mxu1 }
0x11aa   : > { %4228 = vst [vmem:[%s787_s1] sm:$0xff] %v4198_v11  ;;  %v4201_v12 = vadd.f32 %v4507_v52, %v4200_v20 }
0x11ab   : > { %4231 = vst [vmem:[%s787_s1 + $0x18] sm:$0xff] %v4209_v57 }
0x11ac   : > { %4229 = vst [vmem:[%s787_s1 + $0x8] sm:$0xff] %v4201_v12 }
0x11b3   : > { %v4938_v9 = vpop.f32.mrb[76].mxu1 }
0x11b4   : > { %v4222_v63 = vadd.f32 %v4938_v9, %v4507_v52  ;;  %v4213_v2 = vpop.f32.mrb[77].mxu1 }
0x11b5   : > { %v4214_v38 = vadd.f32 %v4507_v52, %v4213_v2  ;;  %v4939_v6 = vpop.f32.mrb[78].mxu1 }
0x11b6   : > { %4234 = vst [vmem:[%s787_s1 + $0x30] sm:$0xff] %v4222_v63  ;;  %v4225_v40 = vadd.f32 %v4939_v6, %v4507_v52  ;;  %v4216_v50 = vpop.f32.mrb[79].mxu1 }
0x11b7   : > { %4232 = vst [vmem:[%s787_s1 + $0x20] sm:$0xff] %v4214_v38  ;;  %v4217_v47 = vadd.f32 %v4507_v52, %v4216_v50 }
0x11b8   : > { %4235 = vst [vmem:[%s787_s1 + $0x38] sm:$0xff] %v4225_v40 }
0x11b9   : > { %4233 = vst [vmem:[%s787_s1 + $0x28] sm:$0xff] %v4217_v47 }
0x11ba PF: > { %s7172_s25 = sld [smem:[#allocation13_spill]] }
0x11c0   : > { %s36_s4 = sadd.s32 1, %s7172_s25  }
0x11c1   : > { %p33_p9 = scmp.ge.s32.totalorder %s36_s4, 4  }
0x11c3   :  { %35 = sbr.rel (!%p33_p9) target bundleno = 14 (0xe), region = 166 }
0x11ca   :  { %4257 = vsyncpa [#allocation3], 1 }
0x11cb   :  { %4259 = vsyncpa [#allocation3 + $0x1], 1 }
0x11cc   :  { %4260 = vsyncpa [#allocation5], 1 }
0x11cd   :  { %4261 = vsyncpa [#allocation8], 1 }

</bundles_post_ra>
